<compile_context>
chip_gen: v7x
topology: tpu7x:2x2x1
jax: 0.10.0
libtpu: 0.0.40
codegen_flags: <defaults>
</compile_context>

<pallas_src>
import functools

import jax
import jax.numpy as jnp
import numpy as np
from jax import lax
from jax.experimental import pallas as pl
from jax.experimental.pallas import tpu as pltpu


# ----------------------------------------------------------------------------
# Pallas kernel: whole bottleneck block for Nb images per grid step.
# All channel dims (Cin == Cout, Cmid) are already padded to multiples of 128.
# ----------------------------------------------------------------------------
def _bottleneck_kernel(x_ref, w1_ref, w2_ref, w3_ref, b1_ref, b2_ref, b3_ref,
                       out_ref, pad_ref, *, Nb, H, W, Cin, Cmid):
    M = Nb * H * W

    # ---- conv1 (1x1) + folded bn1 + relu: one MXU matmul ---------------------
    x_bf = x_ref[...].reshape(M, Cin).astype(jnp.bfloat16)
    h1 = jnp.dot(x_bf, w1_ref[...], preferred_element_type=jnp.float32)
    h1 = jnp.maximum(h1 + b1_ref[...], 0.0)                       # f32 bias+relu

    # ---- zero-padded bf16 feature map in persistent VMEM scratch -------------
    # Width-pad in registers so rows 1..H go in with a single lane-dense store
    # (no size-1 second-minor masked column stores); only the top/bottom border
    # rows are zeroed explicitly.  The whole scratch is rewritten every step.
    zcol = jnp.zeros((Nb, H, 1, Cmid), jnp.bfloat16)
    h1_p = jnp.concatenate(
        [zcol, h1.reshape(Nb, H, W, Cmid).astype(jnp.bfloat16), zcol], axis=2)
    pad_ref[:, 0:1, :, :] = jnp.zeros((Nb, 1, W + 2, Cmid), jnp.bfloat16)
    pad_ref[:, H + 1:H + 2, :, :] = jnp.zeros((Nb, 1, W + 2, Cmid), jnp.bfloat16)
    pad_ref[:, 1:H + 1, :, :] = h1_p

    # ---- conv2 (3x3, pad=1): nine accumulating per-tap matmuls ---------------
    # No (M, 9*Cmid) im2col materialization; one bf16 tap slice live at a time,
    # f32 accumulator carries the partial sums.
    acc = jnp.zeros((M, Cmid), jnp.float32)
    for kh in range(3):
        for kw in range(3):
            tap = pad_ref[:, kh:kh + H, kw:kw + W, :].reshape(M, Cmid)
            acc = acc + jnp.dot(tap, w2_ref[kh * 3 + kw],
                                preferred_element_type=jnp.float32)
    h2 = jnp.maximum(acc + b2_ref[...], 0.0)

    # ---- conv3 (1x1) + folded bn3 + identity residual + relu -----------------
    h3 = jnp.dot(h2.astype(jnp.bfloat16), w3_ref[...],
                 preferred_element_type=jnp.float32)
    out = jnp.maximum(h3 + b3_ref[...] + x_ref[...].reshape(M, Cin), 0.0)
    out_ref[...] = out.reshape(Nb, H, W, Cin).astype(out_ref.dtype)


# ----------------------------------------------------------------------------
# Sizing helpers
# ----------------------------------------------------------------------------
def _round_up(v, m):
    return (v + m - 1) // m * m


def _physical_vmem_bytes():
    try:
        return int(pltpu.get_tpu_info().vmem_capacity_bytes)
    except Exception:
        return 64 << 20   # conservative (v7x per-TC VMEM)


def _pick_batch_tile(N, H, W, Cin_p, Cmid_p, Cout_p, target_bytes=24 << 20):
    """Largest divisor Nb of N s.t. the per-step footprint stays near target
    and there are >= 2 grid steps (pipelining / megacore) whenever N >= 2."""
    per_row = (
        2 * 4 * (Cin_p + Cout_p) * 2       # x + out blocks, f32, double-buffered
        + 2 * Cmid_p * 2                   # bf16 padded scratch (interior)
        + 4 * Cmid_p * 2                   # h1 + conv2 accumulator, f32
        + 2 * Cmid_p * 2                   # bf16 tap slice / width-padded h1
        + 4 * Cout_p + 4 * Cin_p           # conv3 result + residual re-read, f32
    )
    max_rows = max(H * W, target_bytes // max(1, per_row))
    nb = max(1, min(N, max_rows // (H * W)))
    if N >= 2:
        nb = min(nb, max(1, N // 2))       # keep >= 2 grid steps
    while N % nb:
        nb -= 1
    return nb


def _vmem_limit_bytes(Nb, H, W, Cin_p, Cmid_p, Cout_p):
    M = Nb * H * W
    io = 2 * 4 * M * (Cin_p + Cout_p)                              # double-buffered x/out
    weights = (2 * (Cin_p * Cmid_p + 9 * Cmid_p * Cmid_p + Cmid_p * Cout_p)
               + 4 * (2 * Cmid_p + Cout_p))                        # bf16 weights, f32 biases
    scratch = 2 * Nb * (H + 2) * (W + 2) * Cmid_p                  # bf16 padded feature map
    live = M * (4 * 2 * Cmid_p + 2 * 2 * Cmid_p + 4 * Cout_p + 4 * Cin_p)
    budget = io + weights + scratch + live
    return int(min(max(int(budget * 1.5) + (4 << 20), 16 << 20),
                   _physical_vmem_bytes()))


# ----------------------------------------------------------------------------
# Wrappers
# ----------------------------------------------------------------------------
def bottleneck_forward_nhwc(x_nhwc, kernel_params):
    """Production hot path: NHWC in / NHWC out, no layout transposes."""
    w1, w2, w3, b1, b2, b3, cin, cout = kernel_params
    assert cin == cout, "identity residual requires in_channel == channel*4"
    N, H, W, cin_raw = x_nhwc.shape
    assert cin_raw == cin
    Cin_p, Cmid_p = w1.shape
    Cout_p = w3.shape[1]
    assert Cin_p == Cout_p

    # Pad channels to lane width (no-op if the surrounding network already
    # keeps activations channel-padded / channels-last).
    if Cin_p != cin:
        x_nhwc = jnp.pad(x_nhwc, ((0, 0), (0, 0), (0, 0), (0, Cin_p - cin)))

    Nb = _pick_batch_tile(N, H, W, Cin_p, Cmid_p, Cout_p)
    vmem_limit = _vmem_limit_bytes(Nb, H, W, Cin_p, Cmid_p, Cout_p)
    kernel = functools.partial(_bottleneck_kernel, Nb=Nb, H=H, W=W,
                               Cin=Cin_p, Cmid=Cmid_p)

    def _run(single_buffer_consts):
        const_kw = ({"pipeline_mode": pl.Buffered(1)}
                    if single_buffer_consts else {})
        grid_spec = pltpu.PrefetchScalarGridSpec(
            num_scalar_prefetch=0,
            grid=(N // Nb,),
            in_specs=[
                pl.BlockSpec((Nb, H, W, Cin_p), lambda n: (n, 0, 0, 0)),       # x
                pl.BlockSpec((Cin_p, Cmid_p), lambda n: (0, 0), **const_kw),   # w1 (bf16, BN folded)
                pl.BlockSpec((9, Cmid_p, Cmid_p),
                             lambda n: (0, 0, 0), **const_kw),                 # w2 (bf16, per-tap)
                pl.BlockSpec((Cmid_p, Cout_p), lambda n: (0, 0), **const_kw),  # w3 (bf16, BN folded)
                pl.BlockSpec((1, Cmid_p), lambda n: (0, 0), **const_kw),       # b1 (f32)
                pl.BlockSpec((1, Cmid_p), lambda n: (0, 0), **const_kw),       # b2 (f32)
                pl.BlockSpec((1, Cout_p), lambda n: (0, 0), **const_kw),       # b3 (f32)
            ],
            out_specs=pl.BlockSpec((Nb, H, W, Cout_p), lambda n: (n, 0, 0, 0)),
            scratch_shapes=[pltpu.VMEM((Nb, H + 2, W + 2, Cmid_p), jnp.bfloat16)],
        )
        return pl.pallas_call(
            kernel,
            out_shape=jax.ShapeDtypeStruct((N, H, W, Cout_p), x_nhwc.dtype),
            grid_spec=grid_spec,
            compiler_params=pltpu.CompilerParams(
                dimension_semantics=("parallel",),
                vmem_limit_bytes=vmem_limit),
        )(x_nhwc, w1, w2, w3, b1, b2, b3)

    try:
        out = _run(True)           # single-buffered constant weight blocks
    except Exception:
        out = _run(False)          # fallback if pipeline_mode is unsupported

    # For standard ResNet widths Cout_p == cout and this is a no-op; keep
    # activations channel-padded end-to-end in a real network to avoid it.
    return out[..., :cout] if Cout_p != cout else out


def bottleneck_forward(x_nchw, kernel_params):
    """PyTorch-layout convenience wrapper (transposes stay out of the hot path)."""
    x_nhwc = jnp.transpose(x_nchw, (0, 2, 3, 1))
    out_nhwc = bottleneck_forward_nhwc(x_nhwc, kernel_params)
    return jnp.transpose(out_nhwc, (0, 3, 1, 2))


# ----------------------------------------------------------------------------
# Parameter preparation: fold eval-mode BN into weights, pad channels to 128,
# cast matmul weights to bf16 (biases stay f32).
# ----------------------------------------------------------------------------
def prepare_kernel_params(torch_p, eps=1e-5):
    def fold(w, bn):
        gamma, beta, mean, var = bn
        scale = gamma / jnp.sqrt(var + eps)
        bias = beta - mean * scale
        w = w * scale.reshape((-1,) + (1,) * (w.ndim - 1))   # scale output channels
        return w, bias

    w1, b1 = fold(torch_p["w1"], torch_p["bn1"])   # (C, Cin, 1, 1)
    w2, b2 = fold(torch_p["w2"], torch_p["bn2"])   # (C, C, 3, 3)
    w3, b3 = fold(torch_p["w3"], torch_p["bn3"])   # (Cout, C, 1, 1)

    C, Cin = w1.shape[0], w1.shape[1]
    Cout = w3.shape[0]
    C_p, Cin_p, Cout_p = _round_up(C, 128), _round_up(Cin, 128), _round_up(Cout, 128)

    def pad2(a, r, c):
        return jnp.pad(a, ((0, r - a.shape[0]), (0, c - a.shape[1])))

    w1_k = pad2(w1[:, :, 0, 0].T, Cin_p, C_p).astype(jnp.bfloat16)     # (Cin_p, C_p)
    w2_t = jnp.transpose(w2, (2, 3, 1, 0))                             # (3,3,in,out)
    w2_t = jnp.pad(w2_t, ((0, 0), (0, 0), (0, C_p - C), (0, C_p - C)))
    w2_k = w2_t.reshape(9, C_p, C_p).astype(jnp.bfloat16)              # per-tap weights
    w3_k = pad2(w3[:, :, 0, 0].T, C_p, Cout_p).astype(jnp.bfloat16)    # (C_p, Cout_p)

    b1_k = jnp.pad(b1, (0, C_p - C)).reshape(1, C_p).astype(jnp.float32)
    b2_k = jnp.pad(b2, (0, C_p - C)).reshape(1, C_p).astype(jnp.float32)
    b3_k = jnp.pad(b3, (0, Cout_p - Cout)).reshape(1, Cout_p).astype(jnp.float32)

    return (w1_k, w2_k, w3_k, b1_k, b2_k, b3_k, Cin, Cout)


# ----------------------------------------------------------------------------
# Pure-JAX reference (NCHW, OIHW conv weights) for the correctness check.
# ----------------------------------------------------------------------------
def _bn_eval(y, gamma, beta, mean, var, eps=1e-5):
    r = lambda v: v.reshape(1, -1, 1, 1)
    return (y - r(mean)) / jnp.sqrt(r(var) + eps) * r(gamma) + r(beta)


def _conv(x, w, padding):
    return lax.conv_general_dilated(
        x, w, window_strides=(1, 1), padding=padding,
        dimension_numbers=("NCHW", "OIHW", "NCHW"))


def bottleneck_reference(x, p):
    out = jax.nn.relu(_bn_eval(_conv(x, p["w1"], "VALID"), *p["bn1"]))
    out = jax.nn.relu(_bn_eval(_conv(out, p["w2"], [(1, 1), (1, 1)]), *p["bn2"]))
    out = _bn_eval(_conv(out, p["w3"], "VALID"), *p["bn3"])
    return jax.nn.relu(out + x)


# ----------------------------------------------------------------------------
# Deterministic PyTorch-style parameter construction.
# ----------------------------------------------------------------------------
def make_torch_params(key, in_channel, channel, expansion=4):
    Cout = channel * expansion
    ks = jax.random.split(key, 6)

    def conv_w(k, o, i, kh, kw):
        return (jax.random.normal(k, (o, i, kh, kw), jnp.float32)
                / np.sqrt(i * kh * kw)).astype(jnp.float32)

    def bn_params(k, c):
        k1, k2, k3, k4 = jax.random.split(k, 4)
        gamma = jax.random.uniform(k1, (c,), jnp.float32, 0.5, 1.5)
        beta = jax.random.normal(k2, (c,), jnp.float32) * 0.1
        mean = jax.random.normal(k3, (c,), jnp.float32) * 0.1
        var = jax.random.uniform(k4, (c,), jnp.float32, 0.5, 1.5)
        return (gamma, beta, mean, var)

    return {
        "w1": conv_w(ks[0], channel, in_channel, 1, 1),
        "w2": conv_w(ks[1], channel, channel, 3, 3),
        "w3": conv_w(ks[2], Cout, channel, 1, 1),
        "bn1": bn_params(ks[3], channel),
        "bn2": bn_params(ks[4], channel),
        "bn3": bn_params(ks[5], Cout),
    }


# ----------------------------------------------------------------------------
if __name__ == "__main__":
    N, channel, H, W = 2, 8, 16, 16
    in_channel = channel * 4        # identity residual path (downsample=None)

    key = jax.random.PRNGKey(0)
    kx, kp = jax.random.split(key)
    x = jax.random.normal(kx, (N, in_channel, H, W), jnp.float32)

    torch_p = make_torch_params(kp, in_channel, channel)
    kernel_p = prepare_kernel_params(torch_p)

    out = jax.block_until_ready(bottleneck_forward(x, kernel_p))
    ref = jax.block_until_ready(bottleneck_reference(x, torch_p))

    assert out.shape == ref.shape == (N, in_channel, H, W)
    diff = jnp.abs(out - ref)
    max_diff = float(jnp.max(diff))
    mean_diff = float(jnp.mean(diff))
    # Both the kernel (explicit bf16 operands, f32 accumulation) and the XLA
    # conv reference (default single-pass bf16 MXU precision) round operands
    # to bf16, which bounds how tight the element-wise agreement can be.
    assert np.isfinite(max_diff) and max_diff < 5e-2 and mean_diff < 1e-2, (
        f"max_diff={max_diff} mean_diff={mean_diff}")
    print("KERNEL_OK")
</pallas_src>

<mosaic_0001>
module attributes {stable_mosaic.version = 11 : i64} {
  func.func @_bottleneck_kernel(%arg0: i32, %arg1: memref<1x16x16x128xf32, #tpu.memory_space<vmem>>, %arg2: memref<128x128xbf16, #tpu.memory_space<vmem>>, %arg3: memref<9x128x128xbf16, #tpu.memory_space<vmem>>, %arg4: memref<128x128xbf16, #tpu.memory_space<vmem>>, %arg5: memref<1x128xf32, #tpu.memory_space<vmem>>, %arg6: memref<1x128xf32, #tpu.memory_space<vmem>>, %arg7: memref<1x128xf32, #tpu.memory_space<vmem>>, %arg8: memref<1x16x16x128xf32, #tpu.memory_space<vmem>>, %arg9: memref<1x18x18x128xbf16, #tpu.memory_space<vmem>>) attributes {dimension_semantics = [#tpu.dimension_semantics<parallel>], iteration_bounds = array<i64: 2>, scalar_prefetch = 0 : i64, scratch_operands = 1 : i64, tpu.core_type = #tpu.core_type<tc>, window_params = [{transform_indices = @transform_0, window_bounds = array<i64: 1, 16, 16, 128>}, {pipeline_mode = #tpu.pipeline_mode<synchronous>, transform_indices = @transform_1, window_bounds = array<i64: 128, 128>}, {pipeline_mode = #tpu.pipeline_mode<synchronous>, transform_indices = @transform_2, window_bounds = array<i64: 9, 128, 128>}, {pipeline_mode = #tpu.pipeline_mode<synchronous>, transform_indices = @transform_3, window_bounds = array<i64: 128, 128>}, {pipeline_mode = #tpu.pipeline_mode<synchronous>, transform_indices = @transform_4, window_bounds = array<i64: 1, 128>}, {pipeline_mode = #tpu.pipeline_mode<synchronous>, transform_indices = @transform_5, window_bounds = array<i64: 1, 128>}, {pipeline_mode = #tpu.pipeline_mode<synchronous>, transform_indices = @transform_6, window_bounds = array<i64: 1, 128>}, {transform_indices = @transform_7, window_bounds = array<i64: 1, 16, 16, 128>}]} {
    %c0 = arith.constant 0 : index
    %c0_0 = arith.constant 0 : index
    %c0_1 = arith.constant 0 : index
    %c0_2 = arith.constant 0 : index
    %0 = vector.load %arg1[%c0, %c0_0, %c0_1, %c0_2] : memref<1x16x16x128xf32, #tpu.memory_space<vmem>>, vector<1x16x16x128xf32>
    %1 = vector.shape_cast %0 : vector<1x16x16x128xf32> to vector<256x128xf32>
    %2 = arith.truncf %1 : vector<256x128xf32> to vector<256x128xbf16>
    %c0_3 = arith.constant 0 : index
    %c0_4 = arith.constant 0 : index
    %3 = vector.load %arg2[%c0_3, %c0_4] : memref<128x128xbf16, #tpu.memory_space<vmem>>, vector<128x128xbf16>
    %cst = arith.constant dense<0.000000e+00> : vector<256x128xf32>
    %4 = tpu.matmul %2, %3, %cst {dimension_numbers = #tpu.dot_dimension_numbers<[1], [0], [0], [1], [0, 0, 1, 1], [], []>} : vector<256x128xbf16>, vector<128x128xbf16>, vector<256x128xf32> -> vector<256x128xf32>
    %c0_5 = arith.constant 0 : index
    %c0_6 = arith.constant 0 : index
    %5 = vector.load %arg5[%c0_5, %c0_6] : memref<1x128xf32, #tpu.memory_space<vmem>>, vector<1x128xf32>
    %6 = vector.broadcast %5 : vector<1x128xf32> to vector<256x128xf32>
    %7 = arith.addf %4, %6 : vector<256x128xf32>
    %cst_7 = arith.constant 0.000000e+00 : f32
    %8 = vector.broadcast %cst_7 : f32 to vector<256x128xf32>
    %9 = arith.maximumf %7, %8 : vector<256x128xf32>
    %cst_8 = arith.constant 0.000000e+00 : bf16
    %10 = vector.broadcast %cst_8 : bf16 to vector<1x16x1x128xbf16>
    %11 = vector.shape_cast %9 : vector<256x128xf32> to vector<1x16x16x128xf32>
    %12 = arith.truncf %11 : vector<1x16x16x128xf32> to vector<1x16x16x128xbf16>
    %13 = tpu.concatenate %10, %12, %10 in 2 : vector<1x16x1x128xbf16>, vector<1x16x16x128xbf16>, vector<1x16x1x128xbf16> -> vector<1x16x18x128xbf16>
    %cst_9 = arith.constant 0.000000e+00 : bf16
    %14 = vector.broadcast %cst_9 : bf16 to vector<1x1x18x128xbf16>
    %c0_10 = arith.constant 0 : index
    %c0_11 = arith.constant 0 : index
    %c0_12 = arith.constant 0 : index
    %c0_13 = arith.constant 0 : index
    %15 = vector.load %arg9[%c0_10, %c0_11, %c0_12, %c0_13] : memref<1x18x18x128xbf16, #tpu.memory_space<vmem>>, vector<1x1x18x128xbf16>
    tpu.vector_store %arg9[%c0_10, %c0_11, %c0_12, %c0_13], %14 {strides = array<i32>} : memref<1x18x18x128xbf16, #tpu.memory_space<vmem>>, vector<1x1x18x128xbf16>,
    %cst_14 = arith.constant 0.000000e+00 : bf16
    %16 = vector.broadcast %cst_14 : bf16 to vector<1x1x18x128xbf16>
    %c0_15 = arith.constant 0 : index
    %c17 = arith.constant 17 : index
    %c0_16 = arith.constant 0 : index
    %c0_17 = arith.constant 0 : index
    %17 = vector.load %arg9[%c0_15, %c17, %c0_16, %c0_17] : memref<1x18x18x128xbf16, #tpu.memory_space<vmem>>, vector<1x1x18x128xbf16>
    tpu.vector_store %arg9[%c0_15, %c17, %c0_16, %c0_17], %16 {strides = array<i32>} : memref<1x18x18x128xbf16, #tpu.memory_space<vmem>>, vector<1x1x18x128xbf16>,
    %c0_18 = arith.constant 0 : index
    %c1 = arith.constant 1 : index
    %c0_19 = arith.constant 0 : index
    %c0_20 = arith.constant 0 : index
    %18 = vector.load %arg9[%c0_18, %c1, %c0_19, %c0_20] : memref<1x18x18x128xbf16, #tpu.memory_space<vmem>>, vector<1x16x18x128xbf16>
    tpu.vector_store %arg9[%c0_18, %c1, %c0_19, %c0_20], %13 {strides = array<i32>} : memref<1x18x18x128xbf16, #tpu.memory_space<vmem>>, vector<1x16x18x128xbf16>,
    %cst_21 = arith.constant 0.000000e+00 : f32
    %19 = vector.broadcast %cst_21 : f32 to vector<256x128xf32>
    %c0_22 = arith.constant 0 : index
    %c0_23 = arith.constant 0 : index
    %c0_24 = arith.constant 0 : index
    %c0_25 = arith.constant 0 : index
    %20 = vector.load %arg9[%c0_22, %c0_23, %c0_24, %c0_25] : memref<1x18x18x128xbf16, #tpu.memory_space<vmem>>, vector<1x16x16x128xbf16>
    %21 = vector.shape_cast %20 : vector<1x16x16x128xbf16> to vector<256x128xbf16>
    %c0_26 = arith.constant 0 : index
    %c0_27 = arith.constant 0 : index
    %c0_28 = arith.constant 0 : index
    %22 = vector.load %arg3[%c0_26, %c0_27, %c0_28] : memref<9x128x128xbf16, #tpu.memory_space<vmem>>, vector<1x128x128xbf16>
    %23 = vector.shape_cast %22 : vector<1x128x128xbf16> to vector<128x128xbf16>
    %cst_29 = arith.constant dense<0.000000e+00> : vector<256x128xf32>
    %24 = tpu.matmul %21, %23, %cst_29 {dimension_numbers = #tpu.dot_dimension_numbers<[1], [0], [0], [1], [0, 0, 1, 1], [], []>} : vector<256x128xbf16>, vector<128x128xbf16>, vector<256x128xf32> -> vector<256x128xf32>
    %25 = arith.addf %19, %24 : vector<256x128xf32>
    %c0_30 = arith.constant 0 : index
    %c0_31 = arith.constant 0 : index
    %c1_32 = arith.constant 1 : index
    %c0_33 = arith.constant 0 : index
    %26 = vector.load %arg9[%c0_30, %c0_31, %c1_32, %c0_33] : memref<1x18x18x128xbf16, #tpu.memory_space<vmem>>, vector<1x16x16x128xbf16>
    %27 = vector.shape_cast %26 : vector<1x16x16x128xbf16> to vector<256x128xbf16>
    %c1_34 = arith.constant 1 : index
    %c0_35 = arith.constant 0 : index
    %c0_36 = arith.constant 0 : index
    %28 = vector.load %arg3[%c1_34, %c0_35, %c0_36] : memref<9x128x128xbf16, #tpu.memory_space<vmem>>, vector<1x128x128xbf16>
    %29 = vector.shape_cast %28 : vector<1x128x128xbf16> to vector<128x128xbf16>
    %cst_37 = arith.constant dense<0.000000e+00> : vector<256x128xf32>
    %30 = tpu.matmul %27, %29, %cst_37 {dimension_numbers = #tpu.dot_dimension_numbers<[1], [0], [0], [1], [0, 0, 1, 1], [], []>} : vector<256x128xbf16>, vector<128x128xbf16>, vector<256x128xf32> -> vector<256x128xf32>
    %31 = arith.addf %25, %30 : vector<256x128xf32>
    %c0_38 = arith.constant 0 : index
    %c0_39 = arith.constant 0 : index
    %c2 = arith.constant 2 : index
    %c0_40 = arith.constant 0 : index
    %32 = vector.load %arg9[%c0_38, %c0_39, %c2, %c0_40] : memref<1x18x18x128xbf16, #tpu.memory_space<vmem>>, vector<1x16x16x128xbf16>
    %33 = vector.shape_cast %32 : vector<1x16x16x128xbf16> to vector<256x128xbf16>
    %c2_41 = arith.constant 2 : index
    %c0_42 = arith.constant 0 : index
    %c0_43 = arith.constant 0 : index
    %34 = vector.load %arg3[%c2_41, %c0_42, %c0_43] : memref<9x128x128xbf16, #tpu.memory_space<vmem>>, vector<1x128x128xbf16>
    %35 = vector.shape_cast %34 : vector<1x128x128xbf16> to vector<128x128xbf16>
    %cst_44 = arith.constant dense<0.000000e+00> : vector<256x128xf32>
    %36 = tpu.matmul %33, %35, %cst_44 {dimension_numbers = #tpu.dot_dimension_numbers<[1], [0], [0], [1], [0, 0, 1, 1], [], []>} : vector<256x128xbf16>, vector<128x128xbf16>, vector<256x128xf32> -> vector<256x128xf32>
    %37 = arith.addf %31, %36 : vector<256x128xf32>
    %c0_45 = arith.constant 0 : index
    %c1_46 = arith.constant 1 : index
    %c0_47 = arith.constant 0 : index
    %c0_48 = arith.constant 0 : index
    %38 = vector.load %arg9[%c0_45, %c1_46, %c0_47, %c0_48] : memref<1x18x18x128xbf16, #tpu.memory_space<vmem>>, vector<1x16x16x128xbf16>
    %39 = vector.shape_cast %38 : vector<1x16x16x128xbf16> to vector<256x128xbf16>
    %c3 = arith.constant 3 : index
    %c0_49 = arith.constant 0 : index
    %c0_50 = arith.constant 0 : index
    %40 = vector.load %arg3[%c3, %c0_49, %c0_50] : memref<9x128x128xbf16, #tpu.memory_space<vmem>>, vector<1x128x128xbf16>
    %41 = vector.shape_cast %40 : vector<1x128x128xbf16> to vector<128x128xbf16>
    %cst_51 = arith.constant dense<0.000000e+00> : vector<256x128xf32>
    %42 = tpu.matmul %39, %41, %cst_51 {dimension_numbers = #tpu.dot_dimension_numbers<[1], [0], [0], [1], [0, 0, 1, 1], [], []>} : vector<256x128xbf16>, vector<128x128xbf16>, vector<256x128xf32> -> vector<256x128xf32>
    %43 = arith.addf %37, %42 : vector<256x128xf32>
    %c0_52 = arith.constant 0 : index
    %c1_53 = arith.constant 1 : index
    %c1_54 = arith.constant 1 : index
    %c0_55 = arith.constant 0 : index
    %44 = vector.load %arg9[%c0_52, %c1_53, %c1_54, %c0_55] : memref<1x18x18x128xbf16, #tpu.memory_space<vmem>>, vector<1x16x16x128xbf16>
    %45 = vector.shape_cast %44 : vector<1x16x16x128xbf16> to vector<256x128xbf16>
    %c4 = arith.constant 4 : index
    %c0_56 = arith.constant 0 : index
    %c0_57 = arith.constant 0 : index
    %46 = vector.load %arg3[%c4, %c0_56, %c0_57] : memref<9x128x128xbf16, #tpu.memory_space<vmem>>, vector<1x128x128xbf16>
    %47 = vector.shape_cast %46 : vector<1x128x128xbf16> to vector<128x128xbf16>
    %cst_58 = arith.constant dense<0.000000e+00> : vector<256x128xf32>
    %48 = tpu.matmul %45, %47, %cst_58 {dimension_numbers = #tpu.dot_dimension_numbers<[1], [0], [0], [1], [0, 0, 1, 1], [], []>} : vector<256x128xbf16>, vector<128x128xbf16>, vector<256x128xf32> -> vector<256x128xf32>
    %49 = arith.addf %43, %48 : vector<256x128xf32>
    %c0_59 = arith.constant 0 : index
    %c1_60 = arith.constant 1 : index
    %c2_61 = arith.constant 2 : index
    %c0_62 = arith.constant 0 : index
    %50 = vector.load %arg9[%c0_59, %c1_60, %c2_61, %c0_62] : memref<1x18x18x128xbf16, #tpu.memory_space<vmem>>, vector<1x16x16x128xbf16>
    %51 = vector.shape_cast %50 : vector<1x16x16x128xbf16> to vector<256x128xbf16>
    %c5 = arith.constant 5 : index
    %c0_63 = arith.constant 0 : index
    %c0_64 = arith.constant 0 : index
    %52 = vector.load %arg3[%c5, %c0_63, %c0_64] : memref<9x128x128xbf16, #tpu.memory_space<vmem>>, vector<1x128x128xbf16>
    %53 = vector.shape_cast %52 : vector<1x128x128xbf16> to vector<128x128xbf16>
    %cst_65 = arith.constant dense<0.000000e+00> : vector<256x128xf32>
    %54 = tpu.matmul %51, %53, %cst_65 {dimension_numbers = #tpu.dot_dimension_numbers<[1], [0], [0], [1], [0, 0, 1, 1], [], []>} : vector<256x128xbf16>, vector<128x128xbf16>, vector<256x128xf32> -> vector<256x128xf32>
    %55 = arith.addf %49, %54 : vector<256x128xf32>
    %c0_66 = arith.constant 0 : index
    %c2_67 = arith.constant 2 : index
    %c0_68 = arith.constant 0 : index
    %c0_69 = arith.constant 0 : index
    %56 = vector.load %arg9[%c0_66, %c2_67, %c0_68, %c0_69] : memref<1x18x18x128xbf16, #tpu.memory_space<vmem>>, vector<1x16x16x128xbf16>
    %57 = vector.shape_cast %56 : vector<1x16x16x128xbf16> to vector<256x128xbf16>
    %c6 = arith.constant 6 : index
    %c0_70 = arith.constant 0 : index
    %c0_71 = arith.constant 0 : index
    %58 = vector.load %arg3[%c6, %c0_70, %c0_71] : memref<9x128x128xbf16, #tpu.memory_space<vmem>>, vector<1x128x128xbf16>
    %59 = vector.shape_cast %58 : vector<1x128x128xbf16> to vector<128x128xbf16>
    %cst_72 = arith.constant dense<0.000000e+00> : vector<256x128xf32>
    %60 = tpu.matmul %57, %59, %cst_72 {dimension_numbers = #tpu.dot_dimension_numbers<[1], [0], [0], [1], [0, 0, 1, 1], [], []>} : vector<256x128xbf16>, vector<128x128xbf16>, vector<256x128xf32> -> vector<256x128xf32>
    %61 = arith.addf %55, %60 : vector<256x128xf32>
    %c0_73 = arith.constant 0 : index
    %c2_74 = arith.constant 2 : index
    %c1_75 = arith.constant 1 : index
    %c0_76 = arith.constant 0 : index
    %62 = vector.load %arg9[%c0_73, %c2_74, %c1_75, %c0_76] : memref<1x18x18x128xbf16, #tpu.memory_space<vmem>>, vector<1x16x16x128xbf16>
    %63 = vector.shape_cast %62 : vector<1x16x16x128xbf16> to vector<256x128xbf16>
    %c7 = arith.constant 7 : index
    %c0_77 = arith.constant 0 : index
    %c0_78 = arith.constant 0 : index
    %64 = vector.load %arg3[%c7, %c0_77, %c0_78] : memref<9x128x128xbf16, #tpu.memory_space<vmem>>, vector<1x128x128xbf16>
    %65 = vector.shape_cast %64 : vector<1x128x128xbf16> to vector<128x128xbf16>
    %cst_79 = arith.constant dense<0.000000e+00> : vector<256x128xf32>
    %66 = tpu.matmul %63, %65, %cst_79 {dimension_numbers = #tpu.dot_dimension_numbers<[1], [0], [0], [1], [0, 0, 1, 1], [], []>} : vector<256x128xbf16>, vector<128x128xbf16>, vector<256x128xf32> -> vector<256x128xf32>
    %67 = arith.addf %61, %66 : vector<256x128xf32>
    %c0_80 = arith.constant 0 : index
    %c2_81 = arith.constant 2 : index
    %c2_82 = arith.constant 2 : index
    %c0_83 = arith.constant 0 : index
    %68 = vector.load %arg9[%c0_80, %c2_81, %c2_82, %c0_83] : memref<1x18x18x128xbf16, #tpu.memory_space<vmem>>, vector<1x16x16x128xbf16>
    %69 = vector.shape_cast %68 : vector<1x16x16x128xbf16> to vector<256x128xbf16>
    %c8 = arith.constant 8 : index
    %c0_84 = arith.constant 0 : index
    %c0_85 = arith.constant 0 : index
    %70 = vector.load %arg3[%c8, %c0_84, %c0_85] : memref<9x128x128xbf16, #tpu.memory_space<vmem>>, vector<1x128x128xbf16>
    %71 = vector.shape_cast %70 : vector<1x128x128xbf16> to vector<128x128xbf16>
    %cst_86 = arith.constant dense<0.000000e+00> : vector<256x128xf32>
    %72 = tpu.matmul %69, %71, %cst_86 {dimension_numbers = #tpu.dot_dimension_numbers<[1], [0], [0], [1], [0, 0, 1, 1], [], []>} : vector<256x128xbf16>, vector<128x128xbf16>, vector<256x128xf32> -> vector<256x128xf32>
    %73 = arith.addf %67, %72 : vector<256x128xf32>
    %c0_87 = arith.constant 0 : index
    %c0_88 = arith.constant 0 : index
    %74 = vector.load %arg6[%c0_87, %c0_88] : memref<1x128xf32, #tpu.memory_space<vmem>>, vector<1x128xf32>
    %75 = vector.broadcast %74 : vector<1x128xf32> to vector<256x128xf32>
    %76 = arith.addf %73, %75 : vector<256x128xf32>
    %cst_89 = arith.constant 0.000000e+00 : f32
    %77 = vector.broadcast %cst_89 : f32 to vector<256x128xf32>
    %78 = arith.maximumf %76, %77 : vector<256x128xf32>
    %79 = arith.truncf %78 : vector<256x128xf32> to vector<256x128xbf16>
    %c0_90 = arith.constant 0 : index
    %c0_91 = arith.constant 0 : index
    %80 = vector.load %arg4[%c0_90, %c0_91] : memref<128x128xbf16, #tpu.memory_space<vmem>>, vector<128x128xbf16>
    %cst_92 = arith.constant dense<0.000000e+00> : vector<256x128xf32>
    %81 = tpu.matmul %79, %80, %cst_92 {dimension_numbers = #tpu.dot_dimension_numbers<[1], [0], [0], [1], [0, 0, 1, 1], [], []>} : vector<256x128xbf16>, vector<128x128xbf16>, vector<256x128xf32> -> vector<256x128xf32>
    %c0_93 = arith.constant 0 : index
    %c0_94 = arith.constant 0 : index
    %82 = vector.load %arg7[%c0_93, %c0_94] : memref<1x128xf32, #tpu.memory_space<vmem>>, vector<1x128xf32>
    %83 = vector.broadcast %82 : vector<1x128xf32> to vector<256x128xf32>
    %84 = arith.addf %81, %83 : vector<256x128xf32>
    %c0_95 = arith.constant 0 : index
    %c0_96 = arith.constant 0 : index
    %c0_97 = arith.constant 0 : index
    %c0_98 = arith.constant 0 : index
    %85 = vector.load %arg1[%c0_95, %c0_96, %c0_97, %c0_98] : memref<1x16x16x128xf32, #tpu.memory_space<vmem>>, vector<1x16x16x128xf32>
    %86 = vector.shape_cast %85 : vector<1x16x16x128xf32> to vector<256x128xf32>
    %87 = arith.addf %84, %86 : vector<256x128xf32>
    %cst_99 = arith.constant 0.000000e+00 : f32
    %88 = vector.broadcast %cst_99 : f32 to vector<256x128xf32>
    %89 = arith.maximumf %87, %88 : vector<256x128xf32>
    %90 = vector.shape_cast %89 : vector<256x128xf32> to vector<1x16x16x128xf32>
    %c0_100 = arith.constant 0 : index
    %c0_101 = arith.constant 0 : index
    %c0_102 = arith.constant 0 : index
    %c0_103 = arith.constant 0 : index
    %91 = vector.load %arg8[%c0_100, %c0_101, %c0_102, %c0_103] : memref<1x16x16x128xf32, #tpu.memory_space<vmem>>, vector<1x16x16x128xf32>
    tpu.vector_store %arg8[%c0_100, %c0_101, %c0_102, %c0_103], %90 {strides = array<i32>} : memref<1x16x16x128xf32, #tpu.memory_space<vmem>>, vector<1x16x16x128xf32>,
    return
  }
  func.func @transform_0(%arg0: i32) -> (i32, i32, i32, i32) {
    %c0_i32 = arith.constant 0 : i32
    %c0_i32_0 = arith.constant 0 : i32
    %c0_i32_1 = arith.constant 0 : i32
    %c0_i32_2 = arith.constant 0 : i32
    return %arg0, %c0_i32, %c0_i32_0, %c0_i32_1 : i32, i32, i32, i32
  }
  func.func @transform_1(%arg0: i32) -> (i32, i32) {
    %c0_i32 = arith.constant 0 : i32
    %c0_i32_0 = arith.constant 0 : i32
    %c0_i32_1 = arith.constant 0 : i32
    return %c0_i32, %c0_i32_0 : i32, i32
  }
  func.func @transform_2(%arg0: i32) -> (i32, i32, i32) {
    %c0_i32 = arith.constant 0 : i32
    %c0_i32_0 = arith.constant 0 : i32
    %c0_i32_1 = arith.constant 0 : i32
    %c0_i32_2 = arith.constant 0 : i32
    return %c0_i32, %c0_i32_0, %c0_i32_1 : i32, i32, i32
  }
  func.func @transform_3(%arg0: i32) -> (i32, i32) {
    %c0_i32 = arith.constant 0 : i32
    %c0_i32_0 = arith.constant 0 : i32
    %c0_i32_1 = arith.constant 0 : i32
    return %c0_i32, %c0_i32_0 : i32, i32
  }
  func.func @transform_4(%arg0: i32) -> (i32, i32) {
    %c0_i32 = arith.constant 0 : i32
    %c0_i32_0 = arith.constant 0 : i32
    %c0_i32_1 = arith.constant 0 : i32
    return %c0_i32, %c0_i32_0 : i32, i32
  }
  func.func @transform_5(%arg0: i32) -> (i32, i32) {
    %c0_i32 = arith.constant 0 : i32
    %c0_i32_0 = arith.constant 0 : i32
    %c0_i32_1 = arith.constant 0 : i32
    return %c0_i32, %c0_i32_0 : i32, i32
  }
  func.func @transform_6(%arg0: i32) -> (i32, i32) {
    %c0_i32 = arith.constant 0 : i32
    %c0_i32_0 = arith.constant 0 : i32
    %c0_i32_1 = arith.constant 0 : i32
    return %c0_i32, %c0_i32_0 : i32, i32
  }
  func.func @transform_7(%arg0: i32) -> (i32, i32, i32, i32) {
    %c0_i32 = arith.constant 0 : i32
    %c0_i32_0 = arith.constant 0 : i32
    %c0_i32_1 = arith.constant 0 : i32
    %c0_i32_2 = arith.constant 0 : i32
    return %arg0, %c0_i32, %c0_i32_0, %c0_i32_1 : i32, i32, i32, i32
  }
}

module attributes {stable_mosaic.version = 11 : i64} {
  func.func @_bottleneck_kernel(%arg0: i32, %arg1: memref<1x16x16x128xf32, #tpu.memory_space<vmem>>, %arg2: memref<128x128xbf16, #tpu.memory_space<vmem>>, %arg3: memref<9x128x128xbf16, #tpu.memory_space<vmem>>, %arg4: memref<128x128xbf16, #tpu.memory_space<vmem>>, %arg5: memref<1x128xf32, #tpu.memory_space<vmem>>, %arg6: memref<1x128xf32, #tpu.memory_space<vmem>>, %arg7: memref<1x128xf32, #tpu.memory_space<vmem>>, %arg8: memref<1x16x16x128xf32, #tpu.memory_space<vmem>>, %arg9: memref<1x18x18x128xbf16, #tpu.memory_space<vmem>>) attributes {dimension_semantics = [#tpu.dimension_semantics<parallel>], iteration_bounds = array<i64: 2>, scalar_prefetch = 0 : i64, scratch_operands = 1 : i64, tpu.core_type = #tpu.core_type<tc>, window_params = [{transform_indices = @transform_0, window_bounds = array<i64: 1, 16, 16, 128>}, {pipeline_mode = #tpu.pipeline_mode<synchronous>, transform_indices = @transform_1, window_bounds = array<i64: 128, 128>}, {pipeline_mode = #tpu.pipeline_mode<synchronous>, transform_indices = @transform_2, window_bounds = array<i64: 9, 128, 128>}, {pipeline_mode = #tpu.pipeline_mode<synchronous>, transform_indices = @transform_3, window_bounds = array<i64: 128, 128>}, {pipeline_mode = #tpu.pipeline_mode<synchronous>, transform_indices = @transform_4, window_bounds = array<i64: 1, 128>}, {pipeline_mode = #tpu.pipeline_mode<synchronous>, transform_indices = @transform_5, window_bounds = array<i64: 1, 128>}, {pipeline_mode = #tpu.pipeline_mode<synchronous>, transform_indices = @transform_6, window_bounds = array<i64: 1, 128>}, {transform_indices = @transform_7, window_bounds = array<i64: 1, 16, 16, 128>}]} {
    %c0 = arith.constant 0 : index
    %c0_0 = arith.constant 0 : index
    %c0_1 = arith.constant 0 : index
    %c0_2 = arith.constant 0 : index
    %0 = vector.load %arg1[%c0, %c0_0, %c0_1, %c0_2] : memref<1x16x16x128xf32, #tpu.memory_space<vmem>>, vector<1x16x16x128xf32>
    %1 = vector.shape_cast %0 : vector<1x16x16x128xf32> to vector<256x128xf32>
    %2 = arith.truncf %1 : vector<256x128xf32> to vector<256x128xbf16>
    %c0_3 = arith.constant 0 : index
    %c0_4 = arith.constant 0 : index
    %3 = vector.load %arg2[%c0_3, %c0_4] : memref<128x128xbf16, #tpu.memory_space<vmem>>, vector<128x128xbf16>
    %cst = arith.constant dense<0.000000e+00> : vector<256x128xf32>
    %4 = tpu.matmul %2, %3, %cst {dimension_numbers = #tpu.dot_dimension_numbers<[1], [0], [0], [1], [0, 0, 1, 1], [], []>} : vector<256x128xbf16>, vector<128x128xbf16>, vector<256x128xf32> -> vector<256x128xf32>
    %c0_5 = arith.constant 0 : index
    %c0_6 = arith.constant 0 : index
    %5 = vector.load %arg5[%c0_5, %c0_6] : memref<1x128xf32, #tpu.memory_space<vmem>>, vector<1x128xf32>
    %6 = vector.broadcast %5 : vector<1x128xf32> to vector<256x128xf32>
    %7 = arith.addf %4, %6 : vector<256x128xf32>
    %cst_7 = arith.constant 0.000000e+00 : f32
    %8 = vector.broadcast %cst_7 : f32 to vector<256x128xf32>
    %9 = arith.maximumf %7, %8 : vector<256x128xf32>
    %cst_8 = arith.constant 0.000000e+00 : bf16
    %10 = vector.broadcast %cst_8 : bf16 to vector<1x16x1x128xbf16>
    %11 = vector.shape_cast %9 : vector<256x128xf32> to vector<1x16x16x128xf32>
    %12 = arith.truncf %11 : vector<1x16x16x128xf32> to vector<1x16x16x128xbf16>
    %13 = tpu.concatenate %10, %12, %10 in 2 : vector<1x16x1x128xbf16>, vector<1x16x16x128xbf16>, vector<1x16x1x128xbf16> -> vector<1x16x18x128xbf16>
    %cst_9 = arith.constant 0.000000e+00 : bf16
    %14 = vector.broadcast %cst_9 : bf16 to vector<1x1x18x128xbf16>
    %c0_10 = arith.constant 0 : index
    %c0_11 = arith.constant 0 : index
    %c0_12 = arith.constant 0 : index
    %c0_13 = arith.constant 0 : index
    %15 = vector.load %arg9[%c0_10, %c0_11, %c0_12, %c0_13] : memref<1x18x18x128xbf16, #tpu.memory_space<vmem>>, vector<1x1x18x128xbf16>
    tpu.vector_store %arg9[%c0_10, %c0_11, %c0_12, %c0_13], %14 {strides = array<i32>} : memref<1x18x18x128xbf16, #tpu.memory_space<vmem>>, vector<1x1x18x128xbf16>,
    %cst_14 = arith.constant 0.000000e+00 : bf16
    %16 = vector.broadcast %cst_14 : bf16 to vector<1x1x18x128xbf16>
    %c0_15 = arith.constant 0 : index
    %c17 = arith.constant 17 : index
    %c0_16 = arith.constant 0 : index
    %c0_17 = arith.constant 0 : index
    %17 = vector.load %arg9[%c0_15, %c17, %c0_16, %c0_17] : memref<1x18x18x128xbf16, #tpu.memory_space<vmem>>, vector<1x1x18x128xbf16>
    tpu.vector_store %arg9[%c0_15, %c17, %c0_16, %c0_17], %16 {strides = array<i32>} : memref<1x18x18x128xbf16, #tpu.memory_space<vmem>>, vector<1x1x18x128xbf16>,
    %c0_18 = arith.constant 0 : index
    %c1 = arith.constant 1 : index
    %c0_19 = arith.constant 0 : index
    %c0_20 = arith.constant 0 : index
    %18 = vector.load %arg9[%c0_18, %c1, %c0_19, %c0_20] : memref<1x18x18x128xbf16, #tpu.memory_space<vmem>>, vector<1x16x18x128xbf16>
    tpu.vector_store %arg9[%c0_18, %c1, %c0_19, %c0_20], %13 {strides = array<i32>} : memref<1x18x18x128xbf16, #tpu.memory_space<vmem>>, vector<1x16x18x128xbf16>,
    %cst_21 = arith.constant 0.000000e+00 : f32
    %19 = vector.broadcast %cst_21 : f32 to vector<256x128xf32>
    %c0_22 = arith.constant 0 : index
    %c0_23 = arith.constant 0 : index
    %c0_24 = arith.constant 0 : index
    %c0_25 = arith.constant 0 : index
    %20 = vector.load %arg9[%c0_22, %c0_23, %c0_24, %c0_25] : memref<1x18x18x128xbf16, #tpu.memory_space<vmem>>, vector<1x16x16x128xbf16>
    %21 = vector.shape_cast %20 : vector<1x16x16x128xbf16> to vector<256x128xbf16>
    %c0_26 = arith.constant 0 : index
    %c0_27 = arith.constant 0 : index
    %c0_28 = arith.constant 0 : index
    %22 = vector.load %arg3[%c0_26, %c0_27, %c0_28] : memref<9x128x128xbf16, #tpu.memory_space<vmem>>, vector<1x128x128xbf16>
    %23 = vector.shape_cast %22 : vector<1x128x128xbf16> to vector<128x128xbf16>
    %cst_29 = arith.constant dense<0.000000e+00> : vector<256x128xf32>
    %24 = tpu.matmul %21, %23, %cst_29 {dimension_numbers = #tpu.dot_dimension_numbers<[1], [0], [0], [1], [0, 0, 1, 1], [], []>} : vector<256x128xbf16>, vector<128x128xbf16>, vector<256x128xf32> -> vector<256x128xf32>
    %25 = arith.addf %19, %24 : vector<256x128xf32>
    %c0_30 = arith.constant 0 : index
    %c0_31 = arith.constant 0 : index
    %c1_32 = arith.constant 1 : index
    %c0_33 = arith.constant 0 : index
    %26 = vector.load %arg9[%c0_30, %c0_31, %c1_32, %c0_33] : memref<1x18x18x128xbf16, #tpu.memory_space<vmem>>, vector<1x16x16x128xbf16>
    %27 = vector.shape_cast %26 : vector<1x16x16x128xbf16> to vector<256x128xbf16>
    %c1_34 = arith.constant 1 : index
    %c0_35 = arith.constant 0 : index
    %c0_36 = arith.constant 0 : index
    %28 = vector.load %arg3[%c1_34, %c0_35, %c0_36] : memref<9x128x128xbf16, #tpu.memory_space<vmem>>, vector<1x128x128xbf16>
    %29 = vector.shape_cast %28 : vector<1x128x128xbf16> to vector<128x128xbf16>
    %cst_37 = arith.constant dense<0.000000e+00> : vector<256x128xf32>
    %30 = tpu.matmul %27, %29, %cst_37 {dimension_numbers = #tpu.dot_dimension_numbers<[1], [0], [0], [1], [0, 0, 1, 1], [], []>} : vector<256x128xbf16>, vector<128x128xbf16>, vector<256x128xf32> -> vector<256x128xf32>
    %31 = arith.addf %25, %30 : vector<256x128xf32>
    %c0_38 = arith.constant 0 : index
    %c0_39 = arith.constant 0 : index
    %c2 = arith.constant 2 : index
    %c0_40 = arith.constant 0 : index
    %32 = vector.load %arg9[%c0_38, %c0_39, %c2, %c0_40] : memref<1x18x18x128xbf16, #tpu.memory_space<vmem>>, vector<1x16x16x128xbf16>
    %33 = vector.shape_cast %32 : vector<1x16x16x128xbf16> to vector<256x128xbf16>
    %c2_41 = arith.constant 2 : index
    %c0_42 = arith.constant 0 : index
    %c0_43 = arith.constant 0 : index
    %34 = vector.load %arg3[%c2_41, %c0_42, %c0_43] : memref<9x128x128xbf16, #tpu.memory_space<vmem>>, vector<1x128x128xbf16>
    %35 = vector.shape_cast %34 : vector<1x128x128xbf16> to vector<128x128xbf16>
    %cst_44 = arith.constant dense<0.000000e+00> : vector<256x128xf32>
    %36 = tpu.matmul %33, %35, %cst_44 {dimension_numbers = #tpu.dot_dimension_numbers<[1], [0], [0], [1], [0, 0, 1, 1], [], []>} : vector<256x128xbf16>, vector<128x128xbf16>, vector<256x128xf32> -> vector<256x128xf32>
    %37 = arith.addf %31, %36 : vector<256x128xf32>
    %c0_45 = arith.constant 0 : index
    %c1_46 = arith.constant 1 : index
    %c0_47 = arith.constant 0 : index
    %c0_48 = arith.constant 0 : index
    %38 = vector.load %arg9[%c0_45, %c1_46, %c0_47, %c0_48] : memref<1x18x18x128xbf16, #tpu.memory_space<vmem>>, vector<1x16x16x128xbf16>
    %39 = vector.shape_cast %38 : vector<1x16x16x128xbf16> to vector<256x128xbf16>
    %c3 = arith.constant 3 : index
    %c0_49 = arith.constant 0 : index
    %c0_50 = arith.constant 0 : index
    %40 = vector.load %arg3[%c3, %c0_49, %c0_50] : memref<9x128x128xbf16, #tpu.memory_space<vmem>>, vector<1x128x128xbf16>
    %41 = vector.shape_cast %40 : vector<1x128x128xbf16> to vector<128x128xbf16>
    %cst_51 = arith.constant dense<0.000000e+00> : vector<256x128xf32>
    %42 = tpu.matmul %39, %41, %cst_51 {dimension_numbers = #tpu.dot_dimension_numbers<[1], [0], [0], [1], [0, 0, 1, 1], [], []>} : vector<256x128xbf16>, vector<128x128xbf16>, vector<256x128xf32> -> vector<256x128xf32>
    %43 = arith.addf %37, %42 : vector<256x128xf32>
    %c0_52 = arith.constant 0 : index
    %c1_53 = arith.constant 1 : index
    %c1_54 = arith.constant 1 : index
    %c0_55 = arith.constant 0 : index
    %44 = vector.load %arg9[%c0_52, %c1_53, %c1_54, %c0_55] : memref<1x18x18x128xbf16, #tpu.memory_space<vmem>>, vector<1x16x16x128xbf16>
    %45 = vector.shape_cast %44 : vector<1x16x16x128xbf16> to vector<256x128xbf16>
    %c4 = arith.constant 4 : index
    %c0_56 = arith.constant 0 : index
    %c0_57 = arith.constant 0 : index
    %46 = vector.load %arg3[%c4, %c0_56, %c0_57] : memref<9x128x128xbf16, #tpu.memory_space<vmem>>, vector<1x128x128xbf16>
    %47 = vector.shape_cast %46 : vector<1x128x128xbf16> to vector<128x128xbf16>
    %cst_58 = arith.constant dense<0.000000e+00> : vector<256x128xf32>
    %48 = tpu.matmul %45, %47, %cst_58 {dimension_numbers = #tpu.dot_dimension_numbers<[1], [0], [0], [1], [0, 0, 1, 1], [], []>} : vector<256x128xbf16>, vector<128x128xbf16>, vector<256x128xf32> -> vector<256x128xf32>
    %49 = arith.addf %43, %48 : vector<256x128xf32>
    %c0_59 = arith.constant 0 : index
    %c1_60 = arith.constant 1 : index
    %c2_61 = arith.constant 2 : index
    %c0_62 = arith.constant 0 : index
    %50 = vector.load %arg9[%c0_59, %c1_60, %c2_61, %c0_62] : memref<1x18x18x128xbf16, #tpu.memory_space<vmem>>, vector<1x16x16x128xbf16>
    %51 = vector.shape_cast %50 : vector<1x16x16x128xbf16> to vector<256x128xbf16>
    %c5 = arith.constant 5 : index
    %c0_63 = arith.constant 0 : index
    %c0_64 = arith.constant 0 : index
    %52 = vector.load %arg3[%c5, %c0_63, %c0_64] : memref<9x128x128xbf16, #tpu.memory_space<vmem>>, vector<1x128x128xbf16>
    %53 = vector.shape_cast %52 : vector<1x128x128xbf16> to vector<128x128xbf16>
    %cst_65 = arith.constant dense<0.000000e+00> : vector<256x128xf32>
    %54 = tpu.matmul %51, %53, %cst_65 {dimension_numbers = #tpu.dot_dimension_numbers<[1], [0], [0], [1], [0, 0, 1, 1], [], []>} : vector<256x128xbf16>, vector<128x128xbf16>, vector<256x128xf32> -> vector<256x128xf32>
    %55 = arith.addf %49, %54 : vector<256x128xf32>
    %c0_66 = arith.constant 0 : index
    %c2_67 = arith.constant 2 : index
    %c0_68 = arith.constant 0 : index
    %c0_69 = arith.constant 0 : index
    %56 = vector.load %arg9[%c0_66, %c2_67, %c0_68, %c0_69] : memref<1x18x18x128xbf16, #tpu.memory_space<vmem>>, vector<1x16x16x128xbf16>
    %57 = vector.shape_cast %56 : vector<1x16x16x128xbf16> to vector<256x128xbf16>
    %c6 = arith.constant 6 : index
    %c0_70 = arith.constant 0 : index
    %c0_71 = arith.constant 0 : index
    %58 = vector.load %arg3[%c6, %c0_70, %c0_71] : memref<9x128x128xbf16, #tpu.memory_space<vmem>>, vector<1x128x128xbf16>
    %59 = vector.shape_cast %58 : vector<1x128x128xbf16> to vector<128x128xbf16>
    %cst_72 = arith.constant dense<0.000000e+00> : vector<256x128xf32>
    %60 = tpu.matmul %57, %59, %cst_72 {dimension_numbers = #tpu.dot_dimension_numbers<[1], [0], [0], [1], [0, 0, 1, 1], [], []>} : vector<256x128xbf16>, vector<128x128xbf16>, vector<256x128xf32> -> vector<256x128xf32>
    %61 = arith.addf %55, %60 : vector<256x128xf32>
    %c0_73 = arith.constant 0 : index
    %c2_74 = arith.constant 2 : index
    %c1_75 = arith.constant 1 : index
    %c0_76 = arith.constant 0 : index
    %62 = vector.load %arg9[%c0_73, %c2_74, %c1_75, %c0_76] : memref<1x18x18x128xbf16, #tpu.memory_space<vmem>>, vector<1x16x16x128xbf16>
    %63 = vector.shape_cast %62 : vector<1x16x16x128xbf16> to vector<256x128xbf16>
    %c7 = arith.constant 7 : index
    %c0_77 = arith.constant 0 : index
    %c0_78 = arith.constant 0 : index
    %64 = vector.load %arg3[%c7, %c0_77, %c0_78] : memref<9x128x128xbf16, #tpu.memory_space<vmem>>, vector<1x128x128xbf16>
    %65 = vector.shape_cast %64 : vector<1x128x128xbf16> to vector<128x128xbf16>
    %cst_79 = arith.constant dense<0.000000e+00> : vector<256x128xf32>
    %66 = tpu.matmul %63, %65, %cst_79 {dimension_numbers = #tpu.dot_dimension_numbers<[1], [0], [0], [1], [0, 0, 1, 1], [], []>} : vector<256x128xbf16>, vector<128x128xbf16>, vector<256x128xf32> -> vector<256x128xf32>
    %67 = arith.addf %61, %66 : vector<256x128xf32>
    %c0_80 = arith.constant 0 : index
    %c2_81 = arith.constant 2 : index
    %c2_82 = arith.constant 2 : index
    %c0_83 = arith.constant 0 : index
    %68 = vector.load %arg9[%c0_80, %c2_81, %c2_82, %c0_83] : memref<1x18x18x128xbf16, #tpu.memory_space<vmem>>, vector<1x16x16x128xbf16>
    %69 = vector.shape_cast %68 : vector<1x16x16x128xbf16> to vector<256x128xbf16>
    %c8 = arith.constant 8 : index
    %c0_84 = arith.constant 0 : index
    %c0_85 = arith.constant 0 : index
    %70 = vector.load %arg3[%c8, %c0_84, %c0_85] : memref<9x128x128xbf16, #tpu.memory_space<vmem>>, vector<1x128x128xbf16>
    %71 = vector.shape_cast %70 : vector<1x128x128xbf16> to vector<128x128xbf16>
    %cst_86 = arith.constant dense<0.000000e+00> : vector<256x128xf32>
    %72 = tpu.matmul %69, %71, %cst_86 {dimension_numbers = #tpu.dot_dimension_numbers<[1], [0], [0], [1], [0, 0, 1, 1], [], []>} : vector<256x128xbf16>, vector<128x128xbf16>, vector<256x128xf32> -> vector<256x128xf32>
    %73 = arith.addf %67, %72 : vector<256x128xf32>
    %c0_87 = arith.constant 0 : index
    %c0_88 = arith.constant 0 : index
    %74 = vector.load %arg6[%c0_87, %c0_88] : memref<1x128xf32, #tpu.memory_space<vmem>>, vector<1x128xf32>
    %75 = vector.broadcast %74 : vector<1x128xf32> to vector<256x128xf32>
    %76 = arith.addf %73, %75 : vector<256x128xf32>
    %cst_89 = arith.constant 0.000000e+00 : f32
    %77 = vector.broadcast %cst_89 : f32 to vector<256x128xf32>
    %78 = arith.maximumf %76, %77 : vector<256x128xf32>
    %79 = arith.truncf %78 : vector<256x128xf32> to vector<256x128xbf16>
    %c0_90 = arith.constant 0 : index
    %c0_91 = arith.constant 0 : index
    %80 = vector.load %arg4[%c0_90, %c0_91] : memref<128x128xbf16, #tpu.memory_space<vmem>>, vector<128x128xbf16>
    %cst_92 = arith.constant dense<0.000000e+00> : vector<256x128xf32>
    %81 = tpu.matmul %79, %80, %cst_92 {dimension_numbers = #tpu.dot_dimension_numbers<[1], [0], [0], [1], [0, 0, 1, 1], [], []>} : vector<256x128xbf16>, vector<128x128xbf16>, vector<256x128xf32> -> vector<256x128xf32>
    %c0_93 = arith.constant 0 : index
    %c0_94 = arith.constant 0 : index
    %82 = vector.load %arg7[%c0_93, %c0_94] : memref<1x128xf32, #tpu.memory_space<vmem>>, vector<1x128xf32>
    %83 = vector.broadcast %82 : vector<1x128xf32> to vector<256x128xf32>
    %84 = arith.addf %81, %83 : vector<256x128xf32>
    %c0_95 = arith.constant 0 : index
    %c0_96 = arith.constant 0 : index
    %c0_97 = arith.constant 0 : index
    %c0_98 = arith.constant 0 : index
    %85 = vector.load %arg1[%c0_95, %c0_96, %c0_97, %c0_98] : memref<1x16x16x128xf32, #tpu.memory_space<vmem>>, vector<1x16x16x128xf32>
    %86 = vector.shape_cast %85 : vector<1x16x16x128xf32> to vector<256x128xf32>
    %87 = arith.addf %84, %86 : vector<256x128xf32>
    %cst_99 = arith.constant 0.000000e+00 : f32
    %88 = vector.broadcast %cst_99 : f32 to vector<256x128xf32>
    %89 = arith.maximumf %87, %88 : vector<256x128xf32>
    %90 = vector.shape_cast %89 : vector<256x128xf32> to vector<1x16x16x128xf32>
    %c0_100 = arith.constant 0 : index
    %c0_101 = arith.constant 0 : index
    %c0_102 = arith.constant 0 : index
    %c0_103 = arith.constant 0 : index
    %91 = vector.load %arg8[%c0_100, %c0_101, %c0_102, %c0_103] : memref<1x16x16x128xf32, #tpu.memory_space<vmem>>, vector<1x16x16x128xf32>
    tpu.vector_store %arg8[%c0_100, %c0_101, %c0_102, %c0_103], %90 {strides = array<i32>} : memref<1x16x16x128xf32, #tpu.memory_space<vmem>>, vector<1x16x16x128xf32>,
    return
  }
  func.func @transform_0(%arg0: i32) -> (i32, i32, i32, i32) {
    %c0_i32 = arith.constant 0 : i32
    %c0_i32_0 = arith.constant 0 : i32
    %c0_i32_1 = arith.constant 0 : i32
    %c0_i32_2 = arith.constant 0 : i32
    return %arg0, %c0_i32, %c0_i32_0, %c0_i32_1 : i32, i32, i32, i32
  }
  func.func @transform_1(%arg0: i32) -> (i32, i32) {
    %c0_i32 = arith.constant 0 : i32
    %c0_i32_0 = arith.constant 0 : i32
    %c0_i32_1 = arith.constant 0 : i32
    return %c0_i32, %c0_i32_0 : i32, i32
  }
  func.func @transform_2(%arg0: i32) -> (i32, i32, i32) {
    %c0_i32 = arith.constant 0 : i32
    %c0_i32_0 = arith.constant 0 : i32
    %c0_i32_1 = arith.constant 0 : i32
    %c0_i32_2 = arith.constant 0 : i32
    return %c0_i32, %c0_i32_0, %c0_i32_1 : i32, i32, i32
  }
  func.func @transform_3(%arg0: i32) -> (i32, i32) {
    %c0_i32 = arith.constant 0 : i32
    %c0_i32_0 = arith.constant 0 : i32
    %c0_i32_1 = arith.constant 0 : i32
    return %c0_i32, %c0_i32_0 : i32, i32
  }
  func.func @transform_4(%arg0: i32) -> (i32, i32) {
    %c0_i32 = arith.constant 0 : i32
    %c0_i32_0 = arith.constant 0 : i32
    %c0_i32_1 = arith.constant 0 : i32
    return %c0_i32, %c0_i32_0 : i32, i32
  }
  func.func @transform_5(%arg0: i32) -> (i32, i32) {
    %c0_i32 = arith.constant 0 : i32
    %c0_i32_0 = arith.constant 0 : i32
    %c0_i32_1 = arith.constant 0 : i32
    return %c0_i32, %c0_i32_0 : i32, i32
  }
  func.func @transform_6(%arg0: i32) -> (i32, i32) {
    %c0_i32 = arith.constant 0 : i32
    %c0_i32_0 = arith.constant 0 : i32
    %c0_i32_1 = arith.constant 0 : i32
    return %c0_i32, %c0_i32_0 : i32, i32
  }
  func.func @transform_7(%arg0: i32) -> (i32, i32, i32, i32) {
    %c0_i32 = arith.constant 0 : i32
    %c0_i32_0 = arith.constant 0 : i32
    %c0_i32_1 = arith.constant 0 : i32
    %c0_i32_2 = arith.constant 0 : i32
    return %arg0, %c0_i32, %c0_i32_0, %c0_i32_1 : i32, i32, i32, i32
  }
}

</mosaic_0001>

<bundles_post_ra>
// kernel: tpu_custom_call.1
= control target key start
LH: loop header
LB: loop body
LE: loop exit
PB: predicated region body
PF: predicated region fallthrough
CT: control target
= control target key end

     0   :  { %12 = vsyncpa [#allocation4], 0  ;;  %s10162_s0 = inlined_call_operand.hbm [shape: f32[2,16,16,128], index: 0, kind: input, shape index: {}]   ;;  %s10163_s1 = inlined_call_operand.hbm [shape: bf16[128,128], index: 1, kind: input, shape index: {}]   ;;  %s10164_s2 = inlined_call_operand.hbm [shape: bf16[9,128,128], index: 2, kind: input, shape index: {}]   ;;  %s10165_s3 = inlined_call_operand.hbm [shape: bf16[128,128], index: 3, kind: input, shape index: {}]   ;;  %s10166_s4 = inlined_call_operand.vmem [shape: f32[1,128], index: 4, kind: input, shape index: {}]   ;;  %s10167_s5 = inlined_call_operand.vmem [shape: f32[1,128], index: 5, kind: input, shape index: {}]   ;;  %s10168_s6 = inlined_call_operand.vmem [shape: f32[1,128], index: 6, kind: input, shape index: {}]   ;;  %s10169_s7 = inlined_call_operand.hbm [shape: f32[2,16,16,128], index: 7, kind: output, shape index: {}]  }
   0x1   :  { %14 = vsyncpa [#allocation4 + $0x1], 0 }
   0x2   :  { %15 = vsyncpa [#allocation7], 0 }
   0x3   :  { %16 = vsyncpa [#allocation10], 0 }
   0x4   :  { %17 = vsyncpa [#allocation5], 0 }
   0x5   :  { %19 = vsyncpa [#allocation5 + $0x1], 0  ;;  %s8387_s24 = smov 0   ;;  %s8389_s25 = smov 0  }
   0x6   :  { %s8391_s26 = smov 0   ;;  %s8393_s27 = smov 0  }
   0x7 LB: > { %s8408_s28 = sadd.s32 4294967295, %s8333_s27   ;;  %s6452_s29 = sadd.s32 4294967294, %s8333_s27   ;;  %s8333_s27 = sphi %s8393_s27, %s10291_s27   ;;  %s8329_s26 = sphi %s8391_s26, %s10290_s26   ;;  %s8325_s25 = sphi %s8389_s25, %s10289_s25   ;;  %s8321_s24 = sphi %s8387_s24, %s10288_s24  }
   0x8   : > { %p45_p0 = scmp.ne.s32.totalorder %s8325_s25, %s8321_s24  ;;  %p10170_p1 = scmp.eq.s32.totalorder %s8408_s28, 0 }
   0x9   : > { %p201_p3 = scmp.eq.s32.totalorder %s6452_s29, 1  ;;  %p6453_p5 = scmp.ge.s32.totalorder %s8333_s27, 1 }
   0xa   : > { %p8417_p4 = por %p10170_p1, %p45_p0  ;;  %p208_p7 = scmp.lt.s32.totalorder %s8333_s27, 3 }
   0xb   : > { %p8422_p6 = por %p201_p3, %p45_p0  ;;  %s8335_s10 = smov [#allocation6]  }
   0xc   : > { %s10196_s30 = scalar_select %p8417_p4, 1, 0 }
   0xd   : > { %s10197_s8 = scalar_select %p8422_p6, 1, 0 }
   0xe   : > { %p8427_p8 = pnand %p6453_p5, %p208_p7  ;;  %s220_s11 = sshll.u32 %s8335_s10, 4  ;;  %s8431_s11 = int_to_ptr.vmem [resolvable:$true] %s220_s11 }
   0xf   : > { %10198 = sst [smem:[#allocation16_spill]] %s10197_s8  ;;  %s8336_s13 = smov [#allocation8]  }
  0x10   : > { %s10199_s9 = scalar_select %p8427_p8, 1, 0 }
  0x11   : > { %p7885_p9 = pneg %p8427_p8  ;;  %s233_s14 = sshll.u32 %s8336_s13, 4  ;;  %s8442_s14 = int_to_ptr.vmem [resolvable:$true] %s233_s14 }
  0x12   : > { %s8337_s15 = smov [#allocation9]   ;;  %s8145_s19 = scalar_lea.hbm %s10163_s1, 1024 }
  0x13   : > { %p8438_p11 = pnand %p7885_p9, %p10170_p1  ;;  %s8444_s16 = sshll.u32 %s8337_s15, 4  ;;  %s247_s16 = int_to_ptr.vmem [resolvable:$true] %s8444_s16 }
  0x14   : > { %p8146_p12 = scmp.ne.s32.totalorder %s10163_s1, %s8145_s19  ;;  %p8152_p5 = scmp.lt.u32.totalorder %s8145_s19, %s10163_s1 }
  0x15   : > { %p8454_p13 = pneg %p8438_p11 }
  0x17   : > { %p8148_p0 = pnand %p8454_p13, %p8146_p12 }
  0x19   : > { %p8149_p3 = pneg %p8148_p0 }
  0x1b   : > { %p8154_p7 = pnand %p8152_p5, %p8149_p3 }
  0x1d   : > { %8157 = shalt.err (!%p8154_p7)
}
  0x1e   : > { %s8158_s10 = scalar_lea.vmem %s8431_s11, 1024  ;;  %p8166_p2 = scmp.lt.s32.totalorder %s8431_s11, %s8431_s11 }
  0x1f   : > { %p8159_p9 = scmp.ne.s32.totalorder %s8431_s11, %s8158_s10  ;;  %p8167_p6 = scmp.lt.s32.totalorder %s8158_s10, %s8158_s10 }
  0x21   : > { %p8161_p10 = pnand %p8159_p9, %p8454_p13  ;;  %p8168_p12 = por %p8167_p6, %p8166_p2 }
  0x23   : > { %p8162_p1 = pneg %p8161_p10 }
  0x25   : > { %p8169_p0 = pnand %p8168_p12, %p8162_p1 }
  0x27   : > { %8172 = shalt.err (!%p8169_p0)
}
  0x28   : > { %s8338_s13 = smov 64   ;;  %s8339_s15 = smov 4  }
  0x29   : > { %7888 = dma.hbm_to_vmem [thread:$0]  (!%p8438_p11), %s10163_s1, 1024, %s8431_s11, [#allocation7], %s8338_s13, %s8338_s13, %s8339_s15  }
  0x2a   : > { %s8173_s21 = scalar_lea.hbm %s10164_s2, 9216 }
  0x2b   : > { %p8174_p1 = scmp.ne.s32.totalorder %s10164_s2, %s8173_s21  ;;  %p8180_p10 = scmp.lt.u32.totalorder %s8173_s21, %s10164_s2 }
  0x2d   : > { %p8176_p2 = pnand %p8174_p1, %p8454_p13 }
  0x2f   : > { %p8177_p6 = pneg %p8176_p2 }
  0x31   : > { %p8182_p3 = pnand %p8180_p10, %p8177_p6 }
  0x33   : > { %8185 = shalt.err (!%p8182_p3)
}
  0x34   : > { %s8186_s11 = scalar_lea.vmem %s8442_s14, 9216  ;;  %p8194_p12 = scmp.lt.s32.totalorder %s8442_s14, %s8442_s14 }
  0x35   : > { %p8187_p5 = scmp.ne.s32.totalorder %s8442_s14, %s8186_s11  ;;  %p8195_p0 = scmp.lt.s32.totalorder %s8186_s11, %s8186_s11 }
  0x37   : > { %p8189_p7 = pnand %p8187_p5, %p8454_p13  ;;  %p8196_p1 = por %p8195_p0, %p8194_p12 }
  0x39   : > { %p8190_p9 = pneg %p8189_p7 }
  0x3b   : > { %p8197_p2 = pnand %p8196_p1, %p8190_p9 }
  0x3d   : > { %8200 = shalt.err (!%p8197_p2)
}
  0x3e   : > { %7891 = dma.hbm_to_vmem [thread:$0]  (!%p8438_p11), %s10164_s2, 9216, %s8442_s14, [#allocation7], %s8338_s13, %s8338_s13, %s8339_s15  }
  0x3f   : > { %s8201_s20 = scalar_lea.hbm %s10165_s3, 1024 }
  0x40   : > { %p8202_p6 = scmp.ne.s32.totalorder %s10165_s3, %s8201_s20  ;;  %p8208_p5 = scmp.lt.u32.totalorder %s8201_s20, %s10165_s3 }
  0x42   : > { %p8204_p10 = pnand %p8202_p6, %p8454_p13 }
  0x44   : > { %p8205_p3 = pneg %p8204_p10 }
  0x46   : > { %p8210_p7 = pnand %p8208_p5, %p8205_p3 }
  0x48   : > { %8213 = shalt.err (!%p8210_p7)
}
  0x49   : > { %s8214_s11 = scalar_lea.vmem %s247_s16, 1024  ;;  %p8222_p1 = scmp.lt.s32.totalorder %s247_s16, %s247_s16 }
  0x4a   : > { %p8215_p9 = scmp.ne.s32.totalorder %s247_s16, %s8214_s11  ;;  %p8223_p2 = scmp.lt.s32.totalorder %s8214_s11, %s8214_s11 }
  0x4c   : > { %p8217_p12 = pnand %p8215_p9, %p8454_p13  ;;  %p8224_p4 = por %p8223_p2, %p8222_p1 }
  0x4e   : > { %p8218_p0 = pneg %p8217_p12 }
  0x50   : > { %p8225_p8 = pnand %p8224_p4, %p8218_p0 }
  0x52   : > { %8228 = shalt.err (!%p8225_p8)
}
  0x53   : > { %7894 = dma.hbm_to_vmem [thread:$0]  (!%p8438_p11), %s10165_s3, 1024, %s247_s16, [#allocation10], %s8338_s13, %s8338_s13, %s8339_s15  }
  0x54   : > { %s8527_s22 = sadd.s32 1, %s8333_s27   ;;  %s32_s17 = sadd.s32 1, %s8329_s26 }
  0x55   : > { %s29_s12 = ssub.s32 %s8333_s27, %s8527_s22  ;;  %p39_p8 = scmp.ne.s32.totalorder %s8329_s26, %s8325_s25 }
  0x56   : > { %p30_p4 = scmp.eq.s32.totalorder %s29_s12, 0  ;;  %p40_p13 = scmp.eq.s32.totalorder %s8333_s27, 0 }
  0x57   : > { %p7906_p6 = scmp.lt.s32.totalorder %s8333_s27, 2  ;;  %p10202_p3 = scmp.eq.s32.totalorder %s8408_s28, 1 }
  0x58   : > { %s8537_s18 = scalar_select %p30_p4, %s8329_s26, %s32_s17  }
  0x59   : > { %p41_p10 = por %p40_p13, %p39_p8  ;;  %p8541_p5 = por %p10202_p3, %p39_p8 }
  0x5a   : > { %s269_s20 = sand.u32 1, %s8329_s26   ;;  %s6803_s21 = sshll.u32 %s8333_s27, 12 }
  0x5b   : > { %s6458_s16 = sshll.u32 %s269_s20, 8  ;;  %s8550_s23 = scalar_lea.hbm %s10162_s0, %s6803_s21 }
  0x5c   : > { %s273_s29 = scalar_lea.vmem [#allocation3], %s6458_s16  ;;  %p8552_p11 = pnand %p7906_p6, %p41_p10 }
  0x5d   : > { %s280_s10 = sshll.u32 %s273_s29, 4  ;;  %s8558_s14 = scalar_lea.sflag [#allocation4], %s269_s20  ;;  %s8556_s10 = int_to_ptr.vmem [resolvable:$true] %s280_s10 }
  0x5e   : > { %s8229_s8 = scalar_lea.hbm %s8550_s23, 4096  ;;  %p8231_p9 = pneg %p8552_p11 }
  0x5f   : > { %p8230_p7 = scmp.ne.s32.totalorder %s8550_s23, %s8229_s8  ;;  %s8234_s21 = scalar_lea.hbm %s10162_s0, 8192 }
  0x60   : > { %p8235_p1 = scmp.lt.u32.totalorder %s8550_s23, %s10162_s0  ;;  %p8236_p2 = scmp.lt.u32.totalorder %s8234_s21, %s8229_s8 }
  0x61   : > { %p8232_p12 = pnand %p8231_p9, %p8230_p7  ;;  %p8238_p8 = scmp.lt.u32.totalorder %s8229_s8, %s8550_s23 }
  0x62   : > { %p8237_p4 = por %p8236_p2, %p8235_p1 }
  0x63   : > { %p8233_p0 = pneg %p8232_p12 }
  0x64   : > { %p8239_p13 = por %p8238_p8, %p8237_p4 }
  0x66   : > { %p8240_p6 = pnand %p8239_p13, %p8233_p0 }
  0x68   : > { %8243 = shalt.err (!%p8240_p6)
}
  0x69   : > { %s8244_s20 = scalar_lea.vmem %s8556_s10, 4096  ;;  %s8340_s15 = smov [#allocation3]  }
  0x6a   : > { %p8245_p10 = scmp.ne.s32.totalorder %s8556_s10, %s8244_s20  ;;  %s8249_s29 = sshll.u32 %s8340_s15, 4  ;;  %s8250_s29 = int_to_ptr.vmem [resolvable:$false] %s8249_s29 }
  0x6b   : > { %s8251_s12 = scalar_lea.vmem %s8250_s29, 8192  ;;  %p8252_p12 = scmp.lt.s32.totalorder %s8556_s10, %s8250_s29 }
  0x6c   : > { %p8247_p3 = pnand %p8245_p10, %p8231_p9  ;;  %p8253_p1 = scmp.lt.s32.totalorder %s8251_s12, %s8244_s20 }
  0x6e   : > { %p8248_p7 = pneg %p8247_p3  ;;  %p8254_p2 = por %p8253_p1, %p8252_p12 }
  0x70   : > { %p8255_p4 = pnand %p8254_p2, %p8248_p7 }
  0x72   : > { %8258 = shalt.err (!%p8255_p4)
}
  0x73   : > { %s8341_s8 = smov 128   ;;  %s8342_s17 = smov 8  }
  0x74   : > { %7898 = dma.hbm_to_vmem [thread:$0]  (!%p8552_p11), %s8550_s23, 4096, %s8556_s10, %s8558_s14, %s8341_s8, %s8341_s8, %s8342_s17  }
  0x75   : > { %p10205_p9 = scmp.ne.s32.totalorder %s10199_s9, 0 }
  0x77   : > { %292 = sbr.rel (%p10205_p9) target bundleno = 1305 (0x519), region = 48 }
  0x7e   : > { %s8589_s21 = sand.u32 1, %s8325_s25   ;;  %p10206_p0 = scmp.ne.s32.totalorder %s10196_s30, 0 }
  0x7f   : > { %s6462_s16 = sshll.u32 %s8589_s21, 8  ;;  %s295_s13 = scalar_lea.sflag [#allocation4], %s8589_s21 }
  0x80   : > { %s8595_s20 = scalar_lea.vmem [#allocation3], %s6462_s16 }
  0x81   : > { %8304 = dma.done.wait (%p10206_p0), %s295_s13, 4096  }
  0x82   : > { %8306 = vsyncadd (%p10206_p0), %s295_s13, 4294963200  ;;  %p10207_p11 = scmp.eq.s32.totalorder %s8408_s28, 0 }
  0x84   : > { %8308 = dma.done.wait (%p10207_p11), [#allocation7], 10240   ;;  %p10208_p8 = pmov %p10207_p11 }
  0x86   : > { %8310 = vsyncadd (%p10208_p8), [#allocation7], 4294957056  ;;  %p10209_p13 = pmov %p10208_p8 }
  0x87   : > { %p10210_p6 = pmov %p10208_p8 }
  0x88   : > { %8312 = dma.done.wait (%p10209_p13), [#allocation10], 1024  }
  0x89   : > { %8314 = vsyncadd (%p10210_p6), [#allocation10], 4294966272  ;;  %v7953_v0 = vld [vmem:[#allocation6] sm:$0xff]   ;;  %v7954_v1 = vld [vmem:[#allocation6 + $0x8] sm:$0xff]   ;;  %v8343_v60 = vmov 0   ;;  %vm814_vm3 = vcmask 1040384  }
  0x8a   : > { %7069 = vmatprep.subr.bf16.mxu0 %v7953_v0  ;;  %v7955_v2 = vld [vmem:[#allocation6 + $0x10] sm:$0xff]   ;;  %v7956_v3 = vld [vmem:[#allocation6 + $0x18] sm:$0xff]   ;;  %v342_v4 = vld [vmem:[%s8595_s20] sm:$0xff]  ;;  %849 = vst [vmem:[#allocation2] sm:$0xf] %v8343_v60  ;;  %vm2175_vm6 = vcmask 1042432  }
  0x8b   : > { %7070 = vmatpush3.bf16.msra.mxu0 %v7953_v0  ;;  %v343_v5 = vld [vmem:[%s8595_s20 + $0x8] sm:$0xff]  ;;  %v7957_v7 = vld [vmem:[#allocation6 + $0x20] sm:$0xff]   ;;  %v7959_v9 = vld [vmem:[#allocation6 + $0x30] sm:$0xff]   ;;  %850 = vst [vmem:[#allocation2 + $0x4] sm:$0xf] %v8343_v60  ;;  %vm2176_vm7 = vcmask 1046532  }
  0x8c   : > { %7071 = vmatprep.subr.bf16.mxu0 %v7954_v1  ;;  %v374_v6 = vpack.c.bf16 %v343_v5, %v342_v4  ;;  %v7958_v8 = vld [vmem:[#allocation6 + $0x28] sm:$0xff]   ;;  %v7960_v10 = vld [vmem:[#allocation6 + $0x38] sm:$0xff]   ;;  %v344_v11 = vld [vmem:[%s8595_s20 + $0x10] sm:$0xff]  ;;  %851 = vst [vmem:[#allocation2 + $0x8] sm:$0x1] %v8343_v60  ;;  %s10021_s15 = scalar_lea.vmem [#allocation11], %s6462_s16 }
  0x8d   : > { %v345_v12 = vld [vmem:[%s8595_s20 + $0x18] sm:$0xff]  ;;  %v346_v13 = vld [vmem:[%s8595_s20 + $0x20] sm:$0xff]  ;;  %v347_v14 = vld [vmem:[%s8595_s20 + $0x28] sm:$0xff]  ;;  %853 = vst [vmem:[#allocation2 + $0xcc] sm:$0xf] %v8343_v60  ;;  %s6804_s29 = sshll.u32 %s8408_s28, 12 }
  0x8e   : > { %7085 = vmatprep.mubr.bf16.mxu0 %v374_v6  ;;  %v375_v15 = vpack.c.bf16 %v345_v12, %v344_v11  ;;  %v376_v16 = vpack.c.bf16 %v347_v14, %v346_v13  ;;  %v348_v17 = vld [vmem:[%s8595_s20 + $0x30] sm:$0xff]  ;;  %v349_v18 = vld [vmem:[%s8595_s20 + $0x38] sm:$0xff]  ;;  %v350_v19 = vld [vmem:[%s8595_s20 + $0x40] sm:$0xff]  ;;  %854 = vst [vmem:[#allocation2 + $0xd0] sm:$0xf] %v8343_v60  ;;  %s6350_s12 = sshll.u32 %s10021_s15, 4  ;;  %s10113_s16 = scalar_lea.hbm %s10169_s7, %s6804_s29  ;;  %s10115_s12 = int_to_ptr.vmem [resolvable:$true] %s6350_s12 }
  0x8f   : > { %7072 = vmatpush3.bf16.msra.mxu0 %v7954_v1  ;;  %v351_v20 = vld [vmem:[%s8595_s20 + $0x48] sm:$0xff]  ;;  %v377_v21 = vpack.c.bf16 %v349_v18, %v348_v17  ;;  %v352_v23 = vld [vmem:[%s8595_s20 + $0x50] sm:$0xff]  ;;  %v353_v24 = vld [vmem:[%s8595_s20 + $0x58] sm:$0xff]  ;;  %855 = vst [vmem:[#allocation2 + $0xd4] sm:$0x1] %v8343_v60  ;;  %s6337_s28 = scalar_lea.sflag [#allocation5], %s8589_s21 }
  0x90   : > { %7073 = vmatprep.subr.bf16.mxu0 %v7955_v2  ;;  %v378_v22 = vpack.c.bf16 %v351_v20, %v350_v19  ;;  %v354_v25 = vld [vmem:[%s8595_s20 + $0x60] sm:$0xff]  ;;  %v355_v26 = vld [vmem:[%s8595_s20 + $0x68] sm:$0xff]  ;;  %v379_v27 = vpack.c.bf16 %v353_v24, %v352_v23  ;;  %v356_v29 = vld [vmem:[%s8595_s20 + $0x70] sm:$0xff]  ;;  %vm1145_vm0 = vsmask.f32 3328  ;;  %s8259_s13 = scalar_lea.vmem %s10115_s12, 4096 }
  0x91   : > { %v380_v28 = vpack.c.bf16 %v355_v26, %v354_v25  ;;  %v357_v30 = vld [vmem:[%s8595_s20 + $0x78] sm:$0xff]  ;;  %v358_v31 = vld [vmem:[%s8595_s20 + $0x80] sm:$0xff]  ;;  %v359_v32 = vld [vmem:[%s8595_s20 + $0x88] sm:$0xff]  ;;  %vm1146_vm1 = vsmask.f32 7440  ;;  %p8260_p10 = scmp.ne.s32.totalorder %s10115_s12, %s8259_s13 }
  0x92   : > { %v381_v33 = vpack.c.bf16 %v357_v30, %v356_v29  ;;  %v382_v34 = vpack.c.bf16 %v359_v32, %v358_v31  ;;  %v360_v35 = vld [vmem:[%s8595_s20 + $0x90] sm:$0xff]  ;;  %v361_v36 = vld [vmem:[%s8595_s20 + $0x98] sm:$0xff]  ;;  %v362_v37 = vld [vmem:[%s8595_s20 + $0xa0] sm:$0xff]  ;;  %vm815_vm4 = vsmask.f32 256 }
  0x93   : > { %7074 = vmatpush3.bf16.msra.mxu0 %v7955_v2  ;;  %v363_v38 = vld [vmem:[%s8595_s20 + $0xa8] sm:$0xff]  ;;  %v383_v39 = vpack.c.bf16 %v361_v36, %v360_v35  ;;  %v364_v41 = vld [vmem:[%s8595_s20 + $0xb0] sm:$0xff]  ;;  %v365_v42 = vld [vmem:[%s8595_s20 + $0xb8] sm:$0xff]  ;;  %p8261_p3 = pnand %p8260_p10, %p8541_p5 }
  0x94   : > { %7075 = vmatprep.subr.bf16.mxu0 %v7956_v3  ;;  %v384_v40 = vpack.c.bf16 %v363_v38, %v362_v37  ;;  %v366_v43 = vld [vmem:[%s8595_s20 + $0xc0] sm:$0xff]  ;;  %v367_v44 = vld [vmem:[%s8595_s20 + $0xc8] sm:$0xff]  ;;  %v385_v45 = vpack.c.bf16 %v365_v42, %v364_v41  ;;  %v368_v47 = vld [vmem:[%s8595_s20 + $0xd0] sm:$0xff] }
  0x95   : > { %v386_v46 = vpack.c.bf16 %v367_v44, %v366_v43  ;;  %v369_v48 = vld [vmem:[%s8595_s20 + $0xd8] sm:$0xff]  ;;  %v370_v49 = vld [vmem:[%s8595_s20 + $0xe0] sm:$0xff]  ;;  %v371_v50 = vld [vmem:[%s8595_s20 + $0xe8] sm:$0xff]  ;;  %p8262_p7 = pneg %p8261_p3 }
  0x96   : > { %v387_v51 = vpack.c.bf16 %v369_v48, %v368_v47  ;;  %v388_v52 = vpack.c.bf16 %v371_v50, %v370_v49  ;;  %v372_v53 = vld [vmem:[%s8595_s20 + $0xf0] sm:$0xff]  ;;  %v373_v54 = vld [vmem:[%s8595_s20 + $0xf8] sm:$0xff]  ;;  %v7961_v56 = vld [vmem:[#allocation8 + $0x40] sm:$0xff]  }
  0x97   : > { %7076 = vmatpush3.bf16.msra.mxu0 %v7956_v3  ;;  %v389_v55 = vpack.c.bf16 %v373_v54, %v372_v53  ;;  %v7962_v57 = vld [vmem:[#allocation8 + $0x48] sm:$0xff]   ;;  %v7963_v58 = vld [vmem:[#allocation8 + $0x50] sm:$0xff]   ;;  %v7964_v59 = vld [vmem:[#allocation8 + $0x58] sm:$0xff]  }
  0x98   : > { %7077 = vmatprep.subr.bf16.mxu0 %v7957_v7  ;;  %v7965_v61 = vld [vmem:[#allocation8 + $0x60] sm:$0xff]   ;;  %v7966_v62 = vld [vmem:[#allocation8 + $0x68] sm:$0xff]   ;;  %v7968_v6 = vld [vmem:[#allocation8 + $0x70] sm:$0xff]  }
  0x99   : > { %v8641_v63 = vld [vmem:[#allocation2] sm:$0xf]  ;;  %v8643_v0 = vld [vmem:[#allocation2 + $0x4] sm:$0xf]  ;;  %v7967_v5 = vld [vmem:[#allocation8 + $0xc0] sm:$0xff]  }
  0x9a   : > { %v1149_v1 = vshrl.u32 %v8641_v63, 16  ;;  %v1152_v2 = vshll.u32 %v8641_v63, 16  ;;  %v1158_v3 = vshll.u32 %v8643_v0, 16  ;;  %v1162_v4 = vshrl.u32 %v8643_v0, 16  ;;  %7597 = vmatprep.subr.bf16.mxu1 %v7967_v5  ;;  %v1129_v11 = vld [vmem:[#allocation2 + $0x8] sm:$0x1]  ;;  %vm8649_vm2 = vmor %vm1145_vm0, %vm1146_vm1 }
  0x9b   : > { %7078 = vmatpush3.bf16.msra.mxu0 %v7957_v7  ;;  %7605 = vmatpush3.bf16.msra.mxu1 %v7967_v5  ;;  %v1168_v14 = vshll.u32 %v1129_v11, 16  ;;  %v7971_v23 = vld [vmem:[#allocation8 + $0xd0] sm:$0xff]   ;;  %v7972_v25 = vld [vmem:[#allocation8 + $0xd8] sm:$0xff]   ;;  %v7973_v26 = vld [vmem:[#allocation8 + $0xe0] sm:$0xff]  }
  0x9c   : > { %7079 = vmatprep.subr.bf16.mxu0 %v7958_v8  ;;  %v1151_v7 = vrot.slane %v1149_v1, 4  ;;  %v7976_v29 = vld [vmem:[#allocation8 + $0xf8] sm:$0xff]   ;;  %v8657_v30 = vld [vmem:[#allocation8 + $0x100] sm:$0xff]   ;;  %v8666_v32 = vld [vmem:[%s10166_s4] ss:$0 sm:$0xff] }
  0x9d   : > { %v1170_v20 = vrot.slane %v1168_v14, 5  ;;  %v8660_v31 = vld [vmem:[#allocation8] sm:$0xff]   ;;  %vm8673_vm5 = vmand %vm814_vm3, %vm815_vm4 }
  0x9e   : > { %vm9141_vm8 = vmor %vm2175_vm6, %vm2176_vm7 }
  0x9f   : > { %7080 = vmatpush3.bf16.msra.mxu0 %v7958_v8  ;;  %v1154_v8 = vrot.slane %v1152_v2, 5 }
  0xa0   : > { %7081 = vmatprep.subr.bf16.mxu0 %v7959_v9 }
  0xa1   : > { %v1155_v12 = vor.u32 %v1154_v8, %v1151_v7 }
  0xa3   : > { %7082 = vmatpush3.bf16.msra.mxu0 %v7959_v9  ;;  %v1160_v9 = vrot.slane %v1158_v3, 5  ;;  %v1156_v17 = vrot.slane %v1155_v12, 4 }
  0xa4   : > { %7083 = vmatprep.subr.bf16.mxu0 %v7960_v10 }
  0xa7   : > { %7084 = vmatpush3.bf16.msra.mxu0 %v7960_v10  ;;  %v1164_v10 = vrot.slane %v1162_v4, 4 }
  0xa8   : > { %7117 = vmatprep.subr.bf16.mxu0 %v7961_v56 }
  0xa9   : > { %v1165_v13 = vor.u32 %v1164_v10, %v1160_v9 }
  0xaa   : > { %7086 = vmatmul.mubr.bf16.vlgmr.msra.gmra.mrb[0].mxu0 %v375_v15  ;;  %v7969_v15 = vld [vmem:[#allocation8 + $0xc8] sm:$0xff]  }
  0xab   : > { %7089 = vmatprep.mubr.bf16.mxu0 %v376_v16  ;;  %7118 = vmatpush3.bf16.msra.mxu0 %v7961_v56  ;;  %v7970_v16 = vld [vmem:[#allocation8 + $0x78] sm:$0xff]   ;;  %v1166_v19 = vrot.slane %v1165_v13, 4 }
  0xac   : > { %7119 = vmatprep.subr.bf16.mxu0 %v7962_v57  ;;  %7598 = vmatprep.subr.bf16.mxu1 %v7969_v15 }
  0xad   : > { %7606 = vmatpush3.bf16.msra.mxu1 %v7969_v15 }
  0xae   : > { %7599 = vmatprep.subr.bf16.mxu1 %v7971_v23 }
  0xaf   : > { %7120 = vmatpush3.bf16.msra.mxu0 %v7962_v57 }
  0xb0   : > { %7121 = vmatprep.subr.bf16.mxu0 %v7963_v58 }
  0xb1   : > { %7607 = vmatpush3.bf16.msra.mxu1 %v7971_v23 }
  0xb2   : > { %7090 = vmatmul.mubr.bf16.gmra.mrb[4].mxu0 %v377_v21  ;;  %v1161_v21 = vsel %vm8649_vm2, %v1156_v17, %v1160_v9  ;;  %7600 = vmatprep.subr.bf16.mxu1 %v7972_v25 }
  0xb3   : > { %7093 = vmatprep.mubr.bf16.mxu0 %v378_v22  ;;  %7122 = vmatpush3.bf16.msra.mxu0 %v7963_v58  ;;  %v1171_v22 = vsel %vm8649_vm2, %v1166_v19, %v1170_v20 }
  0xb4   : > { %7123 = vmatprep.subr.bf16.mxu0 %v7964_v59  ;;  %v6524_v24 = vcombine.low %v1161_v21, %v1171_v22 }
  0xb5   : > { %7608 = vmatpush3.bf16.msra.mxu1 %v7972_v25 }
  0xb6   : > { %7601 = vmatprep.subr.bf16.mxu1 %v7973_v26 }
  0xb7   : > { %7124 = vmatpush3.bf16.msra.mxu0 %v7964_v59 }
  0xb8   : > { %7125 = vmatprep.subr.bf16.mxu0 %v7965_v61 }
  0xb9   : > { %7609 = vmatpush3.bf16.msra.mxu1 %v7973_v26 }
  0xba   : > { %7094 = vmatmul.mubr.bf16.gmra.mrb[8].mxu0 %v379_v27  ;;  %v7974_v27 = vld [vmem:[#allocation8 + $0xe8] sm:$0xff]  }
  0xbb   : > { %7097 = vmatprep.mubr.bf16.mxu0 %v380_v28  ;;  %7126 = vmatpush3.bf16.msra.mxu0 %v7965_v61  ;;  %v7975_v28 = vld [vmem:[#allocation8 + $0xf0] sm:$0xff]  }
  0xbc   : > { %7127 = vmatprep.subr.bf16.mxu0 %v7966_v62  ;;  %7602 = vmatprep.subr.bf16.mxu1 %v7974_v27 }
  0xbd   : > { %7610 = vmatpush3.bf16.msra.mxu1 %v7974_v27 }
  0xbe   : > { %7603 = vmatprep.subr.bf16.mxu1 %v7975_v28 }
  0xbf   : > { %7128 = vmatpush3.bf16.msra.mxu0 %v7966_v62 }
  0xc0   : > { %7129 = vmatprep.subr.bf16.mxu0 %v7968_v6 }
  0xc1   : > { %7611 = vmatpush3.bf16.msra.mxu1 %v7975_v28 }
  0xc2   : > { %7098 = vmatmul.mubr.bf16.gmra.mrb[12].mxu0 %v381_v33  ;;  %7604 = vmatprep.subr.bf16.mxu1 %v7976_v29 }
  0xc3   : > { %7101 = vmatprep.mubr.bf16.mxu0 %v382_v34  ;;  %7130 = vmatpush3.bf16.msra.mxu0 %v7968_v6 }
  0xc4   : > { %7131 = vmatprep.subr.bf16.mxu0 %v7970_v16 }
  0xc5   : > { %7612 = vmatpush3.bf16.msra.mxu1 %v7976_v29 }
  0xc6   : > { %7309 = vmatprep.subr.bf16.mxu1 %v8657_v30 }
  0xc7   : > { %7132 = vmatpush3.bf16.msra.mxu0 %v7970_v16 }
  0xc8   : > { %7165 = vmatprep.subr.bf16.mxu0 %v8660_v31 }
  0xca   : > { %7102 = vmatmul.mubr.bf16.gmra.mrb[16].mxu0 %v383_v39 }
  0xcb   : > { %7105 = vmatprep.mubr.bf16.mxu0 %v384_v40 }
  0xd2   : > { %7106 = vmatmul.mubr.bf16.gmra.mrb[20].mxu0 %v385_v45 }
  0xd3   : > { %7109 = vmatprep.mubr.bf16.mxu0 %v386_v46 }
  0xda   : > { %7110 = vmatmul.mubr.bf16.gmra.mrb[24].mxu0 %v387_v51 }
  0xdb   : > { %7113 = vmatprep.mubr.bf16.mxu0 %v388_v52 }
  0xe2   : > { %7114 = vmatmul.mubr.bf16.gmra.mrb[28].mxu0 %v389_v55 }
  0xe3   : > { %7133 = vmatprep.mubr.bf16.mxu0 %v6524_v24 }
 0x17d   : > { %v7087_v33 = vpop.f32.mrb[0].mxu0 }
 0x17e   : > { %v504_v34 = vadd.f32 %v7087_v33, %v8666_v32  ;;  %v495_v35 = vpop.f32.mrb[1].mxu0 }
 0x17f   : > { %v496_v36 = vadd.f32 %v8666_v32, %v495_v35  ;;  %v7088_v37 = vpop.f32.mrb[2].mxu0 }
 0x180   : > { %v507_v38 = vadd.f32 %v7088_v37, %v8666_v32  ;;  %v498_v39 = vpop.f32.mrb[3].mxu0  ;;  %v624_v41 = vmax.f32 %v504_v34, 0.0 }
 0x181   : > { %v499_v40 = vadd.f32 %v8666_v32, %v498_v39  ;;  %v622_v43 = vmax.f32 %v496_v36, 0.0 }
 0x182   : > { %v625_v42 = vmax.f32 %v507_v38, 0.0 }
 0x183   : > { %v623_v44 = vmax.f32 %v499_v40, 0.0 }
 0x184   : > { %v655_v45 = vpack.c.bf16 %v625_v42, %v624_v41 }
 0x185   : > { %v654_v46 = vpack.c.bf16 %v623_v44, %v622_v43  ;;  %v7091_v47 = vpop.f32.mrb[4].mxu0 }
 0x186   : > { %v678_v48 = vshrl.u32 %v655_v45, 16  ;;  %v520_v49 = vadd.f32 %v7091_v47, %v8666_v32  ;;  %v511_v50 = vpop.f32.mrb[5].mxu0  ;;  %v681_v56 = vshll.u32 %v655_v45, 16 }
 0x187   : > { %v671_v52 = vshrl.u32 %v654_v46, 16  ;;  %v512_v53 = vadd.f32 %v8666_v32, %v511_v50  ;;  %v7092_v54 = vpop.f32.mrb[6].mxu0  ;;  %v674_v60 = vshll.u32 %v654_v46, 16 }
 0x188   : > { %v680_v55 = vrot.slane %v678_v48, 7  ;;  %v523_v57 = vadd.f32 %v7092_v54, %v8666_v32  ;;  %v514_v58 = vpop.f32.mrb[7].mxu0  ;;  %v628_v61 = vmax.f32 %v520_v49, 0.0  ;;  %v6548_v48 = vcombine.low %v8641_v63, %v8643_v0 }
 0x189   : > { %v673_v59 = vrot.slane %v671_v52, 7  ;;  %v515_v62 = vadd.f32 %v8666_v32, %v514_v58  ;;  %v626_v3 = vmax.f32 %v512_v53, 0.0 }
 0x18a   : > { %v683_v1 = vor.u32 %v681_v56, %v680_v55  ;;  %v834_v2 = vsel %vm8673_vm5, %v680_v55, 0  ;;  %v629_v4 = vmax.f32 %v523_v57, 0.0 }
 0x18b   : > { %v6481_v5 = vcombine.low %v834_v2, %v834_v2  ;;  %v676_v6 = vor.u32 %v674_v60, %v673_v59  ;;  %v833_v7 = vsel %vm8673_vm5, %v673_v59, 0  ;;  %v627_v8 = vmax.f32 %v515_v62, 0.0 }
 0x18c   : > { %v818_v9 = vsel %vm8673_vm5, 0, %v683_v1  ;;  %v6478_v10 = vcombine.low %v833_v7, %v833_v7  ;;  %v657_v11 = vpack.c.bf16 %v629_v4, %v628_v61 }
 0x18d   : > { %v6479_v12 = vcombine.low %v818_v9, %v818_v9  ;;  %v6480_v13 = vcombine.high %v818_v9, %v818_v9  ;;  %1038 = vst [vmem:[#allocation2 + $0x20] sm:$0x1] %v6481_v5  ;;  %v817_v14 = vsel %vm8673_vm5, 0, %v676_v6  ;;  %v656_v15 = vpack.c.bf16 %v627_v8, %v626_v3  ;;  %v7095_v16 = vpop.f32.mrb[8].mxu0 }
 0x18e   : > { %v6476_v17 = vcombine.low %v817_v14, %v817_v14  ;;  %v6477_v19 = vcombine.high %v817_v14, %v817_v14  ;;  %1035 = vst [vmem:[#allocation2 + $0x14] sm:$0x1] %v6478_v10  ;;  %v692_v20 = vshrl.u32 %v657_v11, 16  ;;  %v527_v21 = vpop.f32.mrb[9].mxu0  ;;  %v536_v23 = vadd.f32 %v7095_v16, %v8666_v32 }
 0x18f   : > { %1036 = vst [vmem:[#allocation2 + $0x18] sm:$0xf] %v6479_v12  ;;  %1037 = vst [vmem:[#allocation2 + $0x1c] sm:$0xf] %v6480_v13  ;;  %v685_v22 = vshrl.u32 %v656_v15, 16  ;;  %v528_v24 = vadd.f32 %v8666_v32, %v527_v21  ;;  %v7096_v25 = vpop.f32.mrb[10].mxu0 }
 0x190   : > { %1033 = vst [vmem:[#allocation2 + $0xc] sm:$0xf] %v6476_v17  ;;  %1034 = vst [vmem:[#allocation2 + $0x10] sm:$0xf] %v6477_v19  ;;  %v694_v26 = vrot.slane %v692_v20, 7  ;;  %v695_v27 = vshll.u32 %v657_v11, 16  ;;  %v539_v28 = vadd.f32 %v7096_v25, %v8666_v32 }
 0x191   : > { %v530_v29 = vpop.f32.mrb[11].mxu0  ;;  %v687_v33 = vrot.slane %v685_v22, 7  ;;  %v688_v34 = vshll.u32 %v656_v15, 16  ;;  %v632_v35 = vmax.f32 %v536_v23, 0.0  ;;  %v630_v39 = vmax.f32 %v528_v24, 0.0 }
 0x192   : > { %v531_v36 = vadd.f32 %v8666_v32, %v530_v29  ;;  %v697_v37 = vor.u32 %v695_v27, %v694_v26  ;;  %v836_v38 = vsel %vm8673_vm5, %v694_v26, 0  ;;  %v633_v40 = vmax.f32 %v539_v28, 0.0 }
 0x193   : > { %v6487_v41 = vcombine.low %v836_v38, %v836_v38  ;;  %v690_v42 = vor.u32 %v688_v34, %v687_v33  ;;  %v835_v43 = vsel %vm8673_vm5, %v687_v33, 0 }
 0x194   : > { %v631_v44 = vmax.f32 %v531_v36, 0.0  ;;  %v820_v45 = vsel %vm8673_vm5, 0, %v697_v37  ;;  %v6484_v46 = vcombine.low %v835_v43, %v835_v43  ;;  %v659_v47 = vpack.c.bf16 %v633_v40, %v632_v35 }
 0x195   : > { %v6485_v49 = vcombine.low %v820_v45, %v820_v45  ;;  %v6486_v50 = vcombine.high %v820_v45, %v820_v45  ;;  %1044 = vst [vmem:[#allocation2 + $0x38] sm:$0x1] %v6487_v41  ;;  %v819_v52 = vsel %vm8673_vm5, 0, %v690_v42  ;;  %v7099_v54 = vpop.f32.mrb[12].mxu0 }
 0x196   : > { %v658_v53 = vpack.c.bf16 %v631_v44, %v630_v39  ;;  %v6482_v55 = vcombine.low %v819_v52, %v819_v52  ;;  %v6483_v56 = vcombine.high %v819_v52, %v819_v52  ;;  %1041 = vst [vmem:[#allocation2 + $0x2c] sm:$0x1] %v6484_v46  ;;  %v706_v57 = vshrl.u32 %v659_v47, 16  ;;  %v543_v59 = vpop.f32.mrb[13].mxu0 }
 0x197   : > { %v709_v58 = vshll.u32 %v659_v47, 16  ;;  %1042 = vst [vmem:[#allocation2 + $0x30] sm:$0xf] %v6485_v49  ;;  %1043 = vst [vmem:[#allocation2 + $0x34] sm:$0xf] %v6486_v50  ;;  %v552_v62 = vadd.f32 %v7099_v54, %v8666_v32  ;;  %v544_v1 = vadd.f32 %v8666_v32, %v543_v59  ;;  %v7100_v2 = vpop.f32.mrb[14].mxu0 }
 0x198   : > { %v699_v60 = vshrl.u32 %v658_v53, 16  ;;  %v702_v61 = vshll.u32 %v658_v53, 16  ;;  %v1083_v3 = vld [vmem:[#allocation2 + $0xc] sm:$0xf]  ;;  %1039 = vst [vmem:[#allocation2 + $0x24] sm:$0xf] %v6482_v55  ;;  %v555_v5 = vadd.f32 %v7100_v2, %v8666_v32 }
 0x199   : > { %1040 = vst [vmem:[#allocation2 + $0x28] sm:$0xf] %v6483_v56  ;;  %v708_v4 = vrot.slane %v706_v57, 7  ;;  %v546_v6 = vpop.f32.mrb[15].mxu0  ;;  %v1173_v7 = vshrl.u32 %v1083_v3, 16  ;;  %v1176_v8 = vshll.u32 %v1083_v3, 16 }
 0x19a   : > { %v701_v9 = vrot.slane %v699_v60, 7  ;;  %v636_v10 = vmax.f32 %v552_v62, 0.0  ;;  %v634_v11 = vmax.f32 %v544_v1, 0.0  ;;  %v547_v12 = vadd.f32 %v8666_v32, %v546_v6  ;;  %v8714_v34 = vld [vmem:[#allocation2 + $0x10] sm:$0xf] }
 0x19b   : > { %v711_v13 = vor.u32 %v709_v58, %v708_v4  ;;  %v838_v14 = vsel %vm8673_vm5, %v708_v4, 0  ;;  %v637_v15 = vmax.f32 %v555_v5, 0.0  ;;  %v1175_v16 = vrot.slane %v1173_v7, 4 }
 0x19c   : > { %v6493_v17 = vcombine.low %v838_v14, %v838_v14  ;;  %v704_v19 = vor.u32 %v702_v61, %v701_v9  ;;  %v837_v20 = vsel %vm8673_vm5, %v701_v9, 0  ;;  %v635_v21 = vmax.f32 %v547_v12, 0.0 }
 0x19d   : > { %v822_v22 = vsel %vm8673_vm5, 0, %v711_v13  ;;  %v6490_v23 = vcombine.low %v837_v20, %v837_v20  ;;  %v661_v24 = vpack.c.bf16 %v637_v15, %v636_v10  ;;  %v1178_v25 = vrot.slane %v1176_v8, 5  ;;  %v7103_v33 = vpop.f32.mrb[16].mxu0  ;;  %v1130_v10 = vld [vmem:[#allocation2 + $0x14] sm:$0x1] }
 0x19e   : > { %v6491_v26 = vcombine.low %v822_v22, %v822_v22  ;;  %v6492_v27 = vcombine.high %v822_v22, %v822_v22  ;;  %1050 = vst [vmem:[#allocation2 + $0x50] sm:$0x1] %v6493_v17  ;;  %v821_v28 = vsel %vm8673_vm5, 0, %v704_v19  ;;  %v660_v29 = vpack.c.bf16 %v635_v21, %v634_v11  ;;  %v559_v39 = vpop.f32.mrb[17].mxu0  ;;  %v1085_v11 = vld [vmem:[#allocation2 + $0x18] sm:$0xf] }
 0x19f   : > { %v6488_v35 = vcombine.low %v821_v28, %v821_v28  ;;  %v6489_v36 = vcombine.high %v821_v28, %v821_v28  ;;  %1047 = vst [vmem:[#allocation2 + $0x44] sm:$0x1] %v6490_v23  ;;  %v720_v37 = vshrl.u32 %v661_v24, 16  ;;  %v723_v38 = vshll.u32 %v661_v24, 16  ;;  %v7104_v44 = vpop.f32.mrb[18].mxu0 }
 0x1a0   : > { %1048 = vst [vmem:[#allocation2 + $0x48] sm:$0xf] %v6491_v26  ;;  %1049 = vst [vmem:[#allocation2 + $0x4c] sm:$0xf] %v6492_v27  ;;  %v713_v40 = vshrl.u32 %v660_v29, 16  ;;  %v716_v41 = vshll.u32 %v660_v29, 16  ;;  %v568_v42 = vadd.f32 %v7103_v33, %v8666_v32  ;;  %v560_v43 = vadd.f32 %v8666_v32, %v559_v39 }
 0x1a1   : > { %1045 = vst [vmem:[#allocation2 + $0x3c] sm:$0xf] %v6488_v35  ;;  %1046 = vst [vmem:[#allocation2 + $0x40] sm:$0xf] %v6489_v36  ;;  %v722_v45 = vrot.slane %v720_v37, 7  ;;  %v571_v46 = vadd.f32 %v7104_v44, %v8666_v32  ;;  %v562_v47 = vpop.f32.mrb[19].mxu0  ;;  %v1179_v49 = vor.u32 %v1178_v25, %v1175_v16 }
 0x1a2   : > { %v1182_v50 = vshll.u32 %v8714_v34, 16  ;;  %v715_v52 = vrot.slane %v713_v40, 7  ;;  %v640_v53 = vmax.f32 %v568_v42, 0.0  ;;  %v638_v54 = vmax.f32 %v560_v43, 0.0  ;;  %v1086_v17 = vld [vmem:[#allocation2 + $0x1c] sm:$0xf] }
 0x1a3   : > { %v563_v55 = vadd.f32 %v8666_v32, %v562_v47  ;;  %v725_v56 = vor.u32 %v723_v38, %v722_v45  ;;  %v840_v57 = vsel %vm8673_vm5, %v722_v45, 0  ;;  %v641_v58 = vmax.f32 %v571_v46, 0.0  ;;  %v1131_v47 = vld [vmem:[#allocation2 + $0x20] sm:$0x1] }
 0x1a4   : > { %v8723_v59 = vrot.slane %v1179_v49, 4  ;;  %v6499_v60 = vcombine.low %v840_v57, %v840_v57  ;;  %v718_v61 = vor.u32 %v716_v41, %v715_v52  ;;  %v839_v62 = vsel %vm8673_vm5, %v715_v52, 0 }
 0x1a5   : > { %v639_v1 = vmax.f32 %v563_v55, 0.0  ;;  %v824_v2 = vsel %vm8673_vm5, 0, %v725_v56  ;;  %v6496_v3 = vcombine.low %v839_v62, %v839_v62  ;;  %v663_v4 = vpack.c.bf16 %v641_v58, %v640_v53  ;;  %v7107_v12 = vpop.f32.mrb[20].mxu0 }
 0x1a6   : > { %v8729_v5 = vrot.slane %v1182_v50, 5  ;;  %v6497_v6 = vcombine.low %v824_v2, %v824_v2  ;;  %v6498_v7 = vcombine.high %v824_v2, %v824_v2  ;;  %1056 = vst [vmem:[#allocation2 + $0x68] sm:$0x1] %v6499_v60  ;;  %v823_v8 = vsel %vm8673_vm5, 0, %v718_v61  ;;  %v575_v19 = vpop.f32.mrb[21].mxu0 }
 0x1a7   : > { %v662_v9 = vpack.c.bf16 %v639_v1, %v638_v54  ;;  %v6494_v13 = vcombine.low %v823_v8, %v823_v8  ;;  %v6495_v14 = vcombine.high %v823_v8, %v823_v8  ;;  %1053 = vst [vmem:[#allocation2 + $0x5c] sm:$0x1] %v6496_v3  ;;  %v734_v15 = vshrl.u32 %v663_v4, 16  ;;  %v7108_v24 = vpop.f32.mrb[22].mxu0 }
 0x1a8   : > { %v737_v16 = vshll.u32 %v663_v4, 16  ;;  %1054 = vst [vmem:[#allocation2 + $0x60] sm:$0xf] %v6497_v6  ;;  %1055 = vst [vmem:[#allocation2 + $0x64] sm:$0xf] %v6498_v7  ;;  %v1185_v22 = vsel %vm8649_vm2, %v8723_v59, %v8729_v5  ;;  %v1186_v23 = vshrl.u32 %v8714_v34, 16  ;;  %v584_v2 = vadd.f32 %v7107_v12, %v8666_v32 }
 0x1a9   : > { %v727_v20 = vshrl.u32 %v662_v9, 16  ;;  %v730_v21 = vshll.u32 %v662_v9, 16  ;;  %1051 = vst [vmem:[#allocation2 + $0x54] sm:$0xf] %v6494_v13  ;;  %1052 = vst [vmem:[#allocation2 + $0x58] sm:$0xf] %v6495_v14  ;;  %v576_v3 = vadd.f32 %v8666_v32, %v575_v19  ;;  %v587_v9 = vadd.f32 %v7108_v24, %v8666_v32 }
 0x1aa   : > { %v736_v25 = vrot.slane %v734_v15, 7  ;;  %v1192_v26 = vshll.u32 %v1130_v10, 16  ;;  %v1197_v27 = vshrl.u32 %v1085_v11, 16  ;;  %v1200_v28 = vshll.u32 %v1085_v11, 16  ;;  %v578_v29 = vpop.f32.mrb[23].mxu0  ;;  %v7986_v13 = vld [vmem:[#allocation8 + $0x8] sm:$0xff]  }
 0x1ab   : > { %v729_v33 = vrot.slane %v727_v20, 7  ;;  %v1188_v35 = vrot.slane %v1186_v23, 4  ;;  %v1206_v36 = vshll.u32 %v1086_v17, 16  ;;  %v1210_v37 = vshrl.u32 %v1086_v17, 16  ;;  %v1087_v4 = vld [vmem:[#allocation2 + $0x24] sm:$0xf] }
 0x1ac   : > { %v739_v38 = vor.u32 %v737_v16, %v736_v25  ;;  %v842_v39 = vsel %vm8673_vm5, %v736_v25, 0  ;;  %v1194_v40 = vrot.slane %v1192_v26, 5  ;;  %v1199_v41 = vrot.slane %v1197_v27, 4  ;;  %v1088_v10 = vld [vmem:[#allocation2 + $0x28] sm:$0xf] }
 0x1ad   : > { %v6505_v42 = vcombine.low %v842_v39, %v842_v39  ;;  %v732_v34 = vor.u32 %v730_v21, %v729_v33  ;;  %v841_v43 = vsel %vm8673_vm5, %v729_v33, 0  ;;  %v1189_v44 = vor.u32 %v1188_v35, %v8729_v5  ;;  %v8747_v56 = vpop.f32.mrb[24].mxu0  ;;  %v1132_v17 = vld [vmem:[#allocation2 + $0x2c] sm:$0x1]  ;;  %v1089_v35 = vld [vmem:[#allocation2 + $0x30] sm:$0xf] }
 0x1ae   : > { %v826_v45 = vsel %vm8673_vm5, 0, %v739_v38  ;;  %v6502_v46 = vcombine.low %v841_v43, %v841_v43  ;;  %v1202_v49 = vrot.slane %v1200_v28, 5  ;;  %v1208_v50 = vrot.slane %v1206_v36, 5  ;;  %v8749_v61 = vpop.f32.mrb[25].mxu0  ;;  %v7989_v36 = vld [vmem:[#allocation8 + $0x10] sm:$0xff]  }
 0x1af   : > { %v6503_v52 = vcombine.low %v826_v45, %v826_v45  ;;  %v6504_v53 = vcombine.high %v826_v45, %v826_v45  ;;  %1062 = vst [vmem:[#allocation2 + $0x80] sm:$0x1] %v6505_v42  ;;  %v825_v54 = vsel %vm8673_vm5, 0, %v732_v34  ;;  %v1190_v55 = vrot.slane %v1189_v44, 4  ;;  %v8755_v5 = vpop.f32.mrb[26].mxu0 }
 0x1b0   : > { %v6500_v57 = vcombine.low %v825_v54, %v825_v54  ;;  %v6501_v58 = vcombine.high %v825_v54, %v825_v54  ;;  %1059 = vst [vmem:[#allocation2 + $0x74] sm:$0x1] %v6502_v46  ;;  %v1203_v59 = vor.u32 %v1202_v49, %v1199_v41  ;;  %v1212_v60 = vrot.slane %v1210_v37, 4  ;;  %v8758_v11 = vpop.f32.mrb[27].mxu0  ;;  %v8766_v41 = vld [vmem:[#allocation2 + $0x34] sm:$0xf] }
 0x1b1   : > { %1060 = vst [vmem:[#allocation2 + $0x78] sm:$0xf] %v6503_v52  ;;  %1061 = vst [vmem:[#allocation2 + $0x7c] sm:$0xf] %v6504_v53  ;;  %v1195_v62 = vsel %vm8649_vm2, %v1190_v55, %v1194_v40  ;;  %v1216_v1 = vshll.u32 %v1131_v47, 16  ;;  %v644_v15 = vmax.f32 %v584_v2, 0.0  ;;  %v579_v12 = vadd.f32 %v8666_v32, %v578_v29 }
 0x1b2   : > { %1057 = vst [vmem:[#allocation2 + $0x6c] sm:$0xf] %v6500_v57  ;;  %1058 = vst [vmem:[#allocation2 + $0x70] sm:$0xf] %v6501_v58  ;;  %v6525_v6 = vcombine.low %v1185_v22, %v1195_v62  ;;  %v1204_v7 = vrot.slane %v1203_v59, 4  ;;  %v1213_v8 = vor.u32 %v1212_v60, %v1208_v50  ;;  %v642_v16 = vmax.f32 %v576_v3, 0.0 }
 0x1b3   : > { %v1218_v14 = vrot.slane %v1216_v1, 5  ;;  %v645_v21 = vmax.f32 %v587_v9, 0.0  ;;  %v1221_v22 = vshrl.u32 %v1087_v4, 16  ;;  %v643_v23 = vmax.f32 %v579_v12, 0.0  ;;  %v8772_v46 = vld [vmem:[#allocation8 + $0x18] sm:$0xff]  }
 0x1b4   : > { %7134 = vmatmul.mubr.bf16.vlgmr.msra.gmra.mrb[32].mxu0 %v6525_v6  ;;  %v1209_v19 = vsel %vm8649_vm2, %v1204_v7, %v1208_v50  ;;  %v1214_v20 = vrot.slane %v1213_v8, 4  ;;  %v1224_v25 = vshll.u32 %v1087_v4, 16  ;;  %v1230_v24 = vshll.u32 %v1088_v10, 16  ;;  %v7980_v4 = vld [vmem:[#allocation8 + $0x108] sm:$0xff]  }
 0x1b5   : > { %v1234_v26 = vshrl.u32 %v1088_v10, 16  ;;  %7166 = vmatpush3.bf16.msra.mxu0 %v8660_v31  ;;  %v665_v28 = vpack.c.bf16 %v645_v21, %v644_v15  ;;  %v1223_v33 = vrot.slane %v1221_v22, 4  ;;  %v1240_v29 = vshll.u32 %v1132_v17, 16  ;;  %v8768_v42 = vpop.f32.mrb[28].mxu0 }
 0x1b6   : > { %v1219_v27 = vsel %vm8649_vm2, %v1214_v20, %v1218_v14  ;;  %7167 = vmatprep.subr.bf16.mxu0 %v7986_v13  ;;  %v664_v38 = vpack.c.bf16 %v643_v23, %v642_v16  ;;  %v1226_v39 = vrot.slane %v1224_v25, 5  ;;  %v1232_v40 = vrot.slane %v1230_v24, 5  ;;  %v8770_v45 = vpop.f32.mrb[29].mxu0  ;;  %v1133_v20 = vld [vmem:[#allocation2 + $0x38] sm:$0x1] }
 0x1b7   : > { %v6526_v37 = vcombine.low %v1209_v19, %v1219_v27  ;;  %v748_v34 = vshrl.u32 %v665_v28, 16  ;;  %v751_v43 = vshll.u32 %v665_v28, 16  ;;  %v1236_v31 = vrot.slane %v1234_v26, 4  ;;  %v8774_v53 = vpop.f32.mrb[30].mxu0  ;;  %v1091_v26 = vld [vmem:[#allocation2 + $0x3c] sm:$0xf] }
 0x1b8   : > { %v1242_v44 = vrot.slane %v1240_v29, 5  ;;  %v741_v47 = vshrl.u32 %v664_v38, 16  ;;  %v744_v49 = vshll.u32 %v664_v38, 16  ;;  %v1227_v50 = vor.u32 %v1226_v39, %v1223_v33  ;;  %v8777_v59 = vpop.f32.mrb[31].mxu0  ;;  %v7979_v10 = vld [vmem:[#allocation2 + $0x78] sm:$0xff]  }
 0x1b9   : > { %7137 = vmatprep.mubr.bf16.mxu0 %v6526_v37  ;;  %v1245_v52 = vshrl.u32 %v1089_v35, 16  ;;  %7168 = vmatpush3.bf16.msra.mxu0 %v7986_v13  ;;  %v750_v54 = vrot.slane %v748_v34, 7  ;;  %v1237_v55 = vor.u32 %v1236_v31, %v1232_v40  ;;  %v1248_v57 = vshll.u32 %v1089_v35, 16  ;;  %v7977_v3 = vld [vmem:[#allocation2 + $0x6c] sm:$0xff]   ;;  %v7995_v27 = vld [vmem:[#allocation8 + $0x20] sm:$0xff]  }
 0x1ba   : > { %v1254_v58 = vshll.u32 %v8766_v41, 16  ;;  %7169 = vmatprep.subr.bf16.mxu0 %v7989_v36  ;;  %v743_v60 = vrot.slane %v741_v47, 7  ;;  %v1228_v62 = vrot.slane %v1227_v50, 4  ;;  %v1258_v2 = vshrl.u32 %v8766_v41, 16  ;;  %7293 = vmatprep.mubr.bf16.mxu1 %v7977_v3  ;;  %v1134_v31 = vld [vmem:[#allocation2 + $0x44] sm:$0x1] }
 0x1bb   : > { %v1247_v1 = vrot.slane %v1245_v52, 4  ;;  %v753_v6 = vor.u32 %v751_v43, %v750_v54  ;;  %v844_v7 = vsel %vm8673_vm5, %v750_v54, 0  ;;  %v1238_v8 = vrot.slane %v1237_v55, 4  ;;  %7294 = vmatmul.mubr.bf16.vlgmr.msra.gmra.mrb[0].mxu1 %v7979_v10  ;;  %v1092_v43 = vld [vmem:[#allocation2 + $0x40] sm:$0xf] }
 0x1bc   : > { %v1250_v9 = vrot.slane %v1248_v57, 5  ;;  %v6511_v13 = vcombine.low %v844_v7, %v844_v7  ;;  %v746_v14 = vor.u32 %v744_v49, %v743_v60  ;;  %v843_v15 = vsel %vm8673_vm5, %v743_v60, 0  ;;  %7310 = vmatpush3.bf16.msra.mxu1 %v8657_v30  ;;  %v8805_v50 = vld [vmem:[#allocation2 + $0x48] sm:$0xf]  ;;  %v7998_v52 = vld [vmem:[#allocation8 + $0x28] sm:$0xff]  }
 0x1bd   : > { %v1233_v16 = vsel %vm8649_vm2, %v1228_v62, %v1232_v40  ;;  %7170 = vmatpush3.bf16.msra.mxu0 %v7989_v36  ;;  %v828_v12 = vsel %vm8673_vm5, 0, %v753_v6  ;;  %v6508_v17 = vcombine.low %v843_v15, %v843_v15  ;;  %v1243_v19 = vsel %vm8649_vm2, %v1238_v8, %v1242_v44  ;;  %7311 = vmatprep.subr.bf16.mxu1 %v7980_v4  ;;  %v7982_v36 = vld [vmem:[#allocation8 + $0x110] sm:$0xff]   ;;  %v8807_v6 = vld [vmem:[#allocation2 + $0x50] sm:$0x1]  ;;  %v1138_v51 = vld [vmem:[#allocation2 + $0x74] sm:$0x1] }
 0x1be   : > { %v1251_v21 = vor.u32 %v1250_v9, %v1247_v1  ;;  %7171 = vmatprep.subr.bf16.mxu0 %v8772_v46  ;;  %v6509_v22 = vcombine.low %v828_v12, %v828_v12  ;;  %v6510_v23 = vcombine.high %v828_v12, %v828_v12  ;;  %1068 = vst [vmem:[#allocation2 + $0x98] sm:$0x1] %v6511_v13  ;;  %v827_v25 = vsel %vm8673_vm5, 0, %v746_v14  ;;  %v1094_v13 = vld [vmem:[#allocation2 + $0x4c] sm:$0xf] }
 0x1bf   : > { %v6527_v24 = vcombine.low %v1233_v16, %v1243_v19  ;;  %v6506_v28 = vcombine.low %v827_v25, %v827_v25  ;;  %v6507_v33 = vcombine.high %v827_v25, %v827_v25  ;;  %1065 = vst [vmem:[#allocation2 + $0x8c] sm:$0x1] %v6508_v17  ;;  %v1256_v35 = vrot.slane %v1254_v58, 5  ;;  %v8000_v14 = vld [vmem:[#allocation8 + $0x30] sm:$0xff]   ;;  %v7988_v19 = vld [vmem:[#allocation8 + $0x120] sm:$0xff]  }
 0x1c0   : > { %v1252_v29 = vrot.slane %v1251_v21, 4  ;;  %1066 = vst [vmem:[#allocation2 + $0x90] sm:$0xf] %v6509_v22  ;;  %1067 = vst [vmem:[#allocation2 + $0x94] sm:$0xf] %v6510_v23  ;;  %v1260_v37 = vrot.slane %v1258_v2, 4  ;;  %v600_v39 = vadd.f32 %v8747_v56, %v8666_v32  ;;  %v592_v40 = vadd.f32 %v8666_v32, %v8749_v61  ;;  %7312 = vmatpush3.bf16.msra.mxu1 %v7980_v4 }
 0x1c1   : > { %7138 = vmatmul.mubr.bf16.gmra.mrb[36].mxu0 %v6527_v24  ;;  %v1264_v38 = vshll.u32 %v1133_v20, 16  ;;  %1063 = vst [vmem:[#allocation2 + $0x84] sm:$0xf] %v6506_v28  ;;  %1064 = vst [vmem:[#allocation2 + $0x88] sm:$0xf] %v6507_v33  ;;  %v603_v41 = vadd.f32 %v8755_v5, %v8666_v32  ;;  %v595_v34 = vadd.f32 %v8666_v32, %v8758_v11  ;;  %v1269_v44 = vshrl.u32 %v1091_v26, 16 }
 0x1c2   : > { %v1257_v30 = vsel %vm8649_vm2, %v1252_v29, %v1256_v35  ;;  %7172 = vmatpush3.bf16.msra.mxu0 %v8772_v46  ;;  %v1261_v56 = vor.u32 %v1260_v37, %v1256_v35  ;;  %v648_v49 = vmax.f32 %v600_v39, 0.0  ;;  %v646_v61 = vmax.f32 %v592_v40, 0.0  ;;  %7313 = vmatprep.subr.bf16.mxu1 %v7982_v36  ;;  %v7985_v11 = vld [vmem:[#allocation8 + $0x118] sm:$0xff]  }
 0x1c3   : > { %v1266_v47 = vrot.slane %v1264_v38, 5  ;;  %7173 = vmatprep.subr.bf16.mxu0 %v7995_v27  ;;  %v649_v54 = vmax.f32 %v603_v41, 0.0  ;;  %v647_v55 = vmax.f32 %v595_v34, 0.0  ;;  %v1271_v5 = vrot.slane %v1269_v44, 4  ;;  %v7991_v41 = vld [vmem:[#allocation8 + $0x128] sm:$0xff]  }
 0x1c4   : > { %v1272_v57 = vshll.u32 %v1091_v26, 16  ;;  %v1262_v58 = vrot.slane %v1261_v56, 4  ;;  %v1278_v60 = vshll.u32 %v1092_v43, 16  ;;  %v1282_v62 = vshrl.u32 %v1092_v43, 16  ;;  %7314 = vmatpush3.bf16.msra.mxu1 %v7982_v36  ;;  %v8001_v56 = vld [vmem:[#allocation8 + $0x38] sm:$0xff]  }
 0x1c5   : > { %v1288_v1 = vshll.u32 %v1134_v31, 16  ;;  %v667_v46 = vpack.c.bf16 %v649_v54, %v648_v49  ;;  %v666_v2 = vpack.c.bf16 %v647_v55, %v646_v61  ;;  %v1293_v7 = vshrl.u32 %v8805_v50, 16  ;;  %7315 = vmatprep.subr.bf16.mxu1 %v7985_v11 }
 0x1c6   : > { %v1274_v3 = vrot.slane %v1272_v57, 5  ;;  %7174 = vmatpush3.bf16.msra.mxu0 %v7995_v27  ;;  %v1267_v4 = vsel %vm8649_vm2, %v1262_v58, %v1266_v47  ;;  %v1280_v8 = vrot.slane %v1278_v60, 5  ;;  %v1284_v9 = vrot.slane %v1282_v62, 4  ;;  %v1095_v57 = vld [vmem:[#allocation2 + $0x54] sm:$0xf] }
 0x1c7   : > { %v1290_v10 = vrot.slane %v1288_v1, 5  ;;  %7175 = vmatprep.subr.bf16.mxu0 %v7998_v52  ;;  %v6528_v15 = vcombine.low %v1257_v30, %v1267_v4  ;;  %v762_v16 = vshrl.u32 %v667_v46, 16  ;;  %v765_v12 = vshll.u32 %v667_v46, 16  ;;  %v7984_v33 = vld [vmem:[#allocation2 + $0x90] sm:$0xff]   ;;  %v7994_v46 = vld [vmem:[#allocation8 + $0x130] sm:$0xff]  }
 0x1c8   : > { %v755_v17 = vshrl.u32 %v666_v2, 16  ;;  %v758_v20 = vshll.u32 %v666_v2, 16  ;;  %v1275_v21 = vor.u32 %v1274_v3, %v1271_v5  ;;  %v1285_v22 = vor.u32 %v1284_v9, %v1280_v8  ;;  %v7981_v28 = vld [vmem:[#allocation2 + $0x84] sm:$0xff]   ;;  %7316 = vmatpush3.bf16.msra.mxu1 %v7985_v11  ;;  %v8826_v11 = vld [vmem:[#allocation8 + $0x80] sm:$0xff]  }
 0x1c9   : > { %v1295_v23 = vrot.slane %v1293_v7, 4  ;;  %7141 = vmatprep.mubr.bf16.mxu0 %v6528_v15  ;;  %v764_v25 = vrot.slane %v762_v16, 7  ;;  %v1296_v26 = vshll.u32 %v8805_v50, 16  ;;  %v1302_v27 = vshll.u32 %v1094_v13, 16  ;;  %7297 = vmatprep.mubr.bf16.mxu1 %v7981_v28  ;;  %v1136_v4 = vld [vmem:[#allocation2 + $0x5c] sm:$0x1] }
 0x1ca   : > { %v757_v24 = vrot.slane %v755_v17, 7  ;;  %7176 = vmatpush3.bf16.msra.mxu0 %v7998_v52  ;;  %v1276_v29 = vrot.slane %v1275_v21, 4  ;;  %v1286_v35 = vrot.slane %v1285_v22, 4  ;;  %v1306_v36 = vshrl.u32 %v1094_v13, 16  ;;  %7317 = vmatprep.subr.bf16.mxu1 %v7988_v19  ;;  %v1097_v17 = vld [vmem:[#allocation2 + $0x60] sm:$0xf] }
 0x1cb   : > { %v1312_v37 = vshll.u32 %v8807_v6, 16  ;;  %7177 = vmatprep.subr.bf16.mxu0 %v8000_v14  ;;  %v767_v38 = vor.u32 %v765_v12, %v764_v25  ;;  %v846_v39 = vsel %vm8673_vm5, %v764_v25, 0  ;;  %7298 = vmatmul.mubr.bf16.gmra.mrb[4].mxu1 %v7984_v33  ;;  %v1298_v50 = vrot.slane %v1296_v26, 5 }
 0x1cc   : > { %v760_v40 = vor.u32 %v758_v20, %v757_v24  ;;  %v845_v30 = vsel %vm8673_vm5, %v757_v24, 0  ;;  %v6517_v34 = vcombine.low %v846_v39, %v846_v39  ;;  %v1281_v31 = vsel %vm8649_vm2, %v1276_v29, %v1280_v8  ;;  %7318 = vmatpush3.bf16.msra.mxu1 %v7988_v19  ;;  %v7997_v19 = vld [vmem:[#allocation8 + $0x138] sm:$0xff]  }
 0x1cd   : > { %v6514_v43 = vcombine.low %v845_v30, %v845_v30  ;;  %v1291_v44 = vsel %vm8649_vm2, %v1286_v35, %v1290_v10  ;;  %v830_v47 = vsel %vm8673_vm5, 0, %v767_v38  ;;  %v1299_v58 = vor.u32 %v1298_v50, %v1295_v23  ;;  %7319 = vmatprep.subr.bf16.mxu1 %v7991_v41  ;;  %v1096_v10 = vld [vmem:[#allocation2 + $0x58] sm:$0xf] }
 0x1ce   : > { %v829_v49 = vsel %vm8673_vm5, 0, %v760_v40  ;;  %v6529_v61 = vcombine.low %v1281_v31, %v1291_v44  ;;  %7178 = vmatpush3.bf16.msra.mxu0 %v8000_v14  ;;  %v6515_v52 = vcombine.low %v830_v47, %v830_v47  ;;  %v6516_v54 = vcombine.high %v830_v47, %v830_v47  ;;  %1074 = vst [vmem:[#allocation2 + $0xb0] sm:$0x1] %v6517_v34 }
 0x1cf   : > { %v6512_v55 = vcombine.low %v829_v49, %v829_v49  ;;  %v6513_v5 = vcombine.high %v829_v49, %v829_v49  ;;  %1071 = vst [vmem:[#allocation2 + $0xa4] sm:$0x1] %v6514_v43  ;;  %v1304_v60 = vrot.slane %v1302_v27, 5  ;;  %v1308_v62 = vrot.slane %v1306_v36, 4  ;;  %7179 = vmatprep.subr.bf16.mxu0 %v8001_v56  ;;  %v8841_v36 = vld [vmem:[#allocation2 + $0x64] sm:$0xf] }
 0x1d0   : > { %7142 = vmatmul.mubr.bf16.gmra.mrb[40].mxu0 %v6529_v61  ;;  %v1314_v1 = vrot.slane %v1312_v37, 5  ;;  %1072 = vst [vmem:[#allocation2 + $0xa8] sm:$0xf] %v6515_v52  ;;  %1073 = vst [vmem:[#allocation2 + $0xac] sm:$0xf] %v6516_v54  ;;  %v616_v2 = vadd.f32 %v8768_v42, %v8666_v32  ;;  %v608_v3 = vadd.f32 %v8666_v32, %v8770_v45  ;;  %v1300_v8 = vrot.slane %v1299_v58, 4 }
 0x1d1   : > { %1069 = vst [vmem:[#allocation2 + $0x9c] sm:$0xf] %v6512_v55  ;;  %1070 = vst [vmem:[#allocation2 + $0xa0] sm:$0xf] %v6513_v5  ;;  %v619_v6 = vadd.f32 %v8774_v53, %v8666_v32  ;;  %v611_v7 = vadd.f32 %v8666_v32, %v8777_v59  ;;  %v1309_v9 = vor.u32 %v1308_v62, %v1304_v60  ;;  %v1317_v13 = vshrl.u32 %v1095_v57, 16  ;;  %v8843_v37 = vld [vmem:[#allocation8 + $0x140] sm:$0xff]  }
 0x1d2   : > { %v1320_v14 = vshll.u32 %v1095_v57, 16  ;;  %7180 = vmatpush3.bf16.msra.mxu0 %v8001_v56  ;;  %v652_v15 = vmax.f32 %v616_v2, 0.0  ;;  %v650_v16 = vmax.f32 %v608_v3, 0.0  ;;  %7320 = vmatpush3.bf16.msra.mxu1 %v7991_v41  ;;  %v1305_v45 = vsel %vm8649_vm2, %v1300_v8, %v1304_v60  ;;  %v1137_v62 = vld [vmem:[#allocation2 + $0x68] sm:$0x1] }
 0x1d3   : > { %v653_v42 = vmax.f32 %v619_v6, 0.0  ;;  %v651_v12 = vmax.f32 %v611_v7, 0.0  ;;  %7213 = vmatprep.subr.bf16.mxu0 %v8826_v11  ;;  %v1310_v32 = vrot.slane %v1309_v9, 4  ;;  %v1319_v53 = vrot.slane %v1317_v13, 4  ;;  %7321 = vmatprep.subr.bf16.mxu1 %v7994_v46 }
 0x1d4   : > { %v1322_v59 = vrot.slane %v1320_v14, 5  ;;  %v1326_v22 = vshll.u32 %v1096_v10, 16  ;;  %v1330_v23 = vshrl.u32 %v1096_v10, 16  ;;  %v1336_v26 = vshll.u32 %v1136_v4, 16  ;;  %v8858_v4 = vld [vmem:[#allocation2 + $0x70] sm:$0xf] }
 0x1d5   : > { %v669_v20 = vpack.c.bf16 %v653_v42, %v652_v15  ;;  %v668_v21 = vpack.c.bf16 %v651_v12, %v650_v16  ;;  %v1315_v25 = vsel %vm8649_vm2, %v1310_v32, %v1314_v1  ;;  %v1341_v27 = vshrl.u32 %v1097_v17, 16 }
 0x1d6   : > { %v1323_v24 = vor.u32 %v1322_v59, %v1319_v53  ;;  %v6530_v28 = vcombine.low %v1305_v45, %v1315_v25  ;;  %7322 = vmatpush3.bf16.msra.mxu1 %v7994_v46  ;;  %v1328_v40 = vrot.slane %v1326_v22, 5  ;;  %v1332_v30 = vrot.slane %v1330_v23, 4  ;;  %v1099_v46 = vld [vmem:[#allocation2 + $0x6c] sm:$0xf]  ;;  %v1101_v53 = vld [vmem:[#allocation2 + $0x78] sm:$0xf] }
 0x1d7   : > { %v776_v33 = vshrl.u32 %v669_v20, 16  ;;  %v779_v29 = vshll.u32 %v669_v20, 16  ;;  %v769_v35 = vshrl.u32 %v668_v21, 16  ;;  %v772_v38 = vshll.u32 %v668_v21, 16  ;;  %7323 = vmatprep.subr.bf16.mxu1 %v7997_v19  ;;  %v7990_v5 = vld [vmem:[#allocation2 + $0xa8] sm:$0xff]  }
 0x1d8   : > { %v1324_v39 = vrot.slane %v1323_v24, 4  ;;  %7145 = vmatprep.mubr.bf16.mxu0 %v6530_v28  ;;  %v1338_v43 = vrot.slane %v1336_v26, 5  ;;  %v1343_v31 = vrot.slane %v1341_v27, 4  ;;  %v1333_v56 = vor.u32 %v1332_v30, %v1328_v40  ;;  %v7987_v61 = vld [vmem:[#allocation2 + $0x9c] sm:$0xff]  }
 0x1d9   : > { %v778_v41 = vrot.slane %v776_v33, 7  ;;  %v771_v34 = vrot.slane %v769_v35, 7  ;;  %v1344_v47 = vshll.u32 %v1097_v17, 16  ;;  %v1350_v49 = vshll.u32 %v8841_v36, 16  ;;  %7301 = vmatprep.mubr.bf16.mxu1 %v7987_v61  ;;  %v8864_v22 = vld [vmem:[#allocation2 + $0x7c] sm:$0xf] }
 0x1da   : > { %v1329_v44 = vsel %vm8649_vm2, %v1324_v39, %v1328_v40  ;;  %7324 = vmatpush3.bf16.msra.mxu1 %v7997_v19  ;;  %v1334_v60 = vrot.slane %v1333_v56, 4  ;;  %v1354_v7 = vshrl.u32 %v8841_v36, 16  ;;  %v1360_v42 = vshll.u32 %v1137_v62, 16  ;;  %v8872_v56 = vld [vmem:[#allocation2 + $0x88] sm:$0xf] }
 0x1db   : > { %v781_v50 = vor.u32 %v779_v29, %v778_v41  ;;  %v848_v52 = vsel %vm8673_vm5, %v778_v41, 0  ;;  %v774_v54 = vor.u32 %v772_v38, %v771_v34  ;;  %v847_v55 = vsel %vm8673_vm5, %v771_v34, 0  ;;  %7357 = vmatprep.subr.bf16.mxu1 %v8843_v37  ;;  %7302 = vmatmul.mubr.bf16.gmra.mrb[8].mxu1 %v7990_v5  ;;  %v1139_v29 = vld [vmem:[#allocation2 + $0x80] sm:$0x1]  ;;  %v1103_v41 = vld [vmem:[#allocation2 + $0x84] sm:$0xf] }
 0x1dc   : > { %v6523_v57 = vcombine.low %v848_v52, %v848_v52  ;;  %v6520_v58 = vcombine.low %v847_v55, %v847_v55  ;;  %v1346_v1 = vrot.slane %v1344_v47, 5  ;;  %v1352_v6 = vrot.slane %v1350_v49, 5  ;;  %v1140_v52 = vld [vmem:[#allocation2 + $0x8c] sm:$0x1] }
 0x1dd   : > { %v832_v2 = vsel %vm8673_vm5, 0, %v781_v50  ;;  %v831_v3 = vsel %vm8673_vm5, 0, %v774_v54  ;;  %v1339_v14 = vsel %vm8649_vm2, %v1334_v60, %v1338_v43  ;;  %v1356_v16 = vrot.slane %v1354_v7, 4  ;;  %v1105_v54 = vld [vmem:[#allocation2 + $0x90] sm:$0xf] }
 0x1de   : > { %v6521_v8 = vcombine.low %v832_v2, %v832_v2  ;;  %v6522_v9 = vcombine.high %v832_v2, %v832_v2  ;;  %1080 = vst [vmem:[#allocation2 + $0xc8] sm:$0x1] %v6523_v57  ;;  %v6518_v10 = vcombine.low %v831_v3, %v831_v3  ;;  %v6519_v13 = vcombine.high %v831_v3, %v831_v3  ;;  %v1106_v60 = vld [vmem:[#allocation2 + $0x94] sm:$0xf] }
 0x1df   : > { %1077 = vst [vmem:[#allocation2 + $0xbc] sm:$0x1] %v6520_v58  ;;  %v1347_v15 = vor.u32 %v1346_v1, %v1343_v31  ;;  %v6531_v12 = vcombine.low %v1329_v44, %v1339_v14  ;;  %v1365_v17 = vshrl.u32 %v1099_v46, 16  ;;  %v1368_v45 = vshll.u32 %v1099_v46, 16 }
 0x1e0   : > { %1078 = vst [vmem:[#allocation2 + $0xc0] sm:$0xf] %v6521_v8  ;;  %1079 = vst [vmem:[#allocation2 + $0xc4] sm:$0xf] %v6522_v9  ;;  %v1374_v32 = vshll.u32 %v8858_v4, 16  ;;  %v1357_v19 = vor.u32 %v1356_v16, %v1352_v6  ;;  %v1362_v20 = vrot.slane %v1360_v42, 5 }
 0x1e1   : > { %1075 = vst [vmem:[#allocation2 + $0xb4] sm:$0xf] %v6518_v10  ;;  %1076 = vst [vmem:[#allocation2 + $0xb8] sm:$0xf] %v6519_v13  ;;  %v1348_v59 = vrot.slane %v1347_v15, 4  ;;  %v1378_v21 = vshrl.u32 %v8858_v4, 16  ;;  %7146 = vmatmul.mubr.bf16.gmra.mrb[44].mxu0 %v6531_v12 }
 0x1e2   : > { %v1367_v23 = vrot.slane %v1365_v17, 4  ;;  %v1370_v25 = vrot.slane %v1368_v45, 5  ;;  %v1376_v24 = vrot.slane %v1374_v32, 5  ;;  %v1384_v26 = vshll.u32 %v1138_v51, 16 }
 0x1e3   : > { %v1353_v27 = vsel %vm8649_vm2, %v1348_v59, %v1352_v6  ;;  %v1358_v28 = vrot.slane %v1357_v19, 4  ;;  %v1380_v33 = vrot.slane %v1378_v21, 4  ;;  %v1389_v35 = vshrl.u32 %v1101_v53, 16 }
 0x1e4   : > { %v1371_v38 = vor.u32 %v1370_v25, %v1367_v23  ;;  %v1386_v39 = vrot.slane %v1384_v26, 5  ;;  %v1392_v40 = vshll.u32 %v1101_v53, 16  ;;  %v1398_v30 = vshll.u32 %v8864_v22, 16  ;;  %v1141_v53 = vld [vmem:[#allocation2 + $0x98] sm:$0x1] }
 0x1e5   : > { %v1363_v34 = vsel %vm8649_vm2, %v1358_v28, %v1362_v20  ;;  %v1381_v43 = vor.u32 %v1380_v33, %v1376_v24  ;;  %v1391_v31 = vrot.slane %v1389_v35, 4  ;;  %v1402_v44 = vshrl.u32 %v8864_v22, 16  ;;  %v1107_v20 = vld [vmem:[#allocation2 + $0x9c] sm:$0xf]  ;;  %v1108_v26 = vld [vmem:[#allocation2 + $0xa0] sm:$0xf] }
 0x1e6   : > { %v6532_v47 = vcombine.low %v1353_v27, %v1363_v34  ;;  %v1372_v49 = vrot.slane %v1371_v38, 4  ;;  %v1394_v61 = vrot.slane %v1392_v40, 5  ;;  %v1400_v50 = vrot.slane %v1398_v30, 5  ;;  %v1142_v34 = vld [vmem:[#allocation2 + $0xa4] sm:$0x1] }
 0x1e7   : > { %v1382_v55 = vrot.slane %v1381_v43, 4  ;;  %v1404_v5 = vrot.slane %v1402_v44, 4  ;;  %v1408_v57 = vshll.u32 %v1139_v29, 16  ;;  %v1413_v58 = vshrl.u32 %v1103_v41, 16  ;;  %v7996_v6 = vld [vmem:[#allocation2 + $0xc0] sm:$0xff]  }
 0x1e8   : > { %7149 = vmatprep.mubr.bf16.mxu0 %v6532_v47  ;;  %v1377_v62 = vsel %vm8649_vm2, %v1372_v49, %v1376_v24  ;;  %v1395_v1 = vor.u32 %v1394_v61, %v1391_v31  ;;  %v1416_v46 = vshll.u32 %v1103_v41, 16  ;;  %v1422_v2 = vshll.u32 %v8872_v56, 16  ;;  %v7993_v3 = vld [vmem:[#allocation2 + $0xb4] sm:$0xff]   ;;  %v1109_v44 = vld [vmem:[#allocation2 + $0xa8] sm:$0xf] }
 0x1e9   : > { %v1387_v7 = vsel %vm8649_vm2, %v1382_v55, %v1386_v39  ;;  %v1405_v8 = vor.u32 %v1404_v5, %v1400_v50  ;;  %v1410_v9 = vrot.slane %v1408_v57, 5  ;;  %v1415_v10 = vrot.slane %v1413_v58, 4  ;;  %7305 = vmatprep.mubr.bf16.mxu1 %v7993_v3 }
 0x1ea   : > { %v6533_v13 = vcombine.low %v1377_v62, %v1387_v7  ;;  %v1396_v14 = vrot.slane %v1395_v1, 4  ;;  %v1418_v15 = vrot.slane %v1416_v46, 5  ;;  %v1424_v16 = vrot.slane %v1422_v2, 5  ;;  %7306 = vmatmul.mubr.bf16.gmra.mrb[12].mxu1 %v7996_v6  ;;  %v8888_v62 = vld [vmem:[#allocation2 + $0xac] sm:$0xf] }
 0x1eb   : > { %v1406_v42 = vrot.slane %v1405_v8, 4  ;;  %v1426_v51 = vshrl.u32 %v8872_v56, 16  ;;  %v1432_v12 = vshll.u32 %v1140_v52, 16  ;;  %v1437_v17 = vshrl.u32 %v1105_v54, 16  ;;  %v1143_v7 = vld [vmem:[#allocation2 + $0xb0] sm:$0x1] }
 0x1ec   : > { %7150 = vmatmul.mubr.bf16.gmra.mrb[48].mxu0 %v6533_v13  ;;  %v1401_v45 = vsel %vm8649_vm2, %v1396_v14, %v1400_v50  ;;  %v1419_v32 = vor.u32 %v1418_v15, %v1415_v10  ;;  %v1440_v59 = vshll.u32 %v1105_v54, 16  ;;  %v1446_v19 = vshll.u32 %v1106_v60, 16  ;;  %v2998_v8 = vld [vmem:[#allocation2 + $0xc] sm:$0xf] }
 0x1ed   : > { %v1411_v21 = vsel %vm8649_vm2, %v1406_v42, %v1410_v9  ;;  %v1428_v23 = vrot.slane %v1426_v51, 4  ;;  %v1434_v25 = vrot.slane %v1432_v12, 5  ;;  %v1439_v24 = vrot.slane %v1437_v17, 4  ;;  %v8894_v12 = vld [vmem:[#allocation2 + $0x14] sm:$0x1] }
 0x1ee   : > { %v6534_v27 = vcombine.low %v1401_v45, %v1411_v21  ;;  %v1420_v28 = vrot.slane %v1419_v32, 4  ;;  %v1442_v33 = vrot.slane %v1440_v59, 5  ;;  %v1448_v29 = vrot.slane %v1446_v19, 5 }
 0x1ef   : > { %v1429_v35 = vor.u32 %v1428_v23, %v1424_v16  ;;  %v1450_v38 = vshrl.u32 %v1106_v60, 16  ;;  %v1456_v39 = vshll.u32 %v1141_v53, 16  ;;  %v1461_v40 = vshrl.u32 %v1107_v20, 16  ;;  %v8898_v53 = vld [vmem:[#allocation2 + $0x10] sm:$0xf] }
 0x1f0   : > { %7153 = vmatprep.mubr.bf16.mxu0 %v6534_v27  ;;  %v1425_v30 = vsel %vm8649_vm2, %v1420_v28, %v1424_v16  ;;  %v1443_v41 = vor.u32 %v1442_v33, %v1439_v24  ;;  %v1464_v43 = vshll.u32 %v1107_v20, 16  ;;  %v1470_v31 = vshll.u32 %v1108_v26, 16  ;;  %v8902_v28 = vld [vmem:[#allocation2 + $0xb4] sm:$0xf] }
 0x1f1   : > { %v1430_v47 = vrot.slane %v1429_v35, 4  ;;  %v1452_v49 = vrot.slane %v1450_v38, 4  ;;  %v1458_v61 = vrot.slane %v1456_v39, 5  ;;  %v1463_v50 = vrot.slane %v1461_v40, 4  ;;  %v8908_v39 = vld [vmem:[#allocation2 + $0xb8] sm:$0xf] }
 0x1f2   : > { %v1444_v52 = vrot.slane %v1443_v41, 4  ;;  %v1466_v54 = vrot.slane %v1464_v43, 5  ;;  %v1472_v55 = vrot.slane %v1470_v31, 5  ;;  %v1474_v5 = vshrl.u32 %v1108_v26, 16  ;;  %v1144_v40 = vld [vmem:[#allocation2 + $0xbc] sm:$0x1] }
 0x1f3   : > { %v1435_v57 = vsel %vm8649_vm2, %v1430_v47, %v1434_v25  ;;  %v1453_v58 = vor.u32 %v1452_v49, %v1448_v29  ;;  %v1480_v60 = vshll.u32 %v1142_v34, 16  ;;  %v1485_v1 = vshrl.u32 %v1109_v44, 16 }
 0x1f4   : > { %v6535_v46 = vcombine.low %v1425_v30, %v1435_v57  ;;  %v1449_v2 = vsel %vm8649_vm2, %v1444_v52, %v1448_v29  ;;  %v1467_v3 = vor.u32 %v1466_v54, %v1463_v50  ;;  %v1476_v6 = vrot.slane %v1474_v5, 4 }
 0x1f5   : > { %v1454_v9 = vrot.slane %v1453_v58, 4  ;;  %v1482_v10 = vrot.slane %v1480_v60, 5  ;;  %v1487_v13 = vrot.slane %v1485_v1, 4  ;;  %v1488_v14 = vshll.u32 %v1109_v44, 16  ;;  %v3001_v60 = vld [vmem:[#allocation2 + $0x18] sm:$0xf] }
 0x1f6   : > { %7154 = vmatmul.mubr.bf16.gmra.mrb[52].mxu0 %v6535_v46  ;;  %v1468_v15 = vrot.slane %v1467_v3, 4  ;;  %v1477_v16 = vor.u32 %v1476_v6, %v1472_v55  ;;  %v1494_v42 = vshll.u32 %v8888_v62, 16  ;;  %v1498_v51 = vshrl.u32 %v8888_v62, 16  ;;  %v8916_v1 = vld [vmem:[#allocation2 + $0x1c] sm:$0xf] }
 0x1f7   : > { %v1459_v17 = vsel %vm8649_vm2, %v1454_v9, %v1458_v61  ;;  %v1490_v45 = vrot.slane %v1488_v14, 5  ;;  %v1504_v32 = vshll.u32 %v1143_v7, 16  ;;  %v3047_v59 = vshrl.u32 %v2998_v8, 16  ;;  %v8921_v7 = vld [vmem:[#allocation2 + $0x20] sm:$0x1] }
 0x1f8   : > { %v6536_v19 = vcombine.low %v1449_v2, %v1459_v17  ;;  %v1473_v20 = vsel %vm8649_vm2, %v1468_v15, %v1472_v55  ;;  %v1478_v21 = vrot.slane %v1477_v16, 4  ;;  %v1496_v23 = vrot.slane %v1494_v42, 5 }
 0x1f9   : > { %v1491_v25 = vor.u32 %v1490_v45, %v1487_v13  ;;  %v1500_v24 = vrot.slane %v1498_v51, 4  ;;  %v1506_v26 = vrot.slane %v1504_v32, 5  ;;  %v3049_v27 = vrot.slane %v3047_v59, 4  ;;  %v3004_v51 = vld [vmem:[#allocation2 + $0x24] sm:$0xf] }
 0x1fa   : > { %7157 = vmatprep.mubr.bf16.mxu0 %v6536_v19  ;;  %v1483_v33 = vsel %vm8649_vm2, %v1478_v21, %v1482_v10  ;;  %v3050_v29 = vshll.u32 %v2998_v8, 16  ;;  %v3056_v35 = vshll.u32 %v8898_v53, 16  ;;  %v3060_v38 = vshrl.u32 %v8898_v53, 16  ;;  %v8928_v19 = vld [vmem:[#allocation2 + $0x28] sm:$0xf] }
 0x1fb   : > { %v6537_v30 = vcombine.low %v1473_v20, %v1483_v33  ;;  %v1492_v41 = vrot.slane %v1491_v25, 4  ;;  %v1501_v34 = vor.u32 %v1500_v24, %v1496_v23  ;;  %v3066_v43 = vshll.u32 %v8894_v12, 16 }
 0x1fc   : > { %v3052_v31 = vrot.slane %v3050_v29, 5  ;;  %v3058_v44 = vrot.slane %v3056_v35, 5  ;;  %v3062_v47 = vrot.slane %v3060_v38, 4  ;;  %v1509_v49 = vshrl.u32 %v8902_v28, 16  ;;  %v8932_v29 = vld [vmem:[#allocation2 + $0x2c] sm:$0x1] }
 0x1fd   : > { %v1497_v61 = vsel %vm8649_vm2, %v1492_v41, %v1496_v23  ;;  %v1502_v50 = vrot.slane %v1501_v34, 4  ;;  %v3068_v52 = vrot.slane %v3066_v43, 5  ;;  %v1512_v54 = vshll.u32 %v8902_v28, 16  ;;  %v3007_v41 = vld [vmem:[#allocation2 + $0x30] sm:$0xf] }
 0x1fe   : > { %7158 = vmatmul.mubr.bf16.gmra.mrb[56].mxu0 %v6537_v30  ;;  %v3053_v55 = vor.u32 %v3052_v31, %v3049_v27  ;;  %v3063_v5 = vor.u32 %v3062_v47, %v3058_v44  ;;  %v1511_v57 = vrot.slane %v1509_v49, 4  ;;  %v1518_v58 = vshll.u32 %v8908_v39, 16  ;;  %v8937_v47 = vld [vmem:[#allocation2 + $0x34] sm:$0xf] }
 0x1ff   : > { %v1507_v46 = vsel %vm8649_vm2, %v1502_v50, %v1506_v26  ;;  %v1514_v2 = vrot.slane %v1512_v54, 5  ;;  %v1522_v3 = vshrl.u32 %v8908_v39, 16  ;;  %v1528_v6 = vshll.u32 %v1144_v40, 16 }
 0x200   : > { %v6538_v8 = vcombine.low %v1497_v61, %v1507_v46  ;;  %v3054_v9 = vrot.slane %v3053_v55, 4  ;;  %v3064_v10 = vrot.slane %v3063_v5, 4  ;;  %v1520_v13 = vrot.slane %v1518_v58, 5 }
 0x201   : > { %v1515_v14 = vor.u32 %v1514_v2, %v1511_v57  ;;  %v1524_v15 = vrot.slane %v1522_v3, 4  ;;  %v1530_v16 = vrot.slane %v1528_v6, 5  ;;  %v3071_v42 = vshrl.u32 %v3001_v60, 16  ;;  %v8089_v2 = vld [vmem:[#allocation2 + $0xc] sm:$0xf] }
 0x202   : > { %7161 = vmatprep.mubr.bf16.mxu0 %v6538_v8  ;;  %v3059_v17 = vsel %vm8649_vm2, %v3054_v9, %v3058_v44  ;;  %v3069_v45 = vsel %vm8649_vm2, %v3064_v10, %v3068_v52  ;;  %v3074_v32 = vshll.u32 %v3001_v60, 16  ;;  %v3080_v59 = vshll.u32 %v8916_v1, 16  ;;  %v8943_v3 = vld [vmem:[#allocation2 + $0x10] sm:$0xf]  ;;  %v8946_v8 = vld [vmem:[#allocation2 + $0x38] sm:$0x1] }
 0x203   : > { %v6636_v20 = vcombine.low %v3059_v17, %v3069_v45  ;;  %v1516_v21 = vrot.slane %v1515_v14, 4  ;;  %v1525_v23 = vor.u32 %v1524_v15, %v1520_v13  ;;  %v3073_v25 = vrot.slane %v3071_v42, 4  ;;  %v3010_v15 = vld [vmem:[#allocation2 + $0x3c] sm:$0xf] }
 0x204   : > { %v3076_v24 = vrot.slane %v3074_v32, 5  ;;  %v3082_v26 = vrot.slane %v3080_v59, 5  ;;  %v3084_v27 = vshrl.u32 %v8916_v1, 16  ;;  %v3090_v33 = vshll.u32 %v8921_v7, 16  ;;  %v8003_v59 = vld [vmem:[#allocation8 + $0x148] sm:$0xff]  }
 0x205   : > { %7325 = vmatprep.mubr.bf16.mxu1 %v6636_v20  ;;  %v1521_v35 = vsel %vm8649_vm2, %v1516_v21, %v1520_v13  ;;  %v1526_v38 = vrot.slane %v1525_v23, 4  ;;  %v3095_v40 = vshrl.u32 %v3004_v51, 16  ;;  %v3098_v30 = vshll.u32 %v3004_v51, 16 }
 0x206   : > { %v3077_v34 = vor.u32 %v3076_v24, %v3073_v25  ;;  %v3086_v43 = vrot.slane %v3084_v27, 4  ;;  %v3092_v31 = vrot.slane %v3090_v33, 5  ;;  %v3104_v44 = vshll.u32 %v8928_v19, 16  ;;  %v8961_v33 = vld [vmem:[#allocation2 + $0x44] sm:$0x1] }
 0x207   : > { %v1531_v49 = vsel %vm8649_vm2, %v1526_v38, %v1530_v16  ;;  %v3097_v61 = vrot.slane %v3095_v40, 4  ;;  %v3100_v50 = vrot.slane %v3098_v30, 5  ;;  %v3108_v52 = vshrl.u32 %v8928_v19, 16  ;;  %v8950_v16 = vld [vmem:[#allocation2 + $0x40] sm:$0xf] }
 0x208   : > { %v6539_v54 = vcombine.low %v1521_v35, %v1531_v49  ;;  %v3078_v55 = vrot.slane %v3077_v34, 4  ;;  %v3087_v5 = vor.u32 %v3086_v43, %v3082_v26  ;;  %v3106_v57 = vrot.slane %v3104_v44, 5  ;;  %v8091_v35 = vld [vmem:[#allocation2 + $0x18] sm:$0xf]  ;;  %v8964_v38 = vld [vmem:[#allocation2 + $0x1c] sm:$0xf] }
 0x209   : > { %v3101_v58 = vor.u32 %v3100_v50, %v3097_v61  ;;  %v3110_v60 = vrot.slane %v3108_v52, 4  ;;  %v3114_v46 = vshll.u32 %v8932_v29, 16  ;;  %v6549_v6 = vcombine.low %v8089_v2, %v8943_v3  ;;  %v3013_v30 = vld [vmem:[#allocation2 + $0x48] sm:$0xf]  ;;  %v8970_v49 = vld [vmem:[#allocation2 + $0x4c] sm:$0xf] }
 0x20a   : > { %7162 = vmatmul.mubr.bf16.gmra.mrb[60].mxu0 %v6539_v54  ;;  %v3083_v9 = vsel %vm8649_vm2, %v3078_v55, %v3082_v26  ;;  %v3088_v10 = vrot.slane %v3087_v5, 4  ;;  %v3119_v13 = vshrl.u32 %v3007_v41, 16  ;;  %v3122_v14 = vshll.u32 %v3007_v41, 16  ;;  %v8006_v44 = vld [vmem:[#allocation8 + $0x150] sm:$0xff]   ;;  %v8019_v61 = vld [vmem:[#allocation8 + $0x88] sm:$0xff]  }
 0x20b   : > { %v3102_v42 = vrot.slane %v3101_v58, 4  ;;  %v3111_v51 = vor.u32 %v3110_v60, %v3106_v57  ;;  %v3116_v17 = vrot.slane %v3114_v46, 5  ;;  %7181 = vmatprep.mubr.bf16.mxu0 %v6548_v48  ;;  %v3128_v45 = vshll.u32 %v8937_v47, 16  ;;  %v8974_v46 = vld [vmem:[#allocation2 + $0x50] sm:$0x1] }
 0x20c   : > { %v3093_v32 = vsel %vm8649_vm2, %v3088_v10, %v3092_v31  ;;  %v3121_v20 = vrot.slane %v3119_v13, 4  ;;  %v3124_v21 = vrot.slane %v3122_v14, 5  ;;  %v3132_v23 = vshrl.u32 %v8937_v47, 16  ;;  %v8093_v10 = vld [vmem:[#allocation2 + $0x24] sm:$0xf] }
 0x20d   : > { %v6637_v25 = vcombine.low %v3083_v9, %v3093_v32  ;;  %v3107_v24 = vsel %vm8649_vm2, %v3102_v42, %v3106_v57  ;;  %v3112_v26 = vrot.slane %v3111_v51, 4  ;;  %v3130_v27 = vrot.slane %v3128_v45, 5  ;;  %v8979_v13 = vld [vmem:[#allocation2 + $0x28] sm:$0xf]  ;;  %v8982_v32 = vld [vmem:[#allocation8 + $0x158] sm:$0xff]  }
 0x20e   : > { %v3125_v63 = vor.u32 %v3124_v21, %v3121_v20  ;;  %v3134_v0 = vrot.slane %v3132_v23, 4  ;;  %v3138_v48 = vshll.u32 %v8946_v8, 16  ;;  %v6550_v40 = vcombine.low %v8091_v35, %v8964_v38 }
 0x20f   : > { %7326 = vmatmul.mubr.bf16.vlgmr.msra.gmra.mrb[16].mxu1 %v6637_v25  ;;  %v3117_v41 = vsel %vm8649_vm2, %v3112_v26, %v3116_v17  ;;  %v3143_v34 = vshrl.u32 %v3010_v15, 16  ;;  %v3146_v43 = vshll.u32 %v3010_v15, 16  ;;  %v3152_v31 = vshll.u32 %v8950_v16, 16  ;;  %v3016_v15 = vld [vmem:[#allocation2 + $0x54] sm:$0xf] }
 0x210   : > { %7358 = vmatpush3.bf16.msra.mxu1 %v8843_v37  ;;  %v6638_v50 = vcombine.low %v3107_v24, %v3117_v41  ;;  %v3126_v52 = vrot.slane %v3125_v63, 4  ;;  %v3135_v54 = vor.u32 %v3134_v0, %v3130_v27  ;;  %v3140_v55 = vrot.slane %v3138_v48, 5  ;;  %v8989_v25 = vld [vmem:[#allocation2 + $0x58] sm:$0xf]  ;;  %v8022_v24 = vld [vmem:[#allocation8 + $0x90] sm:$0xff]  }
 0x211   : > { %7359 = vmatprep.subr.bf16.mxu1 %v8003_v59  ;;  %v3145_v5 = vrot.slane %v3143_v34, 4  ;;  %v3148_v57 = vrot.slane %v3146_v43, 5  ;;  %v3154_v58 = vrot.slane %v3152_v31, 5  ;;  %v3156_v60 = vshrl.u32 %v8950_v16, 16  ;;  %v8095_v34 = vld [vmem:[#allocation2 + $0x30] sm:$0xf] }
 0x212   : > { %7329 = vmatprep.mubr.bf16.mxu1 %v6638_v50  ;;  %7182 = vmatmul.mubr.bf16.vlgmr.msra.gmra.mrb[32].mxu0 %v6549_v6  ;;  %v3131_v2 = vsel %vm8649_vm2, %v3126_v52, %v3130_v27  ;;  %v3136_v9 = vrot.slane %v3135_v54, 4  ;;  %v3162_v37 = vshll.u32 %v8961_v33, 16  ;;  %v6551_v14 = vcombine.low %v8093_v10, %v8979_v13  ;;  %v8996_v43 = vld [vmem:[#allocation2 + $0x34] sm:$0xf]  ;;  %v3019_v52 = vld [vmem:[#allocation2 + $0x60] sm:$0xf] }
 0x213   : > { %7185 = vmatprep.mubr.bf16.mxu0 %v6550_v40  ;;  %v3149_v42 = vor.u32 %v3148_v57, %v3145_v5  ;;  %v3158_v51 = vrot.slane %v3156_v60, 4  ;;  %v3167_v17 = vshrl.u32 %v3013_v30, 16  ;;  %v3170_v45 = vshll.u32 %v3013_v30, 16  ;;  %7214 = vmatpush3.bf16.msra.mxu0 %v8826_v11  ;;  %v8999_v54 = vld [vmem:[#allocation8 + $0x160] sm:$0xff]   ;;  %v9006_v10 = vld [vmem:[#allocation2 + $0x64] sm:$0xf] }
 0x214   : > { %v3141_v6 = vsel %vm8649_vm2, %v3136_v9, %v3140_v55  ;;  %7360 = vmatpush3.bf16.msra.mxu1 %v8003_v59  ;;  %v3164_v20 = vrot.slane %v3162_v37, 5  ;;  %v3176_v21 = vshll.u32 %v8970_v49, 16  ;;  %v3180_v23 = vshrl.u32 %v8970_v49, 16  ;;  %7215 = vmatprep.subr.bf16.mxu0 %v8019_v61  ;;  %v8992_v59 = vld [vmem:[#allocation2 + $0x5c] sm:$0x1] }
 0x215   : > { %v6639_v26 = vcombine.low %v3131_v2, %v3141_v6  ;;  %v3150_v27 = vrot.slane %v3149_v42, 4  ;;  %v3159_v63 = vor.u32 %v3158_v51, %v3154_v58  ;;  %7361 = vmatprep.subr.bf16.mxu1 %v8006_v44  ;;  %v3169_v0 = vrot.slane %v3167_v17, 4  ;;  %v8024_v42 = vld [vmem:[#allocation8 + $0x98] sm:$0xff]  }
 0x216   : > { %v3172_v48 = vrot.slane %v3170_v45, 5  ;;  %v3178_v11 = vrot.slane %v3176_v21, 5  ;;  %v3182_v35 = vrot.slane %v3180_v23, 4  ;;  %v3186_v40 = vshll.u32 %v8974_v46, 16  ;;  %v8097_v21 = vld [vmem:[#allocation2 + $0x3c] sm:$0xf] }
 0x217   : > { %7330 = vmatmul.mubr.bf16.gmra.mrb[20].mxu1 %v6639_v26  ;;  %v3155_v30 = vsel %vm8649_vm2, %v3150_v27, %v3154_v58  ;;  %v3160_v41 = vrot.slane %v3159_v63, 4  ;;  %v6552_v31 = vcombine.low %v8095_v34, %v8996_v43  ;;  %v3191_v50 = vshrl.u32 %v3016_v15, 16  ;;  %7216 = vmatpush3.bf16.msra.mxu0 %v8019_v61  ;;  %v9011_v23 = vld [vmem:[#allocation2 + $0x40] sm:$0xf]  ;;  %v3022_v27 = vld [vmem:[#allocation2 + $0x6c] sm:$0xf] }
 0x218   : > { %v3173_v55 = vor.u32 %v3172_v48, %v3169_v0  ;;  %v3183_v5 = vor.u32 %v3182_v35, %v3178_v11  ;;  %v3188_v57 = vrot.slane %v3186_v40, 5  ;;  %7362 = vmatpush3.bf16.msra.mxu1 %v8006_v44  ;;  %v3194_v60 = vshll.u32 %v3016_v15, 16  ;;  %7217 = vmatprep.subr.bf16.mxu0 %v8022_v24  ;;  %v9008_v15 = vld [vmem:[#allocation2 + $0x68] sm:$0x1]  ;;  %v8015_v63 = vld [vmem:[#allocation8 + $0x168] sm:$0xff]   ;;  %v8027_v40 = vld [vmem:[#allocation8 + $0xa0] sm:$0xff]  }
 0x219   : > { %v3165_v58 = vsel %vm8649_vm2, %v3160_v41, %v3164_v20  ;;  %v3193_v2 = vrot.slane %v3191_v50, 4  ;;  %v3200_v9 = vshll.u32 %v8989_v25, 16  ;;  %v3204_v37 = vshrl.u32 %v8989_v25, 16  ;;  %7363 = vmatprep.subr.bf16.mxu1 %v8982_v32  ;;  %v9019_v50 = vld [vmem:[#allocation2 + $0x70] sm:$0xf] }
 0x21a   : > { %v6640_v61 = vcombine.low %v3155_v30, %v3165_v58  ;;  %7186 = vmatmul.mubr.bf16.gmra.mrb[36].mxu0 %v6551_v14  ;;  %v3174_v51 = vrot.slane %v3173_v55, 4  ;;  %v3184_v17 = vrot.slane %v3183_v5, 4  ;;  %v3196_v44 = vrot.slane %v3194_v60, 5 }
 0x21b   : > { %7189 = vmatprep.mubr.bf16.mxu0 %v6552_v31  ;;  %v3202_v45 = vrot.slane %v3200_v9, 5  ;;  %v3206_v6 = vrot.slane %v3204_v37, 4  ;;  %v3210_v20 = vshll.u32 %v8992_v59, 16  ;;  %v6553_v26 = vcombine.low %v8097_v21, %v9011_v23  ;;  %7218 = vmatpush3.bf16.msra.mxu0 %v8022_v24  ;;  %v3025_v37 = vld [vmem:[#allocation2 + $0x78] sm:$0xf] }
 0x21c   : > { %7333 = vmatprep.mubr.bf16.mxu1 %v6640_v61  ;;  %v3179_v14 = vsel %vm8649_vm2, %v3174_v51, %v3178_v11  ;;  %v3189_v0 = vsel %vm8649_vm2, %v3184_v17, %v3188_v57  ;;  %v3197_v48 = vor.u32 %v3196_v44, %v3193_v2  ;;  %v3215_v35 = vshrl.u32 %v3019_v52, 16  ;;  %7364 = vmatpush3.bf16.msra.mxu1 %v8982_v32  ;;  %v9024_v57 = vld [vmem:[#allocation2 + $0x74] sm:$0x1]  ;;  %v8099_v2 = vld [vmem:[#allocation2 + $0x48] sm:$0xf] }
 0x21d   : > { %v6641_v30 = vcombine.low %v3179_v14, %v3189_v0  ;;  %v3207_v41 = vor.u32 %v3206_v6, %v3202_v45  ;;  %v3212_v34 = vrot.slane %v3210_v20, 5  ;;  %v3218_v31 = vshll.u32 %v3019_v52, 16  ;;  %7365 = vmatprep.subr.bf16.mxu1 %v8999_v54  ;;  %7219 = vmatprep.subr.bf16.mxu0 %v8024_v42  ;;  %v9027_v52 = vld [vmem:[#allocation2 + $0x4c] sm:$0xf]  ;;  %v8029_v20 = vld [vmem:[#allocation8 + $0xa8] sm:$0xff]  }
 0x21e   : > { %v3198_v24 = vrot.slane %v3197_v48, 4  ;;  %v3217_v55 = vrot.slane %v3215_v35, 4  ;;  %v3224_v11 = vshll.u32 %v9006_v10, 16  ;;  %v3228_v5 = vshrl.u32 %v9006_v10, 16  ;;  %v8020_v61 = vld [vmem:[#allocation8 + $0x170] sm:$0xff]  }
 0x21f   : > { %7334 = vmatmul.mubr.bf16.gmra.mrb[24].mxu1 %v6641_v30  ;;  %v3208_v32 = vrot.slane %v3207_v41, 4  ;;  %v3220_v60 = vrot.slane %v3218_v31, 5  ;;  %v3234_v58 = vshll.u32 %v9008_v15, 16  ;;  %v6554_v9 = vcombine.low %v8099_v2, %v9027_v52  ;;  %7220 = vmatpush3.bf16.msra.mxu0 %v8024_v42 }
 0x220   : > { %v3203_v51 = vsel %vm8649_vm2, %v3198_v24, %v3202_v45  ;;  %v3226_v17 = vrot.slane %v3224_v11, 5  ;;  %v3230_v44 = vrot.slane %v3228_v5, 4  ;;  %v3239_v6 = vshrl.u32 %v3022_v27, 16  ;;  %7366 = vmatpush3.bf16.msra.mxu1 %v8999_v54  ;;  %7221 = vmatprep.subr.bf16.mxu0 %v8027_v40  ;;  %v9038_v11 = vld [vmem:[#allocation2 + $0x7c] sm:$0xf] }
 0x221   : > { %v3213_v21 = vsel %vm8649_vm2, %v3208_v32, %v3212_v34  ;;  %v3221_v14 = vor.u32 %v3220_v60, %v3217_v55  ;;  %v3236_v0 = vrot.slane %v3234_v58, 5  ;;  %v3242_v48 = vshll.u32 %v3022_v27, 16  ;;  %7367 = vmatprep.subr.bf16.mxu1 %v8015_v63  ;;  %v8101_v55 = vld [vmem:[#allocation2 + $0x54] sm:$0xf]  ;;  %v9040_v5 = vld [vmem:[#allocation2 + $0x58] sm:$0xf] }
 0x222   : > { %v6642_v35 = vcombine.low %v3203_v51, %v3213_v21  ;;  %7190 = vmatmul.mubr.bf16.gmra.mrb[40].mxu0 %v6553_v26  ;;  %v3231_v42 = vor.u32 %v3230_v44, %v3226_v17  ;;  %v3241_v30 = vrot.slane %v3239_v6, 4  ;;  %v3248_v45 = vshll.u32 %v9019_v50, 16  ;;  %v8032_v60 = vld [vmem:[#allocation8 + $0xb0] sm:$0xff]   ;;  %v9045_v44 = vld [vmem:[#allocation2 + $0x80] sm:$0x1] }
 0x223   : > { %v3222_v41 = vrot.slane %v3221_v14, 4  ;;  %7193 = vmatprep.mubr.bf16.mxu0 %v6554_v9  ;;  %v3244_v31 = vrot.slane %v3242_v48, 5  ;;  %v3252_v54 = vshrl.u32 %v9019_v50, 16  ;;  %v3258_v24 = vshll.u32 %v9024_v57, 16  ;;  %7222 = vmatpush3.bf16.msra.mxu0 %v8027_v40  ;;  %v8025_v40 = vld [vmem:[#allocation8 + $0x178] sm:$0xff]  }
 0x224   : > { %7337 = vmatprep.mubr.bf16.mxu1 %v6642_v35  ;;  %v3232_v34 = vrot.slane %v3231_v42, 4  ;;  %v3250_v27 = vrot.slane %v3248_v45, 5  ;;  %v6555_v26 = vcombine.low %v8101_v55, %v9040_v5  ;;  %v3263_v32 = vshrl.u32 %v3025_v37, 16  ;;  %7368 = vmatpush3.bf16.msra.mxu1 %v8015_v63  ;;  %v3028_v63 = vld [vmem:[#allocation2 + $0x84] sm:$0xf] }
 0x225   : > { %v3227_v58 = vsel %vm8649_vm2, %v3222_v41, %v3226_v17  ;;  %v3245_v2 = vor.u32 %v3244_v31, %v3241_v30  ;;  %v3254_v9 = vrot.slane %v3252_v54, 4  ;;  %v3260_v51 = vrot.slane %v3258_v24, 5  ;;  %7369 = vmatprep.subr.bf16.mxu1 %v8020_v61  ;;  %7223 = vmatprep.subr.bf16.mxu0 %v8029_v20  ;;  %v9051_v30 = vld [vmem:[#allocation2 + $0x88] sm:$0xf]  ;;  %v8103_v24 = vld [vmem:[#allocation2 + $0x60] sm:$0xf] }
 0x226   : > { %v3237_v6 = vsel %vm8649_vm2, %v3232_v34, %v3236_v0  ;;  %v3265_v21 = vrot.slane %v3263_v32, 4  ;;  %v3266_v14 = vshll.u32 %v3025_v37, 16  ;;  %v3272_v48 = vshll.u32 %v9038_v11, 16  ;;  %v8033_v37 = vld [vmem:[#allocation8 + $0xb8] sm:$0xff]  }
 0x227   : > { %v6643_v35 = vcombine.low %v3227_v58, %v3237_v6  ;;  %v3246_v42 = vrot.slane %v3245_v2, 4  ;;  %v3255_v45 = vor.u32 %v3254_v9, %v3250_v27  ;;  %v3276_v17 = vshrl.u32 %v9038_v11, 16  ;;  %7224 = vmatpush3.bf16.msra.mxu0 %v8029_v20  ;;  %v9057_v2 = vld [vmem:[#allocation8 + $0x180] sm:$0xff]   ;;  %v9059_v6 = vld [vmem:[#allocation2 + $0x8c] sm:$0x1] }
 0x228   : > { %v3268_v41 = vrot.slane %v3266_v14, 5  ;;  %v3274_v31 = vrot.slane %v3272_v48, 5  ;;  %v3282_v54 = vshll.u32 %v9045_v44, 16  ;;  %v6556_v0 = vcombine.low %v8103_v24, %v8841_v36  ;;  %7370 = vmatpush3.bf16.msra.mxu1 %v8020_v61  ;;  %7225 = vmatprep.subr.bf16.mxu0 %v8032_v60 }
 0x229   : > { %7338 = vmatmul.mubr.bf16.gmra.mrb[28].mxu1 %v6643_v35  ;;  %v3251_v34 = vsel %vm8649_vm2, %v3246_v42, %v3250_v27  ;;  %v3256_v55 = vrot.slane %v3255_v45, 4  ;;  %v3278_v32 = vrot.slane %v3276_v17, 4  ;;  %v3287_v58 = vshrl.u32 %v3028_v63, 16  ;;  %7371 = vmatprep.subr.bf16.mxu1 %v8025_v40  ;;  %v3031_v42 = vld [vmem:[#allocation2 + $0x90] sm:$0xf] }
 0x22a   : > { %7194 = vmatmul.mubr.bf16.gmra.mrb[44].mxu0 %v6555_v26  ;;  %v3269_v20 = vor.u32 %v3268_v41, %v3265_v21  ;;  %v3284_v9 = vrot.slane %v3282_v54, 5  ;;  %v3290_v14 = vshll.u32 %v3028_v63, 16  ;;  %v3296_v36 = vshll.u32 %v9051_v30, 16  ;;  %v9065_v41 = vld [vmem:[#allocation2 + $0x94] sm:$0xf] }
 0x22b   : > { %v3261_v61 = vsel %vm8649_vm2, %v3256_v55, %v3260_v51  ;;  %v3279_v48 = vor.u32 %v3278_v32, %v3274_v31  ;;  %7197 = vmatprep.mubr.bf16.mxu0 %v6556_v0  ;;  %v3289_v27 = vrot.slane %v3287_v58, 4  ;;  %v3300_v35 = vshrl.u32 %v9051_v30, 16  ;;  %7226 = vmatpush3.bf16.msra.mxu0 %v8032_v60  ;;  %v8104_v51 = vld [vmem:[#allocation2 + $0x6c] sm:$0xf]  ;;  %v9072_v55 = vld [vmem:[#allocation2 + $0x98] sm:$0x1] }
 0x22c   : > { %v6644_v45 = vcombine.low %v3251_v34, %v3261_v61  ;;  %v3270_v17 = vrot.slane %v3269_v20, 4  ;;  %v3292_v26 = vrot.slane %v3290_v14, 5  ;;  %v3298_v21 = vrot.slane %v3296_v36, 5  ;;  %7372 = vmatpush3.bf16.msra.mxu1 %v8025_v40  ;;  %7227 = vmatprep.subr.bf16.mxu0 %v8033_v37  ;;  %10215 = vst [vmem:[#allocation17_spill] sm:$0xff] %v9072_v55  ;;  %v3034_v61 = vld [vmem:[#allocation2 + $0x9c] sm:$0xf] }
 0x22d   : > { %v3280_v63 = vrot.slane %v3279_v48, 4  ;;  %v3302_v54 = vrot.slane %v3300_v35, 4  ;;  %v3306_v24 = vshll.u32 %v9059_v6, 16  ;;  %v6557_v0 = vcombine.low %v8104_v51, %v8858_v4  ;;  %7405 = vmatprep.subr.bf16.mxu1 %v9057_v2  ;;  %v9077_v51 = vld [vmem:[#allocation8 + $0xc0] sm:$0xff]  }
 0x22e   : > { %7341 = vmatprep.mubr.bf16.mxu1 %v6644_v45  ;;  %v3275_v60 = vsel %vm8649_vm2, %v3270_v17, %v3274_v31  ;;  %v3293_v34 = vor.u32 %v3292_v26, %v3289_v27  ;;  %v3311_v32 = vshrl.u32 %v3031_v42, 16  ;;  %v3314_v58 = vshll.u32 %v3031_v42, 16  ;;  %v9082_v17 = vld [vmem:[#allocation2 + $0xa0] sm:$0xf] }
 0x22f   : > { %v3285_v40 = vsel %vm8649_vm2, %v3280_v63, %v3284_v9  ;;  %v3303_v20 = vor.u32 %v3302_v54, %v3298_v21  ;;  %v3308_v14 = vrot.slane %v3306_v24, 5  ;;  %v3320_v36 = vshll.u32 %v9065_v41, 16  ;;  %7228 = vmatpush3.bf16.msra.mxu0 %v8033_v37  ;;  %v8106_v63 = vld [vmem:[#allocation2 + $0x78] sm:$0xf]  ;;  %v9087_v24 = vld [vmem:[#allocation2 + $0xa4] sm:$0x1] }
 0x230   : > { %v6645_v4 = vcombine.low %v3275_v60, %v3285_v40  ;;  %v3294_v48 = vrot.slane %v3293_v34, 4  ;;  %v3313_v35 = vrot.slane %v3311_v32, 4  ;;  %v3316_v45 = vrot.slane %v3314_v58, 5  ;;  %7261 = vmatprep.subr.bf16.mxu0 %v9077_v51  ;;  %10216 = vst [vmem:[#allocation18_spill] sm:$0xff] %v9087_v24 }
 0x231   : > { %v3304_v31 = vrot.slane %v3303_v20, 4  ;;  %v3322_v27 = vrot.slane %v3320_v36, 5  ;;  %v3324_v42 = vshrl.u32 %v9065_v41, 16  ;;  %v3330_v9 = vshll.u32 %v9072_v55, 16  ;;  %v3037_v20 = vld [vmem:[#allocation2 + $0xa8] sm:$0xf] }
 0x232   : > { %7342 = vmatmul.mubr.bf16.gmra.mrb[0].mxu1 %v6645_v4  ;;  %v3299_v37 = vsel %vm8649_vm2, %v3294_v48, %v3298_v21  ;;  %7198 = vmatmul.mubr.bf16.gmra.mrb[48].mxu0 %v6557_v0  ;;  %v3317_v26 = vor.u32 %v3316_v45, %v3313_v35  ;;  %v6558_v54 = vcombine.low %v8106_v63, %v8864_v22  ;;  %v3335_v60 = vshrl.u32 %v3034_v61, 16  ;;  %v9094_v45 = vld [vmem:[#allocation2 + $0xac] sm:$0xf] }
 0x233   : > { %v3309_v34 = vsel %vm8649_vm2, %v3304_v31, %v3308_v14  ;;  %v3326_v32 = vrot.slane %v3324_v42, 4  ;;  %v3332_v58 = vrot.slane %v3330_v9, 5  ;;  %v3338_v40 = vshll.u32 %v3034_v61, 16  ;;  %10217 = vst [vmem:[#allocation19_spill] sm:$0xff] %v9094_v45  ;;  %v8107_v31 = vld [vmem:[#allocation2 + $0x84] sm:$0xf] }
 0x234   : > { %v6646_v36 = vcombine.low %v3299_v37, %v3309_v34  ;;  %v3318_v4 = vrot.slane %v3317_v26, 4  ;;  %7201 = vmatprep.mubr.bf16.mxu0 %v6558_v54  ;;  %v3337_v55 = vrot.slane %v3335_v60, 4  ;;  %v3344_v21 = vshll.u32 %v9082_v17, 16  ;;  %v9099_v9 = vld [vmem:[#allocation2 + $0xb0] sm:$0x1] }
 0x235   : > { %v3327_v0 = vor.u32 %v3326_v32, %v3322_v27  ;;  %v3340_v48 = vrot.slane %v3338_v40, 5  ;;  %v3348_v22 = vshrl.u32 %v9082_v17, 16  ;;  %v3354_v35 = vshll.u32 %v9087_v24, 16  ;;  %10218 = vst [vmem:[#allocation20_spill] sm:$0xff] %v9099_v9  ;;  %v9106_v24 = vld [vmem:[#allocation2 + $0xbc] sm:$0x1] }
 0x236   : > { %7345 = vmatprep.mubr.bf16.mxu1 %v6646_v36  ;;  %v3323_v14 = vsel %vm8649_vm2, %v3318_v4, %v3322_v27  ;;  %v3346_v61 = vrot.slane %v3344_v21, 5  ;;  %v6559_v42 = vcombine.low %v8107_v31, %v8872_v56  ;;  %v3359_v37 = vshrl.u32 %v3037_v20, 16  ;;  %v3040_v31 = vld [vmem:[#allocation2 + $0xb4] sm:$0xf]  ;;  %10219 = vst [vmem:[#allocation21_spill] sm:$0xff] %v9106_v24 }
 0x237   : > { %v3328_v26 = vrot.slane %v3327_v0, 4  ;;  %v3341_v63 = vor.u32 %v3340_v48, %v3337_v55  ;;  %v3350_v54 = vrot.slane %v3348_v22, 4  ;;  %v3356_v60 = vrot.slane %v3354_v35, 5 }
 0x238   : > { %v3361_v34 = vrot.slane %v3359_v37, 4  ;;  %v3362_v32 = vshll.u32 %v3037_v20, 16  ;;  %v3368_v40 = vshll.u32 %v9094_v45, 16  ;;  %v3372_v36 = vshrl.u32 %v9094_v45, 16  ;;  %v9108_v20 = vld [vmem:[#allocation2 + $0xb8] sm:$0xf] }
 0x239   : > { %v3333_v27 = vsel %vm8649_vm2, %v3328_v26, %v3332_v58  ;;  %v3342_v4 = vrot.slane %v3341_v63, 4  ;;  %v3351_v21 = vor.u32 %v3350_v54, %v3346_v61  ;;  %v3378_v56 = vshll.u32 %v9099_v9, 16  ;;  %10220 = vst [vmem:[#allocation22_spill] sm:$0xff] %v9108_v20  ;;  %v8108_v26 = vld [vmem:[#allocation2 + $0x90] sm:$0xf] }
 0x23a   : > { %v6647_v0 = vcombine.low %v3323_v14, %v3333_v27  ;;  %7202 = vmatmul.mubr.bf16.gmra.mrb[52].mxu0 %v6559_v42  ;;  %v3364_v55 = vrot.slane %v3362_v32, 5  ;;  %v3370_v48 = vrot.slane %v3368_v40, 5  ;;  %v3374_v22 = vrot.slane %v3372_v36, 4  ;;  %v9112_v63 = vld [vmem:[#allocation2 + $0x94] sm:$0xf] }
 0x23b   : > { %v3347_v35 = vsel %vm8649_vm2, %v3342_v4, %v3346_v61  ;;  %v3352_v58 = vrot.slane %v3351_v21, 4  ;;  %v3380_v37 = vrot.slane %v3378_v56, 5  ;;  %10221 = vst [vmem:[#allocation23_spill] sm:$0xff] %v9112_v63  ;;  %v6560_v54 = vcombine.low %v8108_v26, %v9112_v63  ;;  %v3043_v21 = vld [vmem:[#allocation2 + $0xc0] sm:$0xf] }
 0x23c   : > { %7346 = vmatmul.mubr.bf16.gmra.mrb[4].mxu1 %v6647_v0  ;;  %v3365_v14 = vor.u32 %v3364_v55, %v3361_v34  ;;  %v3375_v42 = vor.u32 %v3374_v22, %v3370_v48  ;;  %v3383_v32 = vshrl.u32 %v3040_v31, 16  ;;  %v3386_v40 = vshll.u32 %v3040_v31, 16  ;;  %v9120_v0 = vld [vmem:[#allocation2 + $0xc8] sm:$0x1]  ;;  %v9122_v63 = vld [vmem:[#allocation2 + $0xc4] sm:$0xf] }
 0x23d   : > { %v3357_v36 = vsel %vm8649_vm2, %v3352_v58, %v3356_v60  ;;  %7205 = vmatprep.mubr.bf16.mxu0 %v6560_v54  ;;  %v3392_v27 = vshll.u32 %v9108_v20, 16  ;;  %v3396_v61 = vshrl.u32 %v9108_v20, 16  ;;  %v3402_v4 = vshll.u32 %v9106_v24, 16  ;;  %v8110_v54 = vld [vmem:[#allocation2 + $0x9c] sm:$0xf] }
 0x23e   : > { %v6648_v56 = vcombine.low %v3347_v35, %v3357_v36  ;;  %v3366_v9 = vrot.slane %v3365_v14, 4  ;;  %v3376_v45 = vrot.slane %v3375_v42, 4  ;;  %v3385_v26 = vrot.slane %v3383_v32, 4  ;;  %v9128_v35 = vld [vmem:[#allocation2 + $0xa0] sm:$0xf] }
 0x23f   : > { %v3388_v34 = vrot.slane %v3386_v40, 5  ;;  %v3394_v55 = vrot.slane %v3392_v27, 5  ;;  %v3398_v31 = vrot.slane %v3396_v61, 4  ;;  %v3404_v22 = vrot.slane %v3402_v4, 5  ;;  %v3752_v61 = vld [vmem:[#allocation2 + $0xc] sm:$0xe] }
 0x240   : > { %7349 = vmatprep.mubr.bf16.mxu1 %v6648_v56  ;;  %v3371_v60 = vsel %vm8649_vm2, %v3366_v9, %v3370_v48  ;;  %v3381_v58 = vsel %vm8649_vm2, %v3376_v45, %v3380_v37  ;;  %v6561_v14 = vcombine.low %v8110_v54, %v9128_v35  ;;  %v3407_v42 = vshrl.u32 %v3043_v21, 16  ;;  %v8112_v20 = vld [vmem:[#allocation2 + $0xa8] sm:$0xf] }
 0x241   : > { %v6649_v32 = vcombine.low %v3371_v60, %v3381_v58  ;;  %v3389_v40 = vor.u32 %v3388_v34, %v3385_v26  ;;  %v3399_v36 = vor.u32 %v3398_v31, %v3394_v55  ;;  %v3410_v27 = vshll.u32 %v3043_v21, 16 }
 0x242   : > { %7206 = vmatmul.mubr.bf16.gmra.mrb[56].mxu0 %v6561_v14  ;;  %v3409_v4 = vrot.slane %v3407_v42, 4  ;;  %v3416_v56 = vshll.u32 %v9122_v63, 16  ;;  %v3420_v9 = vshrl.u32 %v9122_v63, 16  ;;  %v3426_v48 = vshll.u32 %v9120_v0, 16 }
 0x243   : > { %v3390_v45 = vrot.slane %v3389_v40, 4  ;;  %v3400_v37 = vrot.slane %v3399_v36, 4  ;;  %v3412_v24 = vrot.slane %v3410_v27, 5  ;;  %v6562_v54 = vcombine.low %v8112_v20, %v8888_v62  ;;  %v3753_v20 = vld [vmem:[#allocation2 + $0x18] sm:$0xe] }
 0x244   : > { %7350 = vmatmul.mubr.bf16.gmra.mrb[8].mxu1 %v6649_v32  ;;  %v3418_v60 = vrot.slane %v3416_v56, 5  ;;  %v3422_v26 = vrot.slane %v3420_v9, 4  ;;  %v6660_v34 = vrot.slane %v3752_v61, 9  ;;  %v3818_v62 = vrot.slane %v8898_v53, 5  ;;  %v3754_v36 = vld [vmem:[#allocation2 + $0x24] sm:$0xe] }
 0x245   : > { %v3395_v21 = vsel %vm8649_vm2, %v3390_v45, %v3394_v55  ;;  %v3405_v31 = vsel %vm8649_vm2, %v3400_v37, %v3404_v22  ;;  %v3413_v58 = vor.u32 %v3412_v24, %v3409_v4  ;;  %7209 = vmatprep.mubr.bf16.mxu0 %v6562_v54  ;;  %v3428_v40 = vrot.slane %v3426_v48, 5  ;;  %v2127_v9 = vld [vmem:[#allocation2] sm:$0xe]  ;;  %v2128_v54 = vld [vmem:[#allocation2 + $0xc] sm:$0xe] }
 0x246   : > { %v6650_v42 = vcombine.low %v3395_v21, %v3405_v31  ;;  %v3423_v32 = vor.u32 %v3422_v26, %v3418_v60  ;;  %v3820_v55 = vrot.slane %v3818_v62, 4  ;;  %v3821_v61 = vrot.slane %v8894_v12, 5 }
 0x247   : > { %v3414_v27 = vrot.slane %v3413_v58, 4  ;;  %v6563_v24 = vcombine.low %v8902_v28, %v8908_v39  ;;  %v3819_v4 = vsel %vm9141_vm8, %v6660_v34, %v3818_v62  ;;  %v6661_v56 = vrot.slane %v3753_v20, 9  ;;  %v8113_v62 = vld [vmem:[#allocation2 + $0x4] sm:$0xf] }
 0x248   : > { %7353 = vmatprep.mubr.bf16.mxu1 %v6650_v42  ;;  %v3424_v22 = vrot.slane %v3423_v32, 4  ;;  %v3825_v53 = vrot.slane %v8916_v1, 5  ;;  %v3822_v45 = vsel %vm9141_vm8, %v3820_v55, %v3821_v61  ;;  %v6662_v37 = vrot.slane %v3754_v36, 9  ;;  %v3755_v36 = vld [vmem:[#allocation2 + $0x30] sm:$0xe] }
 0x249   : > { %v3419_v48 = vsel %vm8649_vm2, %v3414_v27, %v3418_v60  ;;  %v3832_v12 = vrot.slane %v8928_v19, 5  ;;  %v3828_v26 = vrot.slane %v8921_v7, 5  ;;  %v3835_v1 = vrot.slane %v8932_v29, 5  ;;  %v8114_v19 = vld [vmem:[#allocation2 + $0x8] sm:$0x1] }
 0x24a   : > { %v3429_v28 = vsel %vm8649_vm2, %v3424_v22, %v3428_v40  ;;  %7210 = vmatmul.mubr.bf16.gmra.mrb[60].mxu0 %v6563_v24  ;;  %v3827_v39 = vrot.slane %v3825_v53, 4  ;;  %v6676_v21 = vcombine.low %v3819_v4, %v3822_v45  ;;  %v6572_v60 = vrot.slane %v2127_v9, 9  ;;  %v2129_v27 = vld [vmem:[#allocation2 + $0x18] sm:$0xe]  ;;  %v8115_v9 = vld [vmem:[#allocation2 + $0x14] sm:$0x1] }
 0x24b   : > { %v6651_v34 = vcombine.low %v3419_v48, %v3429_v28  ;;  %v3834_v31 = vrot.slane %v3832_v12, 4  ;;  %v2180_v20 = vrot.slane %v8113_v62, 5  ;;  %v2183_v42 = vrot.slane %v8114_v19, 5  ;;  %v3757_v62 = vld [vmem:[#allocation2 + $0x48] sm:$0xe] }
 0x24c   : > { %v3829_v58 = vsel %vm9141_vm8, %v3827_v39, %v3828_v26  ;;  %v6573_v32 = vrot.slane %v2128_v54, 9  ;;  %v3826_v40 = vsel %vm9141_vm8, %v6661_v56, %v3825_v53  ;;  %v3833_v7 = vsel %vm9141_vm8, %v6662_v37, %v3832_v12  ;;  %v3756_v54 = vld [vmem:[#allocation2 + $0x3c] sm:$0xe] }
 0x24d   : > { %7354 = vmatmul.mubr.bf16.gmra.mrb[12].mxu1 %v6651_v34  ;;  %v2187_v29 = vrot.slane %v8943_v3, 5  ;;  %v6677_v55 = vcombine.low %v3826_v40, %v3829_v58  ;;  %v3836_v61 = vsel %vm9141_vm8, %v3834_v31, %v3835_v1  ;;  %v2181_v24 = vsel %vm9141_vm8, %v6572_v60, %v2180_v20  ;;  %v2130_v34 = vld [vmem:[#allocation2 + $0x24] sm:$0xe]  ;;  %v8116_v60 = vld [vmem:[#allocation2 + $0x20] sm:$0x1] }
 0x24e   : > { %7373 = vmatprep.mubr.bf16.mxu1 %v6676_v21  ;;  %v2182_v22 = vrot.slane %v2180_v20, 4  ;;  %v2190_v48 = vrot.slane %v8115_v9, 5  ;;  %v6663_v45 = vrot.slane %v3755_v36, 9  ;;  %v3839_v56 = vrot.slane %v8937_v47, 5  ;;  %v8034_v20 = vld [vmem:[#allocation8 + $0x188] sm:$0xff]  }
 0x24f   : > { %v2189_v4 = vrot.slane %v2187_v29, 4  ;;  %v2188_v3 = vsel %vm9141_vm8, %v6573_v32, %v2187_v29  ;;  %v6574_v37 = vrot.slane %v2129_v27, 9  ;;  %v2194_v12 = vrot.slane %v8964_v38, 5  ;;  %v2131_v29 = vld [vmem:[#allocation2 + $0x30] sm:$0xe] }
 0x250   : > { %v2184_v53 = vsel %vm9141_vm8, %v2182_v22, %v2183_v42  ;;  %v3841_v26 = vrot.slane %v3839_v56, 4  ;;  %v3842_v1 = vrot.slane %v8946_v8, 5  ;;  %v6678_v21 = vcombine.low %v3833_v7, %v3836_v61  ;;  %v8117_v9 = vld [vmem:[#allocation2 + $0x2c] sm:$0x1] }
 0x251   : > { %v6588_v28 = vcombine.low %v2181_v24, %v2184_v53  ;;  %v2191_v39 = vsel %vm9141_vm8, %v2189_v4, %v2190_v48  ;;  %v2196_v31 = vrot.slane %v2194_v12, 4  ;;  %v2197_v58 = vrot.slane %v8116_v60, 5  ;;  %v8120_v60 = vld [vmem:[#allocation8 + $0xd0] sm:$0xff]  }
 0x252   : > { %v6589_v47 = vcombine.low %v2188_v3, %v2191_v39  ;;  %v9183_v38 = vsel %vm9141_vm8, %v6663_v45, %v3839_v56  ;;  %v9187_v19 = vsel %vm9141_vm8, %v3841_v26, %v3842_v1  ;;  %v6664_v42 = vrot.slane %v3756_v54, 9  ;;  %v3758_v56 = vld [vmem:[#allocation2 + $0x54] sm:$0xe]  ;;  %v8118_v54 = vld [vmem:[#allocation8 + $0xc8] sm:$0xff]  }
 0x253   : > { %7229 = vmatprep.mubr.bf16.mxu0 %v6588_v28  ;;  %v3846_v8 = vrot.slane %v8950_v16, 5  ;;  %v2195_v32 = vsel %vm9141_vm8, %v6574_v37, %v2194_v12  ;;  %v2198_v36 = vsel %vm9141_vm8, %v2196_v31, %v2197_v58  ;;  %v6575_v40 = vrot.slane %v2130_v34, 9  ;;  %v2132_v12 = vld [vmem:[#allocation2 + $0x3c] sm:$0xe]  ;;  %v3759_v34 = vld [vmem:[#allocation2 + $0x60] sm:$0xe] }
 0x254   : > { %7230 = vmatmul.mubr.bf16.vlgmr.msra.gmra.mrb[32].mxu0 %v6589_v47  ;;  %v2201_v7 = vrot.slane %v8979_v13, 5  ;;  %v6590_v27 = vcombine.low %v2195_v32, %v2198_v36  ;;  %v3849_v24 = vrot.slane %v8961_v33, 5  ;;  %v6665_v22 = vrot.slane %v3757_v62, 9 }
 0x255   : > { %7374 = vmatmul.mubr.bf16.vlgmr.msra.gmra.mrb[16].mxu1 %v6677_v55  ;;  %v3848_v61 = vrot.slane %v3846_v8, 4  ;;  %7262 = vmatpush3.bf16.msra.mxu0 %v9077_v51  ;;  %v6679_v16 = vcombine.low %v9183_v38, %v9187_v19  ;;  %v2204_v48 = vrot.slane %v8117_v9, 5  ;;  %v3853_v13 = vrot.slane %v8970_v49, 5  ;;  %v8035_v51 = vld [vmem:[#allocation8 + $0x190] sm:$0xff]   ;;  %v8036_v38 = vld [vmem:[#allocation8 + $0x198] sm:$0xff]  }
 0x256   : > { %7406 = vmatpush3.bf16.msra.mxu1 %v9057_v2  ;;  %7377 = vmatprep.mubr.bf16.mxu1 %v6678_v21  ;;  %v2203_v4 = vrot.slane %v2201_v7, 4  ;;  %v3847_v55 = vsel %vm9141_vm8, %v6664_v42, %v3846_v8  ;;  %v6576_v45 = vrot.slane %v2131_v29, 9  ;;  %v2208_v2 = vrot.slane %v8996_v43, 5  ;;  %v8119_v43 = vld [vmem:[#allocation2 + $0x38] sm:$0x1] }
 0x257   : > { %7407 = vmatprep.subr.bf16.mxu1 %v8034_v20  ;;  %7233 = vmatprep.mubr.bf16.mxu0 %v6590_v27  ;;  %v3850_v33 = vsel %vm9141_vm8, %v3848_v61, %v3849_v24  ;;  %v2202_v53 = vsel %vm9141_vm8, %v6575_v40, %v2201_v7  ;;  %v3855_v49 = vrot.slane %v3853_v13, 4  ;;  %v3856_v37 = vrot.slane %v8974_v46, 5  ;;  %v2133_v42 = vld [vmem:[#allocation2 + $0x48] sm:$0xe]  ;;  %v8121_v29 = vld [vmem:[#allocation2 + $0x44] sm:$0x1] }
 0x258   : > { %v2205_v3 = vsel %vm9141_vm8, %v2203_v4, %v2204_v48  ;;  %7263 = vmatprep.subr.bf16.mxu0 %v8118_v54  ;;  %v6680_v28 = vcombine.low %v3847_v55, %v3850_v33  ;;  %v9213_v39 = vsel %vm9141_vm8, %v6665_v22, %v3853_v13  ;;  %v2210_v26 = vrot.slane %v2208_v2, 4  ;;  %v3760_v4 = vld [vmem:[#allocation2 + $0x6c] sm:$0xe]  ;;  %v8037_v13 = vld [vmem:[#allocation8 + $0x1a0] sm:$0xff]  }
 0x259   : > { %v2211_v1 = vrot.slane %v8119_v43, 5  ;;  %7264 = vmatpush3.bf16.msra.mxu0 %v8118_v54  ;;  %v6591_v21 = vcombine.low %v2202_v53, %v2205_v3  ;;  %v9217_v47 = vsel %vm9141_vm8, %v3855_v49, %v3856_v37  ;;  %v6666_v46 = vrot.slane %v3758_v56, 9  ;;  %v8123_v56 = vld [vmem:[#allocation8 + $0xd8] sm:$0xff]   ;;  %v3761_v37 = vld [vmem:[#allocation2 + $0x78] sm:$0xe] }
 0x25a   : > { %7408 = vmatpush3.bf16.msra.mxu1 %v8034_v20  ;;  %v3860_v31 = vrot.slane %v8989_v25, 5  ;;  %7265 = vmatprep.subr.bf16.mxu0 %v8120_v60  ;;  %v2209_v58 = vsel %vm9141_vm8, %v6576_v45, %v2208_v2  ;;  %v6577_v19 = vrot.slane %v2132_v12, 9  ;;  %v2215_v20 = vrot.slane %v9011_v23, 5  ;;  %v2134_v2 = vld [vmem:[#allocation2 + $0x54] sm:$0xe] }
 0x25b   : > { %7409 = vmatprep.subr.bf16.mxu1 %v8035_v51  ;;  %v2212_v62 = vsel %vm9141_vm8, %v2210_v26, %v2211_v1  ;;  %v6681_v8 = vcombine.low %v9213_v39, %v9217_v47  ;;  %v3863_v25 = vrot.slane %v8992_v59, 5  ;;  %v6667_v36 = vrot.slane %v3759_v34, 9  ;;  %v8124_v26 = vld [vmem:[#allocation8 + $0xe0] sm:$0xff]   ;;  %v8038_v47 = vld [vmem:[#allocation8 + $0x1a8] sm:$0xff]  }
 0x25c   : > { %7234 = vmatmul.mubr.bf16.gmra.mrb[36].mxu0 %v6591_v21  ;;  %v3862_v32 = vrot.slane %v3860_v31, 4  ;;  %v6592_v40 = vcombine.low %v2209_v58, %v2212_v62  ;;  %v2217_v7 = vrot.slane %v2215_v20, 4  ;;  %v2218_v27 = vrot.slane %v8121_v29, 5  ;;  %v2135_v21 = vld [vmem:[#allocation2 + $0x60] sm:$0xe] }
 0x25d   : > { %7378 = vmatmul.mubr.bf16.gmra.mrb[20].mxu1 %v6679_v16  ;;  %v3867_v61 = vrot.slane %v9006_v10, 5  ;;  %7266 = vmatpush3.bf16.msra.mxu0 %v8120_v60  ;;  %v3861_v23 = vsel %vm9141_vm8, %v6666_v46, %v3860_v31  ;;  %v6578_v22 = vrot.slane %v2133_v42, 9  ;;  %v2222_v59 = vrot.slane %v9027_v52, 5  ;;  %v8122_v52 = vld [vmem:[#allocation2 + $0x50] sm:$0x1] }
 0x25e   : > { %7381 = vmatprep.mubr.bf16.mxu1 %v6680_v28  ;;  %7410 = vmatpush3.bf16.msra.mxu1 %v8035_v51  ;;  %v3864_v24 = vsel %vm9141_vm8, %v3862_v32, %v3863_v25  ;;  %v2216_v16 = vsel %vm9141_vm8, %v6577_v19, %v2215_v20  ;;  %v2219_v10 = vsel %vm9141_vm8, %v2217_v7, %v2218_v27  ;;  %v3870_v48 = vrot.slane %v9008_v15, 5  ;;  %v8125_v31 = vld [vmem:[#allocation2 + $0x5c] sm:$0x1]  ;;  %v8126_v19 = vld [vmem:[#allocation2 + $0x64] sm:$0xf] }
 0x25f   : > { %7237 = vmatprep.mubr.bf16.mxu0 %v6592_v40  ;;  %7411 = vmatprep.subr.bf16.mxu1 %v8036_v38  ;;  %v3869_v9 = vrot.slane %v3867_v61, 4  ;;  %v6682_v55 = vcombine.low %v3861_v23, %v3864_v24  ;;  %v9241_v33 = vsel %vm9141_vm8, %v6667_v36, %v3867_v61  ;;  %v2224_v51 = vrot.slane %v2222_v59, 4  ;;  %v3762_v42 = vld [vmem:[#allocation2 + $0x84] sm:$0xe]  ;;  %v8127_v7 = vld [vmem:[#allocation2 + $0x68] sm:$0x1] }
 0x260   : > { %v2225_v45 = vrot.slane %v8122_v52, 5  ;;  %7267 = vmatprep.subr.bf16.mxu0 %v8123_v56  ;;  %v6593_v53 = vcombine.low %v2216_v16, %v2219_v10  ;;  %v6668_v49 = vrot.slane %v3760_v4, 9  ;;  %v3874_v15 = vrot.slane %v9019_v50, 5  ;;  %v2136_v27 = vld [vmem:[#allocation2 + $0x6c] sm:$0xe]  ;;  %v8128_v4 = vld [vmem:[#allocation8 + $0xe8] sm:$0xff]  }
 0x261   : > { %v9245_v3 = vsel %vm9141_vm8, %v3869_v9, %v3870_v48  ;;  %7268 = vmatpush3.bf16.msra.mxu0 %v8123_v56  ;;  %v2223_v54 = vsel %vm9141_vm8, %v6578_v22, %v2222_v59  ;;  %v2229_v39 = vrot.slane %v9040_v5, 5  ;;  %v3877_v50 = vrot.slane %v9024_v57, 5  ;;  %v3763_v59 = vld [vmem:[#allocation2 + $0x90] sm:$0xe] }
 0x262   : > { %v6683_v12 = vcombine.low %v9241_v33, %v9245_v3  ;;  %7412 = vmatpush3.bf16.msra.mxu1 %v8036_v38  ;;  %v2226_v28 = vsel %vm9141_vm8, %v2224_v51, %v2225_v45  ;;  %7269 = vmatprep.subr.bf16.mxu0 %v8124_v26  ;;  %v3876_v1 = vrot.slane %v3874_v15, 4  ;;  %v6579_v34 = vrot.slane %v2134_v2, 9  ;;  %v8129_v48 = vld [vmem:[#allocation2 + $0x70] sm:$0xf] }
 0x263   : > { %v6594_v43 = vcombine.low %v2223_v54, %v2226_v28  ;;  %7413 = vmatprep.subr.bf16.mxu1 %v8037_v13  ;;  %v2231_v46 = vrot.slane %v2229_v39, 4  ;;  %v2232_v60 = vrot.slane %v8125_v31, 5  ;;  %v6669_v58 = vrot.slane %v3761_v37, 9 }
 0x264   : > { %7238 = vmatmul.mubr.bf16.gmra.mrb[40].mxu0 %v6593_v53  ;;  %v3881_v62 = vrot.slane %v9038_v11, 5  ;;  %v3875_v5 = vsel %vm9141_vm8, %v6668_v49, %v3874_v15  ;;  %v3878_v38 = vsel %vm9141_vm8, %v3876_v1, %v3877_v50  ;;  %v3884_v57 = vrot.slane %v9045_v44, 5  ;;  %v8039_v44 = vld [vmem:[#allocation8 + $0x1b0] sm:$0xff]   ;;  %v8040_v15 = vld [vmem:[#allocation8 + $0x1b8] sm:$0xff]  }
 0x265   : > { %7382 = vmatmul.mubr.bf16.gmra.mrb[24].mxu1 %v6681_v8  ;;  %7241 = vmatprep.mubr.bf16.mxu0 %v6594_v43  ;;  %v2236_v20 = vrot.slane %v8126_v19, 5  ;;  %v6684_v32 = vcombine.low %v3875_v5, %v3878_v38  ;;  %v2233_v25 = vsel %vm9141_vm8, %v2231_v46, %v2232_v60  ;;  %v6580_v11 = vrot.slane %v2135_v21, 9  ;;  %v3764_v43 = vld [vmem:[#allocation2 + $0x9c] sm:$0xe]  ;;  %v8132_v1 = vld [vmem:[#allocation8 + $0xf0] sm:$0xff]  }
 0x266   : > { %7385 = vmatprep.mubr.bf16.mxu1 %v6682_v55  ;;  %v3883_v36 = vrot.slane %v3881_v62, 4  ;;  %7414 = vmatpush3.bf16.msra.mxu1 %v8037_v13  ;;  %v2230_v8 = vsel %vm9141_vm8, %v6579_v34, %v2229_v39  ;;  %v2239_v29 = vrot.slane %v8127_v7, 5  ;;  %v9268_v61 = vsel %vm9141_vm8, %v6669_v58, %v3881_v62  ;;  %v8131_v39 = vld [vmem:[#allocation2 + $0x7c] sm:$0xf]  ;;  %v8133_v60 = vld [vmem:[#allocation2 + $0x80] sm:$0x1] }
 0x267   : > { %v2238_v40 = vrot.slane %v2236_v20, 4  ;;  %7415 = vmatprep.subr.bf16.mxu1 %v8038_v47  ;;  %7270 = vmatpush3.bf16.msra.mxu0 %v8124_v26  ;;  %v6670_v24 = vrot.slane %v3762_v42, 9  ;;  %v3888_v22 = vrot.slane %v9051_v30, 5  ;;  %v6595_v16 = vcombine.low %v2230_v8, %v2233_v25  ;;  %v2137_v30 = vld [vmem:[#allocation2 + $0x78] sm:$0xe]  ;;  %v8135_v25 = vld [vmem:[#allocation8 + $0xf8] sm:$0xff]  }
 0x268   : > { %v9272_v23 = vsel %vm9141_vm8, %v3883_v36, %v3884_v57  ;;  %7271 = vmatprep.subr.bf16.mxu0 %v8128_v4  ;;  %v2243_v13 = vrot.slane %v8129_v48, 5  ;;  %v2237_v55 = vsel %vm9141_vm8, %v6580_v11, %v2236_v20  ;;  %v3891_v52 = vrot.slane %v9059_v6, 5  ;;  %v8130_v6 = vld [vmem:[#allocation2 + $0x74] sm:$0x1]  ;;  %v10224_v34 = vld [vmem:[#allocation17_spill] sm:$0xff]  ;;  %v10225_v8 = vld [vmem:[#allocation18_spill] sm:$0xff] }
 0x269   : > { %v6685_v10 = vcombine.low %v9268_v61, %v9272_v23  ;;  %v2240_v9 = vsel %vm9141_vm8, %v2238_v40, %v2239_v29  ;;  %v3890_v51 = vrot.slane %v3888_v22, 4  ;;  %v6581_v45 = vrot.slane %v2136_v27, 9  ;;  %v3765_v5 = vld [vmem:[#allocation2 + $0xa8] sm:$0xe]  ;;  %v9308_v38 = vld [vmem:[#allocation8 + $0x1c0] sm:$0xff]  }
 0x26a   : > { %7416 = vmatpush3.bf16.msra.mxu1 %v8038_v47  ;;  %v6596_v2 = vcombine.low %v2237_v55, %v2240_v9  ;;  %v2245_v56 = vrot.slane %v2243_v13, 4  ;;  %v6671_v53 = vrot.slane %v3763_v59, 9  ;;  %v3895_v49 = vrot.slane %v9065_v41, 5  ;;  %v8134_v42 = vld [vmem:[#allocation2 + $0x88] sm:$0xf] }
 0x26b   : > { %7417 = vmatprep.subr.bf16.mxu1 %v8039_v44  ;;  %7272 = vmatpush3.bf16.msra.mxu0 %v8128_v4  ;;  %v9285_v37 = vsel %vm9141_vm8, %v6670_v24, %v3888_v22  ;;  %v9289_v54 = vsel %vm9141_vm8, %v3890_v51, %v3891_v52  ;;  %v2246_v28 = vrot.slane %v8130_v6, 5  ;;  %v2250_v26 = vrot.slane %v8131_v39, 5  ;;  %v2138_v7 = vld [vmem:[#allocation2 + $0x84] sm:$0xe]  ;;  %v8136_v27 = vld [vmem:[#allocation2 + $0x8c] sm:$0x1] }
 0x26c   : > { %7242 = vmatmul.mubr.bf16.gmra.mrb[44].mxu0 %v6595_v16  ;;  %7273 = vmatprep.subr.bf16.mxu0 %v8132_v1  ;;  %v6686_v41 = vcombine.low %v9285_v37, %v9289_v54  ;;  %v3897_v50 = vrot.slane %v3895_v49, 4  ;;  %v3898_v21 = vrot.slane %v10224_v34, 5  ;;  %v6582_v47 = vrot.slane %v2137_v30, 9  ;;  %v10226_v22 = vld [vmem:[#allocation19_spill] sm:$0xff]  ;;  %v2139_v4 = vld [vmem:[#allocation2 + $0x90] sm:$0xe] }
 0x26d   : > { %7386 = vmatmul.mubr.bf16.gmra.mrb[28].mxu1 %v6683_v12  ;;  %7245 = vmatprep.mubr.bf16.mxu0 %v6596_v2  ;;  %v2247_v46 = vsel %vm9141_vm8, %v2245_v56, %v2246_v28  ;;  %v2252_v31 = vrot.slane %v2250_v26, 4  ;;  %v2253_v58 = vrot.slane %v8133_v60, 5  ;;  %v9301_v33 = vsel %vm9141_vm8, %v6671_v53, %v3895_v49  ;;  %v3766_v51 = vld [vmem:[#allocation2 + $0xb4] sm:$0xe]  ;;  %v8137_v37 = vld [vmem:[#allocation2 + $0x98] sm:$0x1] }
 0x26e   : > { %7389 = vmatprep.mubr.bf16.mxu1 %v6684_v32  ;;  %7418 = vmatpush3.bf16.msra.mxu1 %v8039_v44  ;;  %v9305_v3 = vsel %vm9141_vm8, %v3897_v50, %v3898_v21  ;;  %v6672_v12 = vrot.slane %v3764_v43, 9  ;;  %v3902_v62 = vrot.slane %v9082_v17, 5  ;;  %v2244_v57 = vsel %vm9141_vm8, %v6581_v45, %v2243_v13  ;;  %v10227_v13 = vld [vmem:[#allocation23_spill] sm:$0xff]  ;;  %v10228_v2 = vld [vmem:[#allocation20_spill] sm:$0xff]  ;;  %v3767_v61 = vld [vmem:[#allocation2 + $0xc0] sm:$0xe] }
 0x26f   : > { %7419 = vmatprep.subr.bf16.mxu1 %v8040_v15  ;;  %7274 = vmatpush3.bf16.msra.mxu0 %v8132_v1  ;;  %v6687_v19 = vcombine.low %v9301_v33, %v9305_v3  ;;  %v2254_v20 = vsel %vm9141_vm8, %v2252_v31, %v2253_v58  ;;  %v2257_v32 = vrot.slane %v8134_v42, 5  ;;  %v6597_v36 = vcombine.low %v2244_v57, %v2247_v46  ;;  %v10230_v34 = vld [vmem:[#allocation21_spill] sm:$0xff] }
 0x270   : > { %7275 = vmatprep.subr.bf16.mxu0 %v8135_v25  ;;  %v2251_v17 = vsel %vm9141_vm8, %v6582_v47, %v2250_v26  ;;  %v3904_v11 = vrot.slane %v3902_v62, 4  ;;  %v3905_v40 = vrot.slane %v10225_v8, 5  ;;  %v2260_v44 = vrot.slane %v8136_v27, 5  ;;  %v10229_v26 = vld [vmem:[#allocation22_spill] sm:$0xff]  ;;  %v8140_v27 = vld [vmem:[#allocation2 + $0xb0] sm:$0x1] }
 0x271   : > { %v2259_v29 = vrot.slane %v2257_v32, 4  ;;  %v6673_v24 = vrot.slane %v3765_v5, 9  ;;  %v3909_v59 = vrot.slane %v10226_v22, 5  ;;  %v6598_v16 = vcombine.low %v2251_v17, %v2254_v20  ;;  %v8138_v5 = vld [vmem:[#allocation2 + $0xac] sm:$0xf] }
 0x272   : > { %7420 = vmatpush3.bf16.msra.mxu1 %v8040_v15  ;;  %v3903_v9 = vsel %vm9141_vm8, %v6672_v12, %v3902_v62  ;;  %v3906_v48 = vsel %vm9141_vm8, %v3904_v11, %v3905_v40  ;;  %v2264_v55 = vrot.slane %v10227_v13, 5  ;;  %v6583_v45 = vrot.slane %v2138_v7, 9  ;;  %v2140_v62 = vld [vmem:[#allocation2 + $0x9c] sm:$0xe]  ;;  %v8139_v11 = vld [vmem:[#allocation2 + $0xa4] sm:$0x1] }
 0x273   : > { %7453 = vmatprep.subr.bf16.mxu1 %v9308_v38  ;;  %7276 = vmatpush3.bf16.msra.mxu0 %v8135_v25  ;;  %v6688_v52 = vcombine.low %v3903_v9, %v3906_v48  ;;  %v3911_v30 = vrot.slane %v3909_v59, 4  ;;  %v3912_v56 = vrot.slane %v10228_v2, 5  ;;  %v2261_v53 = vsel %vm9141_vm8, %v2259_v29, %v2260_v44  ;;  %v8141_v33 = vld [vmem:[#allocation2 + $0xb8] sm:$0xf]  ;;  %v8044_v2 = vld [vmem:[#allocation2 + $0xc] sm:$0xff]  }
 0x274   : > { %7246 = vmatmul.mubr.bf16.gmra.mrb[48].mxu0 %v6597_v36  ;;  %v6584_v49 = vrot.slane %v2139_v4, 9  ;;  %v2266_v15 = vrot.slane %v2264_v55, 4  ;;  %v2267_v54 = vrot.slane %v8137_v37, 5  ;;  %v3910_v6 = vsel %vm9141_vm8, %v6673_v24, %v3909_v59  ;;  %v2141_v36 = vld [vmem:[#allocation2 + $0xa8] sm:$0xe] }
 0x275   : > { %7390 = vmatmul.mubr.bf16.gmra.mrb[0].mxu1 %v6685_v10  ;;  %7249 = vmatprep.mubr.bf16.mxu0 %v6598_v16  ;;  %v3913_v28 = vsel %vm9141_vm8, %v3911_v30, %v3912_v56  ;;  %v6674_v39 = vrot.slane %v3766_v51, 9  ;;  %v3916_v43 = vrot.slane %v10229_v26, 5  ;;  %v2271_v1 = vrot.slane %v9128_v35, 5  ;;  %v2142_v16 = vld [vmem:[#allocation2 + $0xb4] sm:$0xe]  ;;  %v8041_v56 = vld [vmem:[#allocation2 + $0x18] sm:$0xff]  }
 0x276   : > { %7393 = vmatprep.mubr.bf16.mxu1 %v6686_v41  ;;  %v6689_v23 = vcombine.low %v3910_v6, %v3913_v28  ;;  %v2268_v10 = vsel %vm9141_vm8, %v2266_v15, %v2267_v54  ;;  %v2258_v50 = vsel %vm9141_vm8, %v6583_v45, %v2257_v32  ;;  %v3919_v21 = vrot.slane %v10230_v34, 5  ;;  %v8046_v15 = vld [vmem:[#allocation8 + $0x1c8] sm:$0xff]   ;;  %v8045_v54 = vld [vmem:[#allocation2 + $0x30] sm:$0xff]   ;;  %v8051_v6 = vld [vmem:[#allocation8 + $0x1d0] sm:$0xff]  }
 0x277   : > { %v3918_v41 = vrot.slane %v3916_v43, 4  ;;  %v6599_v47 = vcombine.low %v2258_v50, %v2261_v53  ;;  %v2265_v46 = vsel %vm9141_vm8, %v6584_v49, %v2264_v55  ;;  %v6675_v31 = vrot.slane %v3767_v61, 9  ;;  %v8142_v55 = vld [vmem:[#allocation2 + $0xbc] sm:$0x1]  ;;  %v8043_v49 = vld [vmem:[#allocation2 + $0x24] sm:$0xff]  }
 0x278   : > { %v3923_v60 = vrot.slane %v9122_v63, 5  ;;  %v6600_v58 = vcombine.low %v2265_v46, %v2268_v10  ;;  %v3917_v12 = vsel %vm9141_vm8, %v6674_v39, %v3916_v43  ;;  %v2278_v57 = vrot.slane %v8138_v5, 5  ;;  %v8047_v53 = vld [vmem:[#allocation2 + $0x18] sm:$0xff]   ;;  %v8049_v37 = vld [vmem:[#allocation2 + $0x24] sm:$0xff]   ;;  %v8052_v43 = vld [vmem:[#allocation2 + $0x30] sm:$0xff]  }
 0x279   : > { %v3920_v35 = vsel %vm9141_vm8, %v3918_v41, %v3919_v21  ;;  %v2273_v42 = vrot.slane %v2271_v1, 4  ;;  %v3926_v25 = vrot.slane %v9120_v0, 5  ;;  %v6585_v63 = vrot.slane %v2140_v62, 9  ;;  %v4637_v28 = vld [vmem:[#allocation2 + $0x18] sm:$0xf]  ;;  %v8048_v26 = vld [vmem:[#allocation2 + $0x3c] sm:$0xff]  }
 0x27a   : > { %v6690_v20 = vcombine.low %v3917_v12, %v3920_v35  ;;  %v3925_v32 = vrot.slane %v3923_v60, 4  ;;  %v2280_v17 = vrot.slane %v2278_v57, 4  ;;  %v2274_v8 = vrot.slane %v8139_v11, 5  ;;  %v4638_v39 = vld [vmem:[#allocation2 + $0x1c] sm:$0xf]  ;;  %v8050_v21 = vld [vmem:[#allocation2 + $0x48] sm:$0xff]  }
 0x27b   : > { %v3924_v40 = vsel %vm9141_vm8, %v6675_v31, %v3923_v60  ;;  %v6586_v0 = vrot.slane %v2141_v36, 9  ;;  %v2281_v44 = vrot.slane %v8140_v27, 5  ;;  %v2285_v3 = vrot.slane %v8141_v33, 5  ;;  %v8054_v10 = vld [vmem:[#allocation2 + $0x3c] sm:$0xff]   ;;  %v4640_v34 = vld [vmem:[#allocation2 + $0x24] sm:$0xf] }
 0x27c   : > { %7250 = vmatmul.mubr.bf16.gmra.mrb[52].mxu0 %v6599_v47  ;;  %v3927_v7 = vsel %vm9141_vm8, %v3925_v32, %v3926_v25  ;;  %v2275_v24 = vsel %vm9141_vm8, %v2273_v42, %v2274_v8  ;;  %v2272_v22 = vsel %vm9141_vm8, %v6585_v63, %v2271_v1  ;;  %v6587_v13 = vrot.slane %v2142_v16, 9  ;;  %v8056_v1 = vld [vmem:[#allocation8 + $0x1d8] sm:$0xff]   ;;  %v9373_v42 = vld [vmem:[#allocation2 + $0x20] sm:$0x1]  ;;  %v9379_v27 = vld [vmem:[#allocation2 + $0x2c] sm:$0x1] }
 0x27d   : > { %7394 = vmatmul.mubr.bf16.gmra.mrb[4].mxu1 %v6687_v19  ;;  %7253 = vmatprep.mubr.bf16.mxu0 %v6600_v58  ;;  %v6691_v29 = vcombine.low %v3924_v40, %v3927_v7  ;;  %v2282_v19 = vsel %vm9141_vm8, %v2280_v17, %v2281_v44  ;;  %v6601_v59 = vcombine.low %v2272_v22, %v2275_v24  ;;  %v2287_v48 = vrot.slane %v2285_v3, 4  ;;  %v8061_v58 = vld [vmem:[#allocation8 + $0x1e0] sm:$0xff]   ;;  %v8065_v63 = vld [vmem:[#allocation8 + $0x1e8] sm:$0xff]   ;;  %v4643_v8 = vld [vmem:[#allocation2 + $0x30] sm:$0xf] }
 0x27e   : > { %7397 = vmatprep.mubr.bf16.mxu1 %v6688_v52  ;;  %v2279_v4 = vsel %vm9141_vm8, %v6586_v0, %v2278_v57  ;;  %v2288_v51 = vrot.slane %v8142_v55, 5  ;;  %v2286_v45 = vsel %vm9141_vm8, %v6587_v13, %v2285_v3  ;;  %v4686_v61 = vshrl.u32 %v4637_v28, 16  ;;  %v8053_v57 = vld [vmem:[#allocation2 + $0x54] sm:$0xff]   ;;  %v8055_v40 = vld [vmem:[#allocation2 + $0x60] sm:$0xff]   ;;  %v8068_v22 = vld [vmem:[#allocation8 + $0x1f0] sm:$0xff]  }
 0x27f   : > { %v6602_v9 = vcombine.low %v2279_v4, %v2282_v19  ;;  %v4695_v50 = vshll.u32 %v4638_v39, 16  ;;  %v4699_v41 = vshrl.u32 %v4638_v39, 16  ;;  %v4710_v31 = vshrl.u32 %v4640_v34, 16  ;;  %v8059_v17 = vld [vmem:[#allocation2 + $0x54] sm:$0xff]  }
 0x280   : > { %v2289_v52 = vsel %vm9141_vm8, %v2287_v48, %v2288_v51  ;;  %v4688_v47 = vrot.slane %v4686_v61, 4  ;;  %v4713_v60 = vshll.u32 %v4640_v34, 16  ;;  %v4705_v0 = vshll.u32 %v9373_v42, 16  ;;  %v9381_v33 = vld [vmem:[#allocation2 + $0x34] sm:$0xf] }
 0x281   : > { %v6603_v30 = vcombine.low %v2286_v45, %v2289_v52  ;;  %v9371_v12 = vrot.slane %v4695_v50, 5  ;;  %v4701_v35 = vrot.slane %v4699_v41, 4  ;;  %v4712_v25 = vrot.slane %v4710_v31, 4  ;;  %v9384_v16 = vld [vmem:[#allocation2 + $0x38] sm:$0x1]  ;;  %v8062_v45 = vld [vmem:[#allocation2 + $0x60] sm:$0xff]  }
 0x282   : > { %v4715_v36 = vrot.slane %v4713_v60, 5  ;;  %v4734_v3 = vshrl.u32 %v4643_v8, 16  ;;  %v4737_v19 = vshll.u32 %v4643_v8, 16  ;;  %v9386_v48 = vld [vmem:[#allocation2 + $0x40] sm:$0xf]  ;;  %v4707_v13 = vrot.slane %v4705_v0, 5 }
 0x283   : > { %v4702_v11 = vor.u32 %v4701_v35, %v9371_v12  ;;  %v4729_v55 = vshll.u32 %v9379_v27, 16  ;;  %v4743_v51 = vshll.u32 %v9381_v33, 16  ;;  %v4649_v52 = vld [vmem:[#allocation2 + $0x48] sm:$0xf]  ;;  %v4652_v31 = vld [vmem:[#allocation2 + $0x54] sm:$0xf] }
 0x284   : > { %7254 = vmatmul.mubr.bf16.gmra.mrb[56].mxu0 %v6601_v59  ;;  %v4716_v24 = vor.u32 %v4715_v36, %v4712_v25  ;;  %v4785_v50 = vshll.u32 %v4649_v52, 16  ;;  %v9410_v60 = vld [vmem:[#allocation8 + $0x200] sm:$0xff]   ;;  %v4809_v0 = vshll.u32 %v4652_v31, 16 }
 0x285   : > { %7398 = vmatmul.mubr.bf16.gmra.mrb[8].mxu1 %v6689_v23  ;;  %7257 = vmatprep.mubr.bf16.mxu0 %v6602_v9  ;;  %v4689_v23 = vshll.u32 %v4637_v28, 16  ;;  %v4703_v59 = vrot.slane %v4702_v11, 4  ;;  %v4646_v9 = vld [vmem:[#allocation2 + $0x3c] sm:$0xf]  ;;  %v4753_v28 = vshll.u32 %v9384_v16, 16 }
 0x286   : > { %7401 = vmatprep.mubr.bf16.mxu1 %v6690_v20  ;;  %v8057_v20 = vld [vmem:[#allocation2 + $0x48] sm:$0xff]   ;;  %v4758_v39 = vshrl.u32 %v4646_v9, 16  ;;  %v4761_v61 = vshll.u32 %v4646_v9, 16  ;;  %v4787_v11 = vrot.slane %v4785_v50, 5  ;;  %v8064_v9 = vld [vmem:[#allocation2 + $0x90] sm:$0xff]  }
 0x287   : > { %v4691_v46 = vrot.slane %v4689_v23, 5  ;;  %v4767_v23 = vshll.u32 %v9386_v48, 16  ;;  %v9412_v35 = vrot.slane %v4753_v28, 5 }
 0x289   : > { %v4692_v32 = vor.u32 %v4691_v46, %v4688_v47  ;;  %v4731_v47 = vrot.slane %v4729_v55, 5  ;;  %v9408_v46 = vrot.slane %v4743_v51, 5  ;;  %v9420_v25 = vrot.slane %v4767_v23, 5 }
 0x28b   : > { %v4693_v44 = vrot.slane %v4692_v32, 4  ;;  %v4763_v32 = vrot.slane %v4761_v61, 5 }
 0x28c   : > { %7258 = vmatmul.mubr.bf16.gmra.mrb[60].mxu0 %v6603_v30 }
 0x28d   : > { %7402 = vmatmul.mubr.bf16.gmra.mrb[12].mxu1 %v6691_v29  ;;  %7277 = vmatprep.mubr.bf16.mxu0 %v8044_v2  ;;  %v4698_v30 = vsel %vm8649_vm2, %v4693_v44, %v9371_v12  ;;  %v4717_v2 = vrot.slane %v4716_v24, 4 }
 0x28e   : > { %7421 = vmatprep.mubr.bf16.mxu1 %v8041_v56  ;;  %v4736_v56 = vrot.slane %v4734_v3, 4  ;;  %v8063_v3 = vld [vmem:[#allocation2 + $0x84] sm:$0xff]  }
 0x294   : > { %7278 = vmatmul.mubr.bf16.vlgmr.msra.gmra.mrb[32].mxu0 %v8047_v53  ;;  %v4739_v53 = vrot.slane %v4737_v19, 5 }
 0x295   : > { %7422 = vmatmul.mubr.bf16.vlgmr.msra.gmra.mrb[16].mxu1 %v8043_v49  ;;  %7281 = vmatprep.mubr.bf16.mxu0 %v8049_v37  ;;  %v9393_v49 = vld [vmem:[#allocation2 + $0x4c] sm:$0xf]  ;;  %v8071_v37 = vld [vmem:[#allocation8 + $0x1f8] sm:$0xff]  }
 0x296   : > { %7454 = vmatpush3.bf16.msra.mxu1 %v9308_v38  ;;  %7425 = vmatprep.mubr.bf16.mxu1 %v8045_v54  ;;  %v4641_v38 = vld [vmem:[#allocation2 + $0x28] sm:$0xf]  ;;  %v4708_v54 = vsel %vm8649_vm2, %v4703_v59, %v4707_v13  ;;  %v4791_v41 = vshll.u32 %v9393_v49, 16  ;;  %v4795_v34 = vshrl.u32 %v9393_v49, 16 }
 0x297   : > { %7455 = vmatprep.subr.bf16.mxu1 %v8046_v15  ;;  %v4719_v62 = vshll.u32 %v4641_v38, 16  ;;  %v4723_v5 = vshrl.u32 %v4641_v38, 16 }
 0x298   : > { %v9422_v8 = vrot.slane %v4791_v41, 5 }
 0x299   : > { %v9376_v7 = vrot.slane %v4719_v62, 5  ;;  %v4725_v29 = vrot.slane %v4723_v5, 4  ;;  %v9414_v62 = vld [vmem:[#allocation2 + $0x44] sm:$0x1]  ;;  %v4760_v5 = vrot.slane %v4758_v39, 4 }
 0x29a   : > { %7456 = vmatpush3.bf16.msra.mxu1 %v8046_v15  ;;  %v8058_v15 = vld [vmem:[#allocation2 + $0x6c] sm:$0xff]   ;;  %v4777_v55 = vshll.u32 %v9414_v62, 16 }
 0x29b   : > { %7457 = vmatprep.subr.bf16.mxu1 %v8051_v6  ;;  %v4726_v4 = vor.u32 %v4725_v29, %v9376_v7  ;;  %v4722_v38 = vsel %vm8649_vm2, %v4717_v2, %v9376_v7  ;;  %v9424_v7 = vld [vmem:[#allocation2 + $0x64] sm:$0xf]  ;;  %v4806_v29 = vshrl.u32 %v4652_v31, 16 }
 0x29c   : > { %7282 = vmatmul.mubr.bf16.gmra.mrb[36].mxu0 %v8052_v43  ;;  %v4839_v51 = vshll.u32 %v9424_v7, 16 }
 0x29d   : > { %7426 = vmatmul.mubr.bf16.gmra.mrb[20].mxu1 %v8048_v26  ;;  %7285 = vmatprep.mubr.bf16.mxu0 %v8054_v10  ;;  %v8060_v26 = vld [vmem:[#allocation2 + $0x78] sm:$0xff]   ;;  %v4727_v43 = vrot.slane %v4726_v4, 4  ;;  %v4771_v10 = vshrl.u32 %v9386_v48, 16 }
 0x29e   : > { %7429 = vmatprep.mubr.bf16.mxu1 %v8050_v21  ;;  %7458 = vmatpush3.bf16.msra.mxu1 %v8051_v6  ;;  %v4747_v6 = vshrl.u32 %v9381_v33, 16  ;;  %v9403_v21 = vcombine.low %v4698_v30, %v4708_v54  ;;  %v4764_v30 = vor.u32 %v4763_v32, %v4760_v5  ;;  %v4811_v54 = vrot.slane %v4809_v0, 5  ;;  %v8067_v0 = vld [vmem:[#allocation2 + $0xa8] sm:$0xff]  }
 0x29f   : > { %7459 = vmatprep.subr.bf16.mxu1 %v8056_v1  ;;  %v4773_v36 = vrot.slane %v4771_v10, 4  ;;  %v9446_v50 = vrot.slane %v4839_v51, 5 }
 0x2a0   : > { %v4749_v12 = vrot.slane %v4747_v6, 4 }
 0x2a1   : > { %v4774_v2 = vor.u32 %v4773_v36, %v9420_v25  ;;  %v8066_v36 = vld [vmem:[#allocation2 + $0x9c] sm:$0xff]  }
 0x2a2   : > { %7460 = vmatpush3.bf16.msra.mxu1 %v8056_v1  ;;  %v4782_v1 = vshrl.u32 %v4649_v52, 16  ;;  %v4750_v13 = vor.u32 %v4749_v12, %v9408_v46  ;;  %v4843_v52 = vshrl.u32 %v9424_v7, 16  ;;  %v9448_v12 = vld [vmem:[#allocation2 + $0x5c] sm:$0x1] }
 0x2a3   : > { %7461 = vmatprep.subr.bf16.mxu1 %v8061_v58 }
 0x2a4   : > { %7286 = vmatmul.mubr.bf16.gmra.mrb[40].mxu0 %v8057_v20  ;;  %v4732_v20 = vsel %vm8649_vm2, %v4727_v43, %v4731_v47  ;;  %v9443_v43 = vld [vmem:[#allocation2 + $0x70] sm:$0xf]  ;;  %v4751_v10 = vrot.slane %v4750_v13, 4  ;;  %v4845_v41 = vrot.slane %v4843_v52, 4  ;;  %v4779_v47 = vrot.slane %v4777_v55, 5 }
 0x2a5   : > { %7430 = vmatmul.mubr.bf16.gmra.mrb[24].mxu1 %v8053_v57  ;;  %7289 = vmatprep.mubr.bf16.mxu0 %v8059_v17  ;;  %v9416_v57 = vld [vmem:[#allocation2 + $0x58] sm:$0xf]  ;;  %v4655_v17 = vld [vmem:[#allocation2 + $0x60] sm:$0xf]  ;;  %v9429_v19 = vcombine.low %v4722_v38, %v4732_v20  ;;  %v4775_v38 = vrot.slane %v4774_v2, 4  ;;  %v4863_v20 = vshll.u32 %v9443_v43, 16 }
 0x2a6   : > { %7433 = vmatprep.mubr.bf16.mxu1 %v8055_v40  ;;  %7462 = vmatpush3.bf16.msra.mxu1 %v8061_v58  ;;  %v4740_v58 = vor.u32 %v4739_v53, %v4736_v56  ;;  %v4797_v40 = vrot.slane %v4795_v34, 4  ;;  %v4815_v44 = vshll.u32 %v9416_v57, 16  ;;  %v4819_v24 = vshrl.u32 %v9416_v57, 16  ;;  %v9438_v56 = vld [vmem:[#allocation2 + $0x50] sm:$0x1] }
 0x2a7   : > { %7463 = vmatprep.subr.bf16.mxu1 %v8065_v63  ;;  %v4830_v59 = vshrl.u32 %v4655_v17, 16  ;;  %v4833_v4 = vshll.u32 %v4655_v17, 16  ;;  %v4765_v34 = vrot.slane %v4764_v30, 4  ;;  %v4867_v32 = vshrl.u32 %v9443_v43, 16 }
 0x2a8   : > { %v9441_v6 = vrot.slane %v4815_v44, 5  ;;  %v4821_v28 = vrot.slane %v4819_v24, 4  ;;  %v4756_v24 = vsel %vm8649_vm2, %v4751_v10, %v9412_v35  ;;  %v4661_v35 = vld [vmem:[#allocation2 + $0x78] sm:$0xf]  ;;  %v9477_v52 = vrot.slane %v4863_v20, 5 }
 0x2a9   : > { %v4832_v39 = vrot.slane %v4830_v59, 4  ;;  %v4846_v59 = vor.u32 %v4845_v41, %v9446_v50  ;;  %v5393_v10 = vld [vmem:[#allocation2 + $0x30] sm:$0xe] }
 0x2aa   : > { %7464 = vmatpush3.bf16.msra.mxu1 %v8065_v63  ;;  %v4784_v63 = vrot.slane %v4782_v1, 4  ;;  %v4801_v1 = vshll.u32 %v9438_v56, 16  ;;  %v4822_v17 = vor.u32 %v4821_v28, %v9441_v6  ;;  %v4878_v28 = vshrl.u32 %v4661_v35, 16 }
 0x2ab   : > { %7465 = vmatprep.subr.bf16.mxu1 %v8068_v22 }
 0x2ac   : > { %7290 = vmatmul.mubr.bf16.gmra.mrb[44].mxu0 %v8062_v45  ;;  %v4658_v45 = vld [vmem:[#allocation2 + $0x6c] sm:$0xf]  ;;  %v4788_v53 = vor.u32 %v4787_v11, %v4784_v63  ;;  %v9453_v63 = vld [vmem:[#allocation2 + $0x68] sm:$0x1]  ;;  %v9483_v2 = vrot.slane %v4822_v17, 4  ;;  %v8070_v17 = vld [vmem:[#allocation2 + $0xc0] sm:$0xff]  }
 0x2ad   : > { %7434 = vmatmul.mubr.bf16.gmra.mrb[28].mxu1 %v8058_v15  ;;  %v4798_v15 = vor.u32 %v4797_v40, %v9422_v8  ;;  %v4854_v61 = vshrl.u32 %v4658_v45, 16  ;;  %v4857_v23 = vshll.u32 %v4658_v45, 16  ;;  %v4849_v51 = vshll.u32 %v9453_v63, 16  ;;  %v9479_v45 = vld [vmem:[#allocation2 + $0x7c] sm:$0xf] }
 0x2ae   : > { %7437 = vmatprep.mubr.bf16.mxu1 %v8060_v26  ;;  %7466 = vmatpush3.bf16.msra.mxu1 %v8068_v22  ;;  %v9431_v22 = vrot.slane %v4740_v58, 4  ;;  %v4835_v26 = vrot.slane %v4833_v4, 5  ;;  %v4789_v31 = vrot.slane %v4788_v53, 4  ;;  %v4770_v4 = vsel %vm8649_vm2, %v4765_v34, %v9420_v25 }
 0x2af   : > { %7467 = vmatprep.subr.bf16.mxu1 %v8071_v37  ;;  %v4799_v58 = vrot.slane %v4798_v15, 4  ;;  %v4856_v40 = vrot.slane %v4854_v61, 4  ;;  %v4869_v25 = vrot.slane %v4867_v32, 4  ;;  %v4887_v61 = vshll.u32 %v9479_v45, 16  ;;  %v9517_v32 = vld [vmem:[#allocation2 + $0x84] sm:$0xf] }
 0x2b0   : > { %v4836_v11 = vor.u32 %v4835_v26, %v4832_v39  ;;  %v4746_v44 = vsel %vm8649_vm2, %v9431_v22, %v9408_v46  ;;  %v4794_v13 = vsel %vm8649_vm2, %v4789_v31, %v9422_v8  ;;  %v4825_v46 = vshll.u32 %v9448_v12, 16  ;;  %v9472_v22 = vld [vmem:[#allocation2 + $0x74] sm:$0x1]  ;;  %v5398_v31 = vld [vmem:[#allocation2 + $0x6c] sm:$0xe] }
 0x2b1   : > { %v9487_v15 = vcombine.low %v4746_v44, %v4756_v24  ;;  %v4881_v26 = vshll.u32 %v4661_v35, 16  ;;  %v9500_v34 = vrot.slane %v4849_v51, 5  ;;  %v6750_v44 = vrot.slane %v5393_v10, 9  ;;  %v5395_v51 = vld [vmem:[#allocation2 + $0x48] sm:$0xe] }
 0x2b2   : > { %7468 = vmatpush3.bf16.msra.mxu1 %v8071_v37  ;;  %v4808_v37 = vrot.slane %v4806_v29, 4  ;;  %v4859_v29 = vrot.slane %v4857_v23, 5  ;;  %v9485_v8 = vrot.slane %v4836_v11, 4  ;;  %v9492_v39 = vrot.slane %v4825_v46, 5  ;;  %v9637_v35 = vld [vmem:[#allocation2 + $0xb0] sm:$0x1] }
 0x2b3   : > { %7501 = vmatprep.subr.bf16.mxu1 %v9410_v60  ;;  %v4891_v23 = vshrl.u32 %v9479_v45, 16  ;;  %v9529_v24 = vrot.slane %v4881_v26, 5  ;;  %v5396_v26 = vld [vmem:[#allocation2 + $0x54] sm:$0xe] }
 0x2b4   : > { %v4812_v5 = vor.u32 %v4811_v54, %v4808_v37  ;;  %v4860_v53 = vor.u32 %v4859_v29, %v4856_v40  ;;  %v9489_v37 = vrot.slane %v4846_v59, 4  ;;  %v4873_v54 = vshll.u32 %v9472_v22, 16 }
 0x2b5   : > { %7438 = vmatmul.mubr.bf16.gmra.mrb[0].mxu1 %v8063_v3  ;;  %v4803_v3 = vrot.slane %v4801_v1, 5  ;;  %v9525_v29 = vrot.slane %v4878_v28, 4  ;;  %v9533_v59 = vrot.slane %v4891_v23, 4  ;;  %v5478_v28 = vrot.slane %v9386_v48, 5 }
 0x2b6   : > { %7441 = vmatprep.mubr.bf16.mxu1 %v8064_v9  ;;  %v4780_v9 = vsel %vm8649_vm2, %v4775_v38, %v4779_v47  ;;  %v9481_v30 = vrot.slane %v4812_v5, 4  ;;  %v4870_v38 = vor.u32 %v4869_v25, %v9477_v52  ;;  %v8069_v47 = vld [vmem:[#allocation2 + $0xb4] sm:$0xff]   ;;  %v9515_v20 = vrot.slane %v4860_v53, 4  ;;  %v9631_v25 = vld [vmem:[#allocation2 + $0xac] sm:$0xf] }
 0x2b7   : > { %v4804_v55 = vsel %vm8649_vm2, %v4799_v58, %v4803_v3  ;;  %v9496_v1 = vcombine.low %v4770_v4, %v4780_v9  ;;  %v9523_v40 = vrot.slane %v4873_v54, 5  ;;  %v9531_v3 = vrot.slane %v4887_v61, 5  ;;  %v9535_v4 = vld [vmem:[#allocation2 + $0x90] sm:$0xf] }
 0x2b8   : > { %v9498_v41 = vcombine.low %v4794_v13, %v4804_v55  ;;  %v5471_v9 = vrot.slane %v9381_v33, 5  ;;  %v9538_v13 = vrot.slane %v4870_v38, 4  ;;  %v5474_v54 = vrot.slane %v9384_v16, 5  ;;  %v5397_v38 = vld [vmem:[#allocation2 + $0x60] sm:$0xe] }
 0x2b9   : > { %v5480_v16 = vrot.slane %v5478_v28, 4  ;;  %v5481_v48 = vrot.slane %v9414_v62, 5  ;;  %v5492_v62 = vrot.slane %v9416_v57, 5  ;;  %v5402_v33 = vld [vmem:[#allocation2 + $0x9c] sm:$0xe] }
 0x2ba   : > { %v5473_v53 = vrot.slane %v5471_v9, 4  ;;  %v9550_v10 = vsel %vm9141_vm8, %v6750_v44, %v5471_v9  ;;  %v5485_v44 = vrot.slane %v9393_v49, 5  ;;  %v6753_v9 = vrot.slane %v5396_v26, 9  ;;  %v9574_v49 = vld [vmem:[#allocation2 + $0x80] sm:$0x1] }
 0x2bb   : > { %v9566_v58 = vsel %vm9141_vm8, %v5480_v16, %v5481_v48  ;;  %v5494_v57 = vrot.slane %v5492_v62, 4  ;;  %v5399_v16 = vld [vmem:[#allocation2 + $0x78] sm:$0xe]  ;;  %v5506_v48 = vrot.slane %v9443_v43, 5  ;;  %v9606_v43 = vld [vmem:[#allocation2 + $0x98] sm:$0x1] }
 0x2bc   : > { %v5487_v5 = vrot.slane %v5485_v44, 4 }
 0x2bd   : > { %7442 = vmatmul.mubr.bf16.gmra.mrb[4].mxu1 %v8066_v36  ;;  %v5394_v36 = vld [vmem:[#allocation2 + $0x3c] sm:$0xe] }
 0x2be   : > { %7445 = vmatprep.mubr.bf16.mxu1 %v8067_v0  ;;  %v9527_v0 = vld [vmem:[#allocation2 + $0x88] sm:$0xf]  ;;  %v6751_v55 = vrot.slane %v5394_v36, 9  ;;  %v9554_v36 = vsel %vm9141_vm8, %v5473_v53, %v5474_v54  ;;  %v5488_v53 = vrot.slane %v9438_v56, 5  ;;  %v9582_v56 = vsel %vm9141_vm8, %v6753_v9, %v5492_v62  ;;  %v9614_v54 = vld [vmem:[#allocation2 + $0xa0] sm:$0xf] }
 0x2bf   : > { %10231 = vst [vmem:[#allocation17_spill] sm:$0xff] %v9582_v56  ;;  %v9623_v62 = vld [vmem:[#allocation2 + $0xa4] sm:$0x1]  ;;  %v5406_v56 = vld [vmem:[#allocation2 + $0xcc] sm:$0xe] }
 0x2c0   : > { %v9561_v11 = vsel %vm9141_vm8, %v6751_v55, %v5478_v28  ;;  %v5495_v55 = vrot.slane %v9448_v12, 5  ;;  %v5499_v28 = vrot.slane %v9424_v7, 5  ;;  %v9587_v12 = vsel %vm9141_vm8, %v5487_v5, %v5488_v53  ;;  %v5401_v53 = vld [vmem:[#allocation2 + $0x90] sm:$0xe] }
 0x2c1   : > { %10232 = vst [vmem:[#allocation18_spill] sm:$0xff] %v9587_v12  ;;  %v5509_v5 = vrot.slane %v9472_v22, 5  ;;  %v6758_v61 = vrot.slane %v5401_v53, 9  ;;  %v9686_v12 = vld [vmem:[#allocation2 + $0xc8] sm:$0x1] }
 0x2c2   : > { %v5501_v7 = vrot.slane %v5499_v28, 4 }
 0x2c5   : > { %7446 = vmatmul.mubr.bf16.gmra.mrb[8].mxu1 %v8069_v47  ;;  %v8072_v47 = vld [vmem:[#allocation2 + $0xcc] sm:$0xff]  }
 0x2c6   : > { %7449 = vmatprep.mubr.bf16.mxu1 %v8070_v17  ;;  %v6752_v17 = vrot.slane %v5395_v51, 9  ;;  %v6754_v51 = vrot.slane %v5397_v38, 9  ;;  %v6755_v38 = vrot.slane %v5398_v31, 9  ;;  %v9597_v31 = vsel %vm9141_vm8, %v5494_v57, %v5495_v55 }
 0x2c7   : > { %10233 = vst [vmem:[#allocation19_spill] sm:$0xff] %v9597_v31  ;;  %v5508_v55 = vrot.slane %v5506_v48, 4  ;;  %v6756_v57 = vrot.slane %v5399_v16, 9  ;;  %v5516_v16 = vrot.slane %v9574_v49, 5  ;;  %v5534_v31 = vrot.slane %v9614_v54, 5 }
 0x2c8   : > { %v9578_v26 = vsel %vm9141_vm8, %v6752_v17, %v5485_v44  ;;  %v5400_v17 = vld [vmem:[#allocation2 + $0x84] sm:$0xe]  ;;  %v9591_v44 = vld [vmem:[#allocation2 + $0x8c] sm:$0x1]  ;;  %v9620_v22 = vsel %vm9141_vm8, %v6755_v38, %v5506_v48  ;;  %v5403_v38 = vld [vmem:[#allocation2 + $0xa8] sm:$0xe] }
 0x2c9   : > { %10236 = vst [vmem:[#allocation22_spill] sm:$0xff] %v9620_v22  ;;  %v6757_v23 = vrot.slane %v5400_v17, 9  ;;  %v5523_v48 = vrot.slane %v9591_v44, 5 }
 0x2cd   : > { %7450 = vmatmul.mubr.bf16.gmra.mrb[12].mxu1 %v8072_v47  ;;  %v5502_v47 = vrot.slane %v9453_v63, 5  ;;  %v9604_v63 = vld [vmem:[#allocation2 + $0x94] sm:$0xf] }
 0x2ce   : > { %7469 = vmatprep.mubr.bf16.mxu1 %v9403_v21  ;;  %v9601_v21 = vsel %vm9141_vm8, %v6754_v51, %v5499_v28  ;;  %v5513_v28 = vrot.slane %v9479_v45, 5  ;;  %v8074_v51 = vld [vmem:[#allocation8 + $0x208] sm:$0xff]   ;;  %v5527_v17 = vrot.slane %v9604_v63, 5 }
 0x2cf   : > { %10234 = vst [vmem:[#allocation23_spill] sm:$0xff] %v9601_v21  ;;  %v9612_v9 = vsel %vm9141_vm8, %v5501_v7, %v5502_v47  ;;  %v9627_v7 = vsel %vm9141_vm8, %v5508_v55, %v5509_v5  ;;  %v5520_v47 = vrot.slane %v9527_v0, 5  ;;  %v9639_v5 = vld [vmem:[#allocation2 + $0xb8] sm:$0xf]  ;;  %v5530_v21 = vrot.slane %v9606_v43, 5 }
 0x2d0   : > { %10235 = vst [vmem:[#allocation20_spill] sm:$0xff] %v9612_v9  ;;  %10237 = vst [vmem:[#allocation21_spill] sm:$0xff] %v9627_v7  ;;  %v5515_v45 = vrot.slane %v5513_v28, 4  ;;  %v9643_v55 = vsel %vm9141_vm8, %v6756_v57, %v5513_v28  ;;  %v6759_v9 = vrot.slane %v5402_v33, 9  ;;  %v5529_v22 = vrot.slane %v5527_v17, 4 }
 0x2d1   : > { %10238 = vst [vmem:[#allocation24_spill] sm:$0xff] %v9643_v55  ;;  %v9647_v53 = vsel %vm9141_vm8, %v6757_v23, %v5520_v47  ;;  %v5522_v46 = vrot.slane %v5520_v47, 4  ;;  %v5404_v57 = vld [vmem:[#allocation2 + $0xb4] sm:$0xe]  ;;  %v9658_v23 = vld [vmem:[#allocation2 + $0xbc] sm:$0x1]  ;;  %v9668_v28 = vsel %vm9141_vm8, %v6758_v61, %v5527_v17 }
 0x2d2   : > { %10239 = vst [vmem:[#allocation25_spill] sm:$0xff] %v9647_v53  ;;  %v9652_v7 = vsel %vm9141_vm8, %v5515_v45, %v5516_v16  ;;  %10242 = vst [vmem:[#allocation28_spill] sm:$0xff] %v9668_v28  ;;  %v5537_v16 = vrot.slane %v9623_v62, 5  ;;  %v5405_v47 = vld [vmem:[#allocation2 + $0xc0] sm:$0xe]  ;;  %v9677_v33 = vsel %vm9141_vm8, %v5529_v22, %v5530_v21  ;;  %v9683_v17 = vsel %vm9141_vm8, %v6759_v9, %v5534_v31 }
 0x2d3   : > { %10240 = vst [vmem:[#allocation26_spill] sm:$0xff] %v9652_v7  ;;  %v9671_v45 = vld [vmem:[#allocation2 + $0xc4] sm:$0xf]  ;;  %10243 = vst [vmem:[#allocation29_spill] sm:$0xff] %v9677_v33  ;;  %v5541_v7 = vrot.slane %v9631_v25, 5  ;;  %v6761_v55 = vrot.slane %v5404_v57, 9 }
 0x2d4   : > { %10244 = vst [vmem:[#allocation30_spill] sm:$0xff] %v9683_v17  ;;  %v5544_v21 = vrot.slane %v9637_v35, 5  ;;  %v5548_v22 = vrot.slane %v9639_v5, 5  ;;  %v5551_v61 = vrot.slane %v9658_v23, 5  ;;  %v5555_v57 = vrot.slane %v9671_v45, 5  ;;  %v8076_v33 = vld [vmem:[#allocation8 + $0x218] sm:$0xff]  }
 0x2d5   : > { %7470 = vmatmul.mubr.bf16.vlgmr.msra.gmra.mrb[16].mxu1 %v9429_v19  ;;  %v9664_v19 = vsel %vm9141_vm8, %v5522_v46, %v5523_v48  ;;  %v5536_v46 = vrot.slane %v5534_v31, 4  ;;  %v6760_v48 = vrot.slane %v5403_v38, 9  ;;  %v6762_v38 = vrot.slane %v5405_v47, 9  ;;  %v9698_v28 = vld [vmem:[#allocation2 + $0xd0] sm:$0xf] }
 0x2d6   : > { %7502 = vmatpush3.bf16.msra.mxu1 %v9410_v60  ;;  %7473 = vmatprep.mubr.bf16.mxu1 %v9487_v15  ;;  %10241 = vst [vmem:[#allocation27_spill] sm:$0xff] %v9664_v19  ;;  %v8075_v60 = vld [vmem:[#allocation8 + $0x210] sm:$0xff]   ;;  %v5543_v31 = vrot.slane %v5541_v7, 4  ;;  %v9706_v47 = vsel %vm9141_vm8, %v6761_v55, %v5548_v22  ;;  %v9708_v9 = vld [vmem:[#allocation2 + $0xd4] sm:$0x1]  ;;  %v5557_v17 = vrot.slane %v5555_v57, 4 }
 0x2d7   : > { %7503 = vmatprep.subr.bf16.mxu1 %v8074_v51  ;;  %v9690_v15 = vsel %vm9141_vm8, %v5536_v46, %v5537_v16  ;;  %v9702_v16 = vsel %vm9141_vm8, %v6760_v48, %v5541_v7  ;;  %v6763_v46 = vrot.slane %v5406_v56, 9  ;;  %v5558_v19 = vrot.slane %v9686_v12, 5 }
 0x2d8   : > { %10245 = vst [vmem:[#allocation31_spill] sm:$0xff] %v9690_v15  ;;  %v9712_v15 = vsel %vm9141_vm8, %v5543_v31, %v5544_v21  ;;  %v5562_v53 = vrot.slane %v9698_v28, 5  ;;  %v9725_v56 = vsel %vm9141_vm8, %v6762_v38, %v5555_v57  ;;  %v5565_v48 = vrot.slane %v9708_v9, 5  ;;  %v8077_v31 = vld [vmem:[#allocation8 + $0x220] sm:$0xff]  }
 0x2d9   : > { %v4897_v38 = vshll.u32 %v9574_v49, 16  ;;  %v4935_v57 = vshll.u32 %v9604_v63, 16 }
 0x2da   : > { %7504 = vmatpush3.bf16.msra.mxu1 %v8074_v51  ;;  %v5550_v51 = vrot.slane %v5548_v22, 4  ;;  %v5564_v22 = vrot.slane %v5562_v53, 4 }
 0x2db   : > { %7505 = vmatprep.subr.bf16.mxu1 %v8075_v60 }
 0x2dc   : > { %v9721_v55 = vsel %vm9141_vm8, %v5550_v51, %v5551_v61  ;;  %v9737_v61 = vsel %vm9141_vm8, %v6763_v46, %v5562_v53  ;;  %v10246_v51 = vshrl.u32 %v9517_v32, 16  ;;  %v9752_v49 = vsel %vm9141_vm8, %v5564_v22, %v5565_v48 }
 0x2dd   : > { %7474 = vmatmul.mubr.bf16.gmra.mrb[20].mxu1 %v9496_v1  ;;  %v9733_v1 = vsel %vm9141_vm8, %v5557_v17, %v5558_v19  ;;  %v4884_v19 = vor.u32 %v9529_v24, %v9525_v29  ;;  %v4894_v17 = vor.u32 %v9533_v59, %v9531_v3  ;;  %v10247_v46 = vshll.u32 %v9517_v32, 16 }
 0x2de   : > { %7477 = vmatprep.mubr.bf16.mxu1 %v9498_v41  ;;  %7506 = vmatpush3.bf16.msra.mxu1 %v8075_v60  ;;  %v4939_v41 = vshrl.u32 %v9604_v63, 16  ;;  %v4904_v53 = vrot.slane %v10246_v51, 4  ;;  %v10248_v63 = vshll.u32 %v9527_v0, 16  ;;  %v10249_v60 = vshrl.u32 %v9527_v0, 16 }
 0x2df   : > { %7507 = vmatprep.subr.bf16.mxu1 %v8076_v33  ;;  %v4907_v21 = vrot.slane %v10247_v46, 5  ;;  %v4866_v59 = vsel %vm8649_vm2, %v9515_v20, %v9477_v52  ;;  %v4876_v32 = vsel %vm8649_vm2, %v9538_v13, %v9523_v40  ;;  %v10250_v48 = vshrl.u32 %v9535_v4, 16  ;;  %v4670_v46 = vld [vmem:[#allocation2 + $0x9c] sm:$0xf] }
 0x2e0   : > { %v9758_v7 = vrot.slane %v10248_v63, 5  ;;  %v4917_v29 = vrot.slane %v10249_v60, 4  ;;  %v10251_v0 = vshll.u32 %v9535_v4, 16  ;;  %v10252_v51 = vsel %vm8649_vm2, %v9483_v2, %v9492_v39 }
 0x2e1   : > { %v4928_v22 = vrot.slane %v10250_v48, 4  ;;  %v10253_v52 = vsel %vm8649_vm2, %v9481_v30, %v9441_v6  ;;  %v9786_v40 = vrot.slane %v4935_v57, 5  ;;  %v4941_v13 = vrot.slane %v4939_v41, 4  ;;  %v4673_v30 = vld [vmem:[#allocation2 + $0xa8] sm:$0xf] }
 0x2e2   : > { %7508 = vmatpush3.bf16.msra.mxu1 %v8076_v33  ;;  %v4931_v60 = vrot.slane %v10251_v0, 5  ;;  %v6729_v20 = vcombine.low %v10253_v52, %v10252_v51  ;;  %v8078_v33 = vld [vmem:[#allocation8 + $0x228] sm:$0xff]   ;;  %v10254_v4 = vsel %vm8649_vm2, %v9489_v37, %v9500_v34  ;;  %v10255_v2 = vsel %vm8649_vm2, %v9485_v8, %v9446_v50 }
 0x2e3   : > { %7509 = vmatprep.subr.bf16.mxu1 %v8077_v31  ;;  %v6730_v39 = vcombine.low %v10255_v2, %v10254_v4  ;;  %v4885_v63 = vrot.slane %v4884_v19, 4  ;;  %v4899_v6 = vrot.slane %v4897_v38, 5  ;;  %v6731_v57 = vcombine.low %v4866_v59, %v4876_v32  ;;  %v8079_v19 = vld [vmem:[#allocation8 + $0x230] sm:$0xff]   ;;  %v8080_v2 = vld [vmem:[#allocation8 + $0x238] sm:$0xff]  }
 0x2e4   : > { %v4895_v48 = vrot.slane %v4894_v17, 4  ;;  %v4908_v41 = vor.u32 %v4907_v21, %v4904_v53  ;;  %v4918_v0 = vor.u32 %v4917_v29, %v9758_v7  ;;  %v4932_v51 = vor.u32 %v4931_v60, %v4928_v22 }
 0x2e5   : > { %7478 = vmatmul.mubr.bf16.gmra.mrb[24].mxu1 %v6729_v20  ;;  %v4950_v52 = vshrl.u32 %v4670_v46, 16  ;;  %v4953_v37 = vshll.u32 %v4670_v46, 16  ;;  %v4959_v34 = vshll.u32 %v9614_v54, 16  ;;  %v4942_v24 = vor.u32 %v4941_v13, %v9786_v40 }
 0x2e6   : > { %7481 = vmatprep.mubr.bf16.mxu1 %v6730_v39  ;;  %7510 = vmatpush3.bf16.msra.mxu1 %v8077_v31  ;;  %v4963_v50 = vshrl.u32 %v9614_v54, 16  ;;  %v4974_v8 = vshrl.u32 %v4673_v30, 16  ;;  %v4977_v38 = vshll.u32 %v4673_v30, 16  ;;  %v4890_v21 = vsel %vm8649_vm2, %v4885_v63, %v9531_v3  ;;  %v4676_v30 = vld [vmem:[#allocation2 + $0xb4] sm:$0xf] }
 0x2e7   : > { %7511 = vmatprep.subr.bf16.mxu1 %v8078_v33  ;;  %v4921_v17 = vshll.u32 %v9591_v44, 16  ;;  %v4983_v31 = vshll.u32 %v9631_v25, 16  ;;  %v4987_v53 = vshrl.u32 %v9631_v25, 16  ;;  %v4900_v29 = vsel %vm8649_vm2, %v4895_v48, %v4899_v6 }
 0x2e8   : > { %v4909_v59 = vrot.slane %v4908_v41, 4  ;;  %v4919_v32 = vrot.slane %v4918_v0, 4  ;;  %v4945_v54 = vshll.u32 %v9606_v43, 16  ;;  %v4933_v22 = vrot.slane %v4932_v51, 4  ;;  %v4679_v51 = vld [vmem:[#allocation2 + $0xc0] sm:$0xf] }
 0x2e9   : > { %v4952_v60 = vrot.slane %v4950_v52, 4  ;;  %v4955_v20 = vrot.slane %v4953_v37, 5  ;;  %v9811_v13 = vrot.slane %v4959_v34, 5  ;;  %v4943_v3 = vrot.slane %v4942_v24, 4 }
 0x2ea   : > { %7512 = vmatpush3.bf16.msra.mxu1 %v8078_v33  ;;  %v4965_v46 = vrot.slane %v4963_v50, 4  ;;  %v4976_v44 = vrot.slane %v4974_v8, 4  ;;  %v4979_v4 = vrot.slane %v4977_v38, 5  ;;  %v6732_v25 = vcombine.low %v4890_v21, %v4900_v29 }
 0x2eb   : > { %7513 = vmatprep.subr.bf16.mxu1 %v8079_v19  ;;  %v4923_v39 = vrot.slane %v4921_v17, 5  ;;  %v9813_v63 = vrot.slane %v4983_v31, 5  ;;  %v4989_v6 = vrot.slane %v4987_v53, 4  ;;  %v4914_v43 = vsel %vm8649_vm2, %v4909_v59, %v9758_v7 }
 0x2ec   : > { %v4947_v48 = vrot.slane %v4945_v54, 5  ;;  %v4938_v33 = vsel %vm8649_vm2, %v4933_v22, %v9786_v40  ;;  %v4956_v41 = vor.u32 %v4955_v20, %v4952_v60  ;;  %v4969_v0 = vshll.u32 %v9623_v62, 16  ;;  %v4682_v60 = vld [vmem:[#allocation2 + $0xcc] sm:$0xf] }
 0x2ed   : > { %7482 = vmatmul.mubr.bf16.gmra.mrb[28].mxu1 %v6731_v57  ;;  %v4924_v24 = vsel %vm8649_vm2, %v4919_v32, %v4923_v39  ;;  %v4966_v52 = vor.u32 %v4965_v46, %v9811_v13  ;;  %v4980_v7 = vor.u32 %v4979_v4, %v4976_v44  ;;  %v4998_v37 = vshrl.u32 %v4676_v30, 16 }
 0x2ee   : > { %7485 = vmatprep.mubr.bf16.mxu1 %v6732_v25  ;;  %7514 = vmatpush3.bf16.msra.mxu1 %v8079_v19  ;;  %v4948_v57 = vsel %vm8649_vm2, %v4943_v3, %v4947_v48  ;;  %v4990_v34 = vor.u32 %v4989_v6, %v9813_v63  ;;  %v5001_v50 = vshll.u32 %v4676_v30, 16  ;;  %v5007_v8 = vshll.u32 %v9639_v5, 16 }
 0x2ef   : > { %7515 = vmatprep.subr.bf16.mxu1 %v8080_v2  ;;  %v5011_v40 = vshrl.u32 %v9639_v5, 16  ;;  %v5022_v38 = vshrl.u32 %v4679_v51, 16  ;;  %v5025_v21 = vshll.u32 %v4679_v51, 16  ;;  %v5031_v62 = vshll.u32 %v9671_v45, 16 }
 0x2f0   : > { %v5035_v19 = vshrl.u32 %v9671_v45, 16  ;;  %v6733_v17 = vcombine.low %v4914_v43, %v4924_v24  ;;  %v6734_v31 = vcombine.low %v4938_v33, %v4948_v57  ;;  %v4957_v53 = vrot.slane %v4956_v41, 4 }
 0x2f1   : > { %v4971_v29 = vrot.slane %v4969_v0, 5  ;;  %v4967_v59 = vrot.slane %v4966_v52, 4  ;;  %v4981_v32 = vrot.slane %v4980_v7, 4  ;;  %v4993_v54 = vshll.u32 %v9637_v35, 16 }
 0x2f2   : > { %7516 = vmatpush3.bf16.msra.mxu1 %v8080_v2  ;;  %v5000_v22 = vrot.slane %v4998_v37, 4  ;;  %v4991_v20 = vrot.slane %v4990_v34, 4  ;;  %v5003_v3 = vrot.slane %v5001_v50, 5  ;;  %v5009_v5 = vrot.slane %v5007_v8, 5 }
 0x2f3   : > { %v5013_v46 = vrot.slane %v5011_v40, 4  ;;  %v5024_v44 = vrot.slane %v5022_v38, 4  ;;  %v5027_v4 = vrot.slane %v5025_v21, 5  ;;  %v5033_v25 = vrot.slane %v5031_v62, 5 }
 0x2f4   : > { %v5037_v45 = vrot.slane %v5035_v19, 4  ;;  %v5046_v39 = vshrl.u32 %v4682_v60, 16  ;;  %v5049_v6 = vshll.u32 %v4682_v60, 16  ;;  %v5055_v2 = vshll.u32 %v9698_v28, 16 }
 0x2f5   : > { %7486 = vmatmul.mubr.bf16.gmra.mrb[0].mxu1 %v6733_v17  ;;  %v5059_v30 = vshrl.u32 %v9698_v28, 16  ;;  %v4962_v35 = vsel %vm8649_vm2, %v4957_v53, %v9811_v13  ;;  %v4995_v43 = vrot.slane %v4993_v54, 5  ;;  %v4972_v48 = vsel %vm8649_vm2, %v4967_v59, %v4971_v29 }
 0x2f6   : > { %7489 = vmatprep.mubr.bf16.mxu1 %v6734_v31  ;;  %v4986_v24 = vsel %vm8649_vm2, %v4981_v32, %v9813_v63  ;;  %v5004_v33 = vor.u32 %v5003_v3, %v5000_v22  ;;  %v5014_v41 = vor.u32 %v5013_v46, %v5009_v5  ;;  %v5017_v51 = vshll.u32 %v9658_v23, 16  ;;  %v8143_v32 = vld [vmem:[#allocation2 + $0x1c] sm:$0xf] }
 0x2f7   : > { %v4996_v0 = vsel %vm8649_vm2, %v4991_v20, %v4995_v43  ;;  %v5028_v28 = vor.u32 %v5027_v4, %v5024_v44  ;;  %v5038_v57 = vor.u32 %v5037_v45, %v5033_v25  ;;  %v5048_v52 = vrot.slane %v5046_v39, 4  ;;  %v8081_v3 = vld [vmem:[#allocation9] sm:$0xff]   ;;  %v8083_v39 = vld [vmem:[#allocation9 + $0x10] sm:$0xff]  }
 0x2f8   : > { %v5051_v7 = vrot.slane %v5049_v6, 5  ;;  %v5057_v13 = vrot.slane %v5055_v2, 5  ;;  %v5061_v37 = vrot.slane %v5059_v30, 4  ;;  %v6735_v34 = vcombine.low %v4962_v35, %v4972_v48  ;;  %v5391_v4 = vld [vmem:[#allocation2 + $0x18] sm:$0xe]  ;;  %7549 = vmatprep.subr.bf16.mxu0 %v8081_v3 }
 0x2f9   : > { %v5041_v50 = vshll.u32 %v9686_v12, 16  ;;  %v6736_v8 = vcombine.low %v4986_v24, %v4996_v0  ;;  %v5005_v40 = vrot.slane %v5004_v33, 4  ;;  %v5015_v38 = vrot.slane %v5014_v41, 4  ;;  %7550 = vmatpush3.bf16.msra.mxu0 %v8081_v3  ;;  %v8144_v30 = vld [vmem:[#allocation2 + $0x28] sm:$0xf]  ;;  %v8084_v24 = vld [vmem:[#allocation9 + $0x18] sm:$0xff]  }
 0x2fa   : > { %v5029_v63 = vrot.slane %v5028_v28, 4  ;;  %v5039_v21 = vrot.slane %v5038_v57, 4  ;;  %v5019_v62 = vrot.slane %v5017_v51, 5  ;;  %v5052_v19 = vor.u32 %v5051_v7, %v5048_v52  ;;  %v5392_v41 = vld [vmem:[#allocation2 + $0x24] sm:$0xe]  ;;  %v8085_v28 = vld [vmem:[#allocation9 + $0x20] sm:$0xff]  }
 0x2fb   : > { %v5062_v17 = vor.u32 %v5061_v37, %v5057_v13  ;;  %v5065_v23 = vshll.u32 %v9708_v9, 16  ;;  %v5043_v31 = vrot.slane %v5041_v50, 5  ;;  %v5010_v53 = vsel %vm8649_vm2, %v5005_v40, %v5009_v5  ;;  %v8082_v9 = vld [vmem:[#allocation9 + $0x8] sm:$0xff]   ;;  %v10260_v50 = vld [vmem:[#allocation17_spill] sm:$0xff]  ;;  %v10263_v40 = vld [vmem:[#allocation23_spill] sm:$0xff] }
 0x2fc   : > { %v5020_v29 = vsel %vm8649_vm2, %v5015_v38, %v5019_v62  ;;  %v5034_v12 = vsel %vm8649_vm2, %v5029_v63, %v5033_v25  ;;  %v5457_v54 = vrot.slane %v8143_v32, 5  ;;  %v5053_v22 = vrot.slane %v5052_v19, 4  ;;  %7551 = vmatprep.subr.bf16.mxu0 %v8082_v9  ;;  %v10258_v37 = vld [vmem:[#allocation18_spill] sm:$0xff]  ;;  %v10264_v38 = vld [vmem:[#allocation20_spill] sm:$0xff]  ;;  %v10267_v62 = vld [vmem:[#allocation21_spill] sm:$0xff] }
 0x2fd   : > { %7490 = vmatmul.mubr.bf16.gmra.mrb[4].mxu1 %v6735_v34  ;;  %v5044_v59 = vsel %vm8649_vm2, %v5039_v21, %v5043_v31  ;;  %v5063_v60 = vrot.slane %v5062_v17, 4  ;;  %v5067_v20 = vrot.slane %v5065_v23, 5  ;;  %v6737_v46 = vcombine.low %v5010_v53, %v5020_v29  ;;  %7552 = vmatpush3.bf16.msra.mxu0 %v8082_v9  ;;  %v10266_v21 = vld [vmem:[#allocation22_spill] sm:$0xff]  ;;  %v10273_v17 = vld [vmem:[#allocation27_spill] sm:$0xff]  ;;  %v10275_v23 = vld [vmem:[#allocation28_spill] sm:$0xff] }
 0x2fe   : > { %7493 = vmatprep.mubr.bf16.mxu1 %v6736_v8  ;;  %v6738_v44 = vcombine.low %v5034_v12, %v5044_v59  ;;  %v5459_v5 = vrot.slane %v5457_v54, 4  ;;  %v5058_v25 = vsel %vm8649_vm2, %v5053_v22, %v5057_v13  ;;  %v6748_v6 = vrot.slane %v5391_v4, 9  ;;  %7553 = vmatprep.subr.bf16.mxu0 %v8083_v39  ;;  %v10261_v8 = vld [vmem:[#allocation19_spill] sm:$0xff]  ;;  %v10270_v19 = vld [vmem:[#allocation26_spill] sm:$0xff]  ;;  %v10276_v31 = vld [vmem:[#allocation29_spill] sm:$0xff] }
 0x2ff   : > { %v5068_v45 = vsel %vm8649_vm2, %v5063_v60, %v5067_v20  ;;  %v5460_v2 = vrot.slane %v9373_v42, 5  ;;  %v5464_v35 = vrot.slane %v8144_v30, 5  ;;  %v6749_v51 = vrot.slane %v5392_v41, 9  ;;  %v10278_v29 = vld [vmem:[#allocation30_spill] sm:$0xff]  ;;  %v10279_v12 = vld [vmem:[#allocation31_spill] sm:$0xff]  ;;  %v8088_v41 = vld [vmem:[#allocation9 + $0x38] sm:$0xff]  }
 0x300   : > { %v6739_v43 = vcombine.low %v5058_v25, %v5068_v45  ;;  %v5458_v33 = vsel %vm9141_vm8, %v6748_v6, %v5457_v54  ;;  %v5467_v42 = vrot.slane %v9379_v27, 5  ;;  %v10256_v13 = vcombine.low %v9550_v10, %v9554_v36  ;;  %v10269_v36 = vld [vmem:[#allocation24_spill] sm:$0xff]  ;;  %v8086_v30 = vld [vmem:[#allocation9 + $0x28] sm:$0xff]  }
 0x301   : > { %v5461_v48 = vsel %vm9141_vm8, %v5459_v5, %v5460_v2  ;;  %v5466_v0 = vrot.slane %v5464_v35, 4  ;;  %7554 = vmatpush3.bf16.msra.mxu0 %v8083_v39  ;;  %v5465_v52 = vsel %vm9141_vm8, %v6749_v51, %v5464_v35  ;;  %v10257_v27 = vcombine.low %v9561_v11, %v9566_v58  ;;  %v10272_v11 = vld [vmem:[#allocation25_spill] sm:$0xff] }
 0x302   : > { %v6764_v18 = vcombine.low %v5458_v33, %v5461_v48  ;;  %7555 = vmatprep.subr.bf16.mxu0 %v8084_v24  ;;  %v10259_v34 = vcombine.low %v9578_v26, %v10258_v37  ;;  %v10262_v14 = vcombine.low %v10260_v50, %v10261_v8  ;;  %v10265_v63 = vcombine.low %v10263_v40, %v10264_v38 }
 0x303   : > { %v5468_v57 = vsel %vm9141_vm8, %v5466_v0, %v5467_v42  ;;  %v10268_v10 = vcombine.low %v10266_v21, %v10267_v62  ;;  %v10271_v58 = vcombine.low %v10269_v36, %v10270_v19  ;;  %v10274_v26 = vcombine.low %v10272_v11, %v10273_v17 }
 0x304   : > { %v6765_v7 = vcombine.low %v5465_v52, %v5468_v57  ;;  %v10277_v53 = vcombine.low %v10275_v23, %v10276_v31  ;;  %v10280_v59 = vcombine.low %v10278_v29, %v10279_v12  ;;  %v10281_v32 = vcombine.low %v9702_v16, %v9712_v15 }
 0x305   : > { %7494 = vmatmul.mubr.bf16.gmra.mrb[8].mxu1 %v6737_v46  ;;  %7556 = vmatpush3.bf16.msra.mxu0 %v8084_v24  ;;  %v10282_v54 = vcombine.low %v9706_v47, %v9721_v55  ;;  %v10283_v22 = vcombine.low %v9725_v56, %v9733_v1  ;;  %v10284_v15 = vcombine.low %v9737_v61, %v9752_v49  ;;  %v8087_v24 = vld [vmem:[#allocation9 + $0x30] sm:$0xff]  }
 0x306   : > { %7497 = vmatprep.mubr.bf16.mxu1 %v6738_v44  ;;  %7557 = vmatprep.subr.bf16.mxu0 %v8085_v28 }
 0x309   : > { %7558 = vmatpush3.bf16.msra.mxu0 %v8085_v28 }
 0x30a   : > { %7559 = vmatprep.subr.bf16.mxu0 %v8086_v30 }
 0x30d   : > { %7498 = vmatmul.mubr.bf16.gmra.mrb[12].mxu1 %v6739_v43  ;;  %7560 = vmatpush3.bf16.msra.mxu0 %v8086_v30 }
 0x30e   : > { %7517 = vmatprep.mubr.bf16.mxu1 %v6764_v18  ;;  %7561 = vmatprep.subr.bf16.mxu0 %v8087_v24 }
 0x311   : > { %7562 = vmatpush3.bf16.msra.mxu0 %v8087_v24 }
 0x312   : > { %7563 = vmatprep.subr.bf16.mxu0 %v8088_v41 }
 0x315   : > { %7518 = vmatmul.mubr.bf16.vlgmr.msra.gmra.mrb[16].mxu1 %v6765_v7  ;;  %7564 = vmatpush3.bf16.msra.mxu0 %v8088_v41 }
 0x316   : > { %7521 = vmatprep.mubr.bf16.mxu1 %v10256_v13 }
 0x31d   : > { %7522 = vmatmul.mubr.bf16.gmra.mrb[20].mxu1 %v10257_v27  ;;  %v9953_v27 = vld [vmem:[%s10167_s5] ss:$0 sm:$0xff] }
 0x31e   : > { %7525 = vmatprep.mubr.bf16.mxu1 %v10259_v34 }
 0x325   : > { %7526 = vmatmul.mubr.bf16.gmra.mrb[24].mxu1 %v10262_v14 }
 0x326   : > { %7529 = vmatprep.mubr.bf16.mxu1 %v10265_v63 }
 0x32d   : > { %7530 = vmatmul.mubr.bf16.gmra.mrb[28].mxu1 %v10268_v10 }
 0x32e   : > { %7533 = vmatprep.mubr.bf16.mxu1 %v10271_v58 }
 0x335   : > { %7534 = vmatmul.mubr.bf16.gmra.mrb[0].mxu1 %v10274_v26 }
 0x336   : > { %7537 = vmatprep.mubr.bf16.mxu1 %v10277_v53 }
 0x33d   : > { %7538 = vmatmul.mubr.bf16.gmra.mrb[4].mxu1 %v10280_v59 }
 0x33e   : > { %7541 = vmatprep.mubr.bf16.mxu1 %v10281_v32 }
 0x345   : > { %7542 = vmatmul.mubr.bf16.gmra.mrb[8].mxu1 %v10282_v54 }
 0x346   : > { %7545 = vmatprep.mubr.bf16.mxu1 %v10283_v22 }
 0x347   : > { %v9909_v60 = vpop.f32.mrb[48].mxu0 }
 0x348   : > { %v9911_v20 = vpop.f32.mrb[49].mxu0 }
 0x349   : > { %v9913_v3 = vpop.f32.mrb[50].mxu0 }
 0x34a   : > { %v9915_v9 = vpop.f32.mrb[51].mxu0 }
 0x34d   : > { %7546 = vmatmul.mubr.bf16.gmra.mrb[12].mxu1 %v10284_v15 }
 0x34f   : > { %v9920_v16 = vpop.f32.mrb[52].mxu0 }
 0x350   : > { %v9922_v47 = vpop.f32.mrb[53].mxu0 }
 0x351   : > { %v9924_v55 = vpop.f32.mrb[54].mxu0 }
 0x352   : > { %v9926_v56 = vpop.f32.mrb[55].mxu0 }
 0x357   : > { %v9928_v1 = vpop.f32.mrb[56].mxu0 }
 0x358   : > { %v9930_v46 = vpop.f32.mrb[57].mxu0 }
 0x359   : > { %v9932_v44 = vpop.f32.mrb[58].mxu0 }
 0x35a   : > { %v9934_v4 = vpop.f32.mrb[59].mxu0 }
 0x35f   : > { %v9936_v5 = vpop.f32.mrb[60].mxu0 }
 0x360   : > { %v9938_v61 = vpop.f32.mrb[61].mxu0 }
 0x361   : > { %v9940_v49 = vpop.f32.mrb[62].mxu0 }
 0x362   : > { %v9942_v25 = vpop.f32.mrb[63].mxu0 }
 0x367   : > { %v7279_v45 = vpop.f32.mrb[32].mxu0 }
 0x368   : > { %v2839_v39 = vpop.f32.mrb[33].mxu0 }
 0x369   : > { %v7280_v6 = vpop.f32.mrb[34].mxu0 }
 0x36a   : > { %v2842_v2 = vpop.f32.mrb[35].mxu0 }
 0x36f   : > { %v7283_v35 = vpop.f32.mrb[36].mxu0 }
 0x370   : > { %v2855_v43 = vpop.f32.mrb[37].mxu0 }
 0x371   : > { %v7284_v48 = vpop.f32.mrb[38].mxu0 }
 0x372   : > { %v2858_v33 = vpop.f32.mrb[39].mxu0 }
 0x377   : > { %v7287_v18 = vpop.f32.mrb[40].mxu0 }
 0x378   : > { %v2871_v0 = vpop.f32.mrb[41].mxu0 }
 0x379   : > { %v7288_v51 = vpop.f32.mrb[42].mxu0 }
 0x37a   : > { %v2874_v42 = vpop.f32.mrb[43].mxu0 }
 0x37f   : > { %v7291_v28 = vpop.f32.mrb[44].mxu0 }
 0x380   : > { %v9944_v57 = vpop.f32.mrb[45].mxu0 }
 0x381   : > { %v9946_v52 = vpop.f32.mrb[46].mxu0 }
 0x382   : > { %v9948_v7 = vpop.f32.mrb[47].mxu0 }
 0x3e8   : > { %v7519_v13 = vpop.f32.mrb[16].mxu1 }
 0x3e9   : > { %v7613_v37 = vadd.f32 %v7519_v13, %v7279_v45  ;;  %v5730_v34 = vpop.f32.mrb[17].mxu1 }
 0x3ea   : > { %v7614_v50 = vadd.f32 %v5730_v34, %v2839_v39  ;;  %v7520_v8 = vpop.f32.mrb[18].mxu1 }
 0x3eb   : > { %v5898_v14 = vadd.f32 %v7613_v37, %v9953_v27  ;;  %v7615_v40 = vadd.f32 %v7520_v8, %v7280_v6  ;;  %v5733_v38 = vpop.f32.mrb[19].mxu1 }
 0x3ec   : > { %v5896_v63 = vadd.f32 %v7614_v50, %v9953_v27  ;;  %v7616_v21 = vadd.f32 %v5733_v38, %v2842_v2 }
 0x3ed   : > { %v5899_v62 = vadd.f32 %v7615_v40, %v9953_v27  ;;  %v5930_v36 = vmax.f32 %v5898_v14, 0.0 }
 0x3ee   : > { %v5897_v10 = vadd.f32 %v7616_v21, %v9953_v27  ;;  %v5928_v58 = vmax.f32 %v5896_v63, 0.0 }
 0x3ef   : > { %v5931_v19 = vmax.f32 %v5899_v62, 0.0 }
 0x3f0   : > { %v5929_v11 = vmax.f32 %v5897_v10, 0.0  ;;  %v7523_v17 = vpop.f32.mrb[20].mxu1 }
 0x3f1   : > { %v5961_v26 = vpack.c.bf16 %v5931_v19, %v5930_v36  ;;  %v7617_v23 = vadd.f32 %v7523_v17, %v7283_v35  ;;  %v5746_v31 = vpop.f32.mrb[21].mxu1 }
 0x3f2   : > { %v7618_v53 = vadd.f32 %v5746_v31, %v2855_v43  ;;  %v7524_v29 = vpop.f32.mrb[22].mxu1  ;;  %v5960_v12 = vpack.c.bf16 %v5929_v11, %v5928_v58 }
 0x3f3   : > { %v5902_v59 = vadd.f32 %v7617_v23, %v9953_v27  ;;  %v7619_v32 = vadd.f32 %v7524_v29, %v7284_v48  ;;  %v5749_v54 = vpop.f32.mrb[23].mxu1 }
 0x3f4   : > { %v5900_v22 = vadd.f32 %v7618_v53, %v9953_v27  ;;  %v7620_v15 = vadd.f32 %v5749_v54, %v2858_v33  ;;  %7565 = vmatprep.mubr.bf16.mxu0 %v5960_v12 }
 0x3f5   : > { %v5903_v45 = vadd.f32 %v7619_v32, %v9953_v27  ;;  %7566 = vmatmul.mubr.bf16.vlgmr.msra.gmra.mrb[64].mxu0 %v5961_v26  ;;  %v5934_v6 = vmax.f32 %v5902_v59, 0.0 }
 0x3f6   : > { %v5901_v39 = vadd.f32 %v7620_v15, %v9953_v27  ;;  %v5932_v30 = vmax.f32 %v5900_v22, 0.0 }
 0x3f7   : > { %v5935_v2 = vmax.f32 %v5903_v45, 0.0 }
 0x3f8   : > { %v5933_v35 = vmax.f32 %v5901_v39, 0.0  ;;  %v7527_v43 = vpop.f32.mrb[24].mxu1 }
 0x3f9   : > { %v7621_v24 = vadd.f32 %v7527_v43, %v7287_v18  ;;  %v5762_v41 = vpop.f32.mrb[25].mxu1  ;;  %v5963_v13 = vpack.c.bf16 %v5935_v2, %v5934_v6 }
 0x3fa   : > { %v7622_v37 = vadd.f32 %v5762_v41, %v2871_v0  ;;  %v7528_v48 = vpop.f32.mrb[26].mxu1  ;;  %v5962_v34 = vpack.c.bf16 %v5933_v35, %v5932_v30 }
 0x3fb   : > { %v5906_v50 = vadd.f32 %v7621_v24, %v9953_v27  ;;  %v7623_v33 = vadd.f32 %v7528_v48, %v7288_v51  ;;  %v5765_v8 = vpop.f32.mrb[27].mxu1 }
 0x3fc   : > { %v5904_v14 = vadd.f32 %v7622_v37, %v9953_v27  ;;  %v7624_v40 = vadd.f32 %v5765_v8, %v2874_v42  ;;  %7569 = vmatprep.mubr.bf16.mxu0 %v5962_v34 }
 0x3fd   : > { %v5907_v38 = vadd.f32 %v7623_v33, %v9953_v27  ;;  %7570 = vmatmul.mubr.bf16.gmra.mrb[68].mxu0 %v5963_v13  ;;  %v5938_v21 = vmax.f32 %v5906_v50, 0.0 }
 0x3fe   : > { %v5905_v63 = vadd.f32 %v7624_v40, %v9953_v27  ;;  %v5936_v62 = vmax.f32 %v5904_v14, 0.0 }
 0x3ff   : > { %v5939_v18 = vmax.f32 %v5907_v38, 0.0 }
 0x400   : > { %v5937_v10 = vmax.f32 %v5905_v63, 0.0  ;;  %v7531_v0 = vpop.f32.mrb[28].mxu1 }
 0x401   : > { %v7625_v36 = vadd.f32 %v7531_v0, %v7291_v28  ;;  %v5778_v19 = vpop.f32.mrb[29].mxu1  ;;  %v5965_v58 = vpack.c.bf16 %v5939_v18, %v5938_v21 }
 0x402   : > { %v7626_v51 = vadd.f32 %v5778_v19, %v9944_v57  ;;  %v7532_v11 = vpop.f32.mrb[30].mxu1  ;;  %v5964_v17 = vpack.c.bf16 %v5937_v10, %v5936_v62 }
 0x403   : > { %v5910_v42 = vadd.f32 %v7625_v36, %v9953_v27  ;;  %v7627_v26 = vadd.f32 %v7532_v11, %v9946_v52  ;;  %v5781_v23 = vpop.f32.mrb[31].mxu1 }
 0x404   : > { %v5908_v31 = vadd.f32 %v7626_v51, %v9953_v27  ;;  %v7628_v53 = vadd.f32 %v5781_v23, %v9948_v7  ;;  %7573 = vmatprep.mubr.bf16.mxu0 %v5964_v17 }
 0x405   : > { %v5911_v29 = vadd.f32 %v7627_v26, %v9953_v27  ;;  %7574 = vmatmul.mubr.bf16.gmra.mrb[72].mxu0 %v5965_v58  ;;  %v5942_v12 = vmax.f32 %v5910_v42, 0.0 }
 0x406   : > { %v5909_v28 = vadd.f32 %v7628_v53, %v9953_v27  ;;  %v5940_v57 = vmax.f32 %v5908_v31, 0.0 }
 0x407   : > { %v5943_v59 = vmax.f32 %v5911_v29, 0.0 }
 0x408   : > { %v5941_v32 = vmax.f32 %v5909_v28, 0.0  ;;  %v7535_v54 = vpop.f32.mrb[0].mxu1 }
 0x409   : > { %v7629_v22 = vadd.f32 %v7535_v54, %v9909_v60  ;;  %v5794_v15 = vpop.f32.mrb[1].mxu1  ;;  %v5967_v52 = vpack.c.bf16 %v5943_v59, %v5942_v12 }
 0x40a   : > { %v7630_v45 = vadd.f32 %v5794_v15, %v9911_v20  ;;  %v7536_v39 = vpop.f32.mrb[2].mxu1  ;;  %v5966_v6 = vpack.c.bf16 %v5941_v32, %v5940_v57 }
 0x40b   : > { %v5914_v7 = vadd.f32 %v7629_v22, %v9953_v27  ;;  %v7631_v2 = vadd.f32 %v7536_v39, %v9913_v3  ;;  %v5797_v30 = vpop.f32.mrb[3].mxu1 }
 0x40c   : > { %v5912_v35 = vadd.f32 %v7630_v45, %v9953_v27  ;;  %v7632_v43 = vadd.f32 %v5797_v30, %v9915_v9  ;;  %7577 = vmatprep.mubr.bf16.mxu0 %v5966_v6 }
 0x40d   : > { %v5915_v24 = vadd.f32 %v7631_v2, %v9953_v27  ;;  %7578 = vmatmul.mubr.bf16.gmra.mrb[76].mxu0 %v5967_v52  ;;  %v5946_v41 = vmax.f32 %v5914_v7, 0.0 }
 0x40e   : > { %v5913_v60 = vadd.f32 %v7632_v43, %v9953_v27  ;;  %v5944_v20 = vmax.f32 %v5912_v35, 0.0 }
 0x40f   : > { %v5947_v13 = vmax.f32 %v5915_v24, 0.0 }
 0x410   : > { %v5945_v37 = vmax.f32 %v5913_v60, 0.0  ;;  %v7539_v48 = vpop.f32.mrb[4].mxu1  ;;  %v6210_v60 = vld [vmem:[%s8595_s20 + $0x10] sm:$0xff] }
 0x411   : > { %v7633_v34 = vadd.f32 %v7539_v48, %v9920_v16  ;;  %v5810_v50 = vpop.f32.mrb[5].mxu1  ;;  %v5969_v3 = vpack.c.bf16 %v5947_v13, %v5946_v41  ;;  %v6208_v13 = vld [vmem:[%s8595_s20] sm:$0xff]  ;;  %v6211_v48 = vld [vmem:[%s8595_s20 + $0x18] sm:$0xff] }
 0x412   : > { %v7634_v33 = vadd.f32 %v5810_v50, %v9922_v47  ;;  %v7540_v8 = vpop.f32.mrb[6].mxu1  ;;  %v5968_v14 = vpack.c.bf16 %v5945_v37, %v5944_v20 }
 0x413   : > { %v5918_v9 = vadd.f32 %v7633_v34, %v9953_v27  ;;  %v7635_v40 = vadd.f32 %v7540_v8, %v9924_v55  ;;  %v5813_v38 = vpop.f32.mrb[7].mxu1 }
 0x414   : > { %v5916_v63 = vadd.f32 %v7634_v33, %v9953_v27  ;;  %v7636_v21 = vadd.f32 %v5813_v38, %v9926_v56  ;;  %7581 = vmatprep.mubr.bf16.mxu0 %v5968_v14  ;;  %v6209_v33 = vld [vmem:[%s8595_s20 + $0x8] sm:$0xff] }
 0x415   : > { %v5919_v18 = vadd.f32 %v7635_v40, %v9953_v27  ;;  %7582 = vmatmul.mubr.bf16.gmra.mrb[80].mxu0 %v5969_v3  ;;  %v5950_v62 = vmax.f32 %v5918_v9, 0.0 }
 0x416   : > { %v5917_v16 = vadd.f32 %v7636_v21, %v9953_v27  ;;  %v5948_v47 = vmax.f32 %v5916_v63, 0.0 }
 0x417   : > { %v5951_v10 = vmax.f32 %v5919_v18, 0.0 }
 0x418   : > { %v5949_v0 = vmax.f32 %v5917_v16, 0.0  ;;  %v7543_v36 = vpop.f32.mrb[8].mxu1 }
 0x419   : > { %v7637_v19 = vadd.f32 %v7543_v36, %v9928_v1  ;;  %v5826_v58 = vpop.f32.mrb[9].mxu1  ;;  %v5971_v55 = vpack.c.bf16 %v5951_v10, %v5950_v62  ;;  %v6214_v62 = vld [vmem:[%s8595_s20 + $0x30] sm:$0xff] }
 0x41a   : > { %v7638_v51 = vadd.f32 %v5826_v58, %v9930_v46  ;;  %v7544_v11 = vpop.f32.mrb[10].mxu1  ;;  %v5970_v17 = vpack.c.bf16 %v5949_v0, %v5948_v47  ;;  %v6212_v0 = vld [vmem:[%s8595_s20 + $0x20] sm:$0xff]  ;;  %v6215_v58 = vld [vmem:[%s8595_s20 + $0x38] sm:$0xff] }
 0x41b   : > { %v5922_v56 = vadd.f32 %v7637_v19, %v9953_v27  ;;  %v7639_v42 = vadd.f32 %v7544_v11, %v9932_v44  ;;  %v5829_v26 = vpop.f32.mrb[11].mxu1 }
 0x41c   : > { %v5920_v23 = vadd.f32 %v7638_v51, %v9953_v27  ;;  %v7640_v31 = vadd.f32 %v5829_v26, %v9934_v4  ;;  %7585 = vmatprep.mubr.bf16.mxu0 %v5970_v17  ;;  %v6213_v17 = vld [vmem:[%s8595_s20 + $0x28] sm:$0xff] }
 0x41d   : > { %v5923_v53 = vadd.f32 %v7639_v42, %v9953_v27  ;;  %7586 = vmatmul.mubr.bf16.gmra.mrb[84].mxu0 %v5971_v55  ;;  %v5954_v29 = vmax.f32 %v5922_v56, 0.0 }
 0x41e   : > { %v5921_v1 = vadd.f32 %v7640_v31, %v9953_v27  ;;  %v5952_v46 = vmax.f32 %v5920_v23, 0.0 }
 0x41f   : > { %v5955_v28 = vmax.f32 %v5923_v53, 0.0 }
 0x420   : > { %v5953_v12 = vmax.f32 %v5921_v1, 0.0  ;;  %v7547_v59 = vpop.f32.mrb[12].mxu1 }
 0x421   : > { %v7641_v57 = vadd.f32 %v7547_v59, %v9936_v5  ;;  %v5842_v32 = vpop.f32.mrb[13].mxu1  ;;  %v5973_v44 = vpack.c.bf16 %v5955_v28, %v5954_v29 }
 0x422   : > { %v7642_v54 = vadd.f32 %v5842_v32, %v9938_v61  ;;  %v7548_v22 = vpop.f32.mrb[14].mxu1  ;;  %v5972_v15 = vpack.c.bf16 %v5953_v12, %v5952_v46  ;;  %v6218_v46 = vld [vmem:[%s8595_s20 + $0x50] sm:$0xff] }
 0x423   : > { %v5926_v4 = vadd.f32 %v7641_v57, %v9953_v27  ;;  %v7643_v52 = vadd.f32 %v7548_v22, %v9940_v49  ;;  %v5845_v45 = vpop.f32.mrb[15].mxu1  ;;  %v6216_v57 = vld [vmem:[%s8595_s20 + $0x40] sm:$0xff] }
 0x424   : > { %v5924_v39 = vadd.f32 %v7642_v54, %v9953_v27  ;;  %v7644_v6 = vadd.f32 %v5845_v45, %v9942_v25  ;;  %7589 = vmatprep.mubr.bf16.mxu0 %v5972_v15  ;;  %v10009_v25 = vld [vmem:[%s10168_s6] ss:$0 sm:$0xff]  ;;  %v6219_v54 = vld [vmem:[%s8595_s20 + $0x58] sm:$0xff] }
 0x425   : > { %v5927_v7 = vadd.f32 %v7643_v52, %v9953_v27  ;;  %7590 = vmatmul.mubr.bf16.gmra.mrb[88].mxu0 %v5973_v44  ;;  %v5958_v61 = vmax.f32 %v5926_v4, 0.0  ;;  %v6217_v52 = vld [vmem:[%s8595_s20 + $0x48] sm:$0xff] }
 0x426   : > { %v5925_v5 = vadd.f32 %v7644_v6, %v9953_v27  ;;  %v5956_v30 = vmax.f32 %v5924_v39, 0.0 }
 0x427   : > { %v5959_v2 = vmax.f32 %v5927_v7, 0.0 }
 0x428   : > { %v5957_v35 = vmax.f32 %v5925_v5, 0.0 }
 0x429   : > { %v5975_v43 = vpack.c.bf16 %v5959_v2, %v5958_v61 }
 0x42a   : > { %v5974_v49 = vpack.c.bf16 %v5957_v35, %v5956_v30 }
 0x42c   : > { %7593 = vmatprep.mubr.bf16.mxu0 %v5974_v49 }
 0x42d   : > { %7594 = vmatmul.mubr.bf16.gmra.mrb[92].mxu0 %v5975_v43  ;;  %v6222_v43 = vld [vmem:[%s8595_s20 + $0x70] sm:$0xff] }
 0x4c8   : > { %v7567_v24 = vpop.f32.mrb[64].mxu0 }
 0x4c9   : > { %v6090_v41 = vadd.f32 %v7567_v24, %v10009_v25  ;;  %v6081_v27 = vpop.f32.mrb[65].mxu0 }
 0x4ca   : > { %v6082_v20 = vadd.f32 %v10009_v25, %v6081_v27  ;;  %v7568_v37 = vpop.f32.mrb[66].mxu0 }
 0x4cb   : > { %v6242_v34 = vadd.f32 %v6210_v60, %v6090_v41  ;;  %v6093_v50 = vadd.f32 %v7568_v37, %v10009_v25  ;;  %v6084_v3 = vpop.f32.mrb[67].mxu0  ;;  %v6220_v60 = vld [vmem:[%s8595_s20 + $0x60] sm:$0xff] }
 0x4cc   : > { %v6240_v8 = vadd.f32 %v6208_v13, %v6082_v20  ;;  %v6085_v14 = vadd.f32 %v10009_v25, %v6084_v3  ;;  %v6223_v13 = vld [vmem:[%s8595_s20 + $0x78] sm:$0xff] }
 0x4cd   : > { %v6274_v9 = vmax.f32 %v6242_v34, 0.0  ;;  %v6243_v40 = vadd.f32 %v6211_v48, %v6093_v50  ;;  %v6221_v34 = vld [vmem:[%s8595_s20 + $0x68] sm:$0xff] }
 0x4ce   : > { %v6272_v38 = vmax.f32 %v6240_v8, 0.0  ;;  %v6241_v63 = vadd.f32 %v6209_v33, %v6085_v14 }
 0x4cf   : > { %6306 = vst [vmem:[%s10021_s15 + $0x10] sm:$0xff] %v6274_v9  ;;  %v6275_v21 = vmax.f32 %v6243_v40, 0.0 }
 0x4d0   : > { %6304 = vst [vmem:[%s10021_s15] sm:$0xff] %v6272_v38  ;;  %v6273_v18 = vmax.f32 %v6241_v63, 0.0  ;;  %v7571_v16 = vpop.f32.mrb[68].mxu0 }
 0x4d1   : > { %6307 = vst [vmem:[%s10021_s15 + $0x18] sm:$0xff] %v6275_v21  ;;  %v6106_v10 = vadd.f32 %v7571_v16, %v10009_v25  ;;  %v6097_v47 = vpop.f32.mrb[69].mxu0  ;;  %v6226_v21 = vld [vmem:[%s8595_s20 + $0x90] sm:$0xff] }
 0x4d2   : > { %6305 = vst [vmem:[%s10021_s15 + $0x8] sm:$0xff] %v6273_v18  ;;  %v6098_v36 = vadd.f32 %v10009_v25, %v6097_v47  ;;  %v7572_v19 = vpop.f32.mrb[70].mxu0 }
 0x4d3   : > { %v6246_v55 = vadd.f32 %v6214_v62, %v6106_v10  ;;  %v6109_v51 = vadd.f32 %v7572_v19, %v10009_v25  ;;  %v6100_v11 = vpop.f32.mrb[71].mxu0  ;;  %v6224_v62 = vld [vmem:[%s8595_s20 + $0x80] sm:$0xff] }
 0x4d4   : > { %v6244_v56 = vadd.f32 %v6212_v0, %v6098_v36  ;;  %v6101_v42 = vadd.f32 %v10009_v25, %v6100_v11  ;;  %v6227_v0 = vld [vmem:[%s8595_s20 + $0x98] sm:$0xff] }
 0x4d5   : > { %v6278_v26 = vmax.f32 %v6246_v55, 0.0  ;;  %v6247_v23 = vadd.f32 %v6215_v58, %v6109_v51  ;;  %v6225_v55 = vld [vmem:[%s8595_s20 + $0x88] sm:$0xff] }
 0x4d6   : > { %v6276_v31 = vmax.f32 %v6244_v56, 0.0  ;;  %v6245_v53 = vadd.f32 %v6213_v17, %v6101_v42 }
 0x4d7   : > { %6310 = vst [vmem:[%s10021_s15 + $0x30] sm:$0xff] %v6278_v26  ;;  %v6279_v1 = vmax.f32 %v6247_v23, 0.0 }
 0x4d8   : > { %6308 = vst [vmem:[%s10021_s15 + $0x20] sm:$0xff] %v6276_v31  ;;  %v6277_v29 = vmax.f32 %v6245_v53, 0.0  ;;  %v7575_v28 = vpop.f32.mrb[72].mxu0 }
 0x4d9   : > { %6311 = vst [vmem:[%s10021_s15 + $0x38] sm:$0xff] %v6279_v1  ;;  %v6122_v12 = vadd.f32 %v7575_v28, %v10009_v25  ;;  %v6113_v59 = vpop.f32.mrb[73].mxu0  ;;  %v6230_v1 = vld [vmem:[%s8595_s20 + $0xb0] sm:$0xff] }
 0x4da   : > { %6309 = vst [vmem:[%s10021_s15 + $0x28] sm:$0xff] %v6277_v29  ;;  %v6114_v32 = vadd.f32 %v10009_v25, %v6113_v59  ;;  %v7576_v44 = vpop.f32.mrb[74].mxu0 }
 0x4db   : > { %v6250_v22 = vadd.f32 %v6218_v46, %v6122_v12  ;;  %v6125_v15 = vadd.f32 %v7576_v44, %v10009_v25  ;;  %v6116_v4 = vpop.f32.mrb[75].mxu0  ;;  %v6228_v46 = vld [vmem:[%s8595_s20 + $0xa0] sm:$0xff] }
 0x4dc   : > { %v6248_v45 = vadd.f32 %v6216_v57, %v6114_v32  ;;  %v6117_v39 = vadd.f32 %v10009_v25, %v6116_v4  ;;  %v6231_v57 = vld [vmem:[%s8595_s20 + $0xb8] sm:$0xff] }
 0x4dd   : > { %v6282_v6 = vmax.f32 %v6250_v22, 0.0  ;;  %v6251_v7 = vadd.f32 %v6219_v54, %v6125_v15  ;;  %v6229_v22 = vld [vmem:[%s8595_s20 + $0xa8] sm:$0xff] }
 0x4de   : > { %v6280_v5 = vmax.f32 %v6248_v45, 0.0  ;;  %v6249_v61 = vadd.f32 %v6217_v52, %v6117_v39 }
 0x4df   : > { %6314 = vst [vmem:[%s10021_s15 + $0x50] sm:$0xff] %v6282_v6  ;;  %v6283_v2 = vmax.f32 %v6251_v7, 0.0 }
 0x4e0   : > { %6312 = vst [vmem:[%s10021_s15 + $0x40] sm:$0xff] %v6280_v5  ;;  %v6281_v30 = vmax.f32 %v6249_v61, 0.0  ;;  %v7579_v35 = vpop.f32.mrb[76].mxu0 }
 0x4e1   : > { %6315 = vst [vmem:[%s10021_s15 + $0x58] sm:$0xff] %v6283_v2  ;;  %v6138_v49 = vadd.f32 %v7579_v35, %v10009_v25  ;;  %v6129_v24 = vpop.f32.mrb[77].mxu0  ;;  %v6234_v2 = vld [vmem:[%s8595_s20 + $0xd0] sm:$0xff] }
 0x4e2   : > { %6313 = vst [vmem:[%s10021_s15 + $0x48] sm:$0xff] %v6281_v30  ;;  %v6130_v41 = vadd.f32 %v10009_v25, %v6129_v24  ;;  %v7580_v27 = vpop.f32.mrb[78].mxu0 }
 0x4e3   : > { %v6254_v20 = vadd.f32 %v6222_v43, %v6138_v49  ;;  %v6141_v37 = vadd.f32 %v7580_v27, %v10009_v25  ;;  %v6132_v48 = vpop.f32.mrb[79].mxu0  ;;  %v6232_v43 = vld [vmem:[%s8595_s20 + $0xc0] sm:$0xff] }
 0x4e4   : > { %v6252_v50 = vadd.f32 %v6220_v60, %v6130_v41  ;;  %v6133_v3 = vadd.f32 %v10009_v25, %v6132_v48  ;;  %v6235_v60 = vld [vmem:[%s8595_s20 + $0xd8] sm:$0xff] }
 0x4e5   : > { %v6286_v33 = vmax.f32 %v6254_v20, 0.0  ;;  %v6255_v8 = vadd.f32 %v6223_v13, %v6141_v37  ;;  %v6233_v20 = vld [vmem:[%s8595_s20 + $0xc8] sm:$0xff] }
 0x4e6   : > { %v6284_v14 = vmax.f32 %v6252_v50, 0.0  ;;  %v6253_v9 = vadd.f32 %v6221_v34, %v6133_v3 }
 0x4e7   : > { %6318 = vst [vmem:[%s10021_s15 + $0x70] sm:$0xff] %v6286_v33  ;;  %v6287_v40 = vmax.f32 %v6255_v8, 0.0 }
 0x4e8   : > { %6316 = vst [vmem:[%s10021_s15 + $0x60] sm:$0xff] %v6284_v14  ;;  %v6285_v38 = vmax.f32 %v6253_v9, 0.0  ;;  %v7583_v63 = vpop.f32.mrb[80].mxu0 }
 0x4e9   : > { %6319 = vst [vmem:[%s10021_s15 + $0x78] sm:$0xff] %v6287_v40  ;;  %v6154_v18 = vadd.f32 %v7583_v63, %v10009_v25  ;;  %v6145_v16 = vpop.f32.mrb[81].mxu0  ;;  %v6238_v40 = vld [vmem:[%s8595_s20 + $0xf0] sm:$0xff] }
 0x4ea   : > { %6317 = vst [vmem:[%s10021_s15 + $0x68] sm:$0xff] %v6285_v38  ;;  %v6146_v10 = vadd.f32 %v10009_v25, %v6145_v16  ;;  %v7584_v47 = vpop.f32.mrb[82].mxu0 }
 0x4eb   : > { %v6258_v36 = vadd.f32 %v6226_v21, %v6154_v18  ;;  %v6157_v19 = vadd.f32 %v7584_v47, %v10009_v25  ;;  %v6148_v58 = vpop.f32.mrb[83].mxu0  ;;  %v6236_v21 = vld [vmem:[%s8595_s20 + $0xe0] sm:$0xff] }
 0x4ec   : > { %v6256_v51 = vadd.f32 %v6224_v62, %v6146_v10  ;;  %v6149_v11 = vadd.f32 %v10009_v25, %v6148_v58  ;;  %v6239_v62 = vld [vmem:[%s8595_s20 + $0xf8] sm:$0xff] }
 0x4ed   : > { %v6290_v17 = vmax.f32 %v6258_v36, 0.0  ;;  %v6259_v56 = vadd.f32 %v6227_v0, %v6157_v19  ;;  %v6237_v36 = vld [vmem:[%s8595_s20 + $0xe8] sm:$0xff]  ;;  %s8344_s20 = smov [#allocation11]  }
 0x4ee   : > { %v6288_v42 = vmax.f32 %v6256_v51, 0.0  ;;  %v6257_v26 = vadd.f32 %v6225_v55, %v6149_v11  ;;  %s8263_s30 = sshll.u32 %s8344_s20, 4  ;;  %s8264_s30 = int_to_ptr.vmem [resolvable:$false] %s8263_s30 }
 0x4ef   : > { %6322 = vst [vmem:[%s10021_s15 + $0x90] sm:$0xff] %v6290_v17  ;;  %v6291_v23 = vmax.f32 %v6259_v56, 0.0  ;;  %s8265_s9 = scalar_lea.vmem %s8264_s30, 8192  ;;  %p8266_p12 = scmp.lt.s32.totalorder %s10115_s12, %s8264_s30 }
 0x4f0   : > { %6320 = vst [vmem:[%s10021_s15 + $0x80] sm:$0xff] %v6288_v42  ;;  %v6289_v31 = vmax.f32 %v6257_v26, 0.0  ;;  %v7587_v53 = vpop.f32.mrb[84].mxu0  ;;  %p8267_p1 = scmp.lt.s32.totalorder %s8265_s9, %s8259_s13 }
 0x4f1   : > { %6323 = vst [vmem:[%s10021_s15 + $0x98] sm:$0xff] %v6291_v23  ;;  %v6170_v29 = vadd.f32 %v7587_v53, %v10009_v25  ;;  %v6161_v28 = vpop.f32.mrb[85].mxu0 }
 0x4f2   : > { %6321 = vst [vmem:[%s10021_s15 + $0x88] sm:$0xff] %v6289_v31  ;;  %v6162_v12 = vadd.f32 %v10009_v25, %v6161_v28  ;;  %v7588_v59 = vpop.f32.mrb[86].mxu0  ;;  %p8268_p2 = por %p8267_p1, %p8266_p12 }
 0x4f3   : > { %v6262_v32 = vadd.f32 %v6230_v1, %v6170_v29  ;;  %v6173_v44 = vadd.f32 %v7588_v59, %v10009_v25  ;;  %v6164_v54 = vpop.f32.mrb[87].mxu0 }
 0x4f4   : > { %v6260_v15 = vadd.f32 %v6228_v46, %v6162_v12  ;;  %v6165_v4 = vadd.f32 %v10009_v25, %v6164_v54  ;;  %p8269_p4 = pnand %p8268_p2, %p8262_p7 }
 0x4f5   : > { %v6294_v52 = vmax.f32 %v6262_v32, 0.0  ;;  %v6263_v45 = vadd.f32 %v6231_v57, %v6173_v44 }
 0x4f6   : > { %v6292_v39 = vmax.f32 %v6260_v15, 0.0  ;;  %v6261_v6 = vadd.f32 %v6229_v22, %v6165_v4 }
 0x4f7   : > { %6326 = vst [vmem:[%s10021_s15 + $0xb0] sm:$0xff] %v6294_v52  ;;  %v6295_v7 = vmax.f32 %v6263_v45, 0.0 }
 0x4f8   : > { %6324 = vst [vmem:[%s10021_s15 + $0xa0] sm:$0xff] %v6292_v39  ;;  %v6293_v5 = vmax.f32 %v6261_v6, 0.0  ;;  %v7591_v61 = vpop.f32.mrb[88].mxu0 }
 0x4f9   : > { %6327 = vst [vmem:[%s10021_s15 + $0xb8] sm:$0xff] %v6295_v7  ;;  %v6186_v30 = vadd.f32 %v7591_v61, %v10009_v25  ;;  %v6177_v35 = vpop.f32.mrb[89].mxu0 }
 0x4fa   : > { %6325 = vst [vmem:[%s10021_s15 + $0xa8] sm:$0xff] %v6293_v5  ;;  %v6178_v49 = vadd.f32 %v10009_v25, %v6177_v35  ;;  %v7592_v24 = vpop.f32.mrb[90].mxu0 }
 0x4fb   : > { %v6266_v41 = vadd.f32 %v6234_v2, %v6186_v30  ;;  %v6189_v27 = vadd.f32 %v7592_v24, %v10009_v25  ;;  %v6180_v13 = vpop.f32.mrb[91].mxu0 }
 0x4fc   : > { %v6264_v37 = vadd.f32 %v6232_v43, %v6178_v49  ;;  %v6181_v48 = vadd.f32 %v10009_v25, %v6180_v13 }
 0x4fd   : > { %v6298_v34 = vmax.f32 %v6266_v41, 0.0  ;;  %v6267_v50 = vadd.f32 %v6235_v60, %v6189_v27 }
 0x4fe   : > { %v6296_v3 = vmax.f32 %v6264_v37, 0.0  ;;  %v6265_v33 = vadd.f32 %v6233_v20, %v6181_v48 }
 0x4ff   : > { %6330 = vst [vmem:[%s10021_s15 + $0xd0] sm:$0xff] %v6298_v34  ;;  %v6299_v8 = vmax.f32 %v6267_v50, 0.0 }
 0x500   : > { %6328 = vst [vmem:[%s10021_s15 + $0xc0] sm:$0xff] %v6296_v3  ;;  %v6297_v14 = vmax.f32 %v6265_v33, 0.0  ;;  %v7595_v9 = vpop.f32.mrb[92].mxu0 }
 0x501   : > { %6331 = vst [vmem:[%s10021_s15 + $0xd8] sm:$0xff] %v6299_v8  ;;  %v6202_v38 = vadd.f32 %v7595_v9, %v10009_v25  ;;  %v6193_v63 = vpop.f32.mrb[93].mxu0 }
 0x502   : > { %6329 = vst [vmem:[%s10021_s15 + $0xc8] sm:$0xff] %v6297_v14  ;;  %v6194_v18 = vadd.f32 %v10009_v25, %v6193_v63  ;;  %v7596_v16 = vpop.f32.mrb[94].mxu0 }
 0x503   : > { %v6270_v10 = vadd.f32 %v6238_v40, %v6202_v38  ;;  %v6205_v47 = vadd.f32 %v7596_v16, %v10009_v25  ;;  %v6196_v0 = vpop.f32.mrb[95].mxu0 }
 0x504   : > { %v6268_v19 = vadd.f32 %v6236_v21, %v6194_v18  ;;  %v6197_v58 = vadd.f32 %v10009_v25, %v6196_v0 }
 0x505   : > { %v6302_v55 = vmax.f32 %v6270_v10, 0.0  ;;  %v6271_v51 = vadd.f32 %v6239_v62, %v6205_v47 }
 0x506   : > { %v6300_v11 = vmax.f32 %v6268_v19, 0.0  ;;  %v6269_v17 = vadd.f32 %v6237_v36, %v6197_v58 }
 0x507   : > { %6334 = vst [vmem:[%s10021_s15 + $0xf0] sm:$0xff] %v6302_v55  ;;  %v6303_v56 = vmax.f32 %v6271_v51, 0.0 }
 0x508   : > { %6332 = vst [vmem:[%s10021_s15 + $0xe0] sm:$0xff] %v6300_v11  ;;  %v6301_v25 = vmax.f32 %v6269_v17, 0.0 }
 0x509   : > { %6335 = vst [vmem:[%s10021_s15 + $0xf8] sm:$0xff] %v6303_v56 }
 0x50a   : > { %6333 = vst [vmem:[%s10021_s15 + $0xe8] sm:$0xff] %v6301_v25 }
 0x50b   : > { %8272 = shalt.err (!%p8269_p4)
}
 0x50c   : > { %s8273_s23 = scalar_lea.hbm %s10113_s16, 4096  ;;  %s8277_s14 = scalar_lea.hbm %s10169_s7, 8192 }
 0x50d   : > { %p8274_p9 = scmp.ne.s32.totalorder %s10113_s16, %s8273_s23  ;;  %p8278_p8 = scmp.lt.u32.totalorder %s10113_s16, %s10169_s7 }
 0x50e   : > { %p8279_p13 = scmp.lt.u32.totalorder %s8277_s14, %s8273_s23  ;;  %p8281_p10 = scmp.lt.u32.totalorder %s8273_s23, %s10113_s16 }
 0x50f   : > { %p8275_p0 = pnand %p8274_p9, %p8541_p5 }
 0x510   : > { %p8280_p6 = por %p8279_p13, %p8278_p8 }
 0x511   : > { %p8276_p11 = pneg %p8275_p0 }
 0x512   : > { %p8282_p3 = por %p8281_p10, %p8280_p6 }
 0x514   : > { %p8283_p7 = pnand %p8282_p3, %p8276_p11 }
 0x516   : > { %8286 = shalt.err (!%p8283_p7)
}
 0x517   : > { %s8345_s8 = smov 128   ;;  %s8346_s17 = smov 8  }
 0x518   : > { %7883 = dma.vmem_to_hbm [thread:$0]  (%p8541_p5), %s10115_s12, 4096, %s10113_s16, %s6337_s28, %s8345_s8, %s8345_s8, %s8346_s17  }
 0x519 PF: > { %s10285_s13 = sld [smem:[#allocation16_spill]]  ;;  %s6365_s20 = sand.u32 1, %s8321_s24  }
 0x51a   : > { %p10287_p1 = scmp.ge.s32.totalorder %s8333_s27, 2  ;;  %s6366_s30 = scalar_lea.sflag [#allocation5], %s6365_s20 }
 0x51f   : > { %p10286_p12 = scmp.ne.s32.totalorder %s10285_s13, 0 }
 0x521   : > { %p7900_p2 = pnand %p10287_p1, %p10286_p12 }
 0x523   : > { %8316 = dma.done.wait (!%p7900_p2), %s6366_s30, 4096  }
 0x524   : > { %8318 = vsyncadd (!%p7900_p2), %s6366_s30, 4294963200  ;;  %p22_p4 = scmp.ge.s32.totalorder %s8527_s22, 4   ;;  %s10288_s24 = smov %s8325_s25 }
 0x525   : > { %s10289_s25 = smov %s8329_s26  ;;  %s10290_s26 = smov %s8537_s18 }
 0x526   : > { %s10291_s27 = smov %s8527_s22  ;;  %24 = sbr.rel (!%p22_p4) target bundleno = 7 (0x7), region = 116 }
 0x52d   :  { %6371 = vsyncpa [#allocation4], 1 }
 0x52e   :  { %6373 = vsyncpa [#allocation4 + $0x1], 1 }
 0x52f   :  { %6374 = vsyncpa [#allocation7], 1 }
 0x530   :  { %6375 = vsyncpa [#allocation10], 1 }
 0x531   :  { %6376 = vsyncpa [#allocation5], 1 }
 0x532   :  { %6378 = vsyncpa [#allocation5 + $0x1], 1 }

// kernel: tpu_custom_call.1
= control target key start
LH: loop header
LB: loop body
LE: loop exit
PB: predicated region body
PF: predicated region fallthrough
CT: control target
= control target key end

     0   :  { %12 = vsyncpa [#allocation4], 0  ;;  %s10162_s0 = inlined_call_operand.hbm [shape: f32[2,16,16,128], index: 0, kind: input, shape index: {}]   ;;  %s10163_s1 = inlined_call_operand.hbm [shape: bf16[128,128], index: 1, kind: input, shape index: {}]   ;;  %s10164_s2 = inlined_call_operand.hbm [shape: bf16[9,128,128], index: 2, kind: input, shape index: {}]   ;;  %s10165_s3 = inlined_call_operand.hbm [shape: bf16[128,128], index: 3, kind: input, shape index: {}]   ;;  %s10166_s4 = inlined_call_operand.vmem [shape: f32[1,128], index: 4, kind: input, shape index: {}]   ;;  %s10167_s5 = inlined_call_operand.vmem [shape: f32[1,128], index: 5, kind: input, shape index: {}]   ;;  %s10168_s6 = inlined_call_operand.vmem [shape: f32[1,128], index: 6, kind: input, shape index: {}]   ;;  %s10169_s7 = inlined_call_operand.hbm [shape: f32[2,16,16,128], index: 7, kind: output, shape index: {}]  }
   0x1   :  { %14 = vsyncpa [#allocation4 + $0x1], 0 }
   0x2   :  { %15 = vsyncpa [#allocation7], 0 }
   0x3   :  { %16 = vsyncpa [#allocation10], 0 }
   0x4   :  { %17 = vsyncpa [#allocation5], 0 }
   0x5   :  { %19 = vsyncpa [#allocation5 + $0x1], 0  ;;  %s8387_s24 = smov 0   ;;  %s8389_s25 = smov 0  }
   0x6   :  { %s8391_s26 = smov 0   ;;  %s8393_s27 = smov 0  }
   0x7 LB: > { %s8408_s28 = sadd.s32 4294967295, %s8333_s27   ;;  %s6452_s29 = sadd.s32 4294967294, %s8333_s27   ;;  %s8333_s27 = sphi %s8393_s27, %s10291_s27   ;;  %s8329_s26 = sphi %s8391_s26, %s10290_s26   ;;  %s8325_s25 = sphi %s8389_s25, %s10289_s25   ;;  %s8321_s24 = sphi %s8387_s24, %s10288_s24  }
   0x8   : > { %p45_p0 = scmp.ne.s32.totalorder %s8325_s25, %s8321_s24  ;;  %p10170_p1 = scmp.eq.s32.totalorder %s8408_s28, 0 }
   0x9   : > { %p201_p3 = scmp.eq.s32.totalorder %s6452_s29, 1  ;;  %p6453_p5 = scmp.ge.s32.totalorder %s8333_s27, 1 }
   0xa   : > { %p8417_p4 = por %p10170_p1, %p45_p0  ;;  %p208_p7 = scmp.lt.s32.totalorder %s8333_s27, 3 }
   0xb   : > { %p8422_p6 = por %p201_p3, %p45_p0  ;;  %s8335_s10 = smov [#allocation6]  }
   0xc   : > { %s10196_s30 = scalar_select %p8417_p4, 1, 0 }
   0xd   : > { %s10197_s8 = scalar_select %p8422_p6, 1, 0 }
   0xe   : > { %p8427_p8 = pnand %p6453_p5, %p208_p7  ;;  %s220_s11 = sshll.u32 %s8335_s10, 4  ;;  %s8431_s11 = int_to_ptr.vmem [resolvable:$true] %s220_s11 }
   0xf   : > { %10198 = sst [smem:[#allocation16_spill]] %s10197_s8  ;;  %s8336_s13 = smov [#allocation8]  }
  0x10   : > { %s10199_s9 = scalar_select %p8427_p8, 1, 0 }
  0x11   : > { %p7885_p9 = pneg %p8427_p8  ;;  %s233_s14 = sshll.u32 %s8336_s13, 4  ;;  %s8442_s14 = int_to_ptr.vmem [resolvable:$true] %s233_s14 }
  0x12   : > { %s8337_s15 = smov [#allocation9]   ;;  %s8145_s19 = scalar_lea.hbm %s10163_s1, 1024 }
  0x13   : > { %p8438_p11 = pnand %p7885_p9, %p10170_p1  ;;  %s8444_s16 = sshll.u32 %s8337_s15, 4  ;;  %s247_s16 = int_to_ptr.vmem [resolvable:$true] %s8444_s16 }
  0x14   : > { %p8146_p12 = scmp.ne.s32.totalorder %s10163_s1, %s8145_s19  ;;  %p8152_p5 = scmp.lt.u32.totalorder %s8145_s19, %s10163_s1 }
  0x15   : > { %p8454_p13 = pneg %p8438_p11 }
  0x17   : > { %p8148_p0 = pnand %p8454_p13, %p8146_p12 }
  0x19   : > { %p8149_p3 = pneg %p8148_p0 }
  0x1b   : > { %p8154_p7 = pnand %p8152_p5, %p8149_p3 }
  0x1d   : > { %8157 = shalt.err (!%p8154_p7)
}
  0x1e   : > { %s8158_s10 = scalar_lea.vmem %s8431_s11, 1024  ;;  %p8166_p2 = scmp.lt.s32.totalorder %s8431_s11, %s8431_s11 }
  0x1f   : > { %p8159_p9 = scmp.ne.s32.totalorder %s8431_s11, %s8158_s10  ;;  %p8167_p6 = scmp.lt.s32.totalorder %s8158_s10, %s8158_s10 }
  0x21   : > { %p8161_p10 = pnand %p8159_p9, %p8454_p13  ;;  %p8168_p12 = por %p8167_p6, %p8166_p2 }
  0x23   : > { %p8162_p1 = pneg %p8161_p10 }
  0x25   : > { %p8169_p0 = pnand %p8168_p12, %p8162_p1 }
  0x27   : > { %8172 = shalt.err (!%p8169_p0)
}
  0x28   : > { %s8338_s13 = smov 64   ;;  %s8339_s15 = smov 4  }
  0x29   : > { %7888 = dma.hbm_to_vmem [thread:$0]  (!%p8438_p11), %s10163_s1, 1024, %s8431_s11, [#allocation7], %s8338_s13, %s8338_s13, %s8339_s15  }
  0x2a   : > { %s8173_s21 = scalar_lea.hbm %s10164_s2, 9216 }
  0x2b   : > { %p8174_p1 = scmp.ne.s32.totalorder %s10164_s2, %s8173_s21  ;;  %p8180_p10 = scmp.lt.u32.totalorder %s8173_s21, %s10164_s2 }
  0x2d   : > { %p8176_p2 = pnand %p8174_p1, %p8454_p13 }
  0x2f   : > { %p8177_p6 = pneg %p8176_p2 }
  0x31   : > { %p8182_p3 = pnand %p8180_p10, %p8177_p6 }
  0x33   : > { %8185 = shalt.err (!%p8182_p3)
}
  0x34   : > { %s8186_s11 = scalar_lea.vmem %s8442_s14, 9216  ;;  %p8194_p12 = scmp.lt.s32.totalorder %s8442_s14, %s8442_s14 }
  0x35   : > { %p8187_p5 = scmp.ne.s32.totalorder %s8442_s14, %s8186_s11  ;;  %p8195_p0 = scmp.lt.s32.totalorder %s8186_s11, %s8186_s11 }
  0x37   : > { %p8189_p7 = pnand %p8187_p5, %p8454_p13  ;;  %p8196_p1 = por %p8195_p0, %p8194_p12 }
  0x39   : > { %p8190_p9 = pneg %p8189_p7 }
  0x3b   : > { %p8197_p2 = pnand %p8196_p1, %p8190_p9 }
  0x3d   : > { %8200 = shalt.err (!%p8197_p2)
}
  0x3e   : > { %7891 = dma.hbm_to_vmem [thread:$0]  (!%p8438_p11), %s10164_s2, 9216, %s8442_s14, [#allocation7], %s8338_s13, %s8338_s13, %s8339_s15  }
  0x3f   : > { %s8201_s20 = scalar_lea.hbm %s10165_s3, 1024 }
  0x40   : > { %p8202_p6 = scmp.ne.s32.totalorder %s10165_s3, %s8201_s20  ;;  %p8208_p5 = scmp.lt.u32.totalorder %s8201_s20, %s10165_s3 }
  0x42   : > { %p8204_p10 = pnand %p8202_p6, %p8454_p13 }
  0x44   : > { %p8205_p3 = pneg %p8204_p10 }
  0x46   : > { %p8210_p7 = pnand %p8208_p5, %p8205_p3 }
  0x48   : > { %8213 = shalt.err (!%p8210_p7)
}
  0x49   : > { %s8214_s11 = scalar_lea.vmem %s247_s16, 1024  ;;  %p8222_p1 = scmp.lt.s32.totalorder %s247_s16, %s247_s16 }
  0x4a   : > { %p8215_p9 = scmp.ne.s32.totalorder %s247_s16, %s8214_s11  ;;  %p8223_p2 = scmp.lt.s32.totalorder %s8214_s11, %s8214_s11 }
  0x4c   : > { %p8217_p12 = pnand %p8215_p9, %p8454_p13  ;;  %p8224_p4 = por %p8223_p2, %p8222_p1 }
  0x4e   : > { %p8218_p0 = pneg %p8217_p12 }
  0x50   : > { %p8225_p8 = pnand %p8224_p4, %p8218_p0 }
  0x52   : > { %8228 = shalt.err (!%p8225_p8)
}
  0x53   : > { %7894 = dma.hbm_to_vmem [thread:$0]  (!%p8438_p11), %s10165_s3, 1024, %s247_s16, [#allocation10], %s8338_s13, %s8338_s13, %s8339_s15  }
  0x54   : > { %s8527_s22 = sadd.s32 1, %s8333_s27   ;;  %s32_s17 = sadd.s32 1, %s8329_s26 }
  0x55   : > { %s29_s12 = ssub.s32 %s8333_s27, %s8527_s22  ;;  %p39_p8 = scmp.ne.s32.totalorder %s8329_s26, %s8325_s25 }
  0x56   : > { %p30_p4 = scmp.eq.s32.totalorder %s29_s12, 0  ;;  %p40_p13 = scmp.eq.s32.totalorder %s8333_s27, 0 }
  0x57   : > { %p7906_p6 = scmp.lt.s32.totalorder %s8333_s27, 2  ;;  %p10202_p3 = scmp.eq.s32.totalorder %s8408_s28, 1 }
  0x58   : > { %s8537_s18 = scalar_select %p30_p4, %s8329_s26, %s32_s17  }
  0x59   : > { %p41_p10 = por %p40_p13, %p39_p8  ;;  %p8541_p5 = por %p10202_p3, %p39_p8 }
  0x5a   : > { %s269_s20 = sand.u32 1, %s8329_s26   ;;  %s6803_s21 = sshll.u32 %s8333_s27, 12 }
  0x5b   : > { %s6458_s16 = sshll.u32 %s269_s20, 8  ;;  %s8550_s23 = scalar_lea.hbm %s10162_s0, %s6803_s21 }
  0x5c   : > { %s273_s29 = scalar_lea.vmem [#allocation3], %s6458_s16  ;;  %p8552_p11 = pnand %p7906_p6, %p41_p10 }
  0x5d   : > { %s280_s10 = sshll.u32 %s273_s29, 4  ;;  %s8558_s14 = scalar_lea.sflag [#allocation4], %s269_s20  ;;  %s8556_s10 = int_to_ptr.vmem [resolvable:$true] %s280_s10 }
  0x5e   : > { %s8229_s8 = scalar_lea.hbm %s8550_s23, 4096  ;;  %p8231_p9 = pneg %p8552_p11 }
  0x5f   : > { %p8230_p7 = scmp.ne.s32.totalorder %s8550_s23, %s8229_s8  ;;  %s8234_s21 = scalar_lea.hbm %s10162_s0, 8192 }
  0x60   : > { %p8235_p1 = scmp.lt.u32.totalorder %s8550_s23, %s10162_s0  ;;  %p8236_p2 = scmp.lt.u32.totalorder %s8234_s21, %s8229_s8 }
  0x61   : > { %p8232_p12 = pnand %p8231_p9, %p8230_p7  ;;  %p8238_p8 = scmp.lt.u32.totalorder %s8229_s8, %s8550_s23 }
  0x62   : > { %p8237_p4 = por %p8236_p2, %p8235_p1 }
  0x63   : > { %p8233_p0 = pneg %p8232_p12 }
  0x64   : > { %p8239_p13 = por %p8238_p8, %p8237_p4 }
  0x66   : > { %p8240_p6 = pnand %p8239_p13, %p8233_p0 }
  0x68   : > { %8243 = shalt.err (!%p8240_p6)
}
  0x69   : > { %s8244_s20 = scalar_lea.vmem %s8556_s10, 4096  ;;  %s8340_s15 = smov [#allocation3]  }
  0x6a   : > { %p8245_p10 = scmp.ne.s32.totalorder %s8556_s10, %s8244_s20  ;;  %s8249_s29 = sshll.u32 %s8340_s15, 4  ;;  %s8250_s29 = int_to_ptr.vmem [resolvable:$false] %s8249_s29 }
  0x6b   : > { %s8251_s12 = scalar_lea.vmem %s8250_s29, 8192  ;;  %p8252_p12 = scmp.lt.s32.totalorder %s8556_s10, %s8250_s29 }
  0x6c   : > { %p8247_p3 = pnand %p8245_p10, %p8231_p9  ;;  %p8253_p1 = scmp.lt.s32.totalorder %s8251_s12, %s8244_s20 }
  0x6e   : > { %p8248_p7 = pneg %p8247_p3  ;;  %p8254_p2 = por %p8253_p1, %p8252_p12 }
  0x70   : > { %p8255_p4 = pnand %p8254_p2, %p8248_p7 }
  0x72   : > { %8258 = shalt.err (!%p8255_p4)
}
  0x73   : > { %s8341_s8 = smov 128   ;;  %s8342_s17 = smov 8  }
  0x74   : > { %7898 = dma.hbm_to_vmem [thread:$0]  (!%p8552_p11), %s8550_s23, 4096, %s8556_s10, %s8558_s14, %s8341_s8, %s8341_s8, %s8342_s17  }
  0x75   : > { %p10205_p9 = scmp.ne.s32.totalorder %s10199_s9, 0 }
  0x77   : > { %292 = sbr.rel (%p10205_p9) target bundleno = 1305 (0x519), region = 48 }
  0x7e   : > { %s8589_s21 = sand.u32 1, %s8325_s25   ;;  %p10206_p0 = scmp.ne.s32.totalorder %s10196_s30, 0 }
  0x7f   : > { %s6462_s16 = sshll.u32 %s8589_s21, 8  ;;  %s295_s13 = scalar_lea.sflag [#allocation4], %s8589_s21 }
  0x80   : > { %s8595_s20 = scalar_lea.vmem [#allocation3], %s6462_s16 }
  0x81   : > { %8304 = dma.done.wait (%p10206_p0), %s295_s13, 4096  }
  0x82   : > { %8306 = vsyncadd (%p10206_p0), %s295_s13, 4294963200  ;;  %p10207_p11 = scmp.eq.s32.totalorder %s8408_s28, 0 }
  0x84   : > { %8308 = dma.done.wait (%p10207_p11), [#allocation7], 10240   ;;  %p10208_p8 = pmov %p10207_p11 }
  0x86   : > { %8310 = vsyncadd (%p10208_p8), [#allocation7], 4294957056  ;;  %p10209_p13 = pmov %p10208_p8 }
  0x87   : > { %p10210_p6 = pmov %p10208_p8 }
  0x88   : > { %8312 = dma.done.wait (%p10209_p13), [#allocation10], 1024  }
  0x89   : > { %8314 = vsyncadd (%p10210_p6), [#allocation10], 4294966272  ;;  %v7953_v0 = vld [vmem:[#allocation6] sm:$0xff]   ;;  %v7954_v1 = vld [vmem:[#allocation6 + $0x8] sm:$0xff]   ;;  %v8343_v60 = vmov 0   ;;  %vm814_vm3 = vcmask 1040384  }
  0x8a   : > { %7069 = vmatprep.subr.bf16.mxu0 %v7953_v0  ;;  %v7955_v2 = vld [vmem:[#allocation6 + $0x10] sm:$0xff]   ;;  %v7956_v3 = vld [vmem:[#allocation6 + $0x18] sm:$0xff]   ;;  %v342_v4 = vld [vmem:[%s8595_s20] sm:$0xff]  ;;  %849 = vst [vmem:[#allocation2] sm:$0xf] %v8343_v60  ;;  %vm2175_vm6 = vcmask 1042432  }
  0x8b   : > { %7070 = vmatpush3.bf16.msra.mxu0 %v7953_v0  ;;  %v343_v5 = vld [vmem:[%s8595_s20 + $0x8] sm:$0xff]  ;;  %v7957_v7 = vld [vmem:[#allocation6 + $0x20] sm:$0xff]   ;;  %v7959_v9 = vld [vmem:[#allocation6 + $0x30] sm:$0xff]   ;;  %850 = vst [vmem:[#allocation2 + $0x4] sm:$0xf] %v8343_v60  ;;  %vm2176_vm7 = vcmask 1046532  }
  0x8c   : > { %7071 = vmatprep.subr.bf16.mxu0 %v7954_v1  ;;  %v374_v6 = vpack.c.bf16 %v343_v5, %v342_v4  ;;  %v7958_v8 = vld [vmem:[#allocation6 + $0x28] sm:$0xff]   ;;  %v7960_v10 = vld [vmem:[#allocation6 + $0x38] sm:$0xff]   ;;  %v344_v11 = vld [vmem:[%s8595_s20 + $0x10] sm:$0xff]  ;;  %851 = vst [vmem:[#allocation2 + $0x8] sm:$0x1] %v8343_v60  ;;  %s10021_s15 = scalar_lea.vmem [#allocation11], %s6462_s16 }
  0x8d   : > { %v345_v12 = vld [vmem:[%s8595_s20 + $0x18] sm:$0xff]  ;;  %v346_v13 = vld [vmem:[%s8595_s20 + $0x20] sm:$0xff]  ;;  %v347_v14 = vld [vmem:[%s8595_s20 + $0x28] sm:$0xff]  ;;  %853 = vst [vmem:[#allocation2 + $0xcc] sm:$0xf] %v8343_v60  ;;  %s6804_s29 = sshll.u32 %s8408_s28, 12 }
  0x8e   : > { %7085 = vmatprep.mubr.bf16.mxu0 %v374_v6  ;;  %v375_v15 = vpack.c.bf16 %v345_v12, %v344_v11  ;;  %v376_v16 = vpack.c.bf16 %v347_v14, %v346_v13  ;;  %v348_v17 = vld [vmem:[%s8595_s20 + $0x30] sm:$0xff]  ;;  %v349_v18 = vld [vmem:[%s8595_s20 + $0x38] sm:$0xff]  ;;  %v350_v19 = vld [vmem:[%s8595_s20 + $0x40] sm:$0xff]  ;;  %854 = vst [vmem:[#allocation2 + $0xd0] sm:$0xf] %v8343_v60  ;;  %s6350_s12 = sshll.u32 %s10021_s15, 4  ;;  %s10113_s16 = scalar_lea.hbm %s10169_s7, %s6804_s29  ;;  %s10115_s12 = int_to_ptr.vmem [resolvable:$true] %s6350_s12 }
  0x8f   : > { %7072 = vmatpush3.bf16.msra.mxu0 %v7954_v1  ;;  %v351_v20 = vld [vmem:[%s8595_s20 + $0x48] sm:$0xff]  ;;  %v377_v21 = vpack.c.bf16 %v349_v18, %v348_v17  ;;  %v352_v23 = vld [vmem:[%s8595_s20 + $0x50] sm:$0xff]  ;;  %v353_v24 = vld [vmem:[%s8595_s20 + $0x58] sm:$0xff]  ;;  %855 = vst [vmem:[#allocation2 + $0xd4] sm:$0x1] %v8343_v60  ;;  %s6337_s28 = scalar_lea.sflag [#allocation5], %s8589_s21 }
  0x90   : > { %7073 = vmatprep.subr.bf16.mxu0 %v7955_v2  ;;  %v378_v22 = vpack.c.bf16 %v351_v20, %v350_v19  ;;  %v354_v25 = vld [vmem:[%s8595_s20 + $0x60] sm:$0xff]  ;;  %v355_v26 = vld [vmem:[%s8595_s20 + $0x68] sm:$0xff]  ;;  %v379_v27 = vpack.c.bf16 %v353_v24, %v352_v23  ;;  %v356_v29 = vld [vmem:[%s8595_s20 + $0x70] sm:$0xff]  ;;  %vm1145_vm0 = vsmask.f32 3328  ;;  %s8259_s13 = scalar_lea.vmem %s10115_s12, 4096 }
  0x91   : > { %v380_v28 = vpack.c.bf16 %v355_v26, %v354_v25  ;;  %v357_v30 = vld [vmem:[%s8595_s20 + $0x78] sm:$0xff]  ;;  %v358_v31 = vld [vmem:[%s8595_s20 + $0x80] sm:$0xff]  ;;  %v359_v32 = vld [vmem:[%s8595_s20 + $0x88] sm:$0xff]  ;;  %vm1146_vm1 = vsmask.f32 7440  ;;  %p8260_p10 = scmp.ne.s32.totalorder %s10115_s12, %s8259_s13 }
  0x92   : > { %v381_v33 = vpack.c.bf16 %v357_v30, %v356_v29  ;;  %v382_v34 = vpack.c.bf16 %v359_v32, %v358_v31  ;;  %v360_v35 = vld [vmem:[%s8595_s20 + $0x90] sm:$0xff]  ;;  %v361_v36 = vld [vmem:[%s8595_s20 + $0x98] sm:$0xff]  ;;  %v362_v37 = vld [vmem:[%s8595_s20 + $0xa0] sm:$0xff]  ;;  %vm815_vm4 = vsmask.f32 256 }
  0x93   : > { %7074 = vmatpush3.bf16.msra.mxu0 %v7955_v2  ;;  %v363_v38 = vld [vmem:[%s8595_s20 + $0xa8] sm:$0xff]  ;;  %v383_v39 = vpack.c.bf16 %v361_v36, %v360_v35  ;;  %v364_v41 = vld [vmem:[%s8595_s20 + $0xb0] sm:$0xff]  ;;  %v365_v42 = vld [vmem:[%s8595_s20 + $0xb8] sm:$0xff]  ;;  %p8261_p3 = pnand %p8260_p10, %p8541_p5 }
  0x94   : > { %7075 = vmatprep.subr.bf16.mxu0 %v7956_v3  ;;  %v384_v40 = vpack.c.bf16 %v363_v38, %v362_v37  ;;  %v366_v43 = vld [vmem:[%s8595_s20 + $0xc0] sm:$0xff]  ;;  %v367_v44 = vld [vmem:[%s8595_s20 + $0xc8] sm:$0xff]  ;;  %v385_v45 = vpack.c.bf16 %v365_v42, %v364_v41  ;;  %v368_v47 = vld [vmem:[%s8595_s20 + $0xd0] sm:$0xff] }
  0x95   : > { %v386_v46 = vpack.c.bf16 %v367_v44, %v366_v43  ;;  %v369_v48 = vld [vmem:[%s8595_s20 + $0xd8] sm:$0xff]  ;;  %v370_v49 = vld [vmem:[%s8595_s20 + $0xe0] sm:$0xff]  ;;  %v371_v50 = vld [vmem:[%s8595_s20 + $0xe8] sm:$0xff]  ;;  %p8262_p7 = pneg %p8261_p3 }
  0x96   : > { %v387_v51 = vpack.c.bf16 %v369_v48, %v368_v47  ;;  %v388_v52 = vpack.c.bf16 %v371_v50, %v370_v49  ;;  %v372_v53 = vld [vmem:[%s8595_s20 + $0xf0] sm:$0xff]  ;;  %v373_v54 = vld [vmem:[%s8595_s20 + $0xf8] sm:$0xff]  ;;  %v7961_v56 = vld [vmem:[#allocation8 + $0x40] sm:$0xff]  }
  0x97   : > { %7076 = vmatpush3.bf16.msra.mxu0 %v7956_v3  ;;  %v389_v55 = vpack.c.bf16 %v373_v54, %v372_v53  ;;  %v7962_v57 = vld [vmem:[#allocation8 + $0x48] sm:$0xff]   ;;  %v7963_v58 = vld [vmem:[#allocation8 + $0x50] sm:$0xff]   ;;  %v7964_v59 = vld [vmem:[#allocation8 + $0x58] sm:$0xff]  }
  0x98   : > { %7077 = vmatprep.subr.bf16.mxu0 %v7957_v7  ;;  %v7965_v61 = vld [vmem:[#allocation8 + $0x60] sm:$0xff]   ;;  %v7966_v62 = vld [vmem:[#allocation8 + $0x68] sm:$0xff]   ;;  %v7968_v6 = vld [vmem:[#allocation8 + $0x70] sm:$0xff]  }
  0x99   : > { %v8641_v63 = vld [vmem:[#allocation2] sm:$0xf]  ;;  %v8643_v0 = vld [vmem:[#allocation2 + $0x4] sm:$0xf]  ;;  %v7967_v5 = vld [vmem:[#allocation8 + $0xc0] sm:$0xff]  }
  0x9a   : > { %v1149_v1 = vshrl.u32 %v8641_v63, 16  ;;  %v1152_v2 = vshll.u32 %v8641_v63, 16  ;;  %v1158_v3 = vshll.u32 %v8643_v0, 16  ;;  %v1162_v4 = vshrl.u32 %v8643_v0, 16  ;;  %7597 = vmatprep.subr.bf16.mxu1 %v7967_v5  ;;  %v1129_v11 = vld [vmem:[#allocation2 + $0x8] sm:$0x1]  ;;  %vm8649_vm2 = vmor %vm1145_vm0, %vm1146_vm1 }
  0x9b   : > { %7078 = vmatpush3.bf16.msra.mxu0 %v7957_v7  ;;  %7605 = vmatpush3.bf16.msra.mxu1 %v7967_v5  ;;  %v1168_v14 = vshll.u32 %v1129_v11, 16  ;;  %v7971_v23 = vld [vmem:[#allocation8 + $0xd0] sm:$0xff]   ;;  %v7972_v25 = vld [vmem:[#allocation8 + $0xd8] sm:$0xff]   ;;  %v7973_v26 = vld [vmem:[#allocation8 + $0xe0] sm:$0xff]  }
  0x9c   : > { %7079 = vmatprep.subr.bf16.mxu0 %v7958_v8  ;;  %v1151_v7 = vrot.slane %v1149_v1, 4  ;;  %v7976_v29 = vld [vmem:[#allocation8 + $0xf8] sm:$0xff]   ;;  %v8657_v30 = vld [vmem:[#allocation8 + $0x100] sm:$0xff]   ;;  %v8666_v32 = vld [vmem:[%s10166_s4] ss:$0 sm:$0xff] }
  0x9d   : > { %v1170_v20 = vrot.slane %v1168_v14, 5  ;;  %v8660_v31 = vld [vmem:[#allocation8] sm:$0xff]   ;;  %vm8673_vm5 = vmand %vm814_vm3, %vm815_vm4 }
  0x9e   : > { %vm9141_vm8 = vmor %vm2175_vm6, %vm2176_vm7 }
  0x9f   : > { %7080 = vmatpush3.bf16.msra.mxu0 %v7958_v8  ;;  %v1154_v8 = vrot.slane %v1152_v2, 5 }
  0xa0   : > { %7081 = vmatprep.subr.bf16.mxu0 %v7959_v9 }
  0xa1   : > { %v1155_v12 = vor.u32 %v1154_v8, %v1151_v7 }
  0xa3   : > { %7082 = vmatpush3.bf16.msra.mxu0 %v7959_v9  ;;  %v1160_v9 = vrot.slane %v1158_v3, 5  ;;  %v1156_v17 = vrot.slane %v1155_v12, 4 }
  0xa4   : > { %7083 = vmatprep.subr.bf16.mxu0 %v7960_v10 }
  0xa7   : > { %7084 = vmatpush3.bf16.msra.mxu0 %v7960_v10  ;;  %v1164_v10 = vrot.slane %v1162_v4, 4 }
  0xa8   : > { %7117 = vmatprep.subr.bf16.mxu0 %v7961_v56 }
  0xa9   : > { %v1165_v13 = vor.u32 %v1164_v10, %v1160_v9 }
  0xaa   : > { %7086 = vmatmul.mubr.bf16.vlgmr.msra.gmra.mrb[0].mxu0 %v375_v15  ;;  %v7969_v15 = vld [vmem:[#allocation8 + $0xc8] sm:$0xff]  }
  0xab   : > { %7089 = vmatprep.mubr.bf16.mxu0 %v376_v16  ;;  %7118 = vmatpush3.bf16.msra.mxu0 %v7961_v56  ;;  %v7970_v16 = vld [vmem:[#allocation8 + $0x78] sm:$0xff]   ;;  %v1166_v19 = vrot.slane %v1165_v13, 4 }
  0xac   : > { %7119 = vmatprep.subr.bf16.mxu0 %v7962_v57  ;;  %7598 = vmatprep.subr.bf16.mxu1 %v7969_v15 }
  0xad   : > { %7606 = vmatpush3.bf16.msra.mxu1 %v7969_v15 }
  0xae   : > { %7599 = vmatprep.subr.bf16.mxu1 %v7971_v23 }
  0xaf   : > { %7120 = vmatpush3.bf16.msra.mxu0 %v7962_v57 }
  0xb0   : > { %7121 = vmatprep.subr.bf16.mxu0 %v7963_v58 }
  0xb1   : > { %7607 = vmatpush3.bf16.msra.mxu1 %v7971_v23 }
  0xb2   : > { %7090 = vmatmul.mubr.bf16.gmra.mrb[4].mxu0 %v377_v21  ;;  %v1161_v21 = vsel %vm8649_vm2, %v1156_v17, %v1160_v9  ;;  %7600 = vmatprep.subr.bf16.mxu1 %v7972_v25 }
  0xb3   : > { %7093 = vmatprep.mubr.bf16.mxu0 %v378_v22  ;;  %7122 = vmatpush3.bf16.msra.mxu0 %v7963_v58  ;;  %v1171_v22 = vsel %vm8649_vm2, %v1166_v19, %v1170_v20 }
  0xb4   : > { %7123 = vmatprep.subr.bf16.mxu0 %v7964_v59  ;;  %v6524_v24 = vcombine.low %v1161_v21, %v1171_v22 }
  0xb5   : > { %7608 = vmatpush3.bf16.msra.mxu1 %v7972_v25 }
  0xb6   : > { %7601 = vmatprep.subr.bf16.mxu1 %v7973_v26 }
  0xb7   : > { %7124 = vmatpush3.bf16.msra.mxu0 %v7964_v59 }
  0xb8   : > { %7125 = vmatprep.subr.bf16.mxu0 %v7965_v61 }
  0xb9   : > { %7609 = vmatpush3.bf16.msra.mxu1 %v7973_v26 }
  0xba   : > { %7094 = vmatmul.mubr.bf16.gmra.mrb[8].mxu0 %v379_v27  ;;  %v7974_v27 = vld [vmem:[#allocation8 + $0xe8] sm:$0xff]  }
  0xbb   : > { %7097 = vmatprep.mubr.bf16.mxu0 %v380_v28  ;;  %7126 = vmatpush3.bf16.msra.mxu0 %v7965_v61  ;;  %v7975_v28 = vld [vmem:[#allocation8 + $0xf0] sm:$0xff]  }
  0xbc   : > { %7127 = vmatprep.subr.bf16.mxu0 %v7966_v62  ;;  %7602 = vmatprep.subr.bf16.mxu1 %v7974_v27 }
  0xbd   : > { %7610 = vmatpush3.bf16.msra.mxu1 %v7974_v27 }
  0xbe   : > { %7603 = vmatprep.subr.bf16.mxu1 %v7975_v28 }
  0xbf   : > { %7128 = vmatpush3.bf16.msra.mxu0 %v7966_v62 }
  0xc0   : > { %7129 = vmatprep.subr.bf16.mxu0 %v7968_v6 }
  0xc1   : > { %7611 = vmatpush3.bf16.msra.mxu1 %v7975_v28 }
  0xc2   : > { %7098 = vmatmul.mubr.bf16.gmra.mrb[12].mxu0 %v381_v33  ;;  %7604 = vmatprep.subr.bf16.mxu1 %v7976_v29 }
  0xc3   : > { %7101 = vmatprep.mubr.bf16.mxu0 %v382_v34  ;;  %7130 = vmatpush3.bf16.msra.mxu0 %v7968_v6 }
  0xc4   : > { %7131 = vmatprep.subr.bf16.mxu0 %v7970_v16 }
  0xc5   : > { %7612 = vmatpush3.bf16.msra.mxu1 %v7976_v29 }
  0xc6   : > { %7309 = vmatprep.subr.bf16.mxu1 %v8657_v30 }
  0xc7   : > { %7132 = vmatpush3.bf16.msra.mxu0 %v7970_v16 }
  0xc8   : > { %7165 = vmatprep.subr.bf16.mxu0 %v8660_v31 }
  0xca   : > { %7102 = vmatmul.mubr.bf16.gmra.mrb[16].mxu0 %v383_v39 }
  0xcb   : > { %7105 = vmatprep.mubr.bf16.mxu0 %v384_v40 }
  0xd2   : > { %7106 = vmatmul.mubr.bf16.gmra.mrb[20].mxu0 %v385_v45 }
  0xd3   : > { %7109 = vmatprep.mubr.bf16.mxu0 %v386_v46 }
  0xda   : > { %7110 = vmatmul.mubr.bf16.gmra.mrb[24].mxu0 %v387_v51 }
  0xdb   : > { %7113 = vmatprep.mubr.bf16.mxu0 %v388_v52 }
  0xe2   : > { %7114 = vmatmul.mubr.bf16.gmra.mrb[28].mxu0 %v389_v55 }
  0xe3   : > { %7133 = vmatprep.mubr.bf16.mxu0 %v6524_v24 }
 0x17d   : > { %v7087_v33 = vpop.f32.mrb[0].mxu0 }
 0x17e   : > { %v504_v34 = vadd.f32 %v7087_v33, %v8666_v32  ;;  %v495_v35 = vpop.f32.mrb[1].mxu0 }
 0x17f   : > { %v496_v36 = vadd.f32 %v8666_v32, %v495_v35  ;;  %v7088_v37 = vpop.f32.mrb[2].mxu0 }
 0x180   : > { %v507_v38 = vadd.f32 %v7088_v37, %v8666_v32  ;;  %v498_v39 = vpop.f32.mrb[3].mxu0  ;;  %v624_v41 = vmax.f32 %v504_v34, 0.0 }
 0x181   : > { %v499_v40 = vadd.f32 %v8666_v32, %v498_v39  ;;  %v622_v43 = vmax.f32 %v496_v36, 0.0 }
 0x182   : > { %v625_v42 = vmax.f32 %v507_v38, 0.0 }
 0x183   : > { %v623_v44 = vmax.f32 %v499_v40, 0.0 }
 0x184   : > { %v655_v45 = vpack.c.bf16 %v625_v42, %v624_v41 }
 0x185   : > { %v654_v46 = vpack.c.bf16 %v623_v44, %v622_v43  ;;  %v7091_v47 = vpop.f32.mrb[4].mxu0 }
 0x186   : > { %v678_v48 = vshrl.u32 %v655_v45, 16  ;;  %v520_v49 = vadd.f32 %v7091_v47, %v8666_v32  ;;  %v511_v50 = vpop.f32.mrb[5].mxu0  ;;  %v681_v56 = vshll.u32 %v655_v45, 16 }
 0x187   : > { %v671_v52 = vshrl.u32 %v654_v46, 16  ;;  %v512_v53 = vadd.f32 %v8666_v32, %v511_v50  ;;  %v7092_v54 = vpop.f32.mrb[6].mxu0  ;;  %v674_v60 = vshll.u32 %v654_v46, 16 }
 0x188   : > { %v680_v55 = vrot.slane %v678_v48, 7  ;;  %v523_v57 = vadd.f32 %v7092_v54, %v8666_v32  ;;  %v514_v58 = vpop.f32.mrb[7].mxu0  ;;  %v628_v61 = vmax.f32 %v520_v49, 0.0  ;;  %v6548_v48 = vcombine.low %v8641_v63, %v8643_v0 }
 0x189   : > { %v673_v59 = vrot.slane %v671_v52, 7  ;;  %v515_v62 = vadd.f32 %v8666_v32, %v514_v58  ;;  %v626_v3 = vmax.f32 %v512_v53, 0.0 }
 0x18a   : > { %v683_v1 = vor.u32 %v681_v56, %v680_v55  ;;  %v834_v2 = vsel %vm8673_vm5, %v680_v55, 0  ;;  %v629_v4 = vmax.f32 %v523_v57, 0.0 }
 0x18b   : > { %v6481_v5 = vcombine.low %v834_v2, %v834_v2  ;;  %v676_v6 = vor.u32 %v674_v60, %v673_v59  ;;  %v833_v7 = vsel %vm8673_vm5, %v673_v59, 0  ;;  %v627_v8 = vmax.f32 %v515_v62, 0.0 }
 0x18c   : > { %v818_v9 = vsel %vm8673_vm5, 0, %v683_v1  ;;  %v6478_v10 = vcombine.low %v833_v7, %v833_v7  ;;  %v657_v11 = vpack.c.bf16 %v629_v4, %v628_v61 }
 0x18d   : > { %v6479_v12 = vcombine.low %v818_v9, %v818_v9  ;;  %v6480_v13 = vcombine.high %v818_v9, %v818_v9  ;;  %1038 = vst [vmem:[#allocation2 + $0x20] sm:$0x1] %v6481_v5  ;;  %v817_v14 = vsel %vm8673_vm5, 0, %v676_v6  ;;  %v656_v15 = vpack.c.bf16 %v627_v8, %v626_v3  ;;  %v7095_v16 = vpop.f32.mrb[8].mxu0 }
 0x18e   : > { %v6476_v17 = vcombine.low %v817_v14, %v817_v14  ;;  %v6477_v19 = vcombine.high %v817_v14, %v817_v14  ;;  %1035 = vst [vmem:[#allocation2 + $0x14] sm:$0x1] %v6478_v10  ;;  %v692_v20 = vshrl.u32 %v657_v11, 16  ;;  %v527_v21 = vpop.f32.mrb[9].mxu0  ;;  %v536_v23 = vadd.f32 %v7095_v16, %v8666_v32 }
 0x18f   : > { %1036 = vst [vmem:[#allocation2 + $0x18] sm:$0xf] %v6479_v12  ;;  %1037 = vst [vmem:[#allocation2 + $0x1c] sm:$0xf] %v6480_v13  ;;  %v685_v22 = vshrl.u32 %v656_v15, 16  ;;  %v528_v24 = vadd.f32 %v8666_v32, %v527_v21  ;;  %v7096_v25 = vpop.f32.mrb[10].mxu0 }
 0x190   : > { %1033 = vst [vmem:[#allocation2 + $0xc] sm:$0xf] %v6476_v17  ;;  %1034 = vst [vmem:[#allocation2 + $0x10] sm:$0xf] %v6477_v19  ;;  %v694_v26 = vrot.slane %v692_v20, 7  ;;  %v695_v27 = vshll.u32 %v657_v11, 16  ;;  %v539_v28 = vadd.f32 %v7096_v25, %v8666_v32 }
 0x191   : > { %v530_v29 = vpop.f32.mrb[11].mxu0  ;;  %v687_v33 = vrot.slane %v685_v22, 7  ;;  %v688_v34 = vshll.u32 %v656_v15, 16  ;;  %v632_v35 = vmax.f32 %v536_v23, 0.0  ;;  %v630_v39 = vmax.f32 %v528_v24, 0.0 }
 0x192   : > { %v531_v36 = vadd.f32 %v8666_v32, %v530_v29  ;;  %v697_v37 = vor.u32 %v695_v27, %v694_v26  ;;  %v836_v38 = vsel %vm8673_vm5, %v694_v26, 0  ;;  %v633_v40 = vmax.f32 %v539_v28, 0.0 }
 0x193   : > { %v6487_v41 = vcombine.low %v836_v38, %v836_v38  ;;  %v690_v42 = vor.u32 %v688_v34, %v687_v33  ;;  %v835_v43 = vsel %vm8673_vm5, %v687_v33, 0 }
 0x194   : > { %v631_v44 = vmax.f32 %v531_v36, 0.0  ;;  %v820_v45 = vsel %vm8673_vm5, 0, %v697_v37  ;;  %v6484_v46 = vcombine.low %v835_v43, %v835_v43  ;;  %v659_v47 = vpack.c.bf16 %v633_v40, %v632_v35 }
 0x195   : > { %v6485_v49 = vcombine.low %v820_v45, %v820_v45  ;;  %v6486_v50 = vcombine.high %v820_v45, %v820_v45  ;;  %1044 = vst [vmem:[#allocation2 + $0x38] sm:$0x1] %v6487_v41  ;;  %v819_v52 = vsel %vm8673_vm5, 0, %v690_v42  ;;  %v7099_v54 = vpop.f32.mrb[12].mxu0 }
 0x196   : > { %v658_v53 = vpack.c.bf16 %v631_v44, %v630_v39  ;;  %v6482_v55 = vcombine.low %v819_v52, %v819_v52  ;;  %v6483_v56 = vcombine.high %v819_v52, %v819_v52  ;;  %1041 = vst [vmem:[#allocation2 + $0x2c] sm:$0x1] %v6484_v46  ;;  %v706_v57 = vshrl.u32 %v659_v47, 16  ;;  %v543_v59 = vpop.f32.mrb[13].mxu0 }
 0x197   : > { %v709_v58 = vshll.u32 %v659_v47, 16  ;;  %1042 = vst [vmem:[#allocation2 + $0x30] sm:$0xf] %v6485_v49  ;;  %1043 = vst [vmem:[#allocation2 + $0x34] sm:$0xf] %v6486_v50  ;;  %v552_v62 = vadd.f32 %v7099_v54, %v8666_v32  ;;  %v544_v1 = vadd.f32 %v8666_v32, %v543_v59  ;;  %v7100_v2 = vpop.f32.mrb[14].mxu0 }
 0x198   : > { %v699_v60 = vshrl.u32 %v658_v53, 16  ;;  %v702_v61 = vshll.u32 %v658_v53, 16  ;;  %v1083_v3 = vld [vmem:[#allocation2 + $0xc] sm:$0xf]  ;;  %1039 = vst [vmem:[#allocation2 + $0x24] sm:$0xf] %v6482_v55  ;;  %v555_v5 = vadd.f32 %v7100_v2, %v8666_v32 }
 0x199   : > { %1040 = vst [vmem:[#allocation2 + $0x28] sm:$0xf] %v6483_v56  ;;  %v708_v4 = vrot.slane %v706_v57, 7  ;;  %v546_v6 = vpop.f32.mrb[15].mxu0  ;;  %v1173_v7 = vshrl.u32 %v1083_v3, 16  ;;  %v1176_v8 = vshll.u32 %v1083_v3, 16 }
 0x19a   : > { %v701_v9 = vrot.slane %v699_v60, 7  ;;  %v636_v10 = vmax.f32 %v552_v62, 0.0  ;;  %v634_v11 = vmax.f32 %v544_v1, 0.0  ;;  %v547_v12 = vadd.f32 %v8666_v32, %v546_v6  ;;  %v8714_v34 = vld [vmem:[#allocation2 + $0x10] sm:$0xf] }
 0x19b   : > { %v711_v13 = vor.u32 %v709_v58, %v708_v4  ;;  %v838_v14 = vsel %vm8673_vm5, %v708_v4, 0  ;;  %v637_v15 = vmax.f32 %v555_v5, 0.0  ;;  %v1175_v16 = vrot.slane %v1173_v7, 4 }
 0x19c   : > { %v6493_v17 = vcombine.low %v838_v14, %v838_v14  ;;  %v704_v19 = vor.u32 %v702_v61, %v701_v9  ;;  %v837_v20 = vsel %vm8673_vm5, %v701_v9, 0  ;;  %v635_v21 = vmax.f32 %v547_v12, 0.0 }
 0x19d   : > { %v822_v22 = vsel %vm8673_vm5, 0, %v711_v13  ;;  %v6490_v23 = vcombine.low %v837_v20, %v837_v20  ;;  %v661_v24 = vpack.c.bf16 %v637_v15, %v636_v10  ;;  %v1178_v25 = vrot.slane %v1176_v8, 5  ;;  %v7103_v33 = vpop.f32.mrb[16].mxu0  ;;  %v1130_v10 = vld [vmem:[#allocation2 + $0x14] sm:$0x1] }
 0x19e   : > { %v6491_v26 = vcombine.low %v822_v22, %v822_v22  ;;  %v6492_v27 = vcombine.high %v822_v22, %v822_v22  ;;  %1050 = vst [vmem:[#allocation2 + $0x50] sm:$0x1] %v6493_v17  ;;  %v821_v28 = vsel %vm8673_vm5, 0, %v704_v19  ;;  %v660_v29 = vpack.c.bf16 %v635_v21, %v634_v11  ;;  %v559_v39 = vpop.f32.mrb[17].mxu0  ;;  %v1085_v11 = vld [vmem:[#allocation2 + $0x18] sm:$0xf] }
 0x19f   : > { %v6488_v35 = vcombine.low %v821_v28, %v821_v28  ;;  %v6489_v36 = vcombine.high %v821_v28, %v821_v28  ;;  %1047 = vst [vmem:[#allocation2 + $0x44] sm:$0x1] %v6490_v23  ;;  %v720_v37 = vshrl.u32 %v661_v24, 16  ;;  %v723_v38 = vshll.u32 %v661_v24, 16  ;;  %v7104_v44 = vpop.f32.mrb[18].mxu0 }
 0x1a0   : > { %1048 = vst [vmem:[#allocation2 + $0x48] sm:$0xf] %v6491_v26  ;;  %1049 = vst [vmem:[#allocation2 + $0x4c] sm:$0xf] %v6492_v27  ;;  %v713_v40 = vshrl.u32 %v660_v29, 16  ;;  %v716_v41 = vshll.u32 %v660_v29, 16  ;;  %v568_v42 = vadd.f32 %v7103_v33, %v8666_v32  ;;  %v560_v43 = vadd.f32 %v8666_v32, %v559_v39 }
 0x1a1   : > { %1045 = vst [vmem:[#allocation2 + $0x3c] sm:$0xf] %v6488_v35  ;;  %1046 = vst [vmem:[#allocation2 + $0x40] sm:$0xf] %v6489_v36  ;;  %v722_v45 = vrot.slane %v720_v37, 7  ;;  %v571_v46 = vadd.f32 %v7104_v44, %v8666_v32  ;;  %v562_v47 = vpop.f32.mrb[19].mxu0  ;;  %v1179_v49 = vor.u32 %v1178_v25, %v1175_v16 }
 0x1a2   : > { %v1182_v50 = vshll.u32 %v8714_v34, 16  ;;  %v715_v52 = vrot.slane %v713_v40, 7  ;;  %v640_v53 = vmax.f32 %v568_v42, 0.0  ;;  %v638_v54 = vmax.f32 %v560_v43, 0.0  ;;  %v1086_v17 = vld [vmem:[#allocation2 + $0x1c] sm:$0xf] }
 0x1a3   : > { %v563_v55 = vadd.f32 %v8666_v32, %v562_v47  ;;  %v725_v56 = vor.u32 %v723_v38, %v722_v45  ;;  %v840_v57 = vsel %vm8673_vm5, %v722_v45, 0  ;;  %v641_v58 = vmax.f32 %v571_v46, 0.0  ;;  %v1131_v47 = vld [vmem:[#allocation2 + $0x20] sm:$0x1] }
 0x1a4   : > { %v8723_v59 = vrot.slane %v1179_v49, 4  ;;  %v6499_v60 = vcombine.low %v840_v57, %v840_v57  ;;  %v718_v61 = vor.u32 %v716_v41, %v715_v52  ;;  %v839_v62 = vsel %vm8673_vm5, %v715_v52, 0 }
 0x1a5   : > { %v639_v1 = vmax.f32 %v563_v55, 0.0  ;;  %v824_v2 = vsel %vm8673_vm5, 0, %v725_v56  ;;  %v6496_v3 = vcombine.low %v839_v62, %v839_v62  ;;  %v663_v4 = vpack.c.bf16 %v641_v58, %v640_v53  ;;  %v7107_v12 = vpop.f32.mrb[20].mxu0 }
 0x1a6   : > { %v8729_v5 = vrot.slane %v1182_v50, 5  ;;  %v6497_v6 = vcombine.low %v824_v2, %v824_v2  ;;  %v6498_v7 = vcombine.high %v824_v2, %v824_v2  ;;  %1056 = vst [vmem:[#allocation2 + $0x68] sm:$0x1] %v6499_v60  ;;  %v823_v8 = vsel %vm8673_vm5, 0, %v718_v61  ;;  %v575_v19 = vpop.f32.mrb[21].mxu0 }
 0x1a7   : > { %v662_v9 = vpack.c.bf16 %v639_v1, %v638_v54  ;;  %v6494_v13 = vcombine.low %v823_v8, %v823_v8  ;;  %v6495_v14 = vcombine.high %v823_v8, %v823_v8  ;;  %1053 = vst [vmem:[#allocation2 + $0x5c] sm:$0x1] %v6496_v3  ;;  %v734_v15 = vshrl.u32 %v663_v4, 16  ;;  %v7108_v24 = vpop.f32.mrb[22].mxu0 }
 0x1a8   : > { %v737_v16 = vshll.u32 %v663_v4, 16  ;;  %1054 = vst [vmem:[#allocation2 + $0x60] sm:$0xf] %v6497_v6  ;;  %1055 = vst [vmem:[#allocation2 + $0x64] sm:$0xf] %v6498_v7  ;;  %v1185_v22 = vsel %vm8649_vm2, %v8723_v59, %v8729_v5  ;;  %v1186_v23 = vshrl.u32 %v8714_v34, 16  ;;  %v584_v2 = vadd.f32 %v7107_v12, %v8666_v32 }
 0x1a9   : > { %v727_v20 = vshrl.u32 %v662_v9, 16  ;;  %v730_v21 = vshll.u32 %v662_v9, 16  ;;  %1051 = vst [vmem:[#allocation2 + $0x54] sm:$0xf] %v6494_v13  ;;  %1052 = vst [vmem:[#allocation2 + $0x58] sm:$0xf] %v6495_v14  ;;  %v576_v3 = vadd.f32 %v8666_v32, %v575_v19  ;;  %v587_v9 = vadd.f32 %v7108_v24, %v8666_v32 }
 0x1aa   : > { %v736_v25 = vrot.slane %v734_v15, 7  ;;  %v1192_v26 = vshll.u32 %v1130_v10, 16  ;;  %v1197_v27 = vshrl.u32 %v1085_v11, 16  ;;  %v1200_v28 = vshll.u32 %v1085_v11, 16  ;;  %v578_v29 = vpop.f32.mrb[23].mxu0  ;;  %v7986_v13 = vld [vmem:[#allocation8 + $0x8] sm:$0xff]  }
 0x1ab   : > { %v729_v33 = vrot.slane %v727_v20, 7  ;;  %v1188_v35 = vrot.slane %v1186_v23, 4  ;;  %v1206_v36 = vshll.u32 %v1086_v17, 16  ;;  %v1210_v37 = vshrl.u32 %v1086_v17, 16  ;;  %v1087_v4 = vld [vmem:[#allocation2 + $0x24] sm:$0xf] }
 0x1ac   : > { %v739_v38 = vor.u32 %v737_v16, %v736_v25  ;;  %v842_v39 = vsel %vm8673_vm5, %v736_v25, 0  ;;  %v1194_v40 = vrot.slane %v1192_v26, 5  ;;  %v1199_v41 = vrot.slane %v1197_v27, 4  ;;  %v1088_v10 = vld [vmem:[#allocation2 + $0x28] sm:$0xf] }
 0x1ad   : > { %v6505_v42 = vcombine.low %v842_v39, %v842_v39  ;;  %v732_v34 = vor.u32 %v730_v21, %v729_v33  ;;  %v841_v43 = vsel %vm8673_vm5, %v729_v33, 0  ;;  %v1189_v44 = vor.u32 %v1188_v35, %v8729_v5  ;;  %v8747_v56 = vpop.f32.mrb[24].mxu0  ;;  %v1132_v17 = vld [vmem:[#allocation2 + $0x2c] sm:$0x1]  ;;  %v1089_v35 = vld [vmem:[#allocation2 + $0x30] sm:$0xf] }
 0x1ae   : > { %v826_v45 = vsel %vm8673_vm5, 0, %v739_v38  ;;  %v6502_v46 = vcombine.low %v841_v43, %v841_v43  ;;  %v1202_v49 = vrot.slane %v1200_v28, 5  ;;  %v1208_v50 = vrot.slane %v1206_v36, 5  ;;  %v8749_v61 = vpop.f32.mrb[25].mxu0  ;;  %v7989_v36 = vld [vmem:[#allocation8 + $0x10] sm:$0xff]  }
 0x1af   : > { %v6503_v52 = vcombine.low %v826_v45, %v826_v45  ;;  %v6504_v53 = vcombine.high %v826_v45, %v826_v45  ;;  %1062 = vst [vmem:[#allocation2 + $0x80] sm:$0x1] %v6505_v42  ;;  %v825_v54 = vsel %vm8673_vm5, 0, %v732_v34  ;;  %v1190_v55 = vrot.slane %v1189_v44, 4  ;;  %v8755_v5 = vpop.f32.mrb[26].mxu0 }
 0x1b0   : > { %v6500_v57 = vcombine.low %v825_v54, %v825_v54  ;;  %v6501_v58 = vcombine.high %v825_v54, %v825_v54  ;;  %1059 = vst [vmem:[#allocation2 + $0x74] sm:$0x1] %v6502_v46  ;;  %v1203_v59 = vor.u32 %v1202_v49, %v1199_v41  ;;  %v1212_v60 = vrot.slane %v1210_v37, 4  ;;  %v8758_v11 = vpop.f32.mrb[27].mxu0  ;;  %v8766_v41 = vld [vmem:[#allocation2 + $0x34] sm:$0xf] }
 0x1b1   : > { %1060 = vst [vmem:[#allocation2 + $0x78] sm:$0xf] %v6503_v52  ;;  %1061 = vst [vmem:[#allocation2 + $0x7c] sm:$0xf] %v6504_v53  ;;  %v1195_v62 = vsel %vm8649_vm2, %v1190_v55, %v1194_v40  ;;  %v1216_v1 = vshll.u32 %v1131_v47, 16  ;;  %v644_v15 = vmax.f32 %v584_v2, 0.0  ;;  %v579_v12 = vadd.f32 %v8666_v32, %v578_v29 }
 0x1b2   : > { %1057 = vst [vmem:[#allocation2 + $0x6c] sm:$0xf] %v6500_v57  ;;  %1058 = vst [vmem:[#allocation2 + $0x70] sm:$0xf] %v6501_v58  ;;  %v6525_v6 = vcombine.low %v1185_v22, %v1195_v62  ;;  %v1204_v7 = vrot.slane %v1203_v59, 4  ;;  %v1213_v8 = vor.u32 %v1212_v60, %v1208_v50  ;;  %v642_v16 = vmax.f32 %v576_v3, 0.0 }
 0x1b3   : > { %v1218_v14 = vrot.slane %v1216_v1, 5  ;;  %v645_v21 = vmax.f32 %v587_v9, 0.0  ;;  %v1221_v22 = vshrl.u32 %v1087_v4, 16  ;;  %v643_v23 = vmax.f32 %v579_v12, 0.0  ;;  %v8772_v46 = vld [vmem:[#allocation8 + $0x18] sm:$0xff]  }
 0x1b4   : > { %7134 = vmatmul.mubr.bf16.vlgmr.msra.gmra.mrb[32].mxu0 %v6525_v6  ;;  %v1209_v19 = vsel %vm8649_vm2, %v1204_v7, %v1208_v50  ;;  %v1214_v20 = vrot.slane %v1213_v8, 4  ;;  %v1224_v25 = vshll.u32 %v1087_v4, 16  ;;  %v1230_v24 = vshll.u32 %v1088_v10, 16  ;;  %v7980_v4 = vld [vmem:[#allocation8 + $0x108] sm:$0xff]  }
 0x1b5   : > { %v1234_v26 = vshrl.u32 %v1088_v10, 16  ;;  %7166 = vmatpush3.bf16.msra.mxu0 %v8660_v31  ;;  %v665_v28 = vpack.c.bf16 %v645_v21, %v644_v15  ;;  %v1223_v33 = vrot.slane %v1221_v22, 4  ;;  %v1240_v29 = vshll.u32 %v1132_v17, 16  ;;  %v8768_v42 = vpop.f32.mrb[28].mxu0 }
 0x1b6   : > { %v1219_v27 = vsel %vm8649_vm2, %v1214_v20, %v1218_v14  ;;  %7167 = vmatprep.subr.bf16.mxu0 %v7986_v13  ;;  %v664_v38 = vpack.c.bf16 %v643_v23, %v642_v16  ;;  %v1226_v39 = vrot.slane %v1224_v25, 5  ;;  %v1232_v40 = vrot.slane %v1230_v24, 5  ;;  %v8770_v45 = vpop.f32.mrb[29].mxu0  ;;  %v1133_v20 = vld [vmem:[#allocation2 + $0x38] sm:$0x1] }
 0x1b7   : > { %v6526_v37 = vcombine.low %v1209_v19, %v1219_v27  ;;  %v748_v34 = vshrl.u32 %v665_v28, 16  ;;  %v751_v43 = vshll.u32 %v665_v28, 16  ;;  %v1236_v31 = vrot.slane %v1234_v26, 4  ;;  %v8774_v53 = vpop.f32.mrb[30].mxu0  ;;  %v1091_v26 = vld [vmem:[#allocation2 + $0x3c] sm:$0xf] }
 0x1b8   : > { %v1242_v44 = vrot.slane %v1240_v29, 5  ;;  %v741_v47 = vshrl.u32 %v664_v38, 16  ;;  %v744_v49 = vshll.u32 %v664_v38, 16  ;;  %v1227_v50 = vor.u32 %v1226_v39, %v1223_v33  ;;  %v8777_v59 = vpop.f32.mrb[31].mxu0  ;;  %v7979_v10 = vld [vmem:[#allocation2 + $0x78] sm:$0xff]  }
 0x1b9   : > { %7137 = vmatprep.mubr.bf16.mxu0 %v6526_v37  ;;  %v1245_v52 = vshrl.u32 %v1089_v35, 16  ;;  %7168 = vmatpush3.bf16.msra.mxu0 %v7986_v13  ;;  %v750_v54 = vrot.slane %v748_v34, 7  ;;  %v1237_v55 = vor.u32 %v1236_v31, %v1232_v40  ;;  %v1248_v57 = vshll.u32 %v1089_v35, 16  ;;  %v7977_v3 = vld [vmem:[#allocation2 + $0x6c] sm:$0xff]   ;;  %v7995_v27 = vld [vmem:[#allocation8 + $0x20] sm:$0xff]  }
 0x1ba   : > { %v1254_v58 = vshll.u32 %v8766_v41, 16  ;;  %7169 = vmatprep.subr.bf16.mxu0 %v7989_v36  ;;  %v743_v60 = vrot.slane %v741_v47, 7  ;;  %v1228_v62 = vrot.slane %v1227_v50, 4  ;;  %v1258_v2 = vshrl.u32 %v8766_v41, 16  ;;  %7293 = vmatprep.mubr.bf16.mxu1 %v7977_v3  ;;  %v1134_v31 = vld [vmem:[#allocation2 + $0x44] sm:$0x1] }
 0x1bb   : > { %v1247_v1 = vrot.slane %v1245_v52, 4  ;;  %v753_v6 = vor.u32 %v751_v43, %v750_v54  ;;  %v844_v7 = vsel %vm8673_vm5, %v750_v54, 0  ;;  %v1238_v8 = vrot.slane %v1237_v55, 4  ;;  %7294 = vmatmul.mubr.bf16.vlgmr.msra.gmra.mrb[0].mxu1 %v7979_v10  ;;  %v1092_v43 = vld [vmem:[#allocation2 + $0x40] sm:$0xf] }
 0x1bc   : > { %v1250_v9 = vrot.slane %v1248_v57, 5  ;;  %v6511_v13 = vcombine.low %v844_v7, %v844_v7  ;;  %v746_v14 = vor.u32 %v744_v49, %v743_v60  ;;  %v843_v15 = vsel %vm8673_vm5, %v743_v60, 0  ;;  %7310 = vmatpush3.bf16.msra.mxu1 %v8657_v30  ;;  %v8805_v50 = vld [vmem:[#allocation2 + $0x48] sm:$0xf]  ;;  %v7998_v52 = vld [vmem:[#allocation8 + $0x28] sm:$0xff]  }
 0x1bd   : > { %v1233_v16 = vsel %vm8649_vm2, %v1228_v62, %v1232_v40  ;;  %7170 = vmatpush3.bf16.msra.mxu0 %v7989_v36  ;;  %v828_v12 = vsel %vm8673_vm5, 0, %v753_v6  ;;  %v6508_v17 = vcombine.low %v843_v15, %v843_v15  ;;  %v1243_v19 = vsel %vm8649_vm2, %v1238_v8, %v1242_v44  ;;  %7311 = vmatprep.subr.bf16.mxu1 %v7980_v4  ;;  %v7982_v36 = vld [vmem:[#allocation8 + $0x110] sm:$0xff]   ;;  %v8807_v6 = vld [vmem:[#allocation2 + $0x50] sm:$0x1]  ;;  %v1138_v51 = vld [vmem:[#allocation2 + $0x74] sm:$0x1] }
 0x1be   : > { %v1251_v21 = vor.u32 %v1250_v9, %v1247_v1  ;;  %7171 = vmatprep.subr.bf16.mxu0 %v8772_v46  ;;  %v6509_v22 = vcombine.low %v828_v12, %v828_v12  ;;  %v6510_v23 = vcombine.high %v828_v12, %v828_v12  ;;  %1068 = vst [vmem:[#allocation2 + $0x98] sm:$0x1] %v6511_v13  ;;  %v827_v25 = vsel %vm8673_vm5, 0, %v746_v14  ;;  %v1094_v13 = vld [vmem:[#allocation2 + $0x4c] sm:$0xf] }
 0x1bf   : > { %v6527_v24 = vcombine.low %v1233_v16, %v1243_v19  ;;  %v6506_v28 = vcombine.low %v827_v25, %v827_v25  ;;  %v6507_v33 = vcombine.high %v827_v25, %v827_v25  ;;  %1065 = vst [vmem:[#allocation2 + $0x8c] sm:$0x1] %v6508_v17  ;;  %v1256_v35 = vrot.slane %v1254_v58, 5  ;;  %v8000_v14 = vld [vmem:[#allocation8 + $0x30] sm:$0xff]   ;;  %v7988_v19 = vld [vmem:[#allocation8 + $0x120] sm:$0xff]  }
 0x1c0   : > { %v1252_v29 = vrot.slane %v1251_v21, 4  ;;  %1066 = vst [vmem:[#allocation2 + $0x90] sm:$0xf] %v6509_v22  ;;  %1067 = vst [vmem:[#allocation2 + $0x94] sm:$0xf] %v6510_v23  ;;  %v1260_v37 = vrot.slane %v1258_v2, 4  ;;  %v600_v39 = vadd.f32 %v8747_v56, %v8666_v32  ;;  %v592_v40 = vadd.f32 %v8666_v32, %v8749_v61  ;;  %7312 = vmatpush3.bf16.msra.mxu1 %v7980_v4 }
 0x1c1   : > { %7138 = vmatmul.mubr.bf16.gmra.mrb[36].mxu0 %v6527_v24  ;;  %v1264_v38 = vshll.u32 %v1133_v20, 16  ;;  %1063 = vst [vmem:[#allocation2 + $0x84] sm:$0xf] %v6506_v28  ;;  %1064 = vst [vmem:[#allocation2 + $0x88] sm:$0xf] %v6507_v33  ;;  %v603_v41 = vadd.f32 %v8755_v5, %v8666_v32  ;;  %v595_v34 = vadd.f32 %v8666_v32, %v8758_v11  ;;  %v1269_v44 = vshrl.u32 %v1091_v26, 16 }
 0x1c2   : > { %v1257_v30 = vsel %vm8649_vm2, %v1252_v29, %v1256_v35  ;;  %7172 = vmatpush3.bf16.msra.mxu0 %v8772_v46  ;;  %v1261_v56 = vor.u32 %v1260_v37, %v1256_v35  ;;  %v648_v49 = vmax.f32 %v600_v39, 0.0  ;;  %v646_v61 = vmax.f32 %v592_v40, 0.0  ;;  %7313 = vmatprep.subr.bf16.mxu1 %v7982_v36  ;;  %v7985_v11 = vld [vmem:[#allocation8 + $0x118] sm:$0xff]  }
 0x1c3   : > { %v1266_v47 = vrot.slane %v1264_v38, 5  ;;  %7173 = vmatprep.subr.bf16.mxu0 %v7995_v27  ;;  %v649_v54 = vmax.f32 %v603_v41, 0.0  ;;  %v647_v55 = vmax.f32 %v595_v34, 0.0  ;;  %v1271_v5 = vrot.slane %v1269_v44, 4  ;;  %v7991_v41 = vld [vmem:[#allocation8 + $0x128] sm:$0xff]  }
 0x1c4   : > { %v1272_v57 = vshll.u32 %v1091_v26, 16  ;;  %v1262_v58 = vrot.slane %v1261_v56, 4  ;;  %v1278_v60 = vshll.u32 %v1092_v43, 16  ;;  %v1282_v62 = vshrl.u32 %v1092_v43, 16  ;;  %7314 = vmatpush3.bf16.msra.mxu1 %v7982_v36  ;;  %v8001_v56 = vld [vmem:[#allocation8 + $0x38] sm:$0xff]  }
 0x1c5   : > { %v1288_v1 = vshll.u32 %v1134_v31, 16  ;;  %v667_v46 = vpack.c.bf16 %v649_v54, %v648_v49  ;;  %v666_v2 = vpack.c.bf16 %v647_v55, %v646_v61  ;;  %v1293_v7 = vshrl.u32 %v8805_v50, 16  ;;  %7315 = vmatprep.subr.bf16.mxu1 %v7985_v11 }
 0x1c6   : > { %v1274_v3 = vrot.slane %v1272_v57, 5  ;;  %7174 = vmatpush3.bf16.msra.mxu0 %v7995_v27  ;;  %v1267_v4 = vsel %vm8649_vm2, %v1262_v58, %v1266_v47  ;;  %v1280_v8 = vrot.slane %v1278_v60, 5  ;;  %v1284_v9 = vrot.slane %v1282_v62, 4  ;;  %v1095_v57 = vld [vmem:[#allocation2 + $0x54] sm:$0xf] }
 0x1c7   : > { %v1290_v10 = vrot.slane %v1288_v1, 5  ;;  %7175 = vmatprep.subr.bf16.mxu0 %v7998_v52  ;;  %v6528_v15 = vcombine.low %v1257_v30, %v1267_v4  ;;  %v762_v16 = vshrl.u32 %v667_v46, 16  ;;  %v765_v12 = vshll.u32 %v667_v46, 16  ;;  %v7984_v33 = vld [vmem:[#allocation2 + $0x90] sm:$0xff]   ;;  %v7994_v46 = vld [vmem:[#allocation8 + $0x130] sm:$0xff]  }
 0x1c8   : > { %v755_v17 = vshrl.u32 %v666_v2, 16  ;;  %v758_v20 = vshll.u32 %v666_v2, 16  ;;  %v1275_v21 = vor.u32 %v1274_v3, %v1271_v5  ;;  %v1285_v22 = vor.u32 %v1284_v9, %v1280_v8  ;;  %v7981_v28 = vld [vmem:[#allocation2 + $0x84] sm:$0xff]   ;;  %7316 = vmatpush3.bf16.msra.mxu1 %v7985_v11  ;;  %v8826_v11 = vld [vmem:[#allocation8 + $0x80] sm:$0xff]  }
 0x1c9   : > { %v1295_v23 = vrot.slane %v1293_v7, 4  ;;  %7141 = vmatprep.mubr.bf16.mxu0 %v6528_v15  ;;  %v764_v25 = vrot.slane %v762_v16, 7  ;;  %v1296_v26 = vshll.u32 %v8805_v50, 16  ;;  %v1302_v27 = vshll.u32 %v1094_v13, 16  ;;  %7297 = vmatprep.mubr.bf16.mxu1 %v7981_v28  ;;  %v1136_v4 = vld [vmem:[#allocation2 + $0x5c] sm:$0x1] }
 0x1ca   : > { %v757_v24 = vrot.slane %v755_v17, 7  ;;  %7176 = vmatpush3.bf16.msra.mxu0 %v7998_v52  ;;  %v1276_v29 = vrot.slane %v1275_v21, 4  ;;  %v1286_v35 = vrot.slane %v1285_v22, 4  ;;  %v1306_v36 = vshrl.u32 %v1094_v13, 16  ;;  %7317 = vmatprep.subr.bf16.mxu1 %v7988_v19  ;;  %v1097_v17 = vld [vmem:[#allocation2 + $0x60] sm:$0xf] }
 0x1cb   : > { %v1312_v37 = vshll.u32 %v8807_v6, 16  ;;  %7177 = vmatprep.subr.bf16.mxu0 %v8000_v14  ;;  %v767_v38 = vor.u32 %v765_v12, %v764_v25  ;;  %v846_v39 = vsel %vm8673_vm5, %v764_v25, 0  ;;  %7298 = vmatmul.mubr.bf16.gmra.mrb[4].mxu1 %v7984_v33  ;;  %v1298_v50 = vrot.slane %v1296_v26, 5 }
 0x1cc   : > { %v760_v40 = vor.u32 %v758_v20, %v757_v24  ;;  %v845_v30 = vsel %vm8673_vm5, %v757_v24, 0  ;;  %v6517_v34 = vcombine.low %v846_v39, %v846_v39  ;;  %v1281_v31 = vsel %vm8649_vm2, %v1276_v29, %v1280_v8  ;;  %7318 = vmatpush3.bf16.msra.mxu1 %v7988_v19  ;;  %v7997_v19 = vld [vmem:[#allocation8 + $0x138] sm:$0xff]  }
 0x1cd   : > { %v6514_v43 = vcombine.low %v845_v30, %v845_v30  ;;  %v1291_v44 = vsel %vm8649_vm2, %v1286_v35, %v1290_v10  ;;  %v830_v47 = vsel %vm8673_vm5, 0, %v767_v38  ;;  %v1299_v58 = vor.u32 %v1298_v50, %v1295_v23  ;;  %7319 = vmatprep.subr.bf16.mxu1 %v7991_v41  ;;  %v1096_v10 = vld [vmem:[#allocation2 + $0x58] sm:$0xf] }
 0x1ce   : > { %v829_v49 = vsel %vm8673_vm5, 0, %v760_v40  ;;  %v6529_v61 = vcombine.low %v1281_v31, %v1291_v44  ;;  %7178 = vmatpush3.bf16.msra.mxu0 %v8000_v14  ;;  %v6515_v52 = vcombine.low %v830_v47, %v830_v47  ;;  %v6516_v54 = vcombine.high %v830_v47, %v830_v47  ;;  %1074 = vst [vmem:[#allocation2 + $0xb0] sm:$0x1] %v6517_v34 }
 0x1cf   : > { %v6512_v55 = vcombine.low %v829_v49, %v829_v49  ;;  %v6513_v5 = vcombine.high %v829_v49, %v829_v49  ;;  %1071 = vst [vmem:[#allocation2 + $0xa4] sm:$0x1] %v6514_v43  ;;  %v1304_v60 = vrot.slane %v1302_v27, 5  ;;  %v1308_v62 = vrot.slane %v1306_v36, 4  ;;  %7179 = vmatprep.subr.bf16.mxu0 %v8001_v56  ;;  %v8841_v36 = vld [vmem:[#allocation2 + $0x64] sm:$0xf] }
 0x1d0   : > { %7142 = vmatmul.mubr.bf16.gmra.mrb[40].mxu0 %v6529_v61  ;;  %v1314_v1 = vrot.slane %v1312_v37, 5  ;;  %1072 = vst [vmem:[#allocation2 + $0xa8] sm:$0xf] %v6515_v52  ;;  %1073 = vst [vmem:[#allocation2 + $0xac] sm:$0xf] %v6516_v54  ;;  %v616_v2 = vadd.f32 %v8768_v42, %v8666_v32  ;;  %v608_v3 = vadd.f32 %v8666_v32, %v8770_v45  ;;  %v1300_v8 = vrot.slane %v1299_v58, 4 }
 0x1d1   : > { %1069 = vst [vmem:[#allocation2 + $0x9c] sm:$0xf] %v6512_v55  ;;  %1070 = vst [vmem:[#allocation2 + $0xa0] sm:$0xf] %v6513_v5  ;;  %v619_v6 = vadd.f32 %v8774_v53, %v8666_v32  ;;  %v611_v7 = vadd.f32 %v8666_v32, %v8777_v59  ;;  %v1309_v9 = vor.u32 %v1308_v62, %v1304_v60  ;;  %v1317_v13 = vshrl.u32 %v1095_v57, 16  ;;  %v8843_v37 = vld [vmem:[#allocation8 + $0x140] sm:$0xff]  }
 0x1d2   : > { %v1320_v14 = vshll.u32 %v1095_v57, 16  ;;  %7180 = vmatpush3.bf16.msra.mxu0 %v8001_v56  ;;  %v652_v15 = vmax.f32 %v616_v2, 0.0  ;;  %v650_v16 = vmax.f32 %v608_v3, 0.0  ;;  %7320 = vmatpush3.bf16.msra.mxu1 %v7991_v41  ;;  %v1305_v45 = vsel %vm8649_vm2, %v1300_v8, %v1304_v60  ;;  %v1137_v62 = vld [vmem:[#allocation2 + $0x68] sm:$0x1] }
 0x1d3   : > { %v653_v42 = vmax.f32 %v619_v6, 0.0  ;;  %v651_v12 = vmax.f32 %v611_v7, 0.0  ;;  %7213 = vmatprep.subr.bf16.mxu0 %v8826_v11  ;;  %v1310_v32 = vrot.slane %v1309_v9, 4  ;;  %v1319_v53 = vrot.slane %v1317_v13, 4  ;;  %7321 = vmatprep.subr.bf16.mxu1 %v7994_v46 }
 0x1d4   : > { %v1322_v59 = vrot.slane %v1320_v14, 5  ;;  %v1326_v22 = vshll.u32 %v1096_v10, 16  ;;  %v1330_v23 = vshrl.u32 %v1096_v10, 16  ;;  %v1336_v26 = vshll.u32 %v1136_v4, 16  ;;  %v8858_v4 = vld [vmem:[#allocation2 + $0x70] sm:$0xf] }
 0x1d5   : > { %v669_v20 = vpack.c.bf16 %v653_v42, %v652_v15  ;;  %v668_v21 = vpack.c.bf16 %v651_v12, %v650_v16  ;;  %v1315_v25 = vsel %vm8649_vm2, %v1310_v32, %v1314_v1  ;;  %v1341_v27 = vshrl.u32 %v1097_v17, 16 }
 0x1d6   : > { %v1323_v24 = vor.u32 %v1322_v59, %v1319_v53  ;;  %v6530_v28 = vcombine.low %v1305_v45, %v1315_v25  ;;  %7322 = vmatpush3.bf16.msra.mxu1 %v7994_v46  ;;  %v1328_v40 = vrot.slane %v1326_v22, 5  ;;  %v1332_v30 = vrot.slane %v1330_v23, 4  ;;  %v1099_v46 = vld [vmem:[#allocation2 + $0x6c] sm:$0xf]  ;;  %v1101_v53 = vld [vmem:[#allocation2 + $0x78] sm:$0xf] }
 0x1d7   : > { %v776_v33 = vshrl.u32 %v669_v20, 16  ;;  %v779_v29 = vshll.u32 %v669_v20, 16  ;;  %v769_v35 = vshrl.u32 %v668_v21, 16  ;;  %v772_v38 = vshll.u32 %v668_v21, 16  ;;  %7323 = vmatprep.subr.bf16.mxu1 %v7997_v19  ;;  %v7990_v5 = vld [vmem:[#allocation2 + $0xa8] sm:$0xff]  }
 0x1d8   : > { %v1324_v39 = vrot.slane %v1323_v24, 4  ;;  %7145 = vmatprep.mubr.bf16.mxu0 %v6530_v28  ;;  %v1338_v43 = vrot.slane %v1336_v26, 5  ;;  %v1343_v31 = vrot.slane %v1341_v27, 4  ;;  %v1333_v56 = vor.u32 %v1332_v30, %v1328_v40  ;;  %v7987_v61 = vld [vmem:[#allocation2 + $0x9c] sm:$0xff]  }
 0x1d9   : > { %v778_v41 = vrot.slane %v776_v33, 7  ;;  %v771_v34 = vrot.slane %v769_v35, 7  ;;  %v1344_v47 = vshll.u32 %v1097_v17, 16  ;;  %v1350_v49 = vshll.u32 %v8841_v36, 16  ;;  %7301 = vmatprep.mubr.bf16.mxu1 %v7987_v61  ;;  %v8864_v22 = vld [vmem:[#allocation2 + $0x7c] sm:$0xf] }
 0x1da   : > { %v1329_v44 = vsel %vm8649_vm2, %v1324_v39, %v1328_v40  ;;  %7324 = vmatpush3.bf16.msra.mxu1 %v7997_v19  ;;  %v1334_v60 = vrot.slane %v1333_v56, 4  ;;  %v1354_v7 = vshrl.u32 %v8841_v36, 16  ;;  %v1360_v42 = vshll.u32 %v1137_v62, 16  ;;  %v8872_v56 = vld [vmem:[#allocation2 + $0x88] sm:$0xf] }
 0x1db   : > { %v781_v50 = vor.u32 %v779_v29, %v778_v41  ;;  %v848_v52 = vsel %vm8673_vm5, %v778_v41, 0  ;;  %v774_v54 = vor.u32 %v772_v38, %v771_v34  ;;  %v847_v55 = vsel %vm8673_vm5, %v771_v34, 0  ;;  %7357 = vmatprep.subr.bf16.mxu1 %v8843_v37  ;;  %7302 = vmatmul.mubr.bf16.gmra.mrb[8].mxu1 %v7990_v5  ;;  %v1139_v29 = vld [vmem:[#allocation2 + $0x80] sm:$0x1]  ;;  %v1103_v41 = vld [vmem:[#allocation2 + $0x84] sm:$0xf] }
 0x1dc   : > { %v6523_v57 = vcombine.low %v848_v52, %v848_v52  ;;  %v6520_v58 = vcombine.low %v847_v55, %v847_v55  ;;  %v1346_v1 = vrot.slane %v1344_v47, 5  ;;  %v1352_v6 = vrot.slane %v1350_v49, 5  ;;  %v1140_v52 = vld [vmem:[#allocation2 + $0x8c] sm:$0x1] }
 0x1dd   : > { %v832_v2 = vsel %vm8673_vm5, 0, %v781_v50  ;;  %v831_v3 = vsel %vm8673_vm5, 0, %v774_v54  ;;  %v1339_v14 = vsel %vm8649_vm2, %v1334_v60, %v1338_v43  ;;  %v1356_v16 = vrot.slane %v1354_v7, 4  ;;  %v1105_v54 = vld [vmem:[#allocation2 + $0x90] sm:$0xf] }
 0x1de   : > { %v6521_v8 = vcombine.low %v832_v2, %v832_v2  ;;  %v6522_v9 = vcombine.high %v832_v2, %v832_v2  ;;  %1080 = vst [vmem:[#allocation2 + $0xc8] sm:$0x1] %v6523_v57  ;;  %v6518_v10 = vcombine.low %v831_v3, %v831_v3  ;;  %v6519_v13 = vcombine.high %v831_v3, %v831_v3  ;;  %v1106_v60 = vld [vmem:[#allocation2 + $0x94] sm:$0xf] }
 0x1df   : > { %1077 = vst [vmem:[#allocation2 + $0xbc] sm:$0x1] %v6520_v58  ;;  %v1347_v15 = vor.u32 %v1346_v1, %v1343_v31  ;;  %v6531_v12 = vcombine.low %v1329_v44, %v1339_v14  ;;  %v1365_v17 = vshrl.u32 %v1099_v46, 16  ;;  %v1368_v45 = vshll.u32 %v1099_v46, 16 }
 0x1e0   : > { %1078 = vst [vmem:[#allocation2 + $0xc0] sm:$0xf] %v6521_v8  ;;  %1079 = vst [vmem:[#allocation2 + $0xc4] sm:$0xf] %v6522_v9  ;;  %v1374_v32 = vshll.u32 %v8858_v4, 16  ;;  %v1357_v19 = vor.u32 %v1356_v16, %v1352_v6  ;;  %v1362_v20 = vrot.slane %v1360_v42, 5 }
 0x1e1   : > { %1075 = vst [vmem:[#allocation2 + $0xb4] sm:$0xf] %v6518_v10  ;;  %1076 = vst [vmem:[#allocation2 + $0xb8] sm:$0xf] %v6519_v13  ;;  %v1348_v59 = vrot.slane %v1347_v15, 4  ;;  %v1378_v21 = vshrl.u32 %v8858_v4, 16  ;;  %7146 = vmatmul.mubr.bf16.gmra.mrb[44].mxu0 %v6531_v12 }
 0x1e2   : > { %v1367_v23 = vrot.slane %v1365_v17, 4  ;;  %v1370_v25 = vrot.slane %v1368_v45, 5  ;;  %v1376_v24 = vrot.slane %v1374_v32, 5  ;;  %v1384_v26 = vshll.u32 %v1138_v51, 16 }
 0x1e3   : > { %v1353_v27 = vsel %vm8649_vm2, %v1348_v59, %v1352_v6  ;;  %v1358_v28 = vrot.slane %v1357_v19, 4  ;;  %v1380_v33 = vrot.slane %v1378_v21, 4  ;;  %v1389_v35 = vshrl.u32 %v1101_v53, 16 }
 0x1e4   : > { %v1371_v38 = vor.u32 %v1370_v25, %v1367_v23  ;;  %v1386_v39 = vrot.slane %v1384_v26, 5  ;;  %v1392_v40 = vshll.u32 %v1101_v53, 16  ;;  %v1398_v30 = vshll.u32 %v8864_v22, 16  ;;  %v1141_v53 = vld [vmem:[#allocation2 + $0x98] sm:$0x1] }
 0x1e5   : > { %v1363_v34 = vsel %vm8649_vm2, %v1358_v28, %v1362_v20  ;;  %v1381_v43 = vor.u32 %v1380_v33, %v1376_v24  ;;  %v1391_v31 = vrot.slane %v1389_v35, 4  ;;  %v1402_v44 = vshrl.u32 %v8864_v22, 16  ;;  %v1107_v20 = vld [vmem:[#allocation2 + $0x9c] sm:$0xf]  ;;  %v1108_v26 = vld [vmem:[#allocation2 + $0xa0] sm:$0xf] }
 0x1e6   : > { %v6532_v47 = vcombine.low %v1353_v27, %v1363_v34  ;;  %v1372_v49 = vrot.slane %v1371_v38, 4  ;;  %v1394_v61 = vrot.slane %v1392_v40, 5  ;;  %v1400_v50 = vrot.slane %v1398_v30, 5  ;;  %v1142_v34 = vld [vmem:[#allocation2 + $0xa4] sm:$0x1] }
 0x1e7   : > { %v1382_v55 = vrot.slane %v1381_v43, 4  ;;  %v1404_v5 = vrot.slane %v1402_v44, 4  ;;  %v1408_v57 = vshll.u32 %v1139_v29, 16  ;;  %v1413_v58 = vshrl.u32 %v1103_v41, 16  ;;  %v7996_v6 = vld [vmem:[#allocation2 + $0xc0] sm:$0xff]  }
 0x1e8   : > { %7149 = vmatprep.mubr.bf16.mxu0 %v6532_v47  ;;  %v1377_v62 = vsel %vm8649_vm2, %v1372_v49, %v1376_v24  ;;  %v1395_v1 = vor.u32 %v1394_v61, %v1391_v31  ;;  %v1416_v46 = vshll.u32 %v1103_v41, 16  ;;  %v1422_v2 = vshll.u32 %v8872_v56, 16  ;;  %v7993_v3 = vld [vmem:[#allocation2 + $0xb4] sm:$0xff]   ;;  %v1109_v44 = vld [vmem:[#allocation2 + $0xa8] sm:$0xf] }
 0x1e9   : > { %v1387_v7 = vsel %vm8649_vm2, %v1382_v55, %v1386_v39  ;;  %v1405_v8 = vor.u32 %v1404_v5, %v1400_v50  ;;  %v1410_v9 = vrot.slane %v1408_v57, 5  ;;  %v1415_v10 = vrot.slane %v1413_v58, 4  ;;  %7305 = vmatprep.mubr.bf16.mxu1 %v7993_v3 }
 0x1ea   : > { %v6533_v13 = vcombine.low %v1377_v62, %v1387_v7  ;;  %v1396_v14 = vrot.slane %v1395_v1, 4  ;;  %v1418_v15 = vrot.slane %v1416_v46, 5  ;;  %v1424_v16 = vrot.slane %v1422_v2, 5  ;;  %7306 = vmatmul.mubr.bf16.gmra.mrb[12].mxu1 %v7996_v6  ;;  %v8888_v62 = vld [vmem:[#allocation2 + $0xac] sm:$0xf] }
 0x1eb   : > { %v1406_v42 = vrot.slane %v1405_v8, 4  ;;  %v1426_v51 = vshrl.u32 %v8872_v56, 16  ;;  %v1432_v12 = vshll.u32 %v1140_v52, 16  ;;  %v1437_v17 = vshrl.u32 %v1105_v54, 16  ;;  %v1143_v7 = vld [vmem:[#allocation2 + $0xb0] sm:$0x1] }
 0x1ec   : > { %7150 = vmatmul.mubr.bf16.gmra.mrb[48].mxu0 %v6533_v13  ;;  %v1401_v45 = vsel %vm8649_vm2, %v1396_v14, %v1400_v50  ;;  %v1419_v32 = vor.u32 %v1418_v15, %v1415_v10  ;;  %v1440_v59 = vshll.u32 %v1105_v54, 16  ;;  %v1446_v19 = vshll.u32 %v1106_v60, 16  ;;  %v2998_v8 = vld [vmem:[#allocation2 + $0xc] sm:$0xf] }
 0x1ed   : > { %v1411_v21 = vsel %vm8649_vm2, %v1406_v42, %v1410_v9  ;;  %v1428_v23 = vrot.slane %v1426_v51, 4  ;;  %v1434_v25 = vrot.slane %v1432_v12, 5  ;;  %v1439_v24 = vrot.slane %v1437_v17, 4  ;;  %v8894_v12 = vld [vmem:[#allocation2 + $0x14] sm:$0x1] }
 0x1ee   : > { %v6534_v27 = vcombine.low %v1401_v45, %v1411_v21  ;;  %v1420_v28 = vrot.slane %v1419_v32, 4  ;;  %v1442_v33 = vrot.slane %v1440_v59, 5  ;;  %v1448_v29 = vrot.slane %v1446_v19, 5 }
 0x1ef   : > { %v1429_v35 = vor.u32 %v1428_v23, %v1424_v16  ;;  %v1450_v38 = vshrl.u32 %v1106_v60, 16  ;;  %v1456_v39 = vshll.u32 %v1141_v53, 16  ;;  %v1461_v40 = vshrl.u32 %v1107_v20, 16  ;;  %v8898_v53 = vld [vmem:[#allocation2 + $0x10] sm:$0xf] }
 0x1f0   : > { %7153 = vmatprep.mubr.bf16.mxu0 %v6534_v27  ;;  %v1425_v30 = vsel %vm8649_vm2, %v1420_v28, %v1424_v16  ;;  %v1443_v41 = vor.u32 %v1442_v33, %v1439_v24  ;;  %v1464_v43 = vshll.u32 %v1107_v20, 16  ;;  %v1470_v31 = vshll.u32 %v1108_v26, 16  ;;  %v8902_v28 = vld [vmem:[#allocation2 + $0xb4] sm:$0xf] }
 0x1f1   : > { %v1430_v47 = vrot.slane %v1429_v35, 4  ;;  %v1452_v49 = vrot.slane %v1450_v38, 4  ;;  %v1458_v61 = vrot.slane %v1456_v39, 5  ;;  %v1463_v50 = vrot.slane %v1461_v40, 4  ;;  %v8908_v39 = vld [vmem:[#allocation2 + $0xb8] sm:$0xf] }
 0x1f2   : > { %v1444_v52 = vrot.slane %v1443_v41, 4  ;;  %v1466_v54 = vrot.slane %v1464_v43, 5  ;;  %v1472_v55 = vrot.slane %v1470_v31, 5  ;;  %v1474_v5 = vshrl.u32 %v1108_v26, 16  ;;  %v1144_v40 = vld [vmem:[#allocation2 + $0xbc] sm:$0x1] }
 0x1f3   : > { %v1435_v57 = vsel %vm8649_vm2, %v1430_v47, %v1434_v25  ;;  %v1453_v58 = vor.u32 %v1452_v49, %v1448_v29  ;;  %v1480_v60 = vshll.u32 %v1142_v34, 16  ;;  %v1485_v1 = vshrl.u32 %v1109_v44, 16 }
 0x1f4   : > { %v6535_v46 = vcombine.low %v1425_v30, %v1435_v57  ;;  %v1449_v2 = vsel %vm8649_vm2, %v1444_v52, %v1448_v29  ;;  %v1467_v3 = vor.u32 %v1466_v54, %v1463_v50  ;;  %v1476_v6 = vrot.slane %v1474_v5, 4 }
 0x1f5   : > { %v1454_v9 = vrot.slane %v1453_v58, 4  ;;  %v1482_v10 = vrot.slane %v1480_v60, 5  ;;  %v1487_v13 = vrot.slane %v1485_v1, 4  ;;  %v1488_v14 = vshll.u32 %v1109_v44, 16  ;;  %v3001_v60 = vld [vmem:[#allocation2 + $0x18] sm:$0xf] }
 0x1f6   : > { %7154 = vmatmul.mubr.bf16.gmra.mrb[52].mxu0 %v6535_v46  ;;  %v1468_v15 = vrot.slane %v1467_v3, 4  ;;  %v1477_v16 = vor.u32 %v1476_v6, %v1472_v55  ;;  %v1494_v42 = vshll.u32 %v8888_v62, 16  ;;  %v1498_v51 = vshrl.u32 %v8888_v62, 16  ;;  %v8916_v1 = vld [vmem:[#allocation2 + $0x1c] sm:$0xf] }
 0x1f7   : > { %v1459_v17 = vsel %vm8649_vm2, %v1454_v9, %v1458_v61  ;;  %v1490_v45 = vrot.slane %v1488_v14, 5  ;;  %v1504_v32 = vshll.u32 %v1143_v7, 16  ;;  %v3047_v59 = vshrl.u32 %v2998_v8, 16  ;;  %v8921_v7 = vld [vmem:[#allocation2 + $0x20] sm:$0x1] }
 0x1f8   : > { %v6536_v19 = vcombine.low %v1449_v2, %v1459_v17  ;;  %v1473_v20 = vsel %vm8649_vm2, %v1468_v15, %v1472_v55  ;;  %v1478_v21 = vrot.slane %v1477_v16, 4  ;;  %v1496_v23 = vrot.slane %v1494_v42, 5 }
 0x1f9   : > { %v1491_v25 = vor.u32 %v1490_v45, %v1487_v13  ;;  %v1500_v24 = vrot.slane %v1498_v51, 4  ;;  %v1506_v26 = vrot.slane %v1504_v32, 5  ;;  %v3049_v27 = vrot.slane %v3047_v59, 4  ;;  %v3004_v51 = vld [vmem:[#allocation2 + $0x24] sm:$0xf] }
 0x1fa   : > { %7157 = vmatprep.mubr.bf16.mxu0 %v6536_v19  ;;  %v1483_v33 = vsel %vm8649_vm2, %v1478_v21, %v1482_v10  ;;  %v3050_v29 = vshll.u32 %v2998_v8, 16  ;;  %v3056_v35 = vshll.u32 %v8898_v53, 16  ;;  %v3060_v38 = vshrl.u32 %v8898_v53, 16  ;;  %v8928_v19 = vld [vmem:[#allocation2 + $0x28] sm:$0xf] }
 0x1fb   : > { %v6537_v30 = vcombine.low %v1473_v20, %v1483_v33  ;;  %v1492_v41 = vrot.slane %v1491_v25, 4  ;;  %v1501_v34 = vor.u32 %v1500_v24, %v1496_v23  ;;  %v3066_v43 = vshll.u32 %v8894_v12, 16 }
 0x1fc   : > { %v3052_v31 = vrot.slane %v3050_v29, 5  ;;  %v3058_v44 = vrot.slane %v3056_v35, 5  ;;  %v3062_v47 = vrot.slane %v3060_v38, 4  ;;  %v1509_v49 = vshrl.u32 %v8902_v28, 16  ;;  %v8932_v29 = vld [vmem:[#allocation2 + $0x2c] sm:$0x1] }
 0x1fd   : > { %v1497_v61 = vsel %vm8649_vm2, %v1492_v41, %v1496_v23  ;;  %v1502_v50 = vrot.slane %v1501_v34, 4  ;;  %v3068_v52 = vrot.slane %v3066_v43, 5  ;;  %v1512_v54 = vshll.u32 %v8902_v28, 16  ;;  %v3007_v41 = vld [vmem:[#allocation2 + $0x30] sm:$0xf] }
 0x1fe   : > { %7158 = vmatmul.mubr.bf16.gmra.mrb[56].mxu0 %v6537_v30  ;;  %v3053_v55 = vor.u32 %v3052_v31, %v3049_v27  ;;  %v3063_v5 = vor.u32 %v3062_v47, %v3058_v44  ;;  %v1511_v57 = vrot.slane %v1509_v49, 4  ;;  %v1518_v58 = vshll.u32 %v8908_v39, 16  ;;  %v8937_v47 = vld [vmem:[#allocation2 + $0x34] sm:$0xf] }
 0x1ff   : > { %v1507_v46 = vsel %vm8649_vm2, %v1502_v50, %v1506_v26  ;;  %v1514_v2 = vrot.slane %v1512_v54, 5  ;;  %v1522_v3 = vshrl.u32 %v8908_v39, 16  ;;  %v1528_v6 = vshll.u32 %v1144_v40, 16 }
 0x200   : > { %v6538_v8 = vcombine.low %v1497_v61, %v1507_v46  ;;  %v3054_v9 = vrot.slane %v3053_v55, 4  ;;  %v3064_v10 = vrot.slane %v3063_v5, 4  ;;  %v1520_v13 = vrot.slane %v1518_v58, 5 }
 0x201   : > { %v1515_v14 = vor.u32 %v1514_v2, %v1511_v57  ;;  %v1524_v15 = vrot.slane %v1522_v3, 4  ;;  %v1530_v16 = vrot.slane %v1528_v6, 5  ;;  %v3071_v42 = vshrl.u32 %v3001_v60, 16  ;;  %v8089_v2 = vld [vmem:[#allocation2 + $0xc] sm:$0xf] }
 0x202   : > { %7161 = vmatprep.mubr.bf16.mxu0 %v6538_v8  ;;  %v3059_v17 = vsel %vm8649_vm2, %v3054_v9, %v3058_v44  ;;  %v3069_v45 = vsel %vm8649_vm2, %v3064_v10, %v3068_v52  ;;  %v3074_v32 = vshll.u32 %v3001_v60, 16  ;;  %v3080_v59 = vshll.u32 %v8916_v1, 16  ;;  %v8943_v3 = vld [vmem:[#allocation2 + $0x10] sm:$0xf]  ;;  %v8946_v8 = vld [vmem:[#allocation2 + $0x38] sm:$0x1] }
 0x203   : > { %v6636_v20 = vcombine.low %v3059_v17, %v3069_v45  ;;  %v1516_v21 = vrot.slane %v1515_v14, 4  ;;  %v1525_v23 = vor.u32 %v1524_v15, %v1520_v13  ;;  %v3073_v25 = vrot.slane %v3071_v42, 4  ;;  %v3010_v15 = vld [vmem:[#allocation2 + $0x3c] sm:$0xf] }
 0x204   : > { %v3076_v24 = vrot.slane %v3074_v32, 5  ;;  %v3082_v26 = vrot.slane %v3080_v59, 5  ;;  %v3084_v27 = vshrl.u32 %v8916_v1, 16  ;;  %v3090_v33 = vshll.u32 %v8921_v7, 16  ;;  %v8003_v59 = vld [vmem:[#allocation8 + $0x148] sm:$0xff]  }
 0x205   : > { %7325 = vmatprep.mubr.bf16.mxu1 %v6636_v20  ;;  %v1521_v35 = vsel %vm8649_vm2, %v1516_v21, %v1520_v13  ;;  %v1526_v38 = vrot.slane %v1525_v23, 4  ;;  %v3095_v40 = vshrl.u32 %v3004_v51, 16  ;;  %v3098_v30 = vshll.u32 %v3004_v51, 16 }
 0x206   : > { %v3077_v34 = vor.u32 %v3076_v24, %v3073_v25  ;;  %v3086_v43 = vrot.slane %v3084_v27, 4  ;;  %v3092_v31 = vrot.slane %v3090_v33, 5  ;;  %v3104_v44 = vshll.u32 %v8928_v19, 16  ;;  %v8961_v33 = vld [vmem:[#allocation2 + $0x44] sm:$0x1] }
 0x207   : > { %v1531_v49 = vsel %vm8649_vm2, %v1526_v38, %v1530_v16  ;;  %v3097_v61 = vrot.slane %v3095_v40, 4  ;;  %v3100_v50 = vrot.slane %v3098_v30, 5  ;;  %v3108_v52 = vshrl.u32 %v8928_v19, 16  ;;  %v8950_v16 = vld [vmem:[#allocation2 + $0x40] sm:$0xf] }
 0x208   : > { %v6539_v54 = vcombine.low %v1521_v35, %v1531_v49  ;;  %v3078_v55 = vrot.slane %v3077_v34, 4  ;;  %v3087_v5 = vor.u32 %v3086_v43, %v3082_v26  ;;  %v3106_v57 = vrot.slane %v3104_v44, 5  ;;  %v8091_v35 = vld [vmem:[#allocation2 + $0x18] sm:$0xf]  ;;  %v8964_v38 = vld [vmem:[#allocation2 + $0x1c] sm:$0xf] }
 0x209   : > { %v3101_v58 = vor.u32 %v3100_v50, %v3097_v61  ;;  %v3110_v60 = vrot.slane %v3108_v52, 4  ;;  %v3114_v46 = vshll.u32 %v8932_v29, 16  ;;  %v6549_v6 = vcombine.low %v8089_v2, %v8943_v3  ;;  %v3013_v30 = vld [vmem:[#allocation2 + $0x48] sm:$0xf]  ;;  %v8970_v49 = vld [vmem:[#allocation2 + $0x4c] sm:$0xf] }
 0x20a   : > { %7162 = vmatmul.mubr.bf16.gmra.mrb[60].mxu0 %v6539_v54  ;;  %v3083_v9 = vsel %vm8649_vm2, %v3078_v55, %v3082_v26  ;;  %v3088_v10 = vrot.slane %v3087_v5, 4  ;;  %v3119_v13 = vshrl.u32 %v3007_v41, 16  ;;  %v3122_v14 = vshll.u32 %v3007_v41, 16  ;;  %v8006_v44 = vld [vmem:[#allocation8 + $0x150] sm:$0xff]   ;;  %v8019_v61 = vld [vmem:[#allocation8 + $0x88] sm:$0xff]  }
 0x20b   : > { %v3102_v42 = vrot.slane %v3101_v58, 4  ;;  %v3111_v51 = vor.u32 %v3110_v60, %v3106_v57  ;;  %v3116_v17 = vrot.slane %v3114_v46, 5  ;;  %7181 = vmatprep.mubr.bf16.mxu0 %v6548_v48  ;;  %v3128_v45 = vshll.u32 %v8937_v47, 16  ;;  %v8974_v46 = vld [vmem:[#allocation2 + $0x50] sm:$0x1] }
 0x20c   : > { %v3093_v32 = vsel %vm8649_vm2, %v3088_v10, %v3092_v31  ;;  %v3121_v20 = vrot.slane %v3119_v13, 4  ;;  %v3124_v21 = vrot.slane %v3122_v14, 5  ;;  %v3132_v23 = vshrl.u32 %v8937_v47, 16  ;;  %v8093_v10 = vld [vmem:[#allocation2 + $0x24] sm:$0xf] }
 0x20d   : > { %v6637_v25 = vcombine.low %v3083_v9, %v3093_v32  ;;  %v3107_v24 = vsel %vm8649_vm2, %v3102_v42, %v3106_v57  ;;  %v3112_v26 = vrot.slane %v3111_v51, 4  ;;  %v3130_v27 = vrot.slane %v3128_v45, 5  ;;  %v8979_v13 = vld [vmem:[#allocation2 + $0x28] sm:$0xf]  ;;  %v8982_v32 = vld [vmem:[#allocation8 + $0x158] sm:$0xff]  }
 0x20e   : > { %v3125_v63 = vor.u32 %v3124_v21, %v3121_v20  ;;  %v3134_v0 = vrot.slane %v3132_v23, 4  ;;  %v3138_v48 = vshll.u32 %v8946_v8, 16  ;;  %v6550_v40 = vcombine.low %v8091_v35, %v8964_v38 }
 0x20f   : > { %7326 = vmatmul.mubr.bf16.vlgmr.msra.gmra.mrb[16].mxu1 %v6637_v25  ;;  %v3117_v41 = vsel %vm8649_vm2, %v3112_v26, %v3116_v17  ;;  %v3143_v34 = vshrl.u32 %v3010_v15, 16  ;;  %v3146_v43 = vshll.u32 %v3010_v15, 16  ;;  %v3152_v31 = vshll.u32 %v8950_v16, 16  ;;  %v3016_v15 = vld [vmem:[#allocation2 + $0x54] sm:$0xf] }
 0x210   : > { %7358 = vmatpush3.bf16.msra.mxu1 %v8843_v37  ;;  %v6638_v50 = vcombine.low %v3107_v24, %v3117_v41  ;;  %v3126_v52 = vrot.slane %v3125_v63, 4  ;;  %v3135_v54 = vor.u32 %v3134_v0, %v3130_v27  ;;  %v3140_v55 = vrot.slane %v3138_v48, 5  ;;  %v8989_v25 = vld [vmem:[#allocation2 + $0x58] sm:$0xf]  ;;  %v8022_v24 = vld [vmem:[#allocation8 + $0x90] sm:$0xff]  }
 0x211   : > { %7359 = vmatprep.subr.bf16.mxu1 %v8003_v59  ;;  %v3145_v5 = vrot.slane %v3143_v34, 4  ;;  %v3148_v57 = vrot.slane %v3146_v43, 5  ;;  %v3154_v58 = vrot.slane %v3152_v31, 5  ;;  %v3156_v60 = vshrl.u32 %v8950_v16, 16  ;;  %v8095_v34 = vld [vmem:[#allocation2 + $0x30] sm:$0xf] }
 0x212   : > { %7329 = vmatprep.mubr.bf16.mxu1 %v6638_v50  ;;  %7182 = vmatmul.mubr.bf16.vlgmr.msra.gmra.mrb[32].mxu0 %v6549_v6  ;;  %v3131_v2 = vsel %vm8649_vm2, %v3126_v52, %v3130_v27  ;;  %v3136_v9 = vrot.slane %v3135_v54, 4  ;;  %v3162_v37 = vshll.u32 %v8961_v33, 16  ;;  %v6551_v14 = vcombine.low %v8093_v10, %v8979_v13  ;;  %v8996_v43 = vld [vmem:[#allocation2 + $0x34] sm:$0xf]  ;;  %v3019_v52 = vld [vmem:[#allocation2 + $0x60] sm:$0xf] }
 0x213   : > { %7185 = vmatprep.mubr.bf16.mxu0 %v6550_v40  ;;  %v3149_v42 = vor.u32 %v3148_v57, %v3145_v5  ;;  %v3158_v51 = vrot.slane %v3156_v60, 4  ;;  %v3167_v17 = vshrl.u32 %v3013_v30, 16  ;;  %v3170_v45 = vshll.u32 %v3013_v30, 16  ;;  %7214 = vmatpush3.bf16.msra.mxu0 %v8826_v11  ;;  %v8999_v54 = vld [vmem:[#allocation8 + $0x160] sm:$0xff]   ;;  %v9006_v10 = vld [vmem:[#allocation2 + $0x64] sm:$0xf] }
 0x214   : > { %v3141_v6 = vsel %vm8649_vm2, %v3136_v9, %v3140_v55  ;;  %7360 = vmatpush3.bf16.msra.mxu1 %v8003_v59  ;;  %v3164_v20 = vrot.slane %v3162_v37, 5  ;;  %v3176_v21 = vshll.u32 %v8970_v49, 16  ;;  %v3180_v23 = vshrl.u32 %v8970_v49, 16  ;;  %7215 = vmatprep.subr.bf16.mxu0 %v8019_v61  ;;  %v8992_v59 = vld [vmem:[#allocation2 + $0x5c] sm:$0x1] }
 0x215   : > { %v6639_v26 = vcombine.low %v3131_v2, %v3141_v6  ;;  %v3150_v27 = vrot.slane %v3149_v42, 4  ;;  %v3159_v63 = vor.u32 %v3158_v51, %v3154_v58  ;;  %7361 = vmatprep.subr.bf16.mxu1 %v8006_v44  ;;  %v3169_v0 = vrot.slane %v3167_v17, 4  ;;  %v8024_v42 = vld [vmem:[#allocation8 + $0x98] sm:$0xff]  }
 0x216   : > { %v3172_v48 = vrot.slane %v3170_v45, 5  ;;  %v3178_v11 = vrot.slane %v3176_v21, 5  ;;  %v3182_v35 = vrot.slane %v3180_v23, 4  ;;  %v3186_v40 = vshll.u32 %v8974_v46, 16  ;;  %v8097_v21 = vld [vmem:[#allocation2 + $0x3c] sm:$0xf] }
 0x217   : > { %7330 = vmatmul.mubr.bf16.gmra.mrb[20].mxu1 %v6639_v26  ;;  %v3155_v30 = vsel %vm8649_vm2, %v3150_v27, %v3154_v58  ;;  %v3160_v41 = vrot.slane %v3159_v63, 4  ;;  %v6552_v31 = vcombine.low %v8095_v34, %v8996_v43  ;;  %v3191_v50 = vshrl.u32 %v3016_v15, 16  ;;  %7216 = vmatpush3.bf16.msra.mxu0 %v8019_v61  ;;  %v9011_v23 = vld [vmem:[#allocation2 + $0x40] sm:$0xf]  ;;  %v3022_v27 = vld [vmem:[#allocation2 + $0x6c] sm:$0xf] }
 0x218   : > { %v3173_v55 = vor.u32 %v3172_v48, %v3169_v0  ;;  %v3183_v5 = vor.u32 %v3182_v35, %v3178_v11  ;;  %v3188_v57 = vrot.slane %v3186_v40, 5  ;;  %7362 = vmatpush3.bf16.msra.mxu1 %v8006_v44  ;;  %v3194_v60 = vshll.u32 %v3016_v15, 16  ;;  %7217 = vmatprep.subr.bf16.mxu0 %v8022_v24  ;;  %v9008_v15 = vld [vmem:[#allocation2 + $0x68] sm:$0x1]  ;;  %v8015_v63 = vld [vmem:[#allocation8 + $0x168] sm:$0xff]   ;;  %v8027_v40 = vld [vmem:[#allocation8 + $0xa0] sm:$0xff]  }
 0x219   : > { %v3165_v58 = vsel %vm8649_vm2, %v3160_v41, %v3164_v20  ;;  %v3193_v2 = vrot.slane %v3191_v50, 4  ;;  %v3200_v9 = vshll.u32 %v8989_v25, 16  ;;  %v3204_v37 = vshrl.u32 %v8989_v25, 16  ;;  %7363 = vmatprep.subr.bf16.mxu1 %v8982_v32  ;;  %v9019_v50 = vld [vmem:[#allocation2 + $0x70] sm:$0xf] }
 0x21a   : > { %v6640_v61 = vcombine.low %v3155_v30, %v3165_v58  ;;  %7186 = vmatmul.mubr.bf16.gmra.mrb[36].mxu0 %v6551_v14  ;;  %v3174_v51 = vrot.slane %v3173_v55, 4  ;;  %v3184_v17 = vrot.slane %v3183_v5, 4  ;;  %v3196_v44 = vrot.slane %v3194_v60, 5 }
 0x21b   : > { %7189 = vmatprep.mubr.bf16.mxu0 %v6552_v31  ;;  %v3202_v45 = vrot.slane %v3200_v9, 5  ;;  %v3206_v6 = vrot.slane %v3204_v37, 4  ;;  %v3210_v20 = vshll.u32 %v8992_v59, 16  ;;  %v6553_v26 = vcombine.low %v8097_v21, %v9011_v23  ;;  %7218 = vmatpush3.bf16.msra.mxu0 %v8022_v24  ;;  %v3025_v37 = vld [vmem:[#allocation2 + $0x78] sm:$0xf] }
 0x21c   : > { %7333 = vmatprep.mubr.bf16.mxu1 %v6640_v61  ;;  %v3179_v14 = vsel %vm8649_vm2, %v3174_v51, %v3178_v11  ;;  %v3189_v0 = vsel %vm8649_vm2, %v3184_v17, %v3188_v57  ;;  %v3197_v48 = vor.u32 %v3196_v44, %v3193_v2  ;;  %v3215_v35 = vshrl.u32 %v3019_v52, 16  ;;  %7364 = vmatpush3.bf16.msra.mxu1 %v8982_v32  ;;  %v9024_v57 = vld [vmem:[#allocation2 + $0x74] sm:$0x1]  ;;  %v8099_v2 = vld [vmem:[#allocation2 + $0x48] sm:$0xf] }
 0x21d   : > { %v6641_v30 = vcombine.low %v3179_v14, %v3189_v0  ;;  %v3207_v41 = vor.u32 %v3206_v6, %v3202_v45  ;;  %v3212_v34 = vrot.slane %v3210_v20, 5  ;;  %v3218_v31 = vshll.u32 %v3019_v52, 16  ;;  %7365 = vmatprep.subr.bf16.mxu1 %v8999_v54  ;;  %7219 = vmatprep.subr.bf16.mxu0 %v8024_v42  ;;  %v9027_v52 = vld [vmem:[#allocation2 + $0x4c] sm:$0xf]  ;;  %v8029_v20 = vld [vmem:[#allocation8 + $0xa8] sm:$0xff]  }
 0x21e   : > { %v3198_v24 = vrot.slane %v3197_v48, 4  ;;  %v3217_v55 = vrot.slane %v3215_v35, 4  ;;  %v3224_v11 = vshll.u32 %v9006_v10, 16  ;;  %v3228_v5 = vshrl.u32 %v9006_v10, 16  ;;  %v8020_v61 = vld [vmem:[#allocation8 + $0x170] sm:$0xff]  }
 0x21f   : > { %7334 = vmatmul.mubr.bf16.gmra.mrb[24].mxu1 %v6641_v30  ;;  %v3208_v32 = vrot.slane %v3207_v41, 4  ;;  %v3220_v60 = vrot.slane %v3218_v31, 5  ;;  %v3234_v58 = vshll.u32 %v9008_v15, 16  ;;  %v6554_v9 = vcombine.low %v8099_v2, %v9027_v52  ;;  %7220 = vmatpush3.bf16.msra.mxu0 %v8024_v42 }
 0x220   : > { %v3203_v51 = vsel %vm8649_vm2, %v3198_v24, %v3202_v45  ;;  %v3226_v17 = vrot.slane %v3224_v11, 5  ;;  %v3230_v44 = vrot.slane %v3228_v5, 4  ;;  %v3239_v6 = vshrl.u32 %v3022_v27, 16  ;;  %7366 = vmatpush3.bf16.msra.mxu1 %v8999_v54  ;;  %7221 = vmatprep.subr.bf16.mxu0 %v8027_v40  ;;  %v9038_v11 = vld [vmem:[#allocation2 + $0x7c] sm:$0xf] }
 0x221   : > { %v3213_v21 = vsel %vm8649_vm2, %v3208_v32, %v3212_v34  ;;  %v3221_v14 = vor.u32 %v3220_v60, %v3217_v55  ;;  %v3236_v0 = vrot.slane %v3234_v58, 5  ;;  %v3242_v48 = vshll.u32 %v3022_v27, 16  ;;  %7367 = vmatprep.subr.bf16.mxu1 %v8015_v63  ;;  %v8101_v55 = vld [vmem:[#allocation2 + $0x54] sm:$0xf]  ;;  %v9040_v5 = vld [vmem:[#allocation2 + $0x58] sm:$0xf] }
 0x222   : > { %v6642_v35 = vcombine.low %v3203_v51, %v3213_v21  ;;  %7190 = vmatmul.mubr.bf16.gmra.mrb[40].mxu0 %v6553_v26  ;;  %v3231_v42 = vor.u32 %v3230_v44, %v3226_v17  ;;  %v3241_v30 = vrot.slane %v3239_v6, 4  ;;  %v3248_v45 = vshll.u32 %v9019_v50, 16  ;;  %v8032_v60 = vld [vmem:[#allocation8 + $0xb0] sm:$0xff]   ;;  %v9045_v44 = vld [vmem:[#allocation2 + $0x80] sm:$0x1] }
 0x223   : > { %v3222_v41 = vrot.slane %v3221_v14, 4  ;;  %7193 = vmatprep.mubr.bf16.mxu0 %v6554_v9  ;;  %v3244_v31 = vrot.slane %v3242_v48, 5  ;;  %v3252_v54 = vshrl.u32 %v9019_v50, 16  ;;  %v3258_v24 = vshll.u32 %v9024_v57, 16  ;;  %7222 = vmatpush3.bf16.msra.mxu0 %v8027_v40  ;;  %v8025_v40 = vld [vmem:[#allocation8 + $0x178] sm:$0xff]  }
 0x224   : > { %7337 = vmatprep.mubr.bf16.mxu1 %v6642_v35  ;;  %v3232_v34 = vrot.slane %v3231_v42, 4  ;;  %v3250_v27 = vrot.slane %v3248_v45, 5  ;;  %v6555_v26 = vcombine.low %v8101_v55, %v9040_v5  ;;  %v3263_v32 = vshrl.u32 %v3025_v37, 16  ;;  %7368 = vmatpush3.bf16.msra.mxu1 %v8015_v63  ;;  %v3028_v63 = vld [vmem:[#allocation2 + $0x84] sm:$0xf] }
 0x225   : > { %v3227_v58 = vsel %vm8649_vm2, %v3222_v41, %v3226_v17  ;;  %v3245_v2 = vor.u32 %v3244_v31, %v3241_v30  ;;  %v3254_v9 = vrot.slane %v3252_v54, 4  ;;  %v3260_v51 = vrot.slane %v3258_v24, 5  ;;  %7369 = vmatprep.subr.bf16.mxu1 %v8020_v61  ;;  %7223 = vmatprep.subr.bf16.mxu0 %v8029_v20  ;;  %v9051_v30 = vld [vmem:[#allocation2 + $0x88] sm:$0xf]  ;;  %v8103_v24 = vld [vmem:[#allocation2 + $0x60] sm:$0xf] }
 0x226   : > { %v3237_v6 = vsel %vm8649_vm2, %v3232_v34, %v3236_v0  ;;  %v3265_v21 = vrot.slane %v3263_v32, 4  ;;  %v3266_v14 = vshll.u32 %v3025_v37, 16  ;;  %v3272_v48 = vshll.u32 %v9038_v11, 16  ;;  %v8033_v37 = vld [vmem:[#allocation8 + $0xb8] sm:$0xff]  }
 0x227   : > { %v6643_v35 = vcombine.low %v3227_v58, %v3237_v6  ;;  %v3246_v42 = vrot.slane %v3245_v2, 4  ;;  %v3255_v45 = vor.u32 %v3254_v9, %v3250_v27  ;;  %v3276_v17 = vshrl.u32 %v9038_v11, 16  ;;  %7224 = vmatpush3.bf16.msra.mxu0 %v8029_v20  ;;  %v9057_v2 = vld [vmem:[#allocation8 + $0x180] sm:$0xff]   ;;  %v9059_v6 = vld [vmem:[#allocation2 + $0x8c] sm:$0x1] }
 0x228   : > { %v3268_v41 = vrot.slane %v3266_v14, 5  ;;  %v3274_v31 = vrot.slane %v3272_v48, 5  ;;  %v3282_v54 = vshll.u32 %v9045_v44, 16  ;;  %v6556_v0 = vcombine.low %v8103_v24, %v8841_v36  ;;  %7370 = vmatpush3.bf16.msra.mxu1 %v8020_v61  ;;  %7225 = vmatprep.subr.bf16.mxu0 %v8032_v60 }
 0x229   : > { %7338 = vmatmul.mubr.bf16.gmra.mrb[28].mxu1 %v6643_v35  ;;  %v3251_v34 = vsel %vm8649_vm2, %v3246_v42, %v3250_v27  ;;  %v3256_v55 = vrot.slane %v3255_v45, 4  ;;  %v3278_v32 = vrot.slane %v3276_v17, 4  ;;  %v3287_v58 = vshrl.u32 %v3028_v63, 16  ;;  %7371 = vmatprep.subr.bf16.mxu1 %v8025_v40  ;;  %v3031_v42 = vld [vmem:[#allocation2 + $0x90] sm:$0xf] }
 0x22a   : > { %7194 = vmatmul.mubr.bf16.gmra.mrb[44].mxu0 %v6555_v26  ;;  %v3269_v20 = vor.u32 %v3268_v41, %v3265_v21  ;;  %v3284_v9 = vrot.slane %v3282_v54, 5  ;;  %v3290_v14 = vshll.u32 %v3028_v63, 16  ;;  %v3296_v36 = vshll.u32 %v9051_v30, 16  ;;  %v9065_v41 = vld [vmem:[#allocation2 + $0x94] sm:$0xf] }
 0x22b   : > { %v3261_v61 = vsel %vm8649_vm2, %v3256_v55, %v3260_v51  ;;  %v3279_v48 = vor.u32 %v3278_v32, %v3274_v31  ;;  %7197 = vmatprep.mubr.bf16.mxu0 %v6556_v0  ;;  %v3289_v27 = vrot.slane %v3287_v58, 4  ;;  %v3300_v35 = vshrl.u32 %v9051_v30, 16  ;;  %7226 = vmatpush3.bf16.msra.mxu0 %v8032_v60  ;;  %v8104_v51 = vld [vmem:[#allocation2 + $0x6c] sm:$0xf]  ;;  %v9072_v55 = vld [vmem:[#allocation2 + $0x98] sm:$0x1] }
 0x22c   : > { %v6644_v45 = vcombine.low %v3251_v34, %v3261_v61  ;;  %v3270_v17 = vrot.slane %v3269_v20, 4  ;;  %v3292_v26 = vrot.slane %v3290_v14, 5  ;;  %v3298_v21 = vrot.slane %v3296_v36, 5  ;;  %7372 = vmatpush3.bf16.msra.mxu1 %v8025_v40  ;;  %7227 = vmatprep.subr.bf16.mxu0 %v8033_v37  ;;  %10215 = vst [vmem:[#allocation17_spill] sm:$0xff] %v9072_v55  ;;  %v3034_v61 = vld [vmem:[#allocation2 + $0x9c] sm:$0xf] }
 0x22d   : > { %v3280_v63 = vrot.slane %v3279_v48, 4  ;;  %v3302_v54 = vrot.slane %v3300_v35, 4  ;;  %v3306_v24 = vshll.u32 %v9059_v6, 16  ;;  %v6557_v0 = vcombine.low %v8104_v51, %v8858_v4  ;;  %7405 = vmatprep.subr.bf16.mxu1 %v9057_v2  ;;  %v9077_v51 = vld [vmem:[#allocation8 + $0xc0] sm:$0xff]  }
 0x22e   : > { %7341 = vmatprep.mubr.bf16.mxu1 %v6644_v45  ;;  %v3275_v60 = vsel %vm8649_vm2, %v3270_v17, %v3274_v31  ;;  %v3293_v34 = vor.u32 %v3292_v26, %v3289_v27  ;;  %v3311_v32 = vshrl.u32 %v3031_v42, 16  ;;  %v3314_v58 = vshll.u32 %v3031_v42, 16  ;;  %v9082_v17 = vld [vmem:[#allocation2 + $0xa0] sm:$0xf] }
 0x22f   : > { %v3285_v40 = vsel %vm8649_vm2, %v3280_v63, %v3284_v9  ;;  %v3303_v20 = vor.u32 %v3302_v54, %v3298_v21  ;;  %v3308_v14 = vrot.slane %v3306_v24, 5  ;;  %v3320_v36 = vshll.u32 %v9065_v41, 16  ;;  %7228 = vmatpush3.bf16.msra.mxu0 %v8033_v37  ;;  %v8106_v63 = vld [vmem:[#allocation2 + $0x78] sm:$0xf]  ;;  %v9087_v24 = vld [vmem:[#allocation2 + $0xa4] sm:$0x1] }
 0x230   : > { %v6645_v4 = vcombine.low %v3275_v60, %v3285_v40  ;;  %v3294_v48 = vrot.slane %v3293_v34, 4  ;;  %v3313_v35 = vrot.slane %v3311_v32, 4  ;;  %v3316_v45 = vrot.slane %v3314_v58, 5  ;;  %7261 = vmatprep.subr.bf16.mxu0 %v9077_v51  ;;  %10216 = vst [vmem:[#allocation18_spill] sm:$0xff] %v9087_v24 }
 0x231   : > { %v3304_v31 = vrot.slane %v3303_v20, 4  ;;  %v3322_v27 = vrot.slane %v3320_v36, 5  ;;  %v3324_v42 = vshrl.u32 %v9065_v41, 16  ;;  %v3330_v9 = vshll.u32 %v9072_v55, 16  ;;  %v3037_v20 = vld [vmem:[#allocation2 + $0xa8] sm:$0xf] }
 0x232   : > { %7342 = vmatmul.mubr.bf16.gmra.mrb[0].mxu1 %v6645_v4  ;;  %v3299_v37 = vsel %vm8649_vm2, %v3294_v48, %v3298_v21  ;;  %7198 = vmatmul.mubr.bf16.gmra.mrb[48].mxu0 %v6557_v0  ;;  %v3317_v26 = vor.u32 %v3316_v45, %v3313_v35  ;;  %v6558_v54 = vcombine.low %v8106_v63, %v8864_v22  ;;  %v3335_v60 = vshrl.u32 %v3034_v61, 16  ;;  %v9094_v45 = vld [vmem:[#allocation2 + $0xac] sm:$0xf] }
 0x233   : > { %v3309_v34 = vsel %vm8649_vm2, %v3304_v31, %v3308_v14  ;;  %v3326_v32 = vrot.slane %v3324_v42, 4  ;;  %v3332_v58 = vrot.slane %v3330_v9, 5  ;;  %v3338_v40 = vshll.u32 %v3034_v61, 16  ;;  %10217 = vst [vmem:[#allocation19_spill] sm:$0xff] %v9094_v45  ;;  %v8107_v31 = vld [vmem:[#allocation2 + $0x84] sm:$0xf] }
 0x234   : > { %v6646_v36 = vcombine.low %v3299_v37, %v3309_v34  ;;  %v3318_v4 = vrot.slane %v3317_v26, 4  ;;  %7201 = vmatprep.mubr.bf16.mxu0 %v6558_v54  ;;  %v3337_v55 = vrot.slane %v3335_v60, 4  ;;  %v3344_v21 = vshll.u32 %v9082_v17, 16  ;;  %v9099_v9 = vld [vmem:[#allocation2 + $0xb0] sm:$0x1] }
 0x235   : > { %v3327_v0 = vor.u32 %v3326_v32, %v3322_v27  ;;  %v3340_v48 = vrot.slane %v3338_v40, 5  ;;  %v3348_v22 = vshrl.u32 %v9082_v17, 16  ;;  %v3354_v35 = vshll.u32 %v9087_v24, 16  ;;  %10218 = vst [vmem:[#allocation20_spill] sm:$0xff] %v9099_v9  ;;  %v9106_v24 = vld [vmem:[#allocation2 + $0xbc] sm:$0x1] }
 0x236   : > { %7345 = vmatprep.mubr.bf16.mxu1 %v6646_v36  ;;  %v3323_v14 = vsel %vm8649_vm2, %v3318_v4, %v3322_v27  ;;  %v3346_v61 = vrot.slane %v3344_v21, 5  ;;  %v6559_v42 = vcombine.low %v8107_v31, %v8872_v56  ;;  %v3359_v37 = vshrl.u32 %v3037_v20, 16  ;;  %v3040_v31 = vld [vmem:[#allocation2 + $0xb4] sm:$0xf]  ;;  %10219 = vst [vmem:[#allocation21_spill] sm:$0xff] %v9106_v24 }
 0x237   : > { %v3328_v26 = vrot.slane %v3327_v0, 4  ;;  %v3341_v63 = vor.u32 %v3340_v48, %v3337_v55  ;;  %v3350_v54 = vrot.slane %v3348_v22, 4  ;;  %v3356_v60 = vrot.slane %v3354_v35, 5 }
 0x238   : > { %v3361_v34 = vrot.slane %v3359_v37, 4  ;;  %v3362_v32 = vshll.u32 %v3037_v20, 16  ;;  %v3368_v40 = vshll.u32 %v9094_v45, 16  ;;  %v3372_v36 = vshrl.u32 %v9094_v45, 16  ;;  %v9108_v20 = vld [vmem:[#allocation2 + $0xb8] sm:$0xf] }
 0x239   : > { %v3333_v27 = vsel %vm8649_vm2, %v3328_v26, %v3332_v58  ;;  %v3342_v4 = vrot.slane %v3341_v63, 4  ;;  %v3351_v21 = vor.u32 %v3350_v54, %v3346_v61  ;;  %v3378_v56 = vshll.u32 %v9099_v9, 16  ;;  %10220 = vst [vmem:[#allocation22_spill] sm:$0xff] %v9108_v20  ;;  %v8108_v26 = vld [vmem:[#allocation2 + $0x90] sm:$0xf] }
 0x23a   : > { %v6647_v0 = vcombine.low %v3323_v14, %v3333_v27  ;;  %7202 = vmatmul.mubr.bf16.gmra.mrb[52].mxu0 %v6559_v42  ;;  %v3364_v55 = vrot.slane %v3362_v32, 5  ;;  %v3370_v48 = vrot.slane %v3368_v40, 5  ;;  %v3374_v22 = vrot.slane %v3372_v36, 4  ;;  %v9112_v63 = vld [vmem:[#allocation2 + $0x94] sm:$0xf] }
 0x23b   : > { %v3347_v35 = vsel %vm8649_vm2, %v3342_v4, %v3346_v61  ;;  %v3352_v58 = vrot.slane %v3351_v21, 4  ;;  %v3380_v37 = vrot.slane %v3378_v56, 5  ;;  %10221 = vst [vmem:[#allocation23_spill] sm:$0xff] %v9112_v63  ;;  %v6560_v54 = vcombine.low %v8108_v26, %v9112_v63  ;;  %v3043_v21 = vld [vmem:[#allocation2 + $0xc0] sm:$0xf] }
 0x23c   : > { %7346 = vmatmul.mubr.bf16.gmra.mrb[4].mxu1 %v6647_v0  ;;  %v3365_v14 = vor.u32 %v3364_v55, %v3361_v34  ;;  %v3375_v42 = vor.u32 %v3374_v22, %v3370_v48  ;;  %v3383_v32 = vshrl.u32 %v3040_v31, 16  ;;  %v3386_v40 = vshll.u32 %v3040_v31, 16  ;;  %v9120_v0 = vld [vmem:[#allocation2 + $0xc8] sm:$0x1]  ;;  %v9122_v63 = vld [vmem:[#allocation2 + $0xc4] sm:$0xf] }
 0x23d   : > { %v3357_v36 = vsel %vm8649_vm2, %v3352_v58, %v3356_v60  ;;  %7205 = vmatprep.mubr.bf16.mxu0 %v6560_v54  ;;  %v3392_v27 = vshll.u32 %v9108_v20, 16  ;;  %v3396_v61 = vshrl.u32 %v9108_v20, 16  ;;  %v3402_v4 = vshll.u32 %v9106_v24, 16  ;;  %v8110_v54 = vld [vmem:[#allocation2 + $0x9c] sm:$0xf] }
 0x23e   : > { %v6648_v56 = vcombine.low %v3347_v35, %v3357_v36  ;;  %v3366_v9 = vrot.slane %v3365_v14, 4  ;;  %v3376_v45 = vrot.slane %v3375_v42, 4  ;;  %v3385_v26 = vrot.slane %v3383_v32, 4  ;;  %v9128_v35 = vld [vmem:[#allocation2 + $0xa0] sm:$0xf] }
 0x23f   : > { %v3388_v34 = vrot.slane %v3386_v40, 5  ;;  %v3394_v55 = vrot.slane %v3392_v27, 5  ;;  %v3398_v31 = vrot.slane %v3396_v61, 4  ;;  %v3404_v22 = vrot.slane %v3402_v4, 5  ;;  %v3752_v61 = vld [vmem:[#allocation2 + $0xc] sm:$0xe] }
 0x240   : > { %7349 = vmatprep.mubr.bf16.mxu1 %v6648_v56  ;;  %v3371_v60 = vsel %vm8649_vm2, %v3366_v9, %v3370_v48  ;;  %v3381_v58 = vsel %vm8649_vm2, %v3376_v45, %v3380_v37  ;;  %v6561_v14 = vcombine.low %v8110_v54, %v9128_v35  ;;  %v3407_v42 = vshrl.u32 %v3043_v21, 16  ;;  %v8112_v20 = vld [vmem:[#allocation2 + $0xa8] sm:$0xf] }
 0x241   : > { %v6649_v32 = vcombine.low %v3371_v60, %v3381_v58  ;;  %v3389_v40 = vor.u32 %v3388_v34, %v3385_v26  ;;  %v3399_v36 = vor.u32 %v3398_v31, %v3394_v55  ;;  %v3410_v27 = vshll.u32 %v3043_v21, 16 }
 0x242   : > { %7206 = vmatmul.mubr.bf16.gmra.mrb[56].mxu0 %v6561_v14  ;;  %v3409_v4 = vrot.slane %v3407_v42, 4  ;;  %v3416_v56 = vshll.u32 %v9122_v63, 16  ;;  %v3420_v9 = vshrl.u32 %v9122_v63, 16  ;;  %v3426_v48 = vshll.u32 %v9120_v0, 16 }
 0x243   : > { %v3390_v45 = vrot.slane %v3389_v40, 4  ;;  %v3400_v37 = vrot.slane %v3399_v36, 4  ;;  %v3412_v24 = vrot.slane %v3410_v27, 5  ;;  %v6562_v54 = vcombine.low %v8112_v20, %v8888_v62  ;;  %v3753_v20 = vld [vmem:[#allocation2 + $0x18] sm:$0xe] }
 0x244   : > { %7350 = vmatmul.mubr.bf16.gmra.mrb[8].mxu1 %v6649_v32  ;;  %v3418_v60 = vrot.slane %v3416_v56, 5  ;;  %v3422_v26 = vrot.slane %v3420_v9, 4  ;;  %v6660_v34 = vrot.slane %v3752_v61, 9  ;;  %v3818_v62 = vrot.slane %v8898_v53, 5  ;;  %v3754_v36 = vld [vmem:[#allocation2 + $0x24] sm:$0xe] }
 0x245   : > { %v3395_v21 = vsel %vm8649_vm2, %v3390_v45, %v3394_v55  ;;  %v3405_v31 = vsel %vm8649_vm2, %v3400_v37, %v3404_v22  ;;  %v3413_v58 = vor.u32 %v3412_v24, %v3409_v4  ;;  %7209 = vmatprep.mubr.bf16.mxu0 %v6562_v54  ;;  %v3428_v40 = vrot.slane %v3426_v48, 5  ;;  %v2127_v9 = vld [vmem:[#allocation2] sm:$0xe]  ;;  %v2128_v54 = vld [vmem:[#allocation2 + $0xc] sm:$0xe] }
 0x246   : > { %v6650_v42 = vcombine.low %v3395_v21, %v3405_v31  ;;  %v3423_v32 = vor.u32 %v3422_v26, %v3418_v60  ;;  %v3820_v55 = vrot.slane %v3818_v62, 4  ;;  %v3821_v61 = vrot.slane %v8894_v12, 5 }
 0x247   : > { %v3414_v27 = vrot.slane %v3413_v58, 4  ;;  %v6563_v24 = vcombine.low %v8902_v28, %v8908_v39  ;;  %v3819_v4 = vsel %vm9141_vm8, %v6660_v34, %v3818_v62  ;;  %v6661_v56 = vrot.slane %v3753_v20, 9  ;;  %v8113_v62 = vld [vmem:[#allocation2 + $0x4] sm:$0xf] }
 0x248   : > { %7353 = vmatprep.mubr.bf16.mxu1 %v6650_v42  ;;  %v3424_v22 = vrot.slane %v3423_v32, 4  ;;  %v3825_v53 = vrot.slane %v8916_v1, 5  ;;  %v3822_v45 = vsel %vm9141_vm8, %v3820_v55, %v3821_v61  ;;  %v6662_v37 = vrot.slane %v3754_v36, 9  ;;  %v3755_v36 = vld [vmem:[#allocation2 + $0x30] sm:$0xe] }
 0x249   : > { %v3419_v48 = vsel %vm8649_vm2, %v3414_v27, %v3418_v60  ;;  %v3832_v12 = vrot.slane %v8928_v19, 5  ;;  %v3828_v26 = vrot.slane %v8921_v7, 5  ;;  %v3835_v1 = vrot.slane %v8932_v29, 5  ;;  %v8114_v19 = vld [vmem:[#allocation2 + $0x8] sm:$0x1] }
 0x24a   : > { %v3429_v28 = vsel %vm8649_vm2, %v3424_v22, %v3428_v40  ;;  %7210 = vmatmul.mubr.bf16.gmra.mrb[60].mxu0 %v6563_v24  ;;  %v3827_v39 = vrot.slane %v3825_v53, 4  ;;  %v6676_v21 = vcombine.low %v3819_v4, %v3822_v45  ;;  %v6572_v60 = vrot.slane %v2127_v9, 9  ;;  %v2129_v27 = vld [vmem:[#allocation2 + $0x18] sm:$0xe]  ;;  %v8115_v9 = vld [vmem:[#allocation2 + $0x14] sm:$0x1] }
 0x24b   : > { %v6651_v34 = vcombine.low %v3419_v48, %v3429_v28  ;;  %v3834_v31 = vrot.slane %v3832_v12, 4  ;;  %v2180_v20 = vrot.slane %v8113_v62, 5  ;;  %v2183_v42 = vrot.slane %v8114_v19, 5  ;;  %v3757_v62 = vld [vmem:[#allocation2 + $0x48] sm:$0xe] }
 0x24c   : > { %v3829_v58 = vsel %vm9141_vm8, %v3827_v39, %v3828_v26  ;;  %v6573_v32 = vrot.slane %v2128_v54, 9  ;;  %v3826_v40 = vsel %vm9141_vm8, %v6661_v56, %v3825_v53  ;;  %v3833_v7 = vsel %vm9141_vm8, %v6662_v37, %v3832_v12  ;;  %v3756_v54 = vld [vmem:[#allocation2 + $0x3c] sm:$0xe] }
 0x24d   : > { %7354 = vmatmul.mubr.bf16.gmra.mrb[12].mxu1 %v6651_v34  ;;  %v2187_v29 = vrot.slane %v8943_v3, 5  ;;  %v6677_v55 = vcombine.low %v3826_v40, %v3829_v58  ;;  %v3836_v61 = vsel %vm9141_vm8, %v3834_v31, %v3835_v1  ;;  %v2181_v24 = vsel %vm9141_vm8, %v6572_v60, %v2180_v20  ;;  %v2130_v34 = vld [vmem:[#allocation2 + $0x24] sm:$0xe]  ;;  %v8116_v60 = vld [vmem:[#allocation2 + $0x20] sm:$0x1] }
 0x24e   : > { %7373 = vmatprep.mubr.bf16.mxu1 %v6676_v21  ;;  %v2182_v22 = vrot.slane %v2180_v20, 4  ;;  %v2190_v48 = vrot.slane %v8115_v9, 5  ;;  %v6663_v45 = vrot.slane %v3755_v36, 9  ;;  %v3839_v56 = vrot.slane %v8937_v47, 5  ;;  %v8034_v20 = vld [vmem:[#allocation8 + $0x188] sm:$0xff]  }
 0x24f   : > { %v2189_v4 = vrot.slane %v2187_v29, 4  ;;  %v2188_v3 = vsel %vm9141_vm8, %v6573_v32, %v2187_v29  ;;  %v6574_v37 = vrot.slane %v2129_v27, 9  ;;  %v2194_v12 = vrot.slane %v8964_v38, 5  ;;  %v2131_v29 = vld [vmem:[#allocation2 + $0x30] sm:$0xe] }
 0x250   : > { %v2184_v53 = vsel %vm9141_vm8, %v2182_v22, %v2183_v42  ;;  %v3841_v26 = vrot.slane %v3839_v56, 4  ;;  %v3842_v1 = vrot.slane %v8946_v8, 5  ;;  %v6678_v21 = vcombine.low %v3833_v7, %v3836_v61  ;;  %v8117_v9 = vld [vmem:[#allocation2 + $0x2c] sm:$0x1] }
 0x251   : > { %v6588_v28 = vcombine.low %v2181_v24, %v2184_v53  ;;  %v2191_v39 = vsel %vm9141_vm8, %v2189_v4, %v2190_v48  ;;  %v2196_v31 = vrot.slane %v2194_v12, 4  ;;  %v2197_v58 = vrot.slane %v8116_v60, 5  ;;  %v8120_v60 = vld [vmem:[#allocation8 + $0xd0] sm:$0xff]  }
 0x252   : > { %v6589_v47 = vcombine.low %v2188_v3, %v2191_v39  ;;  %v9183_v38 = vsel %vm9141_vm8, %v6663_v45, %v3839_v56  ;;  %v9187_v19 = vsel %vm9141_vm8, %v3841_v26, %v3842_v1  ;;  %v6664_v42 = vrot.slane %v3756_v54, 9  ;;  %v3758_v56 = vld [vmem:[#allocation2 + $0x54] sm:$0xe]  ;;  %v8118_v54 = vld [vmem:[#allocation8 + $0xc8] sm:$0xff]  }
 0x253   : > { %7229 = vmatprep.mubr.bf16.mxu0 %v6588_v28  ;;  %v3846_v8 = vrot.slane %v8950_v16, 5  ;;  %v2195_v32 = vsel %vm9141_vm8, %v6574_v37, %v2194_v12  ;;  %v2198_v36 = vsel %vm9141_vm8, %v2196_v31, %v2197_v58  ;;  %v6575_v40 = vrot.slane %v2130_v34, 9  ;;  %v2132_v12 = vld [vmem:[#allocation2 + $0x3c] sm:$0xe]  ;;  %v3759_v34 = vld [vmem:[#allocation2 + $0x60] sm:$0xe] }
 0x254   : > { %7230 = vmatmul.mubr.bf16.vlgmr.msra.gmra.mrb[32].mxu0 %v6589_v47  ;;  %v2201_v7 = vrot.slane %v8979_v13, 5  ;;  %v6590_v27 = vcombine.low %v2195_v32, %v2198_v36  ;;  %v3849_v24 = vrot.slane %v8961_v33, 5  ;;  %v6665_v22 = vrot.slane %v3757_v62, 9 }
 0x255   : > { %7374 = vmatmul.mubr.bf16.vlgmr.msra.gmra.mrb[16].mxu1 %v6677_v55  ;;  %v3848_v61 = vrot.slane %v3846_v8, 4  ;;  %7262 = vmatpush3.bf16.msra.mxu0 %v9077_v51  ;;  %v6679_v16 = vcombine.low %v9183_v38, %v9187_v19  ;;  %v2204_v48 = vrot.slane %v8117_v9, 5  ;;  %v3853_v13 = vrot.slane %v8970_v49, 5  ;;  %v8035_v51 = vld [vmem:[#allocation8 + $0x190] sm:$0xff]   ;;  %v8036_v38 = vld [vmem:[#allocation8 + $0x198] sm:$0xff]  }
 0x256   : > { %7406 = vmatpush3.bf16.msra.mxu1 %v9057_v2  ;;  %7377 = vmatprep.mubr.bf16.mxu1 %v6678_v21  ;;  %v2203_v4 = vrot.slane %v2201_v7, 4  ;;  %v3847_v55 = vsel %vm9141_vm8, %v6664_v42, %v3846_v8  ;;  %v6576_v45 = vrot.slane %v2131_v29, 9  ;;  %v2208_v2 = vrot.slane %v8996_v43, 5  ;;  %v8119_v43 = vld [vmem:[#allocation2 + $0x38] sm:$0x1] }
 0x257   : > { %7407 = vmatprep.subr.bf16.mxu1 %v8034_v20  ;;  %7233 = vmatprep.mubr.bf16.mxu0 %v6590_v27  ;;  %v3850_v33 = vsel %vm9141_vm8, %v3848_v61, %v3849_v24  ;;  %v2202_v53 = vsel %vm9141_vm8, %v6575_v40, %v2201_v7  ;;  %v3855_v49 = vrot.slane %v3853_v13, 4  ;;  %v3856_v37 = vrot.slane %v8974_v46, 5  ;;  %v2133_v42 = vld [vmem:[#allocation2 + $0x48] sm:$0xe]  ;;  %v8121_v29 = vld [vmem:[#allocation2 + $0x44] sm:$0x1] }
 0x258   : > { %v2205_v3 = vsel %vm9141_vm8, %v2203_v4, %v2204_v48  ;;  %7263 = vmatprep.subr.bf16.mxu0 %v8118_v54  ;;  %v6680_v28 = vcombine.low %v3847_v55, %v3850_v33  ;;  %v9213_v39 = vsel %vm9141_vm8, %v6665_v22, %v3853_v13  ;;  %v2210_v26 = vrot.slane %v2208_v2, 4  ;;  %v3760_v4 = vld [vmem:[#allocation2 + $0x6c] sm:$0xe]  ;;  %v8037_v13 = vld [vmem:[#allocation8 + $0x1a0] sm:$0xff]  }
 0x259   : > { %v2211_v1 = vrot.slane %v8119_v43, 5  ;;  %7264 = vmatpush3.bf16.msra.mxu0 %v8118_v54  ;;  %v6591_v21 = vcombine.low %v2202_v53, %v2205_v3  ;;  %v9217_v47 = vsel %vm9141_vm8, %v3855_v49, %v3856_v37  ;;  %v6666_v46 = vrot.slane %v3758_v56, 9  ;;  %v8123_v56 = vld [vmem:[#allocation8 + $0xd8] sm:$0xff]   ;;  %v3761_v37 = vld [vmem:[#allocation2 + $0x78] sm:$0xe] }
 0x25a   : > { %7408 = vmatpush3.bf16.msra.mxu1 %v8034_v20  ;;  %v3860_v31 = vrot.slane %v8989_v25, 5  ;;  %7265 = vmatprep.subr.bf16.mxu0 %v8120_v60  ;;  %v2209_v58 = vsel %vm9141_vm8, %v6576_v45, %v2208_v2  ;;  %v6577_v19 = vrot.slane %v2132_v12, 9  ;;  %v2215_v20 = vrot.slane %v9011_v23, 5  ;;  %v2134_v2 = vld [vmem:[#allocation2 + $0x54] sm:$0xe] }
 0x25b   : > { %7409 = vmatprep.subr.bf16.mxu1 %v8035_v51  ;;  %v2212_v62 = vsel %vm9141_vm8, %v2210_v26, %v2211_v1  ;;  %v6681_v8 = vcombine.low %v9213_v39, %v9217_v47  ;;  %v3863_v25 = vrot.slane %v8992_v59, 5  ;;  %v6667_v36 = vrot.slane %v3759_v34, 9  ;;  %v8124_v26 = vld [vmem:[#allocation8 + $0xe0] sm:$0xff]   ;;  %v8038_v47 = vld [vmem:[#allocation8 + $0x1a8] sm:$0xff]  }
 0x25c   : > { %7234 = vmatmul.mubr.bf16.gmra.mrb[36].mxu0 %v6591_v21  ;;  %v3862_v32 = vrot.slane %v3860_v31, 4  ;;  %v6592_v40 = vcombine.low %v2209_v58, %v2212_v62  ;;  %v2217_v7 = vrot.slane %v2215_v20, 4  ;;  %v2218_v27 = vrot.slane %v8121_v29, 5  ;;  %v2135_v21 = vld [vmem:[#allocation2 + $0x60] sm:$0xe] }
 0x25d   : > { %7378 = vmatmul.mubr.bf16.gmra.mrb[20].mxu1 %v6679_v16  ;;  %v3867_v61 = vrot.slane %v9006_v10, 5  ;;  %7266 = vmatpush3.bf16.msra.mxu0 %v8120_v60  ;;  %v3861_v23 = vsel %vm9141_vm8, %v6666_v46, %v3860_v31  ;;  %v6578_v22 = vrot.slane %v2133_v42, 9  ;;  %v2222_v59 = vrot.slane %v9027_v52, 5  ;;  %v8122_v52 = vld [vmem:[#allocation2 + $0x50] sm:$0x1] }
 0x25e   : > { %7381 = vmatprep.mubr.bf16.mxu1 %v6680_v28  ;;  %7410 = vmatpush3.bf16.msra.mxu1 %v8035_v51  ;;  %v3864_v24 = vsel %vm9141_vm8, %v3862_v32, %v3863_v25  ;;  %v2216_v16 = vsel %vm9141_vm8, %v6577_v19, %v2215_v20  ;;  %v2219_v10 = vsel %vm9141_vm8, %v2217_v7, %v2218_v27  ;;  %v3870_v48 = vrot.slane %v9008_v15, 5  ;;  %v8125_v31 = vld [vmem:[#allocation2 + $0x5c] sm:$0x1]  ;;  %v8126_v19 = vld [vmem:[#allocation2 + $0x64] sm:$0xf] }
 0x25f   : > { %7237 = vmatprep.mubr.bf16.mxu0 %v6592_v40  ;;  %7411 = vmatprep.subr.bf16.mxu1 %v8036_v38  ;;  %v3869_v9 = vrot.slane %v3867_v61, 4  ;;  %v6682_v55 = vcombine.low %v3861_v23, %v3864_v24  ;;  %v9241_v33 = vsel %vm9141_vm8, %v6667_v36, %v3867_v61  ;;  %v2224_v51 = vrot.slane %v2222_v59, 4  ;;  %v3762_v42 = vld [vmem:[#allocation2 + $0x84] sm:$0xe]  ;;  %v8127_v7 = vld [vmem:[#allocation2 + $0x68] sm:$0x1] }
 0x260   : > { %v2225_v45 = vrot.slane %v8122_v52, 5  ;;  %7267 = vmatprep.subr.bf16.mxu0 %v8123_v56  ;;  %v6593_v53 = vcombine.low %v2216_v16, %v2219_v10  ;;  %v6668_v49 = vrot.slane %v3760_v4, 9  ;;  %v3874_v15 = vrot.slane %v9019_v50, 5  ;;  %v2136_v27 = vld [vmem:[#allocation2 + $0x6c] sm:$0xe]  ;;  %v8128_v4 = vld [vmem:[#allocation8 + $0xe8] sm:$0xff]  }
 0x261   : > { %v9245_v3 = vsel %vm9141_vm8, %v3869_v9, %v3870_v48  ;;  %7268 = vmatpush3.bf16.msra.mxu0 %v8123_v56  ;;  %v2223_v54 = vsel %vm9141_vm8, %v6578_v22, %v2222_v59  ;;  %v2229_v39 = vrot.slane %v9040_v5, 5  ;;  %v3877_v50 = vrot.slane %v9024_v57, 5  ;;  %v3763_v59 = vld [vmem:[#allocation2 + $0x90] sm:$0xe] }
 0x262   : > { %v6683_v12 = vcombine.low %v9241_v33, %v9245_v3  ;;  %7412 = vmatpush3.bf16.msra.mxu1 %v8036_v38  ;;  %v2226_v28 = vsel %vm9141_vm8, %v2224_v51, %v2225_v45  ;;  %7269 = vmatprep.subr.bf16.mxu0 %v8124_v26  ;;  %v3876_v1 = vrot.slane %v3874_v15, 4  ;;  %v6579_v34 = vrot.slane %v2134_v2, 9  ;;  %v8129_v48 = vld [vmem:[#allocation2 + $0x70] sm:$0xf] }
 0x263   : > { %v6594_v43 = vcombine.low %v2223_v54, %v2226_v28  ;;  %7413 = vmatprep.subr.bf16.mxu1 %v8037_v13  ;;  %v2231_v46 = vrot.slane %v2229_v39, 4  ;;  %v2232_v60 = vrot.slane %v8125_v31, 5  ;;  %v6669_v58 = vrot.slane %v3761_v37, 9 }
 0x264   : > { %7238 = vmatmul.mubr.bf16.gmra.mrb[40].mxu0 %v6593_v53  ;;  %v3881_v62 = vrot.slane %v9038_v11, 5  ;;  %v3875_v5 = vsel %vm9141_vm8, %v6668_v49, %v3874_v15  ;;  %v3878_v38 = vsel %vm9141_vm8, %v3876_v1, %v3877_v50  ;;  %v3884_v57 = vrot.slane %v9045_v44, 5  ;;  %v8039_v44 = vld [vmem:[#allocation8 + $0x1b0] sm:$0xff]   ;;  %v8040_v15 = vld [vmem:[#allocation8 + $0x1b8] sm:$0xff]  }
 0x265   : > { %7382 = vmatmul.mubr.bf16.gmra.mrb[24].mxu1 %v6681_v8  ;;  %7241 = vmatprep.mubr.bf16.mxu0 %v6594_v43  ;;  %v2236_v20 = vrot.slane %v8126_v19, 5  ;;  %v6684_v32 = vcombine.low %v3875_v5, %v3878_v38  ;;  %v2233_v25 = vsel %vm9141_vm8, %v2231_v46, %v2232_v60  ;;  %v6580_v11 = vrot.slane %v2135_v21, 9  ;;  %v3764_v43 = vld [vmem:[#allocation2 + $0x9c] sm:$0xe]  ;;  %v8132_v1 = vld [vmem:[#allocation8 + $0xf0] sm:$0xff]  }
 0x266   : > { %7385 = vmatprep.mubr.bf16.mxu1 %v6682_v55  ;;  %v3883_v36 = vrot.slane %v3881_v62, 4  ;;  %7414 = vmatpush3.bf16.msra.mxu1 %v8037_v13  ;;  %v2230_v8 = vsel %vm9141_vm8, %v6579_v34, %v2229_v39  ;;  %v2239_v29 = vrot.slane %v8127_v7, 5  ;;  %v9268_v61 = vsel %vm9141_vm8, %v6669_v58, %v3881_v62  ;;  %v8131_v39 = vld [vmem:[#allocation2 + $0x7c] sm:$0xf]  ;;  %v8133_v60 = vld [vmem:[#allocation2 + $0x80] sm:$0x1] }
 0x267   : > { %v2238_v40 = vrot.slane %v2236_v20, 4  ;;  %7415 = vmatprep.subr.bf16.mxu1 %v8038_v47  ;;  %7270 = vmatpush3.bf16.msra.mxu0 %v8124_v26  ;;  %v6670_v24 = vrot.slane %v3762_v42, 9  ;;  %v3888_v22 = vrot.slane %v9051_v30, 5  ;;  %v6595_v16 = vcombine.low %v2230_v8, %v2233_v25  ;;  %v2137_v30 = vld [vmem:[#allocation2 + $0x78] sm:$0xe]  ;;  %v8135_v25 = vld [vmem:[#allocation8 + $0xf8] sm:$0xff]  }
 0x268   : > { %v9272_v23 = vsel %vm9141_vm8, %v3883_v36, %v3884_v57  ;;  %7271 = vmatprep.subr.bf16.mxu0 %v8128_v4  ;;  %v2243_v13 = vrot.slane %v8129_v48, 5  ;;  %v2237_v55 = vsel %vm9141_vm8, %v6580_v11, %v2236_v20  ;;  %v3891_v52 = vrot.slane %v9059_v6, 5  ;;  %v8130_v6 = vld [vmem:[#allocation2 + $0x74] sm:$0x1]  ;;  %v10224_v34 = vld [vmem:[#allocation17_spill] sm:$0xff]  ;;  %v10225_v8 = vld [vmem:[#allocation18_spill] sm:$0xff] }
 0x269   : > { %v6685_v10 = vcombine.low %v9268_v61, %v9272_v23  ;;  %v2240_v9 = vsel %vm9141_vm8, %v2238_v40, %v2239_v29  ;;  %v3890_v51 = vrot.slane %v3888_v22, 4  ;;  %v6581_v45 = vrot.slane %v2136_v27, 9  ;;  %v3765_v5 = vld [vmem:[#allocation2 + $0xa8] sm:$0xe]  ;;  %v9308_v38 = vld [vmem:[#allocation8 + $0x1c0] sm:$0xff]  }
 0x26a   : > { %7416 = vmatpush3.bf16.msra.mxu1 %v8038_v47  ;;  %v6596_v2 = vcombine.low %v2237_v55, %v2240_v9  ;;  %v2245_v56 = vrot.slane %v2243_v13, 4  ;;  %v6671_v53 = vrot.slane %v3763_v59, 9  ;;  %v3895_v49 = vrot.slane %v9065_v41, 5  ;;  %v8134_v42 = vld [vmem:[#allocation2 + $0x88] sm:$0xf] }
 0x26b   : > { %7417 = vmatprep.subr.bf16.mxu1 %v8039_v44  ;;  %7272 = vmatpush3.bf16.msra.mxu0 %v8128_v4  ;;  %v9285_v37 = vsel %vm9141_vm8, %v6670_v24, %v3888_v22  ;;  %v9289_v54 = vsel %vm9141_vm8, %v3890_v51, %v3891_v52  ;;  %v2246_v28 = vrot.slane %v8130_v6, 5  ;;  %v2250_v26 = vrot.slane %v8131_v39, 5  ;;  %v2138_v7 = vld [vmem:[#allocation2 + $0x84] sm:$0xe]  ;;  %v8136_v27 = vld [vmem:[#allocation2 + $0x8c] sm:$0x1] }
 0x26c   : > { %7242 = vmatmul.mubr.bf16.gmra.mrb[44].mxu0 %v6595_v16  ;;  %7273 = vmatprep.subr.bf16.mxu0 %v8132_v1  ;;  %v6686_v41 = vcombine.low %v9285_v37, %v9289_v54  ;;  %v3897_v50 = vrot.slane %v3895_v49, 4  ;;  %v3898_v21 = vrot.slane %v10224_v34, 5  ;;  %v6582_v47 = vrot.slane %v2137_v30, 9  ;;  %v10226_v22 = vld [vmem:[#allocation19_spill] sm:$0xff]  ;;  %v2139_v4 = vld [vmem:[#allocation2 + $0x90] sm:$0xe] }
 0x26d   : > { %7386 = vmatmul.mubr.bf16.gmra.mrb[28].mxu1 %v6683_v12  ;;  %7245 = vmatprep.mubr.bf16.mxu0 %v6596_v2  ;;  %v2247_v46 = vsel %vm9141_vm8, %v2245_v56, %v2246_v28  ;;  %v2252_v31 = vrot.slane %v2250_v26, 4  ;;  %v2253_v58 = vrot.slane %v8133_v60, 5  ;;  %v9301_v33 = vsel %vm9141_vm8, %v6671_v53, %v3895_v49  ;;  %v3766_v51 = vld [vmem:[#allocation2 + $0xb4] sm:$0xe]  ;;  %v8137_v37 = vld [vmem:[#allocation2 + $0x98] sm:$0x1] }
 0x26e   : > { %7389 = vmatprep.mubr.bf16.mxu1 %v6684_v32  ;;  %7418 = vmatpush3.bf16.msra.mxu1 %v8039_v44  ;;  %v9305_v3 = vsel %vm9141_vm8, %v3897_v50, %v3898_v21  ;;  %v6672_v12 = vrot.slane %v3764_v43, 9  ;;  %v3902_v62 = vrot.slane %v9082_v17, 5  ;;  %v2244_v57 = vsel %vm9141_vm8, %v6581_v45, %v2243_v13  ;;  %v10227_v13 = vld [vmem:[#allocation23_spill] sm:$0xff]  ;;  %v10228_v2 = vld [vmem:[#allocation20_spill] sm:$0xff]  ;;  %v3767_v61 = vld [vmem:[#allocation2 + $0xc0] sm:$0xe] }
 0x26f   : > { %7419 = vmatprep.subr.bf16.mxu1 %v8040_v15  ;;  %7274 = vmatpush3.bf16.msra.mxu0 %v8132_v1  ;;  %v6687_v19 = vcombine.low %v9301_v33, %v9305_v3  ;;  %v2254_v20 = vsel %vm9141_vm8, %v2252_v31, %v2253_v58  ;;  %v2257_v32 = vrot.slane %v8134_v42, 5  ;;  %v6597_v36 = vcombine.low %v2244_v57, %v2247_v46  ;;  %v10230_v34 = vld [vmem:[#allocation21_spill] sm:$0xff] }
 0x270   : > { %7275 = vmatprep.subr.bf16.mxu0 %v8135_v25  ;;  %v2251_v17 = vsel %vm9141_vm8, %v6582_v47, %v2250_v26  ;;  %v3904_v11 = vrot.slane %v3902_v62, 4  ;;  %v3905_v40 = vrot.slane %v10225_v8, 5  ;;  %v2260_v44 = vrot.slane %v8136_v27, 5  ;;  %v10229_v26 = vld [vmem:[#allocation22_spill] sm:$0xff]  ;;  %v8140_v27 = vld [vmem:[#allocation2 + $0xb0] sm:$0x1] }
 0x271   : > { %v2259_v29 = vrot.slane %v2257_v32, 4  ;;  %v6673_v24 = vrot.slane %v3765_v5, 9  ;;  %v3909_v59 = vrot.slane %v10226_v22, 5  ;;  %v6598_v16 = vcombine.low %v2251_v17, %v2254_v20  ;;  %v8138_v5 = vld [vmem:[#allocation2 + $0xac] sm:$0xf] }
 0x272   : > { %7420 = vmatpush3.bf16.msra.mxu1 %v8040_v15  ;;  %v3903_v9 = vsel %vm9141_vm8, %v6672_v12, %v3902_v62  ;;  %v3906_v48 = vsel %vm9141_vm8, %v3904_v11, %v3905_v40  ;;  %v2264_v55 = vrot.slane %v10227_v13, 5  ;;  %v6583_v45 = vrot.slane %v2138_v7, 9  ;;  %v2140_v62 = vld [vmem:[#allocation2 + $0x9c] sm:$0xe]  ;;  %v8139_v11 = vld [vmem:[#allocation2 + $0xa4] sm:$0x1] }
 0x273   : > { %7453 = vmatprep.subr.bf16.mxu1 %v9308_v38  ;;  %7276 = vmatpush3.bf16.msra.mxu0 %v8135_v25  ;;  %v6688_v52 = vcombine.low %v3903_v9, %v3906_v48  ;;  %v3911_v30 = vrot.slane %v3909_v59, 4  ;;  %v3912_v56 = vrot.slane %v10228_v2, 5  ;;  %v2261_v53 = vsel %vm9141_vm8, %v2259_v29, %v2260_v44  ;;  %v8141_v33 = vld [vmem:[#allocation2 + $0xb8] sm:$0xf]  ;;  %v8044_v2 = vld [vmem:[#allocation2 + $0xc] sm:$0xff]  }
 0x274   : > { %7246 = vmatmul.mubr.bf16.gmra.mrb[48].mxu0 %v6597_v36  ;;  %v6584_v49 = vrot.slane %v2139_v4, 9  ;;  %v2266_v15 = vrot.slane %v2264_v55, 4  ;;  %v2267_v54 = vrot.slane %v8137_v37, 5  ;;  %v3910_v6 = vsel %vm9141_vm8, %v6673_v24, %v3909_v59  ;;  %v2141_v36 = vld [vmem:[#allocation2 + $0xa8] sm:$0xe] }
 0x275   : > { %7390 = vmatmul.mubr.bf16.gmra.mrb[0].mxu1 %v6685_v10  ;;  %7249 = vmatprep.mubr.bf16.mxu0 %v6598_v16  ;;  %v3913_v28 = vsel %vm9141_vm8, %v3911_v30, %v3912_v56  ;;  %v6674_v39 = vrot.slane %v3766_v51, 9  ;;  %v3916_v43 = vrot.slane %v10229_v26, 5  ;;  %v2271_v1 = vrot.slane %v9128_v35, 5  ;;  %v2142_v16 = vld [vmem:[#allocation2 + $0xb4] sm:$0xe]  ;;  %v8041_v56 = vld [vmem:[#allocation2 + $0x18] sm:$0xff]  }
 0x276   : > { %7393 = vmatprep.mubr.bf16.mxu1 %v6686_v41  ;;  %v6689_v23 = vcombine.low %v3910_v6, %v3913_v28  ;;  %v2268_v10 = vsel %vm9141_vm8, %v2266_v15, %v2267_v54  ;;  %v2258_v50 = vsel %vm9141_vm8, %v6583_v45, %v2257_v32  ;;  %v3919_v21 = vrot.slane %v10230_v34, 5  ;;  %v8046_v15 = vld [vmem:[#allocation8 + $0x1c8] sm:$0xff]   ;;  %v8045_v54 = vld [vmem:[#allocation2 + $0x30] sm:$0xff]   ;;  %v8051_v6 = vld [vmem:[#allocation8 + $0x1d0] sm:$0xff]  }
 0x277   : > { %v3918_v41 = vrot.slane %v3916_v43, 4  ;;  %v6599_v47 = vcombine.low %v2258_v50, %v2261_v53  ;;  %v2265_v46 = vsel %vm9141_vm8, %v6584_v49, %v2264_v55  ;;  %v6675_v31 = vrot.slane %v3767_v61, 9  ;;  %v8142_v55 = vld [vmem:[#allocation2 + $0xbc] sm:$0x1]  ;;  %v8043_v49 = vld [vmem:[#allocation2 + $0x24] sm:$0xff]  }
 0x278   : > { %v3923_v60 = vrot.slane %v9122_v63, 5  ;;  %v6600_v58 = vcombine.low %v2265_v46, %v2268_v10  ;;  %v3917_v12 = vsel %vm9141_vm8, %v6674_v39, %v3916_v43  ;;  %v2278_v57 = vrot.slane %v8138_v5, 5  ;;  %v8047_v53 = vld [vmem:[#allocation2 + $0x18] sm:$0xff]   ;;  %v8049_v37 = vld [vmem:[#allocation2 + $0x24] sm:$0xff]   ;;  %v8052_v43 = vld [vmem:[#allocation2 + $0x30] sm:$0xff]  }
 0x279   : > { %v3920_v35 = vsel %vm9141_vm8, %v3918_v41, %v3919_v21  ;;  %v2273_v42 = vrot.slane %v2271_v1, 4  ;;  %v3926_v25 = vrot.slane %v9120_v0, 5  ;;  %v6585_v63 = vrot.slane %v2140_v62, 9  ;;  %v4637_v28 = vld [vmem:[#allocation2 + $0x18] sm:$0xf]  ;;  %v8048_v26 = vld [vmem:[#allocation2 + $0x3c] sm:$0xff]  }
 0x27a   : > { %v6690_v20 = vcombine.low %v3917_v12, %v3920_v35  ;;  %v3925_v32 = vrot.slane %v3923_v60, 4  ;;  %v2280_v17 = vrot.slane %v2278_v57, 4  ;;  %v2274_v8 = vrot.slane %v8139_v11, 5  ;;  %v4638_v39 = vld [vmem:[#allocation2 + $0x1c] sm:$0xf]  ;;  %v8050_v21 = vld [vmem:[#allocation2 + $0x48] sm:$0xff]  }
 0x27b   : > { %v3924_v40 = vsel %vm9141_vm8, %v6675_v31, %v3923_v60  ;;  %v6586_v0 = vrot.slane %v2141_v36, 9  ;;  %v2281_v44 = vrot.slane %v8140_v27, 5  ;;  %v2285_v3 = vrot.slane %v8141_v33, 5  ;;  %v8054_v10 = vld [vmem:[#allocation2 + $0x3c] sm:$0xff]   ;;  %v4640_v34 = vld [vmem:[#allocation2 + $0x24] sm:$0xf] }
 0x27c   : > { %7250 = vmatmul.mubr.bf16.gmra.mrb[52].mxu0 %v6599_v47  ;;  %v3927_v7 = vsel %vm9141_vm8, %v3925_v32, %v3926_v25  ;;  %v2275_v24 = vsel %vm9141_vm8, %v2273_v42, %v2274_v8  ;;  %v2272_v22 = vsel %vm9141_vm8, %v6585_v63, %v2271_v1  ;;  %v6587_v13 = vrot.slane %v2142_v16, 9  ;;  %v8056_v1 = vld [vmem:[#allocation8 + $0x1d8] sm:$0xff]   ;;  %v9373_v42 = vld [vmem:[#allocation2 + $0x20] sm:$0x1]  ;;  %v9379_v27 = vld [vmem:[#allocation2 + $0x2c] sm:$0x1] }
 0x27d   : > { %7394 = vmatmul.mubr.bf16.gmra.mrb[4].mxu1 %v6687_v19  ;;  %7253 = vmatprep.mubr.bf16.mxu0 %v6600_v58  ;;  %v6691_v29 = vcombine.low %v3924_v40, %v3927_v7  ;;  %v2282_v19 = vsel %vm9141_vm8, %v2280_v17, %v2281_v44  ;;  %v6601_v59 = vcombine.low %v2272_v22, %v2275_v24  ;;  %v2287_v48 = vrot.slane %v2285_v3, 4  ;;  %v8061_v58 = vld [vmem:[#allocation8 + $0x1e0] sm:$0xff]   ;;  %v8065_v63 = vld [vmem:[#allocation8 + $0x1e8] sm:$0xff]   ;;  %v4643_v8 = vld [vmem:[#allocation2 + $0x30] sm:$0xf] }
 0x27e   : > { %7397 = vmatprep.mubr.bf16.mxu1 %v6688_v52  ;;  %v2279_v4 = vsel %vm9141_vm8, %v6586_v0, %v2278_v57  ;;  %v2288_v51 = vrot.slane %v8142_v55, 5  ;;  %v2286_v45 = vsel %vm9141_vm8, %v6587_v13, %v2285_v3  ;;  %v4686_v61 = vshrl.u32 %v4637_v28, 16  ;;  %v8053_v57 = vld [vmem:[#allocation2 + $0x54] sm:$0xff]   ;;  %v8055_v40 = vld [vmem:[#allocation2 + $0x60] sm:$0xff]   ;;  %v8068_v22 = vld [vmem:[#allocation8 + $0x1f0] sm:$0xff]  }
 0x27f   : > { %v6602_v9 = vcombine.low %v2279_v4, %v2282_v19  ;;  %v4695_v50 = vshll.u32 %v4638_v39, 16  ;;  %v4699_v41 = vshrl.u32 %v4638_v39, 16  ;;  %v4710_v31 = vshrl.u32 %v4640_v34, 16  ;;  %v8059_v17 = vld [vmem:[#allocation2 + $0x54] sm:$0xff]  }
 0x280   : > { %v2289_v52 = vsel %vm9141_vm8, %v2287_v48, %v2288_v51  ;;  %v4688_v47 = vrot.slane %v4686_v61, 4  ;;  %v4713_v60 = vshll.u32 %v4640_v34, 16  ;;  %v4705_v0 = vshll.u32 %v9373_v42, 16  ;;  %v9381_v33 = vld [vmem:[#allocation2 + $0x34] sm:$0xf] }
 0x281   : > { %v6603_v30 = vcombine.low %v2286_v45, %v2289_v52  ;;  %v9371_v12 = vrot.slane %v4695_v50, 5  ;;  %v4701_v35 = vrot.slane %v4699_v41, 4  ;;  %v4712_v25 = vrot.slane %v4710_v31, 4  ;;  %v9384_v16 = vld [vmem:[#allocation2 + $0x38] sm:$0x1]  ;;  %v8062_v45 = vld [vmem:[#allocation2 + $0x60] sm:$0xff]  }
 0x282   : > { %v4715_v36 = vrot.slane %v4713_v60, 5  ;;  %v4734_v3 = vshrl.u32 %v4643_v8, 16  ;;  %v4737_v19 = vshll.u32 %v4643_v8, 16  ;;  %v9386_v48 = vld [vmem:[#allocation2 + $0x40] sm:$0xf]  ;;  %v4707_v13 = vrot.slane %v4705_v0, 5 }
 0x283   : > { %v4702_v11 = vor.u32 %v4701_v35, %v9371_v12  ;;  %v4729_v55 = vshll.u32 %v9379_v27, 16  ;;  %v4743_v51 = vshll.u32 %v9381_v33, 16  ;;  %v4649_v52 = vld [vmem:[#allocation2 + $0x48] sm:$0xf]  ;;  %v4652_v31 = vld [vmem:[#allocation2 + $0x54] sm:$0xf] }
 0x284   : > { %7254 = vmatmul.mubr.bf16.gmra.mrb[56].mxu0 %v6601_v59  ;;  %v4716_v24 = vor.u32 %v4715_v36, %v4712_v25  ;;  %v4785_v50 = vshll.u32 %v4649_v52, 16  ;;  %v9410_v60 = vld [vmem:[#allocation8 + $0x200] sm:$0xff]   ;;  %v4809_v0 = vshll.u32 %v4652_v31, 16 }
 0x285   : > { %7398 = vmatmul.mubr.bf16.gmra.mrb[8].mxu1 %v6689_v23  ;;  %7257 = vmatprep.mubr.bf16.mxu0 %v6602_v9  ;;  %v4689_v23 = vshll.u32 %v4637_v28, 16  ;;  %v4703_v59 = vrot.slane %v4702_v11, 4  ;;  %v4646_v9 = vld [vmem:[#allocation2 + $0x3c] sm:$0xf]  ;;  %v4753_v28 = vshll.u32 %v9384_v16, 16 }
 0x286   : > { %7401 = vmatprep.mubr.bf16.mxu1 %v6690_v20  ;;  %v8057_v20 = vld [vmem:[#allocation2 + $0x48] sm:$0xff]   ;;  %v4758_v39 = vshrl.u32 %v4646_v9, 16  ;;  %v4761_v61 = vshll.u32 %v4646_v9, 16  ;;  %v4787_v11 = vrot.slane %v4785_v50, 5  ;;  %v8064_v9 = vld [vmem:[#allocation2 + $0x90] sm:$0xff]  }
 0x287   : > { %v4691_v46 = vrot.slane %v4689_v23, 5  ;;  %v4767_v23 = vshll.u32 %v9386_v48, 16  ;;  %v9412_v35 = vrot.slane %v4753_v28, 5 }
 0x289   : > { %v4692_v32 = vor.u32 %v4691_v46, %v4688_v47  ;;  %v4731_v47 = vrot.slane %v4729_v55, 5  ;;  %v9408_v46 = vrot.slane %v4743_v51, 5  ;;  %v9420_v25 = vrot.slane %v4767_v23, 5 }
 0x28b   : > { %v4693_v44 = vrot.slane %v4692_v32, 4  ;;  %v4763_v32 = vrot.slane %v4761_v61, 5 }
 0x28c   : > { %7258 = vmatmul.mubr.bf16.gmra.mrb[60].mxu0 %v6603_v30 }
 0x28d   : > { %7402 = vmatmul.mubr.bf16.gmra.mrb[12].mxu1 %v6691_v29  ;;  %7277 = vmatprep.mubr.bf16.mxu0 %v8044_v2  ;;  %v4698_v30 = vsel %vm8649_vm2, %v4693_v44, %v9371_v12  ;;  %v4717_v2 = vrot.slane %v4716_v24, 4 }
 0x28e   : > { %7421 = vmatprep.mubr.bf16.mxu1 %v8041_v56  ;;  %v4736_v56 = vrot.slane %v4734_v3, 4  ;;  %v8063_v3 = vld [vmem:[#allocation2 + $0x84] sm:$0xff]  }
 0x294   : > { %7278 = vmatmul.mubr.bf16.vlgmr.msra.gmra.mrb[32].mxu0 %v8047_v53  ;;  %v4739_v53 = vrot.slane %v4737_v19, 5 }
 0x295   : > { %7422 = vmatmul.mubr.bf16.vlgmr.msra.gmra.mrb[16].mxu1 %v8043_v49  ;;  %7281 = vmatprep.mubr.bf16.mxu0 %v8049_v37  ;;  %v9393_v49 = vld [vmem:[#allocation2 + $0x4c] sm:$0xf]  ;;  %v8071_v37 = vld [vmem:[#allocation8 + $0x1f8] sm:$0xff]  }
 0x296   : > { %7454 = vmatpush3.bf16.msra.mxu1 %v9308_v38  ;;  %7425 = vmatprep.mubr.bf16.mxu1 %v8045_v54  ;;  %v4641_v38 = vld [vmem:[#allocation2 + $0x28] sm:$0xf]  ;;  %v4708_v54 = vsel %vm8649_vm2, %v4703_v59, %v4707_v13  ;;  %v4791_v41 = vshll.u32 %v9393_v49, 16  ;;  %v4795_v34 = vshrl.u32 %v9393_v49, 16 }
 0x297   : > { %7455 = vmatprep.subr.bf16.mxu1 %v8046_v15  ;;  %v4719_v62 = vshll.u32 %v4641_v38, 16  ;;  %v4723_v5 = vshrl.u32 %v4641_v38, 16 }
 0x298   : > { %v9422_v8 = vrot.slane %v4791_v41, 5 }
 0x299   : > { %v9376_v7 = vrot.slane %v4719_v62, 5  ;;  %v4725_v29 = vrot.slane %v4723_v5, 4  ;;  %v9414_v62 = vld [vmem:[#allocation2 + $0x44] sm:$0x1]  ;;  %v4760_v5 = vrot.slane %v4758_v39, 4 }
 0x29a   : > { %7456 = vmatpush3.bf16.msra.mxu1 %v8046_v15  ;;  %v8058_v15 = vld [vmem:[#allocation2 + $0x6c] sm:$0xff]   ;;  %v4777_v55 = vshll.u32 %v9414_v62, 16 }
 0x29b   : > { %7457 = vmatprep.subr.bf16.mxu1 %v8051_v6  ;;  %v4726_v4 = vor.u32 %v4725_v29, %v9376_v7  ;;  %v4722_v38 = vsel %vm8649_vm2, %v4717_v2, %v9376_v7  ;;  %v9424_v7 = vld [vmem:[#allocation2 + $0x64] sm:$0xf]  ;;  %v4806_v29 = vshrl.u32 %v4652_v31, 16 }
 0x29c   : > { %7282 = vmatmul.mubr.bf16.gmra.mrb[36].mxu0 %v8052_v43  ;;  %v4839_v51 = vshll.u32 %v9424_v7, 16 }
 0x29d   : > { %7426 = vmatmul.mubr.bf16.gmra.mrb[20].mxu1 %v8048_v26  ;;  %7285 = vmatprep.mubr.bf16.mxu0 %v8054_v10  ;;  %v8060_v26 = vld [vmem:[#allocation2 + $0x78] sm:$0xff]   ;;  %v4727_v43 = vrot.slane %v4726_v4, 4  ;;  %v4771_v10 = vshrl.u32 %v9386_v48, 16 }
 0x29e   : > { %7429 = vmatprep.mubr.bf16.mxu1 %v8050_v21  ;;  %7458 = vmatpush3.bf16.msra.mxu1 %v8051_v6  ;;  %v4747_v6 = vshrl.u32 %v9381_v33, 16  ;;  %v9403_v21 = vcombine.low %v4698_v30, %v4708_v54  ;;  %v4764_v30 = vor.u32 %v4763_v32, %v4760_v5  ;;  %v4811_v54 = vrot.slane %v4809_v0, 5  ;;  %v8067_v0 = vld [vmem:[#allocation2 + $0xa8] sm:$0xff]  }
 0x29f   : > { %7459 = vmatprep.subr.bf16.mxu1 %v8056_v1  ;;  %v4773_v36 = vrot.slane %v4771_v10, 4  ;;  %v9446_v50 = vrot.slane %v4839_v51, 5 }
 0x2a0   : > { %v4749_v12 = vrot.slane %v4747_v6, 4 }
 0x2a1   : > { %v4774_v2 = vor.u32 %v4773_v36, %v9420_v25  ;;  %v8066_v36 = vld [vmem:[#allocation2 + $0x9c] sm:$0xff]  }
 0x2a2   : > { %7460 = vmatpush3.bf16.msra.mxu1 %v8056_v1  ;;  %v4782_v1 = vshrl.u32 %v4649_v52, 16  ;;  %v4750_v13 = vor.u32 %v4749_v12, %v9408_v46  ;;  %v4843_v52 = vshrl.u32 %v9424_v7, 16  ;;  %v9448_v12 = vld [vmem:[#allocation2 + $0x5c] sm:$0x1] }
 0x2a3   : > { %7461 = vmatprep.subr.bf16.mxu1 %v8061_v58 }
 0x2a4   : > { %7286 = vmatmul.mubr.bf16.gmra.mrb[40].mxu0 %v8057_v20  ;;  %v4732_v20 = vsel %vm8649_vm2, %v4727_v43, %v4731_v47  ;;  %v9443_v43 = vld [vmem:[#allocation2 + $0x70] sm:$0xf]  ;;  %v4751_v10 = vrot.slane %v4750_v13, 4  ;;  %v4845_v41 = vrot.slane %v4843_v52, 4  ;;  %v4779_v47 = vrot.slane %v4777_v55, 5 }
 0x2a5   : > { %7430 = vmatmul.mubr.bf16.gmra.mrb[24].mxu1 %v8053_v57  ;;  %7289 = vmatprep.mubr.bf16.mxu0 %v8059_v17  ;;  %v9416_v57 = vld [vmem:[#allocation2 + $0x58] sm:$0xf]  ;;  %v4655_v17 = vld [vmem:[#allocation2 + $0x60] sm:$0xf]  ;;  %v9429_v19 = vcombine.low %v4722_v38, %v4732_v20  ;;  %v4775_v38 = vrot.slane %v4774_v2, 4  ;;  %v4863_v20 = vshll.u32 %v9443_v43, 16 }
 0x2a6   : > { %7433 = vmatprep.mubr.bf16.mxu1 %v8055_v40  ;;  %7462 = vmatpush3.bf16.msra.mxu1 %v8061_v58  ;;  %v4740_v58 = vor.u32 %v4739_v53, %v4736_v56  ;;  %v4797_v40 = vrot.slane %v4795_v34, 4  ;;  %v4815_v44 = vshll.u32 %v9416_v57, 16  ;;  %v4819_v24 = vshrl.u32 %v9416_v57, 16  ;;  %v9438_v56 = vld [vmem:[#allocation2 + $0x50] sm:$0x1] }
 0x2a7   : > { %7463 = vmatprep.subr.bf16.mxu1 %v8065_v63  ;;  %v4830_v59 = vshrl.u32 %v4655_v17, 16  ;;  %v4833_v4 = vshll.u32 %v4655_v17, 16  ;;  %v4765_v34 = vrot.slane %v4764_v30, 4  ;;  %v4867_v32 = vshrl.u32 %v9443_v43, 16 }
 0x2a8   : > { %v9441_v6 = vrot.slane %v4815_v44, 5  ;;  %v4821_v28 = vrot.slane %v4819_v24, 4  ;;  %v4756_v24 = vsel %vm8649_vm2, %v4751_v10, %v9412_v35  ;;  %v4661_v35 = vld [vmem:[#allocation2 + $0x78] sm:$0xf]  ;;  %v9477_v52 = vrot.slane %v4863_v20, 5 }
 0x2a9   : > { %v4832_v39 = vrot.slane %v4830_v59, 4  ;;  %v4846_v59 = vor.u32 %v4845_v41, %v9446_v50  ;;  %v5393_v10 = vld [vmem:[#allocation2 + $0x30] sm:$0xe] }
 0x2aa   : > { %7464 = vmatpush3.bf16.msra.mxu1 %v8065_v63  ;;  %v4784_v63 = vrot.slane %v4782_v1, 4  ;;  %v4801_v1 = vshll.u32 %v9438_v56, 16  ;;  %v4822_v17 = vor.u32 %v4821_v28, %v9441_v6  ;;  %v4878_v28 = vshrl.u32 %v4661_v35, 16 }
 0x2ab   : > { %7465 = vmatprep.subr.bf16.mxu1 %v8068_v22 }
 0x2ac   : > { %7290 = vmatmul.mubr.bf16.gmra.mrb[44].mxu0 %v8062_v45  ;;  %v4658_v45 = vld [vmem:[#allocation2 + $0x6c] sm:$0xf]  ;;  %v4788_v53 = vor.u32 %v4787_v11, %v4784_v63  ;;  %v9453_v63 = vld [vmem:[#allocation2 + $0x68] sm:$0x1]  ;;  %v9483_v2 = vrot.slane %v4822_v17, 4  ;;  %v8070_v17 = vld [vmem:[#allocation2 + $0xc0] sm:$0xff]  }
 0x2ad   : > { %7434 = vmatmul.mubr.bf16.gmra.mrb[28].mxu1 %v8058_v15  ;;  %v4798_v15 = vor.u32 %v4797_v40, %v9422_v8  ;;  %v4854_v61 = vshrl.u32 %v4658_v45, 16  ;;  %v4857_v23 = vshll.u32 %v4658_v45, 16  ;;  %v4849_v51 = vshll.u32 %v9453_v63, 16  ;;  %v9479_v45 = vld [vmem:[#allocation2 + $0x7c] sm:$0xf] }
 0x2ae   : > { %7437 = vmatprep.mubr.bf16.mxu1 %v8060_v26  ;;  %7466 = vmatpush3.bf16.msra.mxu1 %v8068_v22  ;;  %v9431_v22 = vrot.slane %v4740_v58, 4  ;;  %v4835_v26 = vrot.slane %v4833_v4, 5  ;;  %v4789_v31 = vrot.slane %v4788_v53, 4  ;;  %v4770_v4 = vsel %vm8649_vm2, %v4765_v34, %v9420_v25 }
 0x2af   : > { %7467 = vmatprep.subr.bf16.mxu1 %v8071_v37  ;;  %v4799_v58 = vrot.slane %v4798_v15, 4  ;;  %v4856_v40 = vrot.slane %v4854_v61, 4  ;;  %v4869_v25 = vrot.slane %v4867_v32, 4  ;;  %v4887_v61 = vshll.u32 %v9479_v45, 16  ;;  %v9517_v32 = vld [vmem:[#allocation2 + $0x84] sm:$0xf] }
 0x2b0   : > { %v4836_v11 = vor.u32 %v4835_v26, %v4832_v39  ;;  %v4746_v44 = vsel %vm8649_vm2, %v9431_v22, %v9408_v46  ;;  %v4794_v13 = vsel %vm8649_vm2, %v4789_v31, %v9422_v8  ;;  %v4825_v46 = vshll.u32 %v9448_v12, 16  ;;  %v9472_v22 = vld [vmem:[#allocation2 + $0x74] sm:$0x1]  ;;  %v5398_v31 = vld [vmem:[#allocation2 + $0x6c] sm:$0xe] }
 0x2b1   : > { %v9487_v15 = vcombine.low %v4746_v44, %v4756_v24  ;;  %v4881_v26 = vshll.u32 %v4661_v35, 16  ;;  %v9500_v34 = vrot.slane %v4849_v51, 5  ;;  %v6750_v44 = vrot.slane %v5393_v10, 9  ;;  %v5395_v51 = vld [vmem:[#allocation2 + $0x48] sm:$0xe] }
 0x2b2   : > { %7468 = vmatpush3.bf16.msra.mxu1 %v8071_v37  ;;  %v4808_v37 = vrot.slane %v4806_v29, 4  ;;  %v4859_v29 = vrot.slane %v4857_v23, 5  ;;  %v9485_v8 = vrot.slane %v4836_v11, 4  ;;  %v9492_v39 = vrot.slane %v4825_v46, 5  ;;  %v9637_v35 = vld [vmem:[#allocation2 + $0xb0] sm:$0x1] }
 0x2b3   : > { %7501 = vmatprep.subr.bf16.mxu1 %v9410_v60  ;;  %v4891_v23 = vshrl.u32 %v9479_v45, 16  ;;  %v9529_v24 = vrot.slane %v4881_v26, 5  ;;  %v5396_v26 = vld [vmem:[#allocation2 + $0x54] sm:$0xe] }
 0x2b4   : > { %v4812_v5 = vor.u32 %v4811_v54, %v4808_v37  ;;  %v4860_v53 = vor.u32 %v4859_v29, %v4856_v40  ;;  %v9489_v37 = vrot.slane %v4846_v59, 4  ;;  %v4873_v54 = vshll.u32 %v9472_v22, 16 }
 0x2b5   : > { %7438 = vmatmul.mubr.bf16.gmra.mrb[0].mxu1 %v8063_v3  ;;  %v4803_v3 = vrot.slane %v4801_v1, 5  ;;  %v9525_v29 = vrot.slane %v4878_v28, 4  ;;  %v9533_v59 = vrot.slane %v4891_v23, 4  ;;  %v5478_v28 = vrot.slane %v9386_v48, 5 }
 0x2b6   : > { %7441 = vmatprep.mubr.bf16.mxu1 %v8064_v9  ;;  %v4780_v9 = vsel %vm8649_vm2, %v4775_v38, %v4779_v47  ;;  %v9481_v30 = vrot.slane %v4812_v5, 4  ;;  %v4870_v38 = vor.u32 %v4869_v25, %v9477_v52  ;;  %v8069_v47 = vld [vmem:[#allocation2 + $0xb4] sm:$0xff]   ;;  %v9515_v20 = vrot.slane %v4860_v53, 4  ;;  %v9631_v25 = vld [vmem:[#allocation2 + $0xac] sm:$0xf] }
 0x2b7   : > { %v4804_v55 = vsel %vm8649_vm2, %v4799_v58, %v4803_v3  ;;  %v9496_v1 = vcombine.low %v4770_v4, %v4780_v9  ;;  %v9523_v40 = vrot.slane %v4873_v54, 5  ;;  %v9531_v3 = vrot.slane %v4887_v61, 5  ;;  %v9535_v4 = vld [vmem:[#allocation2 + $0x90] sm:$0xf] }
 0x2b8   : > { %v9498_v41 = vcombine.low %v4794_v13, %v4804_v55  ;;  %v5471_v9 = vrot.slane %v9381_v33, 5  ;;  %v9538_v13 = vrot.slane %v4870_v38, 4  ;;  %v5474_v54 = vrot.slane %v9384_v16, 5  ;;  %v5397_v38 = vld [vmem:[#allocation2 + $0x60] sm:$0xe] }
 0x2b9   : > { %v5480_v16 = vrot.slane %v5478_v28, 4  ;;  %v5481_v48 = vrot.slane %v9414_v62, 5  ;;  %v5492_v62 = vrot.slane %v9416_v57, 5  ;;  %v5402_v33 = vld [vmem:[#allocation2 + $0x9c] sm:$0xe] }
 0x2ba   : > { %v5473_v53 = vrot.slane %v5471_v9, 4  ;;  %v9550_v10 = vsel %vm9141_vm8, %v6750_v44, %v5471_v9  ;;  %v5485_v44 = vrot.slane %v9393_v49, 5  ;;  %v6753_v9 = vrot.slane %v5396_v26, 9  ;;  %v9574_v49 = vld [vmem:[#allocation2 + $0x80] sm:$0x1] }
 0x2bb   : > { %v9566_v58 = vsel %vm9141_vm8, %v5480_v16, %v5481_v48  ;;  %v5494_v57 = vrot.slane %v5492_v62, 4  ;;  %v5399_v16 = vld [vmem:[#allocation2 + $0x78] sm:$0xe]  ;;  %v5506_v48 = vrot.slane %v9443_v43, 5  ;;  %v9606_v43 = vld [vmem:[#allocation2 + $0x98] sm:$0x1] }
 0x2bc   : > { %v5487_v5 = vrot.slane %v5485_v44, 4 }
 0x2bd   : > { %7442 = vmatmul.mubr.bf16.gmra.mrb[4].mxu1 %v8066_v36  ;;  %v5394_v36 = vld [vmem:[#allocation2 + $0x3c] sm:$0xe] }
 0x2be   : > { %7445 = vmatprep.mubr.bf16.mxu1 %v8067_v0  ;;  %v9527_v0 = vld [vmem:[#allocation2 + $0x88] sm:$0xf]  ;;  %v6751_v55 = vrot.slane %v5394_v36, 9  ;;  %v9554_v36 = vsel %vm9141_vm8, %v5473_v53, %v5474_v54  ;;  %v5488_v53 = vrot.slane %v9438_v56, 5  ;;  %v9582_v56 = vsel %vm9141_vm8, %v6753_v9, %v5492_v62  ;;  %v9614_v54 = vld [vmem:[#allocation2 + $0xa0] sm:$0xf] }
 0x2bf   : > { %10231 = vst [vmem:[#allocation17_spill] sm:$0xff] %v9582_v56  ;;  %v9623_v62 = vld [vmem:[#allocation2 + $0xa4] sm:$0x1]  ;;  %v5406_v56 = vld [vmem:[#allocation2 + $0xcc] sm:$0xe] }
 0x2c0   : > { %v9561_v11 = vsel %vm9141_vm8, %v6751_v55, %v5478_v28  ;;  %v5495_v55 = vrot.slane %v9448_v12, 5  ;;  %v5499_v28 = vrot.slane %v9424_v7, 5  ;;  %v9587_v12 = vsel %vm9141_vm8, %v5487_v5, %v5488_v53  ;;  %v5401_v53 = vld [vmem:[#allocation2 + $0x90] sm:$0xe] }
 0x2c1   : > { %10232 = vst [vmem:[#allocation18_spill] sm:$0xff] %v9587_v12  ;;  %v5509_v5 = vrot.slane %v9472_v22, 5  ;;  %v6758_v61 = vrot.slane %v5401_v53, 9  ;;  %v9686_v12 = vld [vmem:[#allocation2 + $0xc8] sm:$0x1] }
 0x2c2   : > { %v5501_v7 = vrot.slane %v5499_v28, 4 }
 0x2c5   : > { %7446 = vmatmul.mubr.bf16.gmra.mrb[8].mxu1 %v8069_v47  ;;  %v8072_v47 = vld [vmem:[#allocation2 + $0xcc] sm:$0xff]  }
 0x2c6   : > { %7449 = vmatprep.mubr.bf16.mxu1 %v8070_v17  ;;  %v6752_v17 = vrot.slane %v5395_v51, 9  ;;  %v6754_v51 = vrot.slane %v5397_v38, 9  ;;  %v6755_v38 = vrot.slane %v5398_v31, 9  ;;  %v9597_v31 = vsel %vm9141_vm8, %v5494_v57, %v5495_v55 }
 0x2c7   : > { %10233 = vst [vmem:[#allocation19_spill] sm:$0xff] %v9597_v31  ;;  %v5508_v55 = vrot.slane %v5506_v48, 4  ;;  %v6756_v57 = vrot.slane %v5399_v16, 9  ;;  %v5516_v16 = vrot.slane %v9574_v49, 5  ;;  %v5534_v31 = vrot.slane %v9614_v54, 5 }
 0x2c8   : > { %v9578_v26 = vsel %vm9141_vm8, %v6752_v17, %v5485_v44  ;;  %v5400_v17 = vld [vmem:[#allocation2 + $0x84] sm:$0xe]  ;;  %v9591_v44 = vld [vmem:[#allocation2 + $0x8c] sm:$0x1]  ;;  %v9620_v22 = vsel %vm9141_vm8, %v6755_v38, %v5506_v48  ;;  %v5403_v38 = vld [vmem:[#allocation2 + $0xa8] sm:$0xe] }
 0x2c9   : > { %10236 = vst [vmem:[#allocation22_spill] sm:$0xff] %v9620_v22  ;;  %v6757_v23 = vrot.slane %v5400_v17, 9  ;;  %v5523_v48 = vrot.slane %v9591_v44, 5 }
 0x2cd   : > { %7450 = vmatmul.mubr.bf16.gmra.mrb[12].mxu1 %v8072_v47  ;;  %v5502_v47 = vrot.slane %v9453_v63, 5  ;;  %v9604_v63 = vld [vmem:[#allocation2 + $0x94] sm:$0xf] }
 0x2ce   : > { %7469 = vmatprep.mubr.bf16.mxu1 %v9403_v21  ;;  %v9601_v21 = vsel %vm9141_vm8, %v6754_v51, %v5499_v28  ;;  %v5513_v28 = vrot.slane %v9479_v45, 5  ;;  %v8074_v51 = vld [vmem:[#allocation8 + $0x208] sm:$0xff]   ;;  %v5527_v17 = vrot.slane %v9604_v63, 5 }
 0x2cf   : > { %10234 = vst [vmem:[#allocation23_spill] sm:$0xff] %v9601_v21  ;;  %v9612_v9 = vsel %vm9141_vm8, %v5501_v7, %v5502_v47  ;;  %v9627_v7 = vsel %vm9141_vm8, %v5508_v55, %v5509_v5  ;;  %v5520_v47 = vrot.slane %v9527_v0, 5  ;;  %v9639_v5 = vld [vmem:[#allocation2 + $0xb8] sm:$0xf]  ;;  %v5530_v21 = vrot.slane %v9606_v43, 5 }
 0x2d0   : > { %10235 = vst [vmem:[#allocation20_spill] sm:$0xff] %v9612_v9  ;;  %10237 = vst [vmem:[#allocation21_spill] sm:$0xff] %v9627_v7  ;;  %v5515_v45 = vrot.slane %v5513_v28, 4  ;;  %v9643_v55 = vsel %vm9141_vm8, %v6756_v57, %v5513_v28  ;;  %v6759_v9 = vrot.slane %v5402_v33, 9  ;;  %v5529_v22 = vrot.slane %v5527_v17, 4 }
 0x2d1   : > { %10238 = vst [vmem:[#allocation24_spill] sm:$0xff] %v9643_v55  ;;  %v9647_v53 = vsel %vm9141_vm8, %v6757_v23, %v5520_v47  ;;  %v5522_v46 = vrot.slane %v5520_v47, 4  ;;  %v5404_v57 = vld [vmem:[#allocation2 + $0xb4] sm:$0xe]  ;;  %v9658_v23 = vld [vmem:[#allocation2 + $0xbc] sm:$0x1]  ;;  %v9668_v28 = vsel %vm9141_vm8, %v6758_v61, %v5527_v17 }
 0x2d2   : > { %10239 = vst [vmem:[#allocation25_spill] sm:$0xff] %v9647_v53  ;;  %v9652_v7 = vsel %vm9141_vm8, %v5515_v45, %v5516_v16  ;;  %10242 = vst [vmem:[#allocation28_spill] sm:$0xff] %v9668_v28  ;;  %v5537_v16 = vrot.slane %v9623_v62, 5  ;;  %v5405_v47 = vld [vmem:[#allocation2 + $0xc0] sm:$0xe]  ;;  %v9677_v33 = vsel %vm9141_vm8, %v5529_v22, %v5530_v21  ;;  %v9683_v17 = vsel %vm9141_vm8, %v6759_v9, %v5534_v31 }
 0x2d3   : > { %10240 = vst [vmem:[#allocation26_spill] sm:$0xff] %v9652_v7  ;;  %v9671_v45 = vld [vmem:[#allocation2 + $0xc4] sm:$0xf]  ;;  %10243 = vst [vmem:[#allocation29_spill] sm:$0xff] %v9677_v33  ;;  %v5541_v7 = vrot.slane %v9631_v25, 5  ;;  %v6761_v55 = vrot.slane %v5404_v57, 9 }
 0x2d4   : > { %10244 = vst [vmem:[#allocation30_spill] sm:$0xff] %v9683_v17  ;;  %v5544_v21 = vrot.slane %v9637_v35, 5  ;;  %v5548_v22 = vrot.slane %v9639_v5, 5  ;;  %v5551_v61 = vrot.slane %v9658_v23, 5  ;;  %v5555_v57 = vrot.slane %v9671_v45, 5  ;;  %v8076_v33 = vld [vmem:[#allocation8 + $0x218] sm:$0xff]  }
 0x2d5   : > { %7470 = vmatmul.mubr.bf16.vlgmr.msra.gmra.mrb[16].mxu1 %v9429_v19  ;;  %v9664_v19 = vsel %vm9141_vm8, %v5522_v46, %v5523_v48  ;;  %v5536_v46 = vrot.slane %v5534_v31, 4  ;;  %v6760_v48 = vrot.slane %v5403_v38, 9  ;;  %v6762_v38 = vrot.slane %v5405_v47, 9  ;;  %v9698_v28 = vld [vmem:[#allocation2 + $0xd0] sm:$0xf] }
 0x2d6   : > { %7502 = vmatpush3.bf16.msra.mxu1 %v9410_v60  ;;  %7473 = vmatprep.mubr.bf16.mxu1 %v9487_v15  ;;  %10241 = vst [vmem:[#allocation27_spill] sm:$0xff] %v9664_v19  ;;  %v8075_v60 = vld [vmem:[#allocation8 + $0x210] sm:$0xff]   ;;  %v5543_v31 = vrot.slane %v5541_v7, 4  ;;  %v9706_v47 = vsel %vm9141_vm8, %v6761_v55, %v5548_v22  ;;  %v9708_v9 = vld [vmem:[#allocation2 + $0xd4] sm:$0x1]  ;;  %v5557_v17 = vrot.slane %v5555_v57, 4 }
 0x2d7   : > { %7503 = vmatprep.subr.bf16.mxu1 %v8074_v51  ;;  %v9690_v15 = vsel %vm9141_vm8, %v5536_v46, %v5537_v16  ;;  %v9702_v16 = vsel %vm9141_vm8, %v6760_v48, %v5541_v7  ;;  %v6763_v46 = vrot.slane %v5406_v56, 9  ;;  %v5558_v19 = vrot.slane %v9686_v12, 5 }
 0x2d8   : > { %10245 = vst [vmem:[#allocation31_spill] sm:$0xff] %v9690_v15  ;;  %v9712_v15 = vsel %vm9141_vm8, %v5543_v31, %v5544_v21  ;;  %v5562_v53 = vrot.slane %v9698_v28, 5  ;;  %v9725_v56 = vsel %vm9141_vm8, %v6762_v38, %v5555_v57  ;;  %v5565_v48 = vrot.slane %v9708_v9, 5  ;;  %v8077_v31 = vld [vmem:[#allocation8 + $0x220] sm:$0xff]  }
 0x2d9   : > { %v4897_v38 = vshll.u32 %v9574_v49, 16  ;;  %v4935_v57 = vshll.u32 %v9604_v63, 16 }
 0x2da   : > { %7504 = vmatpush3.bf16.msra.mxu1 %v8074_v51  ;;  %v5550_v51 = vrot.slane %v5548_v22, 4  ;;  %v5564_v22 = vrot.slane %v5562_v53, 4 }
 0x2db   : > { %7505 = vmatprep.subr.bf16.mxu1 %v8075_v60 }
 0x2dc   : > { %v9721_v55 = vsel %vm9141_vm8, %v5550_v51, %v5551_v61  ;;  %v9737_v61 = vsel %vm9141_vm8, %v6763_v46, %v5562_v53  ;;  %v10246_v51 = vshrl.u32 %v9517_v32, 16  ;;  %v9752_v49 = vsel %vm9141_vm8, %v5564_v22, %v5565_v48 }
 0x2dd   : > { %7474 = vmatmul.mubr.bf16.gmra.mrb[20].mxu1 %v9496_v1  ;;  %v9733_v1 = vsel %vm9141_vm8, %v5557_v17, %v5558_v19  ;;  %v4884_v19 = vor.u32 %v9529_v24, %v9525_v29  ;;  %v4894_v17 = vor.u32 %v9533_v59, %v9531_v3  ;;  %v10247_v46 = vshll.u32 %v9517_v32, 16 }
 0x2de   : > { %7477 = vmatprep.mubr.bf16.mxu1 %v9498_v41  ;;  %7506 = vmatpush3.bf16.msra.mxu1 %v8075_v60  ;;  %v4939_v41 = vshrl.u32 %v9604_v63, 16  ;;  %v4904_v53 = vrot.slane %v10246_v51, 4  ;;  %v10248_v63 = vshll.u32 %v9527_v0, 16  ;;  %v10249_v60 = vshrl.u32 %v9527_v0, 16 }
 0x2df   : > { %7507 = vmatprep.subr.bf16.mxu1 %v8076_v33  ;;  %v4907_v21 = vrot.slane %v10247_v46, 5  ;;  %v4866_v59 = vsel %vm8649_vm2, %v9515_v20, %v9477_v52  ;;  %v4876_v32 = vsel %vm8649_vm2, %v9538_v13, %v9523_v40  ;;  %v10250_v48 = vshrl.u32 %v9535_v4, 16  ;;  %v4670_v46 = vld [vmem:[#allocation2 + $0x9c] sm:$0xf] }
 0x2e0   : > { %v9758_v7 = vrot.slane %v10248_v63, 5  ;;  %v4917_v29 = vrot.slane %v10249_v60, 4  ;;  %v10251_v0 = vshll.u32 %v9535_v4, 16  ;;  %v10252_v51 = vsel %vm8649_vm2, %v9483_v2, %v9492_v39 }
 0x2e1   : > { %v4928_v22 = vrot.slane %v10250_v48, 4  ;;  %v10253_v52 = vsel %vm8649_vm2, %v9481_v30, %v9441_v6  ;;  %v9786_v40 = vrot.slane %v4935_v57, 5  ;;  %v4941_v13 = vrot.slane %v4939_v41, 4  ;;  %v4673_v30 = vld [vmem:[#allocation2 + $0xa8] sm:$0xf] }
 0x2e2   : > { %7508 = vmatpush3.bf16.msra.mxu1 %v8076_v33  ;;  %v4931_v60 = vrot.slane %v10251_v0, 5  ;;  %v6729_v20 = vcombine.low %v10253_v52, %v10252_v51  ;;  %v8078_v33 = vld [vmem:[#allocation8 + $0x228] sm:$0xff]   ;;  %v10254_v4 = vsel %vm8649_vm2, %v9489_v37, %v9500_v34  ;;  %v10255_v2 = vsel %vm8649_vm2, %v9485_v8, %v9446_v50 }
 0x2e3   : > { %7509 = vmatprep.subr.bf16.mxu1 %v8077_v31  ;;  %v6730_v39 = vcombine.low %v10255_v2, %v10254_v4  ;;  %v4885_v63 = vrot.slane %v4884_v19, 4  ;;  %v4899_v6 = vrot.slane %v4897_v38, 5  ;;  %v6731_v57 = vcombine.low %v4866_v59, %v4876_v32  ;;  %v8079_v19 = vld [vmem:[#allocation8 + $0x230] sm:$0xff]   ;;  %v8080_v2 = vld [vmem:[#allocation8 + $0x238] sm:$0xff]  }
 0x2e4   : > { %v4895_v48 = vrot.slane %v4894_v17, 4  ;;  %v4908_v41 = vor.u32 %v4907_v21, %v4904_v53  ;;  %v4918_v0 = vor.u32 %v4917_v29, %v9758_v7  ;;  %v4932_v51 = vor.u32 %v4931_v60, %v4928_v22 }
 0x2e5   : > { %7478 = vmatmul.mubr.bf16.gmra.mrb[24].mxu1 %v6729_v20  ;;  %v4950_v52 = vshrl.u32 %v4670_v46, 16  ;;  %v4953_v37 = vshll.u32 %v4670_v46, 16  ;;  %v4959_v34 = vshll.u32 %v9614_v54, 16  ;;  %v4942_v24 = vor.u32 %v4941_v13, %v9786_v40 }
 0x2e6   : > { %7481 = vmatprep.mubr.bf16.mxu1 %v6730_v39  ;;  %7510 = vmatpush3.bf16.msra.mxu1 %v8077_v31  ;;  %v4963_v50 = vshrl.u32 %v9614_v54, 16  ;;  %v4974_v8 = vshrl.u32 %v4673_v30, 16  ;;  %v4977_v38 = vshll.u32 %v4673_v30, 16  ;;  %v4890_v21 = vsel %vm8649_vm2, %v4885_v63, %v9531_v3  ;;  %v4676_v30 = vld [vmem:[#allocation2 + $0xb4] sm:$0xf] }
 0x2e7   : > { %7511 = vmatprep.subr.bf16.mxu1 %v8078_v33  ;;  %v4921_v17 = vshll.u32 %v9591_v44, 16  ;;  %v4983_v31 = vshll.u32 %v9631_v25, 16  ;;  %v4987_v53 = vshrl.u32 %v9631_v25, 16  ;;  %v4900_v29 = vsel %vm8649_vm2, %v4895_v48, %v4899_v6 }
 0x2e8   : > { %v4909_v59 = vrot.slane %v4908_v41, 4  ;;  %v4919_v32 = vrot.slane %v4918_v0, 4  ;;  %v4945_v54 = vshll.u32 %v9606_v43, 16  ;;  %v4933_v22 = vrot.slane %v4932_v51, 4  ;;  %v4679_v51 = vld [vmem:[#allocation2 + $0xc0] sm:$0xf] }
 0x2e9   : > { %v4952_v60 = vrot.slane %v4950_v52, 4  ;;  %v4955_v20 = vrot.slane %v4953_v37, 5  ;;  %v9811_v13 = vrot.slane %v4959_v34, 5  ;;  %v4943_v3 = vrot.slane %v4942_v24, 4 }
 0x2ea   : > { %7512 = vmatpush3.bf16.msra.mxu1 %v8078_v33  ;;  %v4965_v46 = vrot.slane %v4963_v50, 4  ;;  %v4976_v44 = vrot.slane %v4974_v8, 4  ;;  %v4979_v4 = vrot.slane %v4977_v38, 5  ;;  %v6732_v25 = vcombine.low %v4890_v21, %v4900_v29 }
 0x2eb   : > { %7513 = vmatprep.subr.bf16.mxu1 %v8079_v19  ;;  %v4923_v39 = vrot.slane %v4921_v17, 5  ;;  %v9813_v63 = vrot.slane %v4983_v31, 5  ;;  %v4989_v6 = vrot.slane %v4987_v53, 4  ;;  %v4914_v43 = vsel %vm8649_vm2, %v4909_v59, %v9758_v7 }
 0x2ec   : > { %v4947_v48 = vrot.slane %v4945_v54, 5  ;;  %v4938_v33 = vsel %vm8649_vm2, %v4933_v22, %v9786_v40  ;;  %v4956_v41 = vor.u32 %v4955_v20, %v4952_v60  ;;  %v4969_v0 = vshll.u32 %v9623_v62, 16  ;;  %v4682_v60 = vld [vmem:[#allocation2 + $0xcc] sm:$0xf] }
 0x2ed   : > { %7482 = vmatmul.mubr.bf16.gmra.mrb[28].mxu1 %v6731_v57  ;;  %v4924_v24 = vsel %vm8649_vm2, %v4919_v32, %v4923_v39  ;;  %v4966_v52 = vor.u32 %v4965_v46, %v9811_v13  ;;  %v4980_v7 = vor.u32 %v4979_v4, %v4976_v44  ;;  %v4998_v37 = vshrl.u32 %v4676_v30, 16 }
 0x2ee   : > { %7485 = vmatprep.mubr.bf16.mxu1 %v6732_v25  ;;  %7514 = vmatpush3.bf16.msra.mxu1 %v8079_v19  ;;  %v4948_v57 = vsel %vm8649_vm2, %v4943_v3, %v4947_v48  ;;  %v4990_v34 = vor.u32 %v4989_v6, %v9813_v63  ;;  %v5001_v50 = vshll.u32 %v4676_v30, 16  ;;  %v5007_v8 = vshll.u32 %v9639_v5, 16 }
 0x2ef   : > { %7515 = vmatprep.subr.bf16.mxu1 %v8080_v2  ;;  %v5011_v40 = vshrl.u32 %v9639_v5, 16  ;;  %v5022_v38 = vshrl.u32 %v4679_v51, 16  ;;  %v5025_v21 = vshll.u32 %v4679_v51, 16  ;;  %v5031_v62 = vshll.u32 %v9671_v45, 16 }
 0x2f0   : > { %v5035_v19 = vshrl.u32 %v9671_v45, 16  ;;  %v6733_v17 = vcombine.low %v4914_v43, %v4924_v24  ;;  %v6734_v31 = vcombine.low %v4938_v33, %v4948_v57  ;;  %v4957_v53 = vrot.slane %v4956_v41, 4 }
 0x2f1   : > { %v4971_v29 = vrot.slane %v4969_v0, 5  ;;  %v4967_v59 = vrot.slane %v4966_v52, 4  ;;  %v4981_v32 = vrot.slane %v4980_v7, 4  ;;  %v4993_v54 = vshll.u32 %v9637_v35, 16 }
 0x2f2   : > { %7516 = vmatpush3.bf16.msra.mxu1 %v8080_v2  ;;  %v5000_v22 = vrot.slane %v4998_v37, 4  ;;  %v4991_v20 = vrot.slane %v4990_v34, 4  ;;  %v5003_v3 = vrot.slane %v5001_v50, 5  ;;  %v5009_v5 = vrot.slane %v5007_v8, 5 }
 0x2f3   : > { %v5013_v46 = vrot.slane %v5011_v40, 4  ;;  %v5024_v44 = vrot.slane %v5022_v38, 4  ;;  %v5027_v4 = vrot.slane %v5025_v21, 5  ;;  %v5033_v25 = vrot.slane %v5031_v62, 5 }
 0x2f4   : > { %v5037_v45 = vrot.slane %v5035_v19, 4  ;;  %v5046_v39 = vshrl.u32 %v4682_v60, 16  ;;  %v5049_v6 = vshll.u32 %v4682_v60, 16  ;;  %v5055_v2 = vshll.u32 %v9698_v28, 16 }
 0x2f5   : > { %7486 = vmatmul.mubr.bf16.gmra.mrb[0].mxu1 %v6733_v17  ;;  %v5059_v30 = vshrl.u32 %v9698_v28, 16  ;;  %v4962_v35 = vsel %vm8649_vm2, %v4957_v53, %v9811_v13  ;;  %v4995_v43 = vrot.slane %v4993_v54, 5  ;;  %v4972_v48 = vsel %vm8649_vm2, %v4967_v59, %v4971_v29 }
 0x2f6   : > { %7489 = vmatprep.mubr.bf16.mxu1 %v6734_v31  ;;  %v4986_v24 = vsel %vm8649_vm2, %v4981_v32, %v9813_v63  ;;  %v5004_v33 = vor.u32 %v5003_v3, %v5000_v22  ;;  %v5014_v41 = vor.u32 %v5013_v46, %v5009_v5  ;;  %v5017_v51 = vshll.u32 %v9658_v23, 16  ;;  %v8143_v32 = vld [vmem:[#allocation2 + $0x1c] sm:$0xf] }
 0x2f7   : > { %v4996_v0 = vsel %vm8649_vm2, %v4991_v20, %v4995_v43  ;;  %v5028_v28 = vor.u32 %v5027_v4, %v5024_v44  ;;  %v5038_v57 = vor.u32 %v5037_v45, %v5033_v25  ;;  %v5048_v52 = vrot.slane %v5046_v39, 4  ;;  %v8081_v3 = vld [vmem:[#allocation9] sm:$0xff]   ;;  %v8083_v39 = vld [vmem:[#allocation9 + $0x10] sm:$0xff]  }
 0x2f8   : > { %v5051_v7 = vrot.slane %v5049_v6, 5  ;;  %v5057_v13 = vrot.slane %v5055_v2, 5  ;;  %v5061_v37 = vrot.slane %v5059_v30, 4  ;;  %v6735_v34 = vcombine.low %v4962_v35, %v4972_v48  ;;  %v5391_v4 = vld [vmem:[#allocation2 + $0x18] sm:$0xe]  ;;  %7549 = vmatprep.subr.bf16.mxu0 %v8081_v3 }
 0x2f9   : > { %v5041_v50 = vshll.u32 %v9686_v12, 16  ;;  %v6736_v8 = vcombine.low %v4986_v24, %v4996_v0  ;;  %v5005_v40 = vrot.slane %v5004_v33, 4  ;;  %v5015_v38 = vrot.slane %v5014_v41, 4  ;;  %7550 = vmatpush3.bf16.msra.mxu0 %v8081_v3  ;;  %v8144_v30 = vld [vmem:[#allocation2 + $0x28] sm:$0xf]  ;;  %v8084_v24 = vld [vmem:[#allocation9 + $0x18] sm:$0xff]  }
 0x2fa   : > { %v5029_v63 = vrot.slane %v5028_v28, 4  ;;  %v5039_v21 = vrot.slane %v5038_v57, 4  ;;  %v5019_v62 = vrot.slane %v5017_v51, 5  ;;  %v5052_v19 = vor.u32 %v5051_v7, %v5048_v52  ;;  %v5392_v41 = vld [vmem:[#allocation2 + $0x24] sm:$0xe]  ;;  %v8085_v28 = vld [vmem:[#allocation9 + $0x20] sm:$0xff]  }
 0x2fb   : > { %v5062_v17 = vor.u32 %v5061_v37, %v5057_v13  ;;  %v5065_v23 = vshll.u32 %v9708_v9, 16  ;;  %v5043_v31 = vrot.slane %v5041_v50, 5  ;;  %v5010_v53 = vsel %vm8649_vm2, %v5005_v40, %v5009_v5  ;;  %v8082_v9 = vld [vmem:[#allocation9 + $0x8] sm:$0xff]   ;;  %v10260_v50 = vld [vmem:[#allocation17_spill] sm:$0xff]  ;;  %v10263_v40 = vld [vmem:[#allocation23_spill] sm:$0xff] }
 0x2fc   : > { %v5020_v29 = vsel %vm8649_vm2, %v5015_v38, %v5019_v62  ;;  %v5034_v12 = vsel %vm8649_vm2, %v5029_v63, %v5033_v25  ;;  %v5457_v54 = vrot.slane %v8143_v32, 5  ;;  %v5053_v22 = vrot.slane %v5052_v19, 4  ;;  %7551 = vmatprep.subr.bf16.mxu0 %v8082_v9  ;;  %v10258_v37 = vld [vmem:[#allocation18_spill] sm:$0xff]  ;;  %v10264_v38 = vld [vmem:[#allocation20_spill] sm:$0xff]  ;;  %v10267_v62 = vld [vmem:[#allocation21_spill] sm:$0xff] }
 0x2fd   : > { %7490 = vmatmul.mubr.bf16.gmra.mrb[4].mxu1 %v6735_v34  ;;  %v5044_v59 = vsel %vm8649_vm2, %v5039_v21, %v5043_v31  ;;  %v5063_v60 = vrot.slane %v5062_v17, 4  ;;  %v5067_v20 = vrot.slane %v5065_v23, 5  ;;  %v6737_v46 = vcombine.low %v5010_v53, %v5020_v29  ;;  %7552 = vmatpush3.bf16.msra.mxu0 %v8082_v9  ;;  %v10266_v21 = vld [vmem:[#allocation22_spill] sm:$0xff]  ;;  %v10273_v17 = vld [vmem:[#allocation27_spill] sm:$0xff]  ;;  %v10275_v23 = vld [vmem:[#allocation28_spill] sm:$0xff] }
 0x2fe   : > { %7493 = vmatprep.mubr.bf16.mxu1 %v6736_v8  ;;  %v6738_v44 = vcombine.low %v5034_v12, %v5044_v59  ;;  %v5459_v5 = vrot.slane %v5457_v54, 4  ;;  %v5058_v25 = vsel %vm8649_vm2, %v5053_v22, %v5057_v13  ;;  %v6748_v6 = vrot.slane %v5391_v4, 9  ;;  %7553 = vmatprep.subr.bf16.mxu0 %v8083_v39  ;;  %v10261_v8 = vld [vmem:[#allocation19_spill] sm:$0xff]  ;;  %v10270_v19 = vld [vmem:[#allocation26_spill] sm:$0xff]  ;;  %v10276_v31 = vld [vmem:[#allocation29_spill] sm:$0xff] }
 0x2ff   : > { %v5068_v45 = vsel %vm8649_vm2, %v5063_v60, %v5067_v20  ;;  %v5460_v2 = vrot.slane %v9373_v42, 5  ;;  %v5464_v35 = vrot.slane %v8144_v30, 5  ;;  %v6749_v51 = vrot.slane %v5392_v41, 9  ;;  %v10278_v29 = vld [vmem:[#allocation30_spill] sm:$0xff]  ;;  %v10279_v12 = vld [vmem:[#allocation31_spill] sm:$0xff]  ;;  %v8088_v41 = vld [vmem:[#allocation9 + $0x38] sm:$0xff]  }
 0x300   : > { %v6739_v43 = vcombine.low %v5058_v25, %v5068_v45  ;;  %v5458_v33 = vsel %vm9141_vm8, %v6748_v6, %v5457_v54  ;;  %v5467_v42 = vrot.slane %v9379_v27, 5  ;;  %v10256_v13 = vcombine.low %v9550_v10, %v9554_v36  ;;  %v10269_v36 = vld [vmem:[#allocation24_spill] sm:$0xff]  ;;  %v8086_v30 = vld [vmem:[#allocation9 + $0x28] sm:$0xff]  }
 0x301   : > { %v5461_v48 = vsel %vm9141_vm8, %v5459_v5, %v5460_v2  ;;  %v5466_v0 = vrot.slane %v5464_v35, 4  ;;  %7554 = vmatpush3.bf16.msra.mxu0 %v8083_v39  ;;  %v5465_v52 = vsel %vm9141_vm8, %v6749_v51, %v5464_v35  ;;  %v10257_v27 = vcombine.low %v9561_v11, %v9566_v58  ;;  %v10272_v11 = vld [vmem:[#allocation25_spill] sm:$0xff] }
 0x302   : > { %v6764_v18 = vcombine.low %v5458_v33, %v5461_v48  ;;  %7555 = vmatprep.subr.bf16.mxu0 %v8084_v24  ;;  %v10259_v34 = vcombine.low %v9578_v26, %v10258_v37  ;;  %v10262_v14 = vcombine.low %v10260_v50, %v10261_v8  ;;  %v10265_v63 = vcombine.low %v10263_v40, %v10264_v38 }
 0x303   : > { %v5468_v57 = vsel %vm9141_vm8, %v5466_v0, %v5467_v42  ;;  %v10268_v10 = vcombine.low %v10266_v21, %v10267_v62  ;;  %v10271_v58 = vcombine.low %v10269_v36, %v10270_v19  ;;  %v10274_v26 = vcombine.low %v10272_v11, %v10273_v17 }
 0x304   : > { %v6765_v7 = vcombine.low %v5465_v52, %v5468_v57  ;;  %v10277_v53 = vcombine.low %v10275_v23, %v10276_v31  ;;  %v10280_v59 = vcombine.low %v10278_v29, %v10279_v12  ;;  %v10281_v32 = vcombine.low %v9702_v16, %v9712_v15 }
 0x305   : > { %7494 = vmatmul.mubr.bf16.gmra.mrb[8].mxu1 %v6737_v46  ;;  %7556 = vmatpush3.bf16.msra.mxu0 %v8084_v24  ;;  %v10282_v54 = vcombine.low %v9706_v47, %v9721_v55  ;;  %v10283_v22 = vcombine.low %v9725_v56, %v9733_v1  ;;  %v10284_v15 = vcombine.low %v9737_v61, %v9752_v49  ;;  %v8087_v24 = vld [vmem:[#allocation9 + $0x30] sm:$0xff]  }
 0x306   : > { %7497 = vmatprep.mubr.bf16.mxu1 %v6738_v44  ;;  %7557 = vmatprep.subr.bf16.mxu0 %v8085_v28 }
 0x309   : > { %7558 = vmatpush3.bf16.msra.mxu0 %v8085_v28 }
 0x30a   : > { %7559 = vmatprep.subr.bf16.mxu0 %v8086_v30 }
 0x30d   : > { %7498 = vmatmul.mubr.bf16.gmra.mrb[12].mxu1 %v6739_v43  ;;  %7560 = vmatpush3.bf16.msra.mxu0 %v8086_v30 }
 0x30e   : > { %7517 = vmatprep.mubr.bf16.mxu1 %v6764_v18  ;;  %7561 = vmatprep.subr.bf16.mxu0 %v8087_v24 }
 0x311   : > { %7562 = vmatpush3.bf16.msra.mxu0 %v8087_v24 }
 0x312   : > { %7563 = vmatprep.subr.bf16.mxu0 %v8088_v41 }
 0x315   : > { %7518 = vmatmul.mubr.bf16.vlgmr.msra.gmra.mrb[16].mxu1 %v6765_v7  ;;  %7564 = vmatpush3.bf16.msra.mxu0 %v8088_v41 }
 0x316   : > { %7521 = vmatprep.mubr.bf16.mxu1 %v10256_v13 }
 0x31d   : > { %7522 = vmatmul.mubr.bf16.gmra.mrb[20].mxu1 %v10257_v27  ;;  %v9953_v27 = vld [vmem:[%s10167_s5] ss:$0 sm:$0xff] }
 0x31e   : > { %7525 = vmatprep.mubr.bf16.mxu1 %v10259_v34 }
 0x325   : > { %7526 = vmatmul.mubr.bf16.gmra.mrb[24].mxu1 %v10262_v14 }
 0x326   : > { %7529 = vmatprep.mubr.bf16.mxu1 %v10265_v63 }
 0x32d   : > { %7530 = vmatmul.mubr.bf16.gmra.mrb[28].mxu1 %v10268_v10 }
 0x32e   : > { %7533 = vmatprep.mubr.bf16.mxu1 %v10271_v58 }
 0x335   : > { %7534 = vmatmul.mubr.bf16.gmra.mrb[0].mxu1 %v10274_v26 }
 0x336   : > { %7537 = vmatprep.mubr.bf16.mxu1 %v10277_v53 }
 0x33d   : > { %7538 = vmatmul.mubr.bf16.gmra.mrb[4].mxu1 %v10280_v59 }
 0x33e   : > { %7541 = vmatprep.mubr.bf16.mxu1 %v10281_v32 }
 0x345   : > { %7542 = vmatmul.mubr.bf16.gmra.mrb[8].mxu1 %v10282_v54 }
 0x346   : > { %7545 = vmatprep.mubr.bf16.mxu1 %v10283_v22 }
 0x347   : > { %v9909_v60 = vpop.f32.mrb[48].mxu0 }
 0x348   : > { %v9911_v20 = vpop.f32.mrb[49].mxu0 }
 0x349   : > { %v9913_v3 = vpop.f32.mrb[50].mxu0 }
 0x34a   : > { %v9915_v9 = vpop.f32.mrb[51].mxu0 }
 0x34d   : > { %7546 = vmatmul.mubr.bf16.gmra.mrb[12].mxu1 %v10284_v15 }
 0x34f   : > { %v9920_v16 = vpop.f32.mrb[52].mxu0 }
 0x350   : > { %v9922_v47 = vpop.f32.mrb[53].mxu0 }
 0x351   : > { %v9924_v55 = vpop.f32.mrb[54].mxu0 }
 0x352   : > { %v9926_v56 = vpop.f32.mrb[55].mxu0 }
 0x357   : > { %v9928_v1 = vpop.f32.mrb[56].mxu0 }
 0x358   : > { %v9930_v46 = vpop.f32.mrb[57].mxu0 }
 0x359   : > { %v9932_v44 = vpop.f32.mrb[58].mxu0 }
 0x35a   : > { %v9934_v4 = vpop.f32.mrb[59].mxu0 }
 0x35f   : > { %v9936_v5 = vpop.f32.mrb[60].mxu0 }
 0x360   : > { %v9938_v61 = vpop.f32.mrb[61].mxu0 }
 0x361   : > { %v9940_v49 = vpop.f32.mrb[62].mxu0 }
 0x362   : > { %v9942_v25 = vpop.f32.mrb[63].mxu0 }
 0x367   : > { %v7279_v45 = vpop.f32.mrb[32].mxu0 }
 0x368   : > { %v2839_v39 = vpop.f32.mrb[33].mxu0 }
 0x369   : > { %v7280_v6 = vpop.f32.mrb[34].mxu0 }
 0x36a   : > { %v2842_v2 = vpop.f32.mrb[35].mxu0 }
 0x36f   : > { %v7283_v35 = vpop.f32.mrb[36].mxu0 }
 0x370   : > { %v2855_v43 = vpop.f32.mrb[37].mxu0 }
 0x371   : > { %v7284_v48 = vpop.f32.mrb[38].mxu0 }
 0x372   : > { %v2858_v33 = vpop.f32.mrb[39].mxu0 }
 0x377   : > { %v7287_v18 = vpop.f32.mrb[40].mxu0 }
 0x378   : > { %v2871_v0 = vpop.f32.mrb[41].mxu0 }
 0x379   : > { %v7288_v51 = vpop.f32.mrb[42].mxu0 }
 0x37a   : > { %v2874_v42 = vpop.f32.mrb[43].mxu0 }
 0x37f   : > { %v7291_v28 = vpop.f32.mrb[44].mxu0 }
 0x380   : > { %v9944_v57 = vpop.f32.mrb[45].mxu0 }
 0x381   : > { %v9946_v52 = vpop.f32.mrb[46].mxu0 }
 0x382   : > { %v9948_v7 = vpop.f32.mrb[47].mxu0 }
 0x3e8   : > { %v7519_v13 = vpop.f32.mrb[16].mxu1 }
 0x3e9   : > { %v7613_v37 = vadd.f32 %v7519_v13, %v7279_v45  ;;  %v5730_v34 = vpop.f32.mrb[17].mxu1 }
 0x3ea   : > { %v7614_v50 = vadd.f32 %v5730_v34, %v2839_v39  ;;  %v7520_v8 = vpop.f32.mrb[18].mxu1 }
 0x3eb   : > { %v5898_v14 = vadd.f32 %v7613_v37, %v9953_v27  ;;  %v7615_v40 = vadd.f32 %v7520_v8, %v7280_v6  ;;  %v5733_v38 = vpop.f32.mrb[19].mxu1 }
 0x3ec   : > { %v5896_v63 = vadd.f32 %v7614_v50, %v9953_v27  ;;  %v7616_v21 = vadd.f32 %v5733_v38, %v2842_v2 }
 0x3ed   : > { %v5899_v62 = vadd.f32 %v7615_v40, %v9953_v27  ;;  %v5930_v36 = vmax.f32 %v5898_v14, 0.0 }
 0x3ee   : > { %v5897_v10 = vadd.f32 %v7616_v21, %v9953_v27  ;;  %v5928_v58 = vmax.f32 %v5896_v63, 0.0 }
 0x3ef   : > { %v5931_v19 = vmax.f32 %v5899_v62, 0.0 }
 0x3f0   : > { %v5929_v11 = vmax.f32 %v5897_v10, 0.0  ;;  %v7523_v17 = vpop.f32.mrb[20].mxu1 }
 0x3f1   : > { %v5961_v26 = vpack.c.bf16 %v5931_v19, %v5930_v36  ;;  %v7617_v23 = vadd.f32 %v7523_v17, %v7283_v35  ;;  %v5746_v31 = vpop.f32.mrb[21].mxu1 }
 0x3f2   : > { %v7618_v53 = vadd.f32 %v5746_v31, %v2855_v43  ;;  %v7524_v29 = vpop.f32.mrb[22].mxu1  ;;  %v5960_v12 = vpack.c.bf16 %v5929_v11, %v5928_v58 }
 0x3f3   : > { %v5902_v59 = vadd.f32 %v7617_v23, %v9953_v27  ;;  %v7619_v32 = vadd.f32 %v7524_v29, %v7284_v48  ;;  %v5749_v54 = vpop.f32.mrb[23].mxu1 }
 0x3f4   : > { %v5900_v22 = vadd.f32 %v7618_v53, %v9953_v27  ;;  %v7620_v15 = vadd.f32 %v5749_v54, %v2858_v33  ;;  %7565 = vmatprep.mubr.bf16.mxu0 %v5960_v12 }
 0x3f5   : > { %v5903_v45 = vadd.f32 %v7619_v32, %v9953_v27  ;;  %7566 = vmatmul.mubr.bf16.vlgmr.msra.gmra.mrb[64].mxu0 %v5961_v26  ;;  %v5934_v6 = vmax.f32 %v5902_v59, 0.0 }
 0x3f6   : > { %v5901_v39 = vadd.f32 %v7620_v15, %v9953_v27  ;;  %v5932_v30 = vmax.f32 %v5900_v22, 0.0 }
 0x3f7   : > { %v5935_v2 = vmax.f32 %v5903_v45, 0.0 }
 0x3f8   : > { %v5933_v35 = vmax.f32 %v5901_v39, 0.0  ;;  %v7527_v43 = vpop.f32.mrb[24].mxu1 }
 0x3f9   : > { %v7621_v24 = vadd.f32 %v7527_v43, %v7287_v18  ;;  %v5762_v41 = vpop.f32.mrb[25].mxu1  ;;  %v5963_v13 = vpack.c.bf16 %v5935_v2, %v5934_v6 }
 0x3fa   : > { %v7622_v37 = vadd.f32 %v5762_v41, %v2871_v0  ;;  %v7528_v48 = vpop.f32.mrb[26].mxu1  ;;  %v5962_v34 = vpack.c.bf16 %v5933_v35, %v5932_v30 }
 0x3fb   : > { %v5906_v50 = vadd.f32 %v7621_v24, %v9953_v27  ;;  %v7623_v33 = vadd.f32 %v7528_v48, %v7288_v51  ;;  %v5765_v8 = vpop.f32.mrb[27].mxu1 }
 0x3fc   : > { %v5904_v14 = vadd.f32 %v7622_v37, %v9953_v27  ;;  %v7624_v40 = vadd.f32 %v5765_v8, %v2874_v42  ;;  %7569 = vmatprep.mubr.bf16.mxu0 %v5962_v34 }
 0x3fd   : > { %v5907_v38 = vadd.f32 %v7623_v33, %v9953_v27  ;;  %7570 = vmatmul.mubr.bf16.gmra.mrb[68].mxu0 %v5963_v13  ;;  %v5938_v21 = vmax.f32 %v5906_v50, 0.0 }
 0x3fe   : > { %v5905_v63 = vadd.f32 %v7624_v40, %v9953_v27  ;;  %v5936_v62 = vmax.f32 %v5904_v14, 0.0 }
 0x3ff   : > { %v5939_v18 = vmax.f32 %v5907_v38, 0.0 }
 0x400   : > { %v5937_v10 = vmax.f32 %v5905_v63, 0.0  ;;  %v7531_v0 = vpop.f32.mrb[28].mxu1 }
 0x401   : > { %v7625_v36 = vadd.f32 %v7531_v0, %v7291_v28  ;;  %v5778_v19 = vpop.f32.mrb[29].mxu1  ;;  %v5965_v58 = vpack.c.bf16 %v5939_v18, %v5938_v21 }
 0x402   : > { %v7626_v51 = vadd.f32 %v5778_v19, %v9944_v57  ;;  %v7532_v11 = vpop.f32.mrb[30].mxu1  ;;  %v5964_v17 = vpack.c.bf16 %v5937_v10, %v5936_v62 }
 0x403   : > { %v5910_v42 = vadd.f32 %v7625_v36, %v9953_v27  ;;  %v7627_v26 = vadd.f32 %v7532_v11, %v9946_v52  ;;  %v5781_v23 = vpop.f32.mrb[31].mxu1 }
 0x404   : > { %v5908_v31 = vadd.f32 %v7626_v51, %v9953_v27  ;;  %v7628_v53 = vadd.f32 %v5781_v23, %v9948_v7  ;;  %7573 = vmatprep.mubr.bf16.mxu0 %v5964_v17 }
 0x405   : > { %v5911_v29 = vadd.f32 %v7627_v26, %v9953_v27  ;;  %7574 = vmatmul.mubr.bf16.gmra.mrb[72].mxu0 %v5965_v58  ;;  %v5942_v12 = vmax.f32 %v5910_v42, 0.0 }
 0x406   : > { %v5909_v28 = vadd.f32 %v7628_v53, %v9953_v27  ;;  %v5940_v57 = vmax.f32 %v5908_v31, 0.0 }
 0x407   : > { %v5943_v59 = vmax.f32 %v5911_v29, 0.0 }
 0x408   : > { %v5941_v32 = vmax.f32 %v5909_v28, 0.0  ;;  %v7535_v54 = vpop.f32.mrb[0].mxu1 }
 0x409   : > { %v7629_v22 = vadd.f32 %v7535_v54, %v9909_v60  ;;  %v5794_v15 = vpop.f32.mrb[1].mxu1  ;;  %v5967_v52 = vpack.c.bf16 %v5943_v59, %v5942_v12 }
 0x40a   : > { %v7630_v45 = vadd.f32 %v5794_v15, %v9911_v20  ;;  %v7536_v39 = vpop.f32.mrb[2].mxu1  ;;  %v5966_v6 = vpack.c.bf16 %v5941_v32, %v5940_v57 }
 0x40b   : > { %v5914_v7 = vadd.f32 %v7629_v22, %v9953_v27  ;;  %v7631_v2 = vadd.f32 %v7536_v39, %v9913_v3  ;;  %v5797_v30 = vpop.f32.mrb[3].mxu1 }
 0x40c   : > { %v5912_v35 = vadd.f32 %v7630_v45, %v9953_v27  ;;  %v7632_v43 = vadd.f32 %v5797_v30, %v9915_v9  ;;  %7577 = vmatprep.mubr.bf16.mxu0 %v5966_v6 }
 0x40d   : > { %v5915_v24 = vadd.f32 %v7631_v2, %v9953_v27  ;;  %7578 = vmatmul.mubr.bf16.gmra.mrb[76].mxu0 %v5967_v52  ;;  %v5946_v41 = vmax.f32 %v5914_v7, 0.0 }
 0x40e   : > { %v5913_v60 = vadd.f32 %v7632_v43, %v9953_v27  ;;  %v5944_v20 = vmax.f32 %v5912_v35, 0.0 }
 0x40f   : > { %v5947_v13 = vmax.f32 %v5915_v24, 0.0 }
 0x410   : > { %v5945_v37 = vmax.f32 %v5913_v60, 0.0  ;;  %v7539_v48 = vpop.f32.mrb[4].mxu1  ;;  %v6210_v60 = vld [vmem:[%s8595_s20 + $0x10] sm:$0xff] }
 0x411   : > { %v7633_v34 = vadd.f32 %v7539_v48, %v9920_v16  ;;  %v5810_v50 = vpop.f32.mrb[5].mxu1  ;;  %v5969_v3 = vpack.c.bf16 %v5947_v13, %v5946_v41  ;;  %v6208_v13 = vld [vmem:[%s8595_s20] sm:$0xff]  ;;  %v6211_v48 = vld [vmem:[%s8595_s20 + $0x18] sm:$0xff] }
 0x412   : > { %v7634_v33 = vadd.f32 %v5810_v50, %v9922_v47  ;;  %v7540_v8 = vpop.f32.mrb[6].mxu1  ;;  %v5968_v14 = vpack.c.bf16 %v5945_v37, %v5944_v20 }
 0x413   : > { %v5918_v9 = vadd.f32 %v7633_v34, %v9953_v27  ;;  %v7635_v40 = vadd.f32 %v7540_v8, %v9924_v55  ;;  %v5813_v38 = vpop.f32.mrb[7].mxu1 }
 0x414   : > { %v5916_v63 = vadd.f32 %v7634_v33, %v9953_v27  ;;  %v7636_v21 = vadd.f32 %v5813_v38, %v9926_v56  ;;  %7581 = vmatprep.mubr.bf16.mxu0 %v5968_v14  ;;  %v6209_v33 = vld [vmem:[%s8595_s20 + $0x8] sm:$0xff] }
 0x415   : > { %v5919_v18 = vadd.f32 %v7635_v40, %v9953_v27  ;;  %7582 = vmatmul.mubr.bf16.gmra.mrb[80].mxu0 %v5969_v3  ;;  %v5950_v62 = vmax.f32 %v5918_v9, 0.0 }
 0x416   : > { %v5917_v16 = vadd.f32 %v7636_v21, %v9953_v27  ;;  %v5948_v47 = vmax.f32 %v5916_v63, 0.0 }
 0x417   : > { %v5951_v10 = vmax.f32 %v5919_v18, 0.0 }
 0x418   : > { %v5949_v0 = vmax.f32 %v5917_v16, 0.0  ;;  %v7543_v36 = vpop.f32.mrb[8].mxu1 }
 0x419   : > { %v7637_v19 = vadd.f32 %v7543_v36, %v9928_v1  ;;  %v5826_v58 = vpop.f32.mrb[9].mxu1  ;;  %v5971_v55 = vpack.c.bf16 %v5951_v10, %v5950_v62  ;;  %v6214_v62 = vld [vmem:[%s8595_s20 + $0x30] sm:$0xff] }
 0x41a   : > { %v7638_v51 = vadd.f32 %v5826_v58, %v9930_v46  ;;  %v7544_v11 = vpop.f32.mrb[10].mxu1  ;;  %v5970_v17 = vpack.c.bf16 %v5949_v0, %v5948_v47  ;;  %v6212_v0 = vld [vmem:[%s8595_s20 + $0x20] sm:$0xff]  ;;  %v6215_v58 = vld [vmem:[%s8595_s20 + $0x38] sm:$0xff] }
 0x41b   : > { %v5922_v56 = vadd.f32 %v7637_v19, %v9953_v27  ;;  %v7639_v42 = vadd.f32 %v7544_v11, %v9932_v44  ;;  %v5829_v26 = vpop.f32.mrb[11].mxu1 }
 0x41c   : > { %v5920_v23 = vadd.f32 %v7638_v51, %v9953_v27  ;;  %v7640_v31 = vadd.f32 %v5829_v26, %v9934_v4  ;;  %7585 = vmatprep.mubr.bf16.mxu0 %v5970_v17  ;;  %v6213_v17 = vld [vmem:[%s8595_s20 + $0x28] sm:$0xff] }
 0x41d   : > { %v5923_v53 = vadd.f32 %v7639_v42, %v9953_v27  ;;  %7586 = vmatmul.mubr.bf16.gmra.mrb[84].mxu0 %v5971_v55  ;;  %v5954_v29 = vmax.f32 %v5922_v56, 0.0 }
 0x41e   : > { %v5921_v1 = vadd.f32 %v7640_v31, %v9953_v27  ;;  %v5952_v46 = vmax.f32 %v5920_v23, 0.0 }
 0x41f   : > { %v5955_v28 = vmax.f32 %v5923_v53, 0.0 }
 0x420   : > { %v5953_v12 = vmax.f32 %v5921_v1, 0.0  ;;  %v7547_v59 = vpop.f32.mrb[12].mxu1 }
 0x421   : > { %v7641_v57 = vadd.f32 %v7547_v59, %v9936_v5  ;;  %v5842_v32 = vpop.f32.mrb[13].mxu1  ;;  %v5973_v44 = vpack.c.bf16 %v5955_v28, %v5954_v29 }
 0x422   : > { %v7642_v54 = vadd.f32 %v5842_v32, %v9938_v61  ;;  %v7548_v22 = vpop.f32.mrb[14].mxu1  ;;  %v5972_v15 = vpack.c.bf16 %v5953_v12, %v5952_v46  ;;  %v6218_v46 = vld [vmem:[%s8595_s20 + $0x50] sm:$0xff] }
 0x423   : > { %v5926_v4 = vadd.f32 %v7641_v57, %v9953_v27  ;;  %v7643_v52 = vadd.f32 %v7548_v22, %v9940_v49  ;;  %v5845_v45 = vpop.f32.mrb[15].mxu1  ;;  %v6216_v57 = vld [vmem:[%s8595_s20 + $0x40] sm:$0xff] }
 0x424   : > { %v5924_v39 = vadd.f32 %v7642_v54, %v9953_v27  ;;  %v7644_v6 = vadd.f32 %v5845_v45, %v9942_v25  ;;  %7589 = vmatprep.mubr.bf16.mxu0 %v5972_v15  ;;  %v10009_v25 = vld [vmem:[%s10168_s6] ss:$0 sm:$0xff]  ;;  %v6219_v54 = vld [vmem:[%s8595_s20 + $0x58] sm:$0xff] }
 0x425   : > { %v5927_v7 = vadd.f32 %v7643_v52, %v9953_v27  ;;  %7590 = vmatmul.mubr.bf16.gmra.mrb[88].mxu0 %v5973_v44  ;;  %v5958_v61 = vmax.f32 %v5926_v4, 0.0  ;;  %v6217_v52 = vld [vmem:[%s8595_s20 + $0x48] sm:$0xff] }
 0x426   : > { %v5925_v5 = vadd.f32 %v7644_v6, %v9953_v27  ;;  %v5956_v30 = vmax.f32 %v5924_v39, 0.0 }
 0x427   : > { %v5959_v2 = vmax.f32 %v5927_v7, 0.0 }
 0x428   : > { %v5957_v35 = vmax.f32 %v5925_v5, 0.0 }
 0x429   : > { %v5975_v43 = vpack.c.bf16 %v5959_v2, %v5958_v61 }
 0x42a   : > { %v5974_v49 = vpack.c.bf16 %v5957_v35, %v5956_v30 }
 0x42c   : > { %7593 = vmatprep.mubr.bf16.mxu0 %v5974_v49 }
 0x42d   : > { %7594 = vmatmul.mubr.bf16.gmra.mrb[92].mxu0 %v5975_v43  ;;  %v6222_v43 = vld [vmem:[%s8595_s20 + $0x70] sm:$0xff] }
 0x4c8   : > { %v7567_v24 = vpop.f32.mrb[64].mxu0 }
 0x4c9   : > { %v6090_v41 = vadd.f32 %v7567_v24, %v10009_v25  ;;  %v6081_v27 = vpop.f32.mrb[65].mxu0 }
 0x4ca   : > { %v6082_v20 = vadd.f32 %v10009_v25, %v6081_v27  ;;  %v7568_v37 = vpop.f32.mrb[66].mxu0 }
 0x4cb   : > { %v6242_v34 = vadd.f32 %v6210_v60, %v6090_v41  ;;  %v6093_v50 = vadd.f32 %v7568_v37, %v10009_v25  ;;  %v6084_v3 = vpop.f32.mrb[67].mxu0  ;;  %v6220_v60 = vld [vmem:[%s8595_s20 + $0x60] sm:$0xff] }
 0x4cc   : > { %v6240_v8 = vadd.f32 %v6208_v13, %v6082_v20  ;;  %v6085_v14 = vadd.f32 %v10009_v25, %v6084_v3  ;;  %v6223_v13 = vld [vmem:[%s8595_s20 + $0x78] sm:$0xff] }
 0x4cd   : > { %v6274_v9 = vmax.f32 %v6242_v34, 0.0  ;;  %v6243_v40 = vadd.f32 %v6211_v48, %v6093_v50  ;;  %v6221_v34 = vld [vmem:[%s8595_s20 + $0x68] sm:$0xff] }
 0x4ce   : > { %v6272_v38 = vmax.f32 %v6240_v8, 0.0  ;;  %v6241_v63 = vadd.f32 %v6209_v33, %v6085_v14 }
 0x4cf   : > { %6306 = vst [vmem:[%s10021_s15 + $0x10] sm:$0xff] %v6274_v9  ;;  %v6275_v21 = vmax.f32 %v6243_v40, 0.0 }
 0x4d0   : > { %6304 = vst [vmem:[%s10021_s15] sm:$0xff] %v6272_v38  ;;  %v6273_v18 = vmax.f32 %v6241_v63, 0.0  ;;  %v7571_v16 = vpop.f32.mrb[68].mxu0 }
 0x4d1   : > { %6307 = vst [vmem:[%s10021_s15 + $0x18] sm:$0xff] %v6275_v21  ;;  %v6106_v10 = vadd.f32 %v7571_v16, %v10009_v25  ;;  %v6097_v47 = vpop.f32.mrb[69].mxu0  ;;  %v6226_v21 = vld [vmem:[%s8595_s20 + $0x90] sm:$0xff] }
 0x4d2   : > { %6305 = vst [vmem:[%s10021_s15 + $0x8] sm:$0xff] %v6273_v18  ;;  %v6098_v36 = vadd.f32 %v10009_v25, %v6097_v47  ;;  %v7572_v19 = vpop.f32.mrb[70].mxu0 }
 0x4d3   : > { %v6246_v55 = vadd.f32 %v6214_v62, %v6106_v10  ;;  %v6109_v51 = vadd.f32 %v7572_v19, %v10009_v25  ;;  %v6100_v11 = vpop.f32.mrb[71].mxu0  ;;  %v6224_v62 = vld [vmem:[%s8595_s20 + $0x80] sm:$0xff] }
 0x4d4   : > { %v6244_v56 = vadd.f32 %v6212_v0, %v6098_v36  ;;  %v6101_v42 = vadd.f32 %v10009_v25, %v6100_v11  ;;  %v6227_v0 = vld [vmem:[%s8595_s20 + $0x98] sm:$0xff] }
 0x4d5   : > { %v6278_v26 = vmax.f32 %v6246_v55, 0.0  ;;  %v6247_v23 = vadd.f32 %v6215_v58, %v6109_v51  ;;  %v6225_v55 = vld [vmem:[%s8595_s20 + $0x88] sm:$0xff] }
 0x4d6   : > { %v6276_v31 = vmax.f32 %v6244_v56, 0.0  ;;  %v6245_v53 = vadd.f32 %v6213_v17, %v6101_v42 }
 0x4d7   : > { %6310 = vst [vmem:[%s10021_s15 + $0x30] sm:$0xff] %v6278_v26  ;;  %v6279_v1 = vmax.f32 %v6247_v23, 0.0 }
 0x4d8   : > { %6308 = vst [vmem:[%s10021_s15 + $0x20] sm:$0xff] %v6276_v31  ;;  %v6277_v29 = vmax.f32 %v6245_v53, 0.0  ;;  %v7575_v28 = vpop.f32.mrb[72].mxu0 }
 0x4d9   : > { %6311 = vst [vmem:[%s10021_s15 + $0x38] sm:$0xff] %v6279_v1  ;;  %v6122_v12 = vadd.f32 %v7575_v28, %v10009_v25  ;;  %v6113_v59 = vpop.f32.mrb[73].mxu0  ;;  %v6230_v1 = vld [vmem:[%s8595_s20 + $0xb0] sm:$0xff] }
 0x4da   : > { %6309 = vst [vmem:[%s10021_s15 + $0x28] sm:$0xff] %v6277_v29  ;;  %v6114_v32 = vadd.f32 %v10009_v25, %v6113_v59  ;;  %v7576_v44 = vpop.f32.mrb[74].mxu0 }
 0x4db   : > { %v6250_v22 = vadd.f32 %v6218_v46, %v6122_v12  ;;  %v6125_v15 = vadd.f32 %v7576_v44, %v10009_v25  ;;  %v6116_v4 = vpop.f32.mrb[75].mxu0  ;;  %v6228_v46 = vld [vmem:[%s8595_s20 + $0xa0] sm:$0xff] }
 0x4dc   : > { %v6248_v45 = vadd.f32 %v6216_v57, %v6114_v32  ;;  %v6117_v39 = vadd.f32 %v10009_v25, %v6116_v4  ;;  %v6231_v57 = vld [vmem:[%s8595_s20 + $0xb8] sm:$0xff] }
 0x4dd   : > { %v6282_v6 = vmax.f32 %v6250_v22, 0.0  ;;  %v6251_v7 = vadd.f32 %v6219_v54, %v6125_v15  ;;  %v6229_v22 = vld [vmem:[%s8595_s20 + $0xa8] sm:$0xff] }
 0x4de   : > { %v6280_v5 = vmax.f32 %v6248_v45, 0.0  ;;  %v6249_v61 = vadd.f32 %v6217_v52, %v6117_v39 }
 0x4df   : > { %6314 = vst [vmem:[%s10021_s15 + $0x50] sm:$0xff] %v6282_v6  ;;  %v6283_v2 = vmax.f32 %v6251_v7, 0.0 }
 0x4e0   : > { %6312 = vst [vmem:[%s10021_s15 + $0x40] sm:$0xff] %v6280_v5  ;;  %v6281_v30 = vmax.f32 %v6249_v61, 0.0  ;;  %v7579_v35 = vpop.f32.mrb[76].mxu0 }
 0x4e1   : > { %6315 = vst [vmem:[%s10021_s15 + $0x58] sm:$0xff] %v6283_v2  ;;  %v6138_v49 = vadd.f32 %v7579_v35, %v10009_v25  ;;  %v6129_v24 = vpop.f32.mrb[77].mxu0  ;;  %v6234_v2 = vld [vmem:[%s8595_s20 + $0xd0] sm:$0xff] }
 0x4e2   : > { %6313 = vst [vmem:[%s10021_s15 + $0x48] sm:$0xff] %v6281_v30  ;;  %v6130_v41 = vadd.f32 %v10009_v25, %v6129_v24  ;;  %v7580_v27 = vpop.f32.mrb[78].mxu0 }
 0x4e3   : > { %v6254_v20 = vadd.f32 %v6222_v43, %v6138_v49  ;;  %v6141_v37 = vadd.f32 %v7580_v27, %v10009_v25  ;;  %v6132_v48 = vpop.f32.mrb[79].mxu0  ;;  %v6232_v43 = vld [vmem:[%s8595_s20 + $0xc0] sm:$0xff] }
 0x4e4   : > { %v6252_v50 = vadd.f32 %v6220_v60, %v6130_v41  ;;  %v6133_v3 = vadd.f32 %v10009_v25, %v6132_v48  ;;  %v6235_v60 = vld [vmem:[%s8595_s20 + $0xd8] sm:$0xff] }
 0x4e5   : > { %v6286_v33 = vmax.f32 %v6254_v20, 0.0  ;;  %v6255_v8 = vadd.f32 %v6223_v13, %v6141_v37  ;;  %v6233_v20 = vld [vmem:[%s8595_s20 + $0xc8] sm:$0xff] }
 0x4e6   : > { %v6284_v14 = vmax.f32 %v6252_v50, 0.0  ;;  %v6253_v9 = vadd.f32 %v6221_v34, %v6133_v3 }
 0x4e7   : > { %6318 = vst [vmem:[%s10021_s15 + $0x70] sm:$0xff] %v6286_v33  ;;  %v6287_v40 = vmax.f32 %v6255_v8, 0.0 }
 0x4e8   : > { %6316 = vst [vmem:[%s10021_s15 + $0x60] sm:$0xff] %v6284_v14  ;;  %v6285_v38 = vmax.f32 %v6253_v9, 0.0  ;;  %v7583_v63 = vpop.f32.mrb[80].mxu0 }
 0x4e9   : > { %6319 = vst [vmem:[%s10021_s15 + $0x78] sm:$0xff] %v6287_v40  ;;  %v6154_v18 = vadd.f32 %v7583_v63, %v10009_v25  ;;  %v6145_v16 = vpop.f32.mrb[81].mxu0  ;;  %v6238_v40 = vld [vmem:[%s8595_s20 + $0xf0] sm:$0xff] }
 0x4ea   : > { %6317 = vst [vmem:[%s10021_s15 + $0x68] sm:$0xff] %v6285_v38  ;;  %v6146_v10 = vadd.f32 %v10009_v25, %v6145_v16  ;;  %v7584_v47 = vpop.f32.mrb[82].mxu0 }
 0x4eb   : > { %v6258_v36 = vadd.f32 %v6226_v21, %v6154_v18  ;;  %v6157_v19 = vadd.f32 %v7584_v47, %v10009_v25  ;;  %v6148_v58 = vpop.f32.mrb[83].mxu0  ;;  %v6236_v21 = vld [vmem:[%s8595_s20 + $0xe0] sm:$0xff] }
 0x4ec   : > { %v6256_v51 = vadd.f32 %v6224_v62, %v6146_v10  ;;  %v6149_v11 = vadd.f32 %v10009_v25, %v6148_v58  ;;  %v6239_v62 = vld [vmem:[%s8595_s20 + $0xf8] sm:$0xff] }
 0x4ed   : > { %v6290_v17 = vmax.f32 %v6258_v36, 0.0  ;;  %v6259_v56 = vadd.f32 %v6227_v0, %v6157_v19  ;;  %v6237_v36 = vld [vmem:[%s8595_s20 + $0xe8] sm:$0xff]  ;;  %s8344_s20 = smov [#allocation11]  }
 0x4ee   : > { %v6288_v42 = vmax.f32 %v6256_v51, 0.0  ;;  %v6257_v26 = vadd.f32 %v6225_v55, %v6149_v11  ;;  %s8263_s30 = sshll.u32 %s8344_s20, 4  ;;  %s8264_s30 = int_to_ptr.vmem [resolvable:$false] %s8263_s30 }
 0x4ef   : > { %6322 = vst [vmem:[%s10021_s15 + $0x90] sm:$0xff] %v6290_v17  ;;  %v6291_v23 = vmax.f32 %v6259_v56, 0.0  ;;  %s8265_s9 = scalar_lea.vmem %s8264_s30, 8192  ;;  %p8266_p12 = scmp.lt.s32.totalorder %s10115_s12, %s8264_s30 }
 0x4f0   : > { %6320 = vst [vmem:[%s10021_s15 + $0x80] sm:$0xff] %v6288_v42  ;;  %v6289_v31 = vmax.f32 %v6257_v26, 0.0  ;;  %v7587_v53 = vpop.f32.mrb[84].mxu0  ;;  %p8267_p1 = scmp.lt.s32.totalorder %s8265_s9, %s8259_s13 }
 0x4f1   : > { %6323 = vst [vmem:[%s10021_s15 + $0x98] sm:$0xff] %v6291_v23  ;;  %v6170_v29 = vadd.f32 %v7587_v53, %v10009_v25  ;;  %v6161_v28 = vpop.f32.mrb[85].mxu0 }
 0x4f2   : > { %6321 = vst [vmem:[%s10021_s15 + $0x88] sm:$0xff] %v6289_v31  ;;  %v6162_v12 = vadd.f32 %v10009_v25, %v6161_v28  ;;  %v7588_v59 = vpop.f32.mrb[86].mxu0  ;;  %p8268_p2 = por %p8267_p1, %p8266_p12 }
 0x4f3   : > { %v6262_v32 = vadd.f32 %v6230_v1, %v6170_v29  ;;  %v6173_v44 = vadd.f32 %v7588_v59, %v10009_v25  ;;  %v6164_v54 = vpop.f32.mrb[87].mxu0 }
 0x4f4   : > { %v6260_v15 = vadd.f32 %v6228_v46, %v6162_v12  ;;  %v6165_v4 = vadd.f32 %v10009_v25, %v6164_v54  ;;  %p8269_p4 = pnand %p8268_p2, %p8262_p7 }
 0x4f5   : > { %v6294_v52 = vmax.f32 %v6262_v32, 0.0  ;;  %v6263_v45 = vadd.f32 %v6231_v57, %v6173_v44 }
 0x4f6   : > { %v6292_v39 = vmax.f32 %v6260_v15, 0.0  ;;  %v6261_v6 = vadd.f32 %v6229_v22, %v6165_v4 }
 0x4f7   : > { %6326 = vst [vmem:[%s10021_s15 + $0xb0] sm:$0xff] %v6294_v52  ;;  %v6295_v7 = vmax.f32 %v6263_v45, 0.0 }
 0x4f8   : > { %6324 = vst [vmem:[%s10021_s15 + $0xa0] sm:$0xff] %v6292_v39  ;;  %v6293_v5 = vmax.f32 %v6261_v6, 0.0  ;;  %v7591_v61 = vpop.f32.mrb[88].mxu0 }
 0x4f9   : > { %6327 = vst [vmem:[%s10021_s15 + $0xb8] sm:$0xff] %v6295_v7  ;;  %v6186_v30 = vadd.f32 %v7591_v61, %v10009_v25  ;;  %v6177_v35 = vpop.f32.mrb[89].mxu0 }
 0x4fa   : > { %6325 = vst [vmem:[%s10021_s15 + $0xa8] sm:$0xff] %v6293_v5  ;;  %v6178_v49 = vadd.f32 %v10009_v25, %v6177_v35  ;;  %v7592_v24 = vpop.f32.mrb[90].mxu0 }
 0x4fb   : > { %v6266_v41 = vadd.f32 %v6234_v2, %v6186_v30  ;;  %v6189_v27 = vadd.f32 %v7592_v24, %v10009_v25  ;;  %v6180_v13 = vpop.f32.mrb[91].mxu0 }
 0x4fc   : > { %v6264_v37 = vadd.f32 %v6232_v43, %v6178_v49  ;;  %v6181_v48 = vadd.f32 %v10009_v25, %v6180_v13 }
 0x4fd   : > { %v6298_v34 = vmax.f32 %v6266_v41, 0.0  ;;  %v6267_v50 = vadd.f32 %v6235_v60, %v6189_v27 }
 0x4fe   : > { %v6296_v3 = vmax.f32 %v6264_v37, 0.0  ;;  %v6265_v33 = vadd.f32 %v6233_v20, %v6181_v48 }
 0x4ff   : > { %6330 = vst [vmem:[%s10021_s15 + $0xd0] sm:$0xff] %v6298_v34  ;;  %v6299_v8 = vmax.f32 %v6267_v50, 0.0 }
 0x500   : > { %6328 = vst [vmem:[%s10021_s15 + $0xc0] sm:$0xff] %v6296_v3  ;;  %v6297_v14 = vmax.f32 %v6265_v33, 0.0  ;;  %v7595_v9 = vpop.f32.mrb[92].mxu0 }
 0x501   : > { %6331 = vst [vmem:[%s10021_s15 + $0xd8] sm:$0xff] %v6299_v8  ;;  %v6202_v38 = vadd.f32 %v7595_v9, %v10009_v25  ;;  %v6193_v63 = vpop.f32.mrb[93].mxu0 }
 0x502   : > { %6329 = vst [vmem:[%s10021_s15 + $0xc8] sm:$0xff] %v6297_v14  ;;  %v6194_v18 = vadd.f32 %v10009_v25, %v6193_v63  ;;  %v7596_v16 = vpop.f32.mrb[94].mxu0 }
 0x503   : > { %v6270_v10 = vadd.f32 %v6238_v40, %v6202_v38  ;;  %v6205_v47 = vadd.f32 %v7596_v16, %v10009_v25  ;;  %v6196_v0 = vpop.f32.mrb[95].mxu0 }
 0x504   : > { %v6268_v19 = vadd.f32 %v6236_v21, %v6194_v18  ;;  %v6197_v58 = vadd.f32 %v10009_v25, %v6196_v0 }
 0x505   : > { %v6302_v55 = vmax.f32 %v6270_v10, 0.0  ;;  %v6271_v51 = vadd.f32 %v6239_v62, %v6205_v47 }
 0x506   : > { %v6300_v11 = vmax.f32 %v6268_v19, 0.0  ;;  %v6269_v17 = vadd.f32 %v6237_v36, %v6197_v58 }
 0x507   : > { %6334 = vst [vmem:[%s10021_s15 + $0xf0] sm:$0xff] %v6302_v55  ;;  %v6303_v56 = vmax.f32 %v6271_v51, 0.0 }
 0x508   : > { %6332 = vst [vmem:[%s10021_s15 + $0xe0] sm:$0xff] %v6300_v11  ;;  %v6301_v25 = vmax.f32 %v6269_v17, 0.0 }
 0x509   : > { %6335 = vst [vmem:[%s10021_s15 + $0xf8] sm:$0xff] %v6303_v56 }
 0x50a   : > { %6333 = vst [vmem:[%s10021_s15 + $0xe8] sm:$0xff] %v6301_v25 }
 0x50b   : > { %8272 = shalt.err (!%p8269_p4)
}
 0x50c   : > { %s8273_s23 = scalar_lea.hbm %s10113_s16, 4096  ;;  %s8277_s14 = scalar_lea.hbm %s10169_s7, 8192 }
 0x50d   : > { %p8274_p9 = scmp.ne.s32.totalorder %s10113_s16, %s8273_s23  ;;  %p8278_p8 = scmp.lt.u32.totalorder %s10113_s16, %s10169_s7 }
 0x50e   : > { %p8279_p13 = scmp.lt.u32.totalorder %s8277_s14, %s8273_s23  ;;  %p8281_p10 = scmp.lt.u32.totalorder %s8273_s23, %s10113_s16 }
 0x50f   : > { %p8275_p0 = pnand %p8274_p9, %p8541_p5 }
 0x510   : > { %p8280_p6 = por %p8279_p13, %p8278_p8 }
 0x511   : > { %p8276_p11 = pneg %p8275_p0 }
 0x512   : > { %p8282_p3 = por %p8281_p10, %p8280_p6 }
 0x514   : > { %p8283_p7 = pnand %p8282_p3, %p8276_p11 }
 0x516   : > { %8286 = shalt.err (!%p8283_p7)
}
 0x517   : > { %s8345_s8 = smov 128   ;;  %s8346_s17 = smov 8  }
 0x518   : > { %7883 = dma.vmem_to_hbm [thread:$0]  (%p8541_p5), %s10115_s12, 4096, %s10113_s16, %s6337_s28, %s8345_s8, %s8345_s8, %s8346_s17  }
 0x519 PF: > { %s10285_s13 = sld [smem:[#allocation16_spill]]  ;;  %s6365_s20 = sand.u32 1, %s8321_s24  }
 0x51a   : > { %p10287_p1 = scmp.ge.s32.totalorder %s8333_s27, 2  ;;  %s6366_s30 = scalar_lea.sflag [#allocation5], %s6365_s20 }
 0x51f   : > { %p10286_p12 = scmp.ne.s32.totalorder %s10285_s13, 0 }
 0x521   : > { %p7900_p2 = pnand %p10287_p1, %p10286_p12 }
 0x523   : > { %8316 = dma.done.wait (!%p7900_p2), %s6366_s30, 4096  }
 0x524   : > { %8318 = vsyncadd (!%p7900_p2), %s6366_s30, 4294963200  ;;  %p22_p4 = scmp.ge.s32.totalorder %s8527_s22, 4   ;;  %s10288_s24 = smov %s8325_s25 }
 0x525   : > { %s10289_s25 = smov %s8329_s26  ;;  %s10290_s26 = smov %s8537_s18 }
 0x526   : > { %s10291_s27 = smov %s8527_s22  ;;  %24 = sbr.rel (!%p22_p4) target bundleno = 7 (0x7), region = 116 }
 0x52d   :  { %6371 = vsyncpa [#allocation4], 1 }
 0x52e   :  { %6373 = vsyncpa [#allocation4 + $0x1], 1 }
 0x52f   :  { %6374 = vsyncpa [#allocation7], 1 }
 0x530   :  { %6375 = vsyncpa [#allocation10], 1 }
 0x531   :  { %6376 = vsyncpa [#allocation5], 1 }
 0x532   :  { %6378 = vsyncpa [#allocation5 + $0x1], 1 }

</bundles_post_ra>
